<compile_context>
chip_gen: v6e
topology: v6e:2x2x1
jax: 0.10.0
libtpu: 0.0.40
codegen_flags: <defaults>
</compile_context>

<pallas_src>
import functools

import numpy as np
import jax
import jax.numpy as jnp
from jax import lax
from jax.experimental import pallas as pl
from jax.experimental.pallas import tpu as pltpu

EPS = 1e-5  # BatchNorm2d default eps


# ------------------------------ helpers --------------------------------------

def _round_up(x, m):
    return (x + m - 1) // m * m


def _const_map(ndim):
    return lambda n: (0,) * ndim


# ------------------------------ fused kernel ----------------------------------

def _fused_cnn_kernel(*refs, cfg):
    blocks = cfg["blocks"]        # per block: (Wp, slab, lo, L, cin, cout)
    n_hidden = cfg["n_hidden"]
    batch = cfg["batch"]
    cmax = cfg["cmax"]
    nb = len(blocks)

    pos = 0
    x_ref = refs[pos]; pos += 1
    blk_refs = [refs[pos + 6 * i: pos + 6 * (i + 1)] for i in range(nb)]
    pos += 6 * nb
    wh_ref, bh_ref, wo_ref, bo_ref = refs[pos:pos + 4]; pos += 4
    o_ref = refs[pos]; pos += 1
    stag_ref = refs[pos]          # (R, cmax) f32 staging slab

    def read_x(start, length, cin):
        return x_ref[0, start:start + length, :]

    def read_stag(start, length, cin):
        return stag_ref[start:start + length, 0:cin]

    def conv3x3(read_tap, cin, w_ref, b_ref, Wp, lo, L):
        # 9 row-offset taps of the zero-padded slab -> one (L, 9*cin) operand ->
        # a single bf16 MXU matmul with f32 accumulation, fused bias + ReLU.
        shifts = [oy * Wp + ox for oy in (-1, 0, 1) for ox in (-1, 0, 1)]
        taps = [read_tap(lo + s, L, cin) for s in shifts]
        t = jnp.concatenate(taps, axis=-1).astype(jnp.bfloat16)
        acc = jnp.dot(t, w_ref[...], preferred_element_type=jnp.float32)
        return jnp.maximum(acc + b_ref[...], 0.0)

    pooled = None
    for bi in range(nb):
        Wp, slab, lo, L, cin, cout = blocks[bi]
        w1_ref, b1_ref, w2_ref, b2_ref, mask_ref, sel_ref = blk_refs[bi]

        # Halo-only zeroing: the 2*lo cap rows of this block's slab. Interior rows
        # are always fully overwritten by the staging stores below.
        stag_ref[0:lo, :] = jnp.zeros((lo, cmax), jnp.float32)
        stag_ref[lo + L:slab, :] = jnp.zeros((slab - lo - L, cmax), jnp.float32)

        # conv1 (+ folded BN + bias + ReLU); mask zeroes the pad rows so the staged
        # activation is a valid zero-padded image for conv2.
        src = read_x if bi == 0 else read_stag
        a1 = conv3x3(src, cin, w1_ref, b1_ref, Wp, lo, L) * mask_ref[...]
        stag_ref[lo:lo + L, 0:cout] = a1

        # conv2 (+ bias + ReLU). Its pad-row outputs are never selected downstream,
        # so no mask is needed before restaging.
        a2 = conv3x3(read_stag, cout, w2_ref, b2_ref, Wp, lo, L)
        stag_ref[lo:lo + L, 0:cout] = a2

        # 2x2 stride-2 max pool: shift-max over the slab ...
        m = jnp.maximum(
            jnp.maximum(stag_ref[lo:lo + L, 0:cout],
                        stag_ref[lo + 1:lo + 1 + L, 0:cout]),
            jnp.maximum(stag_ref[lo + Wp:lo + Wp + L, 0:cout],
                        stag_ref[lo + Wp + 1:lo + Wp + 1 + L, 0:cout]))
        # ... then a one-hot selection matmul that picks the window anchors and
        # scatters them directly into the next block's slab layout.  For the last
        # block `sel` folds the global average pool -> (B, cout).
        nxt = jnp.dot(sel_ref[...], m, preferred_element_type=jnp.float32)
        if bi + 1 < nb:
            _, _, nlo, nL, _, _ = blocks[bi + 1]
            stag_ref[nlo:nlo + nL, 0:cout] = nxt
        else:
            pooled = nxt

        # Dropout: identity in eval mode.

    # Classifier: [Linear -> ReLU] x n_hidden -> Linear(C, 1)
    h = pooled
    for l in range(n_hidden):
        h = jnp.maximum(
            jnp.dot(h, wh_ref[l], preferred_element_type=jnp.float32) + bh_ref[l],
            0.0)
    out = jnp.dot(h, wo_ref[...], preferred_element_type=jnp.float32) + bo_ref[...]
    # Lane-dense store of the per-image scalars (wrapper slices lane 0).
    o_ref[0] = jnp.broadcast_to(out, (batch, 128))


# ------------------------------ wrapper ---------------------------------------

def model_forward(x_nchw, params, *, images_per_step=1):
    """images_per_step > 1 amortizes the per-grid-step overhead for larger batches
    (keep >= 2 grid steps so both v7x TensorCores stay busy)."""
    N, c_raw, H, W = x_nchw.shape
    B = images_per_step
    assert N % B == 0, "images_per_step must divide the batch size"
    n_steps = N // B
    cin0 = _round_up(c_raw, 8)             # pad input channels for friendlier layout

    # ---- per-block slab geometry -------------------------------------------------
    geos = []
    h, w, cin = H, W, cin0
    for blk in params["blocks"]:
        assert h % 2 == 0 and w % 2 == 0, "MaxPool2d(2) path assumes even spatial dims"
        cout = int(blk["w1"].shape[-1])
        Wp = w + 2                          # padded row stride
        S = (h + 2) * Wp                    # per-image slab rows (incl. top/bot halo)
        slab = B * S
        lo = Wp + 1                         # slab row of pixel (0, 0) of image 0
        L = slab - 2 * lo                   # conv-output extent rows
        geos.append(dict(H=h, W=w, Wp=Wp, S=S, slab=slab, lo=lo, L=L,
                         cin=cin, cout=cout))
        h, w, cin = h // 2, w // 2, cout
    cmax = max([cin0] + [g["cout"] for g in geos])
    R = _round_up(max(g["slab"] for g in geos), 8)

    # ---- input: NCHW -> zero-padded flat slab layout ------------------------------
    # TODO(synk): for large images, accept NHWC input directly to skip this transpose.
    x = jnp.transpose(x_nchw, (0, 2, 3, 1)).astype(jnp.float32)
    x = jnp.pad(x, ((0, 0), (1, 1), (1, 1), (0, cin0 - c_raw)))
    x = x.reshape(n_steps, geos[0]["slab"], cin0)

    inputs = [x]
    in_specs = [pl.BlockSpec((1, geos[0]["slab"], cin0), lambda n: (n, 0, 0))]

    def add_const(arr):
        arr = jnp.asarray(arr)
        inputs.append(arr)
        in_specs.append(pl.BlockSpec(arr.shape, _const_map(arr.ndim)))

    nb = len(geos)
    for bi, (blk, g) in enumerate(zip(params["blocks"], geos)):
        cin_b, cout = g["cin"], g["cout"]
        Wp, S, lo, L, hb, wb = g["Wp"], g["S"], g["lo"], g["L"], g["H"], g["W"]

        # Fold BatchNorm scale into conv1; tap-major fused weights, bf16 operands.
        scale = blk["gamma"] / jnp.sqrt(blk["var"] + EPS)
        w1 = blk["w1"] * scale                                  # (3,3,craw,cout)
        if bi == 0 and cin_b > c_raw:
            w1 = jnp.pad(w1, ((0, 0), (0, 0), (0, cin_b - c_raw), (0, 0)))
        w1 = w1.reshape(9 * cin_b, cout).astype(jnp.bfloat16)
        b1 = (blk["beta"] + scale * (blk["b1"] - blk["mean"])).reshape(1, cout)
        w2 = blk["w2"].reshape(9 * cout, cout).astype(jnp.bfloat16)
        b2 = blk["b2"].reshape(1, cout)

        # (L, 1) row mask: 1 at interior-pixel rows, 0 at side-pad / halo rows.
        r = np.arange(L) + lo
        rem = r % S
        col = rem % Wp
        row = rem // Wp
        mask = (((col >= 1) & (col <= wb) & (row >= 1) & (row <= hb))
                .astype(np.float32).reshape(L, 1))

        # Pool-anchor rows (pixel (2i, 2j)) in this block's extent coordinates.
        ho, wo = hb // 2, wb // 2
        kk, ii, jj = np.meshgrid(np.arange(B), np.arange(ho), np.arange(wo),
                                 indexing="ij")
        anchors = (kk * S + (2 * ii + 1) * Wp + (2 * jj + 1) - lo).reshape(-1)

        if bi + 1 < nb:
            gn = geos[bi + 1]
            dests = (kk * gn["S"] + (ii + 1) * gn["Wp"] + (jj + 1)
                     - gn["lo"]).reshape(-1)
            sel = np.zeros((gn["L"], L), np.float32)   # pool + scatter to next slab
            sel[dests, anchors] = 1.0
        else:
            sel = np.zeros((B, L), np.float32)         # pool + global average pool
            sel[kk.reshape(-1), anchors] = 1.0 / (ho * wo)

        for arr in (w1, b1, w2, b2, mask, sel):
            add_const(arr)

    for arr in (params["wh"], params["bh"], params["wo"], params["bo"]):
        add_const(arr)

    kernel = functools.partial(
        _fused_cnn_kernel,
        cfg={"blocks": tuple((g["Wp"], g["slab"], g["lo"], g["L"], g["cin"],
                              g["cout"]) for g in geos),
             "n_hidden": int(params["wh"].shape[0]),
             "batch": B, "cmax": cmax})

    out = pl.pallas_call(
        kernel,
        out_shape=jax.ShapeDtypeStruct((n_steps, B, 128), jnp.float32),
        grid_spec=pltpu.PrefetchScalarGridSpec(
            num_scalar_prefetch=0,
            grid=(n_steps,),
            in_specs=in_specs,
            out_specs=pl.BlockSpec((1, B, 128), lambda n: (n, 0, 0)),
            scratch_shapes=[pltpu.VMEM((R, cmax), jnp.float32)],
        ),
        compiler_params=pltpu.CompilerParams(
            dimension_semantics=("parallel",)),
    )(*inputs)
    return out[:, :, 0].reshape(N, 1)


# --------------------------- parameter init -----------------------------------

def init_params(key, conv_blocks_number=2, base_channels=8,
                classifier_layers_count=2):
    params = {"blocks": []}
    in_ch, ch = 3, base_channels
    for _ in range(conv_blocks_number):
        key, k1, k2, k3, k4, k5, k6, k7, k8 = jax.random.split(key, 9)
        params["blocks"].append({
            "w1": 0.1 * jax.random.normal(k1, (3, 3, in_ch, ch), jnp.float32),
            "b1": 0.1 * jax.random.normal(k2, (ch,), jnp.float32),
            "gamma": 1.0 + 0.1 * jax.random.normal(k3, (ch,), jnp.float32),
            "beta": 0.1 * jax.random.normal(k4, (ch,), jnp.float32),
            "mean": 0.1 * jax.random.normal(k5, (ch,), jnp.float32),
            "var": 1.0 + 0.1 * jax.random.uniform(k6, (ch,), jnp.float32),
            "w2": 0.1 * jax.random.normal(k7, (3, 3, ch, ch), jnp.float32),
            "b2": 0.1 * jax.random.normal(k8, (ch,), jnp.float32),
        })
        in_ch, ch = ch, ch * 2
    C = in_ch
    L = classifier_layers_count
    key, kw, kb, kwo, kbo = jax.random.split(key, 5)
    params["wh"] = 0.1 * jax.random.normal(kw, (L, C, C), jnp.float32)
    params["bh"] = 0.1 * jax.random.normal(kb, (L, 1, C), jnp.float32)
    params["wo"] = 0.1 * jax.random.normal(kwo, (C, 1), jnp.float32)
    params["bo"] = 0.1 * jax.random.normal(kbo, (1, 1), jnp.float32)
    return params


# --------------------------- pure-JAX reference -------------------------------

def reference_forward(x_nchw, params):
    y = jnp.transpose(x_nchw, (0, 2, 3, 1)).astype(jnp.float32)
    for blk in params["blocks"]:
        y = lax.conv_general_dilated(
            y, blk["w1"], (1, 1), "SAME",
            dimension_numbers=("NHWC", "HWIO", "NHWC")) + blk["b1"]
        y = blk["gamma"] * (y - blk["mean"]) / jnp.sqrt(blk["var"] + EPS) + blk["beta"]
        y = jnp.maximum(y, 0.0)
        y = lax.conv_general_dilated(
            y, blk["w2"], (1, 1), "SAME",
            dimension_numbers=("NHWC", "HWIO", "NHWC")) + blk["b2"]
        y = jnp.maximum(y, 0.0)
        y = lax.reduce_window(y, -jnp.inf, lax.max,
                              (1, 2, 2, 1), (1, 2, 2, 1), "VALID")
    h = jnp.mean(y, axis=(1, 2))
    for l in range(params["wh"].shape[0]):
        h = jnp.maximum(h @ params["wh"][l] + params["bh"][l], 0.0)
    return h @ params["wo"] + params["bo"]


# --------------------------------- main ---------------------------------------

if __name__ == "__main__":
    N, H, W = 2, 16, 16
    x = jax.random.normal(jax.random.PRNGKey(0), (N, 3, H, W), jnp.float32)
    params = init_params(jax.random.PRNGKey(1),
                         conv_blocks_number=2, base_channels=8,
                         classifier_layers_count=2)

    out = jax.block_until_ready(model_forward(x, params))
    assert out.shape == (N, 1), out.shape

    ref = jax.block_until_ready(reference_forward(x, params))
    assert jnp.allclose(out, ref, rtol=1e-2, atol=1e-2), (out, ref)

    print("KERNEL_OK")
</pallas_src>

<mosaic_0001>
module attributes {stable_mosaic.version = 11 : i64} {
  func.func @_fused_cnn_kernel(%arg0: i32, %arg1: memref<1x324x8xf32, #tpu.memory_space<vmem>>, %arg2: memref<72x8xbf16, #tpu.memory_space<vmem>>, %arg3: memref<1x8xf32, #tpu.memory_space<vmem>>, %arg4: memref<72x8xbf16, #tpu.memory_space<vmem>>, %arg5: memref<1x8xf32, #tpu.memory_space<vmem>>, %arg6: memref<286x1xf32, #tpu.memory_space<vmem>>, %arg7: memref<78x286xf32, #tpu.memory_space<vmem>>, %arg8: memref<72x16xbf16, #tpu.memory_space<vmem>>, %arg9: memref<1x16xf32, #tpu.memory_space<vmem>>, %arg10: memref<144x16xbf16, #tpu.memory_space<vmem>>, %arg11: memref<1x16xf32, #tpu.memory_space<vmem>>, %arg12: memref<78x1xf32, #tpu.memory_space<vmem>>, %arg13: memref<1x78xf32, #tpu.memory_space<vmem>>, %arg14: memref<2x16x16xf32, #tpu.memory_space<vmem>>, %arg15: memref<2x1x16xf32, #tpu.memory_space<vmem>>, %arg16: memref<16x1xf32, #tpu.memory_space<vmem>>, %arg17: memref<1x1xf32, #tpu.memory_space<vmem>>, %arg18: memref<1x1x128xf32, #tpu.memory_space<vmem>>, %arg19: memref<328x16xf32, #tpu.memory_space<vmem>>) attributes {dimension_semantics = [#tpu.dimension_semantics<parallel>], iteration_bounds = array<i64: 2>, scalar_prefetch = 0 : i64, scratch_operands = 1 : i64, tpu.core_type = #tpu.core_type<tc>, window_params = [{transform_indices = @transform_0, window_bounds = array<i64: 1, 324, 8>}, {pipeline_mode = #tpu.pipeline_mode<synchronous>, transform_indices = @transform_1, window_bounds = array<i64: 72, 8>}, {pipeline_mode = #tpu.pipeline_mode<synchronous>, transform_indices = @transform_2, window_bounds = array<i64: 1, 8>}, {pipeline_mode = #tpu.pipeline_mode<synchronous>, transform_indices = @transform_3, window_bounds = array<i64: 72, 8>}, {pipeline_mode = #tpu.pipeline_mode<synchronous>, transform_indices = @transform_4, window_bounds = array<i64: 1, 8>}, {pipeline_mode = #tpu.pipeline_mode<synchronous>, transform_indices = @transform_5, window_bounds = array<i64: 286, 1>}, {pipeline_mode = #tpu.pipeline_mode<synchronous>, transform_indices = @transform_6, window_bounds = array<i64: 78, 286>}, {pipeline_mode = #tpu.pipeline_mode<synchronous>, transform_indices = @transform_7, window_bounds = array<i64: 72, 16>}, {pipeline_mode = #tpu.pipeline_mode<synchronous>, transform_indices = @transform_8, window_bounds = array<i64: 1, 16>}, {pipeline_mode = #tpu.pipeline_mode<synchronous>, transform_indices = @transform_9, window_bounds = array<i64: 144, 16>}, {pipeline_mode = #tpu.pipeline_mode<synchronous>, transform_indices = @transform_10, window_bounds = array<i64: 1, 16>}, {pipeline_mode = #tpu.pipeline_mode<synchronous>, transform_indices = @transform_11, window_bounds = array<i64: 78, 1>}, {pipeline_mode = #tpu.pipeline_mode<synchronous>, transform_indices = @transform_12, window_bounds = array<i64: 1, 78>}, {pipeline_mode = #tpu.pipeline_mode<synchronous>, transform_indices = @transform_13, window_bounds = array<i64: 2, 16, 16>}, {pipeline_mode = #tpu.pipeline_mode<synchronous>, transform_indices = @transform_14, window_bounds = array<i64: 2, 1, 16>}, {pipeline_mode = #tpu.pipeline_mode<synchronous>, transform_indices = @transform_15, window_bounds = array<i64: 16, 1>}, {pipeline_mode = #tpu.pipeline_mode<synchronous>, transform_indices = @transform_16, window_bounds = array<i64: 1, 1>}, {transform_indices = @transform_17, window_bounds = array<i64: 1, 1, 128>}]} {
    %cst = arith.constant 0.000000e+00 : f32
    %0 = vector.broadcast %cst : f32 to vector<19x16xf32>
    %c0 = arith.constant 0 : index
    %c0_0 = arith.constant 0 : index
    %1 = vector.load %arg19[%c0, %c0_0] : memref<328x16xf32, #tpu.memory_space<vmem>>, vector<19x16xf32>
    tpu.vector_store %arg19[%c0, %c0_0], %0 {strides = array<i32>} : memref<328x16xf32, #tpu.memory_space<vmem>>, vector<19x16xf32>,
    %cst_1 = arith.constant 0.000000e+00 : f32
    %2 = vector.broadcast %cst_1 : f32 to vector<19x16xf32>
    %c305 = arith.constant 305 : index
    %c0_2 = arith.constant 0 : index
    %3 = vector.load %arg19[%c305, %c0_2] : memref<328x16xf32, #tpu.memory_space<vmem>>, vector<19x16xf32>
    tpu.vector_store %arg19[%c305, %c0_2], %2 {strides = array<i32>} : memref<328x16xf32, #tpu.memory_space<vmem>>, vector<19x16xf32>,
    %c0_3 = arith.constant 0 : index
    %c0_4 = arith.constant 0 : index
    %c0_5 = arith.constant 0 : index
    %4 = vector.load %arg1[%c0_3, %c0_4, %c0_5] : memref<1x324x8xf32, #tpu.memory_space<vmem>>, vector<1x286x8xf32>
    %5 = vector.shape_cast %4 : vector<1x286x8xf32> to vector<286x8xf32>
    %c0_6 = arith.constant 0 : index
    %c1 = arith.constant 1 : index
    %c0_7 = arith.constant 0 : index
    %6 = vector.load %arg1[%c0_6, %c1, %c0_7] : memref<1x324x8xf32, #tpu.memory_space<vmem>>, vector<1x286x8xf32>
    %7 = vector.shape_cast %6 : vector<1x286x8xf32> to vector<286x8xf32>
    %c0_8 = arith.constant 0 : index
    %c2 = arith.constant 2 : index
    %c0_9 = arith.constant 0 : index
    %8 = vector.load %arg1[%c0_8, %c2, %c0_9] : memref<1x324x8xf32, #tpu.memory_space<vmem>>, vector<1x286x8xf32>
    %9 = vector.shape_cast %8 : vector<1x286x8xf32> to vector<286x8xf32>
    %c0_10 = arith.constant 0 : index
    %c18 = arith.constant 18 : index
    %c0_11 = arith.constant 0 : index
    %10 = vector.load %arg1[%c0_10, %c18, %c0_11] : memref<1x324x8xf32, #tpu.memory_space<vmem>>, vector<1x286x8xf32>
    %11 = vector.shape_cast %10 : vector<1x286x8xf32> to vector<286x8xf32>
    %c0_12 = arith.constant 0 : index
    %c19 = arith.constant 19 : index
    %c0_13 = arith.constant 0 : index
    %12 = vector.load %arg1[%c0_12, %c19, %c0_13] : memref<1x324x8xf32, #tpu.memory_space<vmem>>, vector<1x286x8xf32>
    %13 = vector.shape_cast %12 : vector<1x286x8xf32> to vector<286x8xf32>
    %c0_14 = arith.constant 0 : index
    %c20 = arith.constant 20 : index
    %c0_15 = arith.constant 0 : index
    %14 = vector.load %arg1[%c0_14, %c20, %c0_15] : memref<1x324x8xf32, #tpu.memory_space<vmem>>, vector<1x286x8xf32>
    %15 = vector.shape_cast %14 : vector<1x286x8xf32> to vector<286x8xf32>
    %c0_16 = arith.constant 0 : index
    %c36 = arith.constant 36 : index
    %c0_17 = arith.constant 0 : index
    %16 = vector.load %arg1[%c0_16, %c36, %c0_17] : memref<1x324x8xf32, #tpu.memory_space<vmem>>, vector<1x286x8xf32>
    %17 = vector.shape_cast %16 : vector<1x286x8xf32> to vector<286x8xf32>
    %c0_18 = arith.constant 0 : index
    %c37 = arith.constant 37 : index
    %c0_19 = arith.constant 0 : index
    %18 = vector.load %arg1[%c0_18, %c37, %c0_19] : memref<1x324x8xf32, #tpu.memory_space<vmem>>, vector<1x286x8xf32>
    %19 = vector.shape_cast %18 : vector<1x286x8xf32> to vector<286x8xf32>
    %c0_20 = arith.constant 0 : index
    %c38 = arith.constant 38 : index
    %c0_21 = arith.constant 0 : index
    %20 = vector.load %arg1[%c0_20, %c38, %c0_21] : memref<1x324x8xf32, #tpu.memory_space<vmem>>, vector<1x286x8xf32>
    %21 = vector.shape_cast %20 : vector<1x286x8xf32> to vector<286x8xf32>
    %22 = tpu.concatenate %5, %7, %9, %11, %13, %15, %17, %19, %21 in 1 : vector<286x8xf32>, vector<286x8xf32>, vector<286x8xf32>, vector<286x8xf32>, vector<286x8xf32>, vector<286x8xf32>, vector<286x8xf32>, vector<286x8xf32>, vector<286x8xf32> -> vector<286x72xf32>
    %23 = arith.truncf %22 : vector<286x72xf32> to vector<286x72xbf16>
    %c0_22 = arith.constant 0 : index
    %c0_23 = arith.constant 0 : index
    %24 = vector.load %arg2[%c0_22, %c0_23] : memref<72x8xbf16, #tpu.memory_space<vmem>>, vector<72x8xbf16>
    %cst_24 = arith.constant dense<0.000000e+00> : vector<286x8xf32>
    %25 = tpu.matmul %23, %24, %cst_24 {dimension_numbers = #tpu.dot_dimension_numbers<[1], [0], [0], [1], [0, 0, 1, 1], [], []>} : vector<286x72xbf16>, vector<72x8xbf16>, vector<286x8xf32> -> vector<286x8xf32>
    %c0_25 = arith.constant 0 : index
    %c0_26 = arith.constant 0 : index
    %26 = vector.load %arg3[%c0_25, %c0_26] : memref<1x8xf32, #tpu.memory_space<vmem>>, vector<1x8xf32>
    %27 = vector.broadcast %26 : vector<1x8xf32> to vector<286x8xf32>
    %28 = arith.addf %25, %27 : vector<286x8xf32>
    %cst_27 = arith.constant 0.000000e+00 : f32
    %29 = vector.broadcast %cst_27 : f32 to vector<286x8xf32>
    %30 = arith.maximumf %28, %29 : vector<286x8xf32>
    %c0_28 = arith.constant 0 : index
    %c0_29 = arith.constant 0 : index
    %31 = vector.load %arg6[%c0_28, %c0_29] : memref<286x1xf32, #tpu.memory_space<vmem>>, vector<286x1xf32>
    %32 = vector.broadcast %31 : vector<286x1xf32> to vector<286x8xf32>
    %33 = arith.mulf %30, %32 : vector<286x8xf32>
    %c19_30 = arith.constant 19 : index
    %c0_31 = arith.constant 0 : index
    %34 = vector.load %arg19[%c19_30, %c0_31] : memref<328x16xf32, #tpu.memory_space<vmem>>, vector<286x8xf32>
    tpu.vector_store %arg19[%c19_30, %c0_31], %33 {strides = array<i32>} : memref<328x16xf32, #tpu.memory_space<vmem>>, vector<286x8xf32>,
    %c0_32 = arith.constant 0 : index
    %c0_33 = arith.constant 0 : index
    %35 = vector.load %arg19[%c0_32, %c0_33] : memref<328x16xf32, #tpu.memory_space<vmem>>, vector<286x8xf32>
    %c1_34 = arith.constant 1 : index
    %c0_35 = arith.constant 0 : index
    %36 = vector.load %arg19[%c1_34, %c0_35] : memref<328x16xf32, #tpu.memory_space<vmem>>, vector<286x8xf32>
    %c2_36 = arith.constant 2 : index
    %c0_37 = arith.constant 0 : index
    %37 = vector.load %arg19[%c2_36, %c0_37] : memref<328x16xf32, #tpu.memory_space<vmem>>, vector<286x8xf32>
    %c18_38 = arith.constant 18 : index
    %c0_39 = arith.constant 0 : index
    %38 = vector.load %arg19[%c18_38, %c0_39] : memref<328x16xf32, #tpu.memory_space<vmem>>, vector<286x8xf32>
    %c19_40 = arith.constant 19 : index
    %c0_41 = arith.constant 0 : index
    %39 = vector.load %arg19[%c19_40, %c0_41] : memref<328x16xf32, #tpu.memory_space<vmem>>, vector<286x8xf32>
    %c20_42 = arith.constant 20 : index
    %c0_43 = arith.constant 0 : index
    %40 = vector.load %arg19[%c20_42, %c0_43] : memref<328x16xf32, #tpu.memory_space<vmem>>, vector<286x8xf32>
    %c36_44 = arith.constant 36 : index
    %c0_45 = arith.constant 0 : index
    %41 = vector.load %arg19[%c36_44, %c0_45] : memref<328x16xf32, #tpu.memory_space<vmem>>, vector<286x8xf32>
    %c37_46 = arith.constant 37 : index
    %c0_47 = arith.constant 0 : index
    %42 = vector.load %arg19[%c37_46, %c0_47] : memref<328x16xf32, #tpu.memory_space<vmem>>, vector<286x8xf32>
    %c38_48 = arith.constant 38 : index
    %c0_49 = arith.constant 0 : index
    %43 = vector.load %arg19[%c38_48, %c0_49] : memref<328x16xf32, #tpu.memory_space<vmem>>, vector<286x8xf32>
    %44 = tpu.concatenate %35, %36, %37, %38, %39, %40, %41, %42, %43 in 1 : vector<286x8xf32>, vector<286x8xf32>, vector<286x8xf32>, vector<286x8xf32>, vector<286x8xf32>, vector<286x8xf32>, vector<286x8xf32>, vector<286x8xf32>, vector<286x8xf32> -> vector<286x72xf32>
    %45 = arith.truncf %44 : vector<286x72xf32> to vector<286x72xbf16>
    %c0_50 = arith.constant 0 : index
    %c0_51 = arith.constant 0 : index
    %46 = vector.load %arg4[%c0_50, %c0_51] : memref<72x8xbf16, #tpu.memory_space<vmem>>, vector<72x8xbf16>
    %cst_52 = arith.constant dense<0.000000e+00> : vector<286x8xf32>
    %47 = tpu.matmul %45, %46, %cst_52 {dimension_numbers = #tpu.dot_dimension_numbers<[1], [0], [0], [1], [0, 0, 1, 1], [], []>} : vector<286x72xbf16>, vector<72x8xbf16>, vector<286x8xf32> -> vector<286x8xf32>
    %c0_53 = arith.constant 0 : index
    %c0_54 = arith.constant 0 : index
    %48 = vector.load %arg5[%c0_53, %c0_54] : memref<1x8xf32, #tpu.memory_space<vmem>>, vector<1x8xf32>
    %49 = vector.broadcast %48 : vector<1x8xf32> to vector<286x8xf32>
    %50 = arith.addf %47, %49 : vector<286x8xf32>
    %cst_55 = arith.constant 0.000000e+00 : f32
    %51 = vector.broadcast %cst_55 : f32 to vector<286x8xf32>
    %52 = arith.maximumf %50, %51 : vector<286x8xf32>
    %c19_56 = arith.constant 19 : index
    %c0_57 = arith.constant 0 : index
    %53 = vector.load %arg19[%c19_56, %c0_57] : memref<328x16xf32, #tpu.memory_space<vmem>>, vector<286x8xf32>
    tpu.vector_store %arg19[%c19_56, %c0_57], %52 {strides = array<i32>} : memref<328x16xf32, #tpu.memory_space<vmem>>, vector<286x8xf32>,
    %c19_58 = arith.constant 19 : index
    %c0_59 = arith.constant 0 : index
    %54 = vector.load %arg19[%c19_58, %c0_59] : memref<328x16xf32, #tpu.memory_space<vmem>>, vector<286x8xf32>
    %c20_60 = arith.constant 20 : index
    %c0_61 = arith.constant 0 : index
    %55 = vector.load %arg19[%c20_60, %c0_61] : memref<328x16xf32, #tpu.memory_space<vmem>>, vector<286x8xf32>
    %56 = arith.maximumf %54, %55 : vector<286x8xf32>
    %c37_62 = arith.constant 37 : index
    %c0_63 = arith.constant 0 : index
    %57 = vector.load %arg19[%c37_62, %c0_63] : memref<328x16xf32, #tpu.memory_space<vmem>>, vector<286x8xf32>
    %c38_64 = arith.constant 38 : index
    %c0_65 = arith.constant 0 : index
    %58 = vector.load %arg19[%c38_64, %c0_65] : memref<328x16xf32, #tpu.memory_space<vmem>>, vector<286x8xf32>
    %59 = arith.maximumf %57, %58 : vector<286x8xf32>
    %60 = arith.maximumf %56, %59 : vector<286x8xf32>
    %c0_66 = arith.constant 0 : index
    %c0_67 = arith.constant 0 : index
    %61 = vector.load %arg7[%c0_66, %c0_67] : memref<78x286xf32, #tpu.memory_space<vmem>>, vector<78x286xf32>
    %cst_68 = arith.constant dense<0.000000e+00> : vector<78x8xf32>
    %62 = tpu.matmul %61, %60, %cst_68 {dimension_numbers = #tpu.dot_dimension_numbers<[1], [0], [0], [1], [0, 0, 1, 1], [], []>} : vector<78x286xf32>, vector<286x8xf32>, vector<78x8xf32> -> vector<78x8xf32>
    %c11 = arith.constant 11 : index
    %c0_69 = arith.constant 0 : index
    %63 = vector.load %arg19[%c11, %c0_69] : memref<328x16xf32, #tpu.memory_space<vmem>>, vector<78x8xf32>
    tpu.vector_store %arg19[%c11, %c0_69], %62 {strides = array<i32>} : memref<328x16xf32, #tpu.memory_space<vmem>>, vector<78x8xf32>,
    %cst_70 = arith.constant 0.000000e+00 : f32
    %64 = vector.broadcast %cst_70 : f32 to vector<11x16xf32>
    %c0_71 = arith.constant 0 : index
    %c0_72 = arith.constant 0 : index
    %65 = vector.load %arg19[%c0_71, %c0_72] : memref<328x16xf32, #tpu.memory_space<vmem>>, vector<11x16xf32>
    tpu.vector_store %arg19[%c0_71, %c0_72], %64 {strides = array<i32>} : memref<328x16xf32, #tpu.memory_space<vmem>>, vector<11x16xf32>,
    %cst_73 = arith.constant 0.000000e+00 : f32
    %66 = vector.broadcast %cst_73 : f32 to vector<11x16xf32>
    %c89 = arith.constant 89 : index
    %c0_74 = arith.constant 0 : index
    %67 = vector.load %arg19[%c89, %c0_74] : memref<328x16xf32, #tpu.memory_space<vmem>>, vector<11x16xf32>
    tpu.vector_store %arg19[%c89, %c0_74], %66 {strides = array<i32>} : memref<328x16xf32, #tpu.memory_space<vmem>>, vector<11x16xf32>,
    %c0_75 = arith.constant 0 : index
    %c0_76 = arith.constant 0 : index
    %68 = vector.load %arg19[%c0_75, %c0_76] : memref<328x16xf32, #tpu.memory_space<vmem>>, vector<78x8xf32>
    %c1_77 = arith.constant 1 : index
    %c0_78 = arith.constant 0 : index
    %69 = vector.load %arg19[%c1_77, %c0_78] : memref<328x16xf32, #tpu.memory_space<vmem>>, vector<78x8xf32>
    %c2_79 = arith.constant 2 : index
    %c0_80 = arith.constant 0 : index
    %70 = vector.load %arg19[%c2_79, %c0_80] : memref<328x16xf32, #tpu.memory_space<vmem>>, vector<78x8xf32>
    %c10 = arith.constant 10 : index
    %c0_81 = arith.constant 0 : index
    %71 = vector.load %arg19[%c10, %c0_81] : memref<328x16xf32, #tpu.memory_space<vmem>>, vector<78x8xf32>
    %c11_82 = arith.constant 11 : index
    %c0_83 = arith.constant 0 : index
    %72 = vector.load %arg19[%c11_82, %c0_83] : memref<328x16xf32, #tpu.memory_space<vmem>>, vector<78x8xf32>
    %c12 = arith.constant 12 : index
    %c0_84 = arith.constant 0 : index
    %73 = vector.load %arg19[%c12, %c0_84] : memref<328x16xf32, #tpu.memory_space<vmem>>, vector<78x8xf32>
    %c20_85 = arith.constant 20 : index
    %c0_86 = arith.constant 0 : index
    %74 = vector.load %arg19[%c20_85, %c0_86] : memref<328x16xf32, #tpu.memory_space<vmem>>, vector<78x8xf32>
    %c21 = arith.constant 21 : index
    %c0_87 = arith.constant 0 : index
    %75 = vector.load %arg19[%c21, %c0_87] : memref<328x16xf32, #tpu.memory_space<vmem>>, vector<78x8xf32>
    %c22 = arith.constant 22 : index
    %c0_88 = arith.constant 0 : index
    %76 = vector.load %arg19[%c22, %c0_88] : memref<328x16xf32, #tpu.memory_space<vmem>>, vector<78x8xf32>
    %77 = tpu.concatenate %68, %69, %70, %71, %72, %73, %74, %75, %76 in 1 : vector<78x8xf32>, vector<78x8xf32>, vector<78x8xf32>, vector<78x8xf32>, vector<78x8xf32>, vector<78x8xf32>, vector<78x8xf32>, vector<78x8xf32>, vector<78x8xf32> -> vector<78x72xf32>
    %78 = arith.truncf %77 : vector<78x72xf32> to vector<78x72xbf16>
    %c0_89 = arith.constant 0 : index
    %c0_90 = arith.constant 0 : index
    %79 = vector.load %arg8[%c0_89, %c0_90] : memref<72x16xbf16, #tpu.memory_space<vmem>>, vector<72x16xbf16>
    %cst_91 = arith.constant dense<0.000000e+00> : vector<78x16xf32>
    %80 = tpu.matmul %78, %79, %cst_91 {dimension_numbers = #tpu.dot_dimension_numbers<[1], [0], [0], [1], [0, 0, 1, 1], [], []>} : vector<78x72xbf16>, vector<72x16xbf16>, vector<78x16xf32> -> vector<78x16xf32>
    %c0_92 = arith.constant 0 : index
    %c0_93 = arith.constant 0 : index
    %81 = vector.load %arg9[%c0_92, %c0_93] : memref<1x16xf32, #tpu.memory_space<vmem>>, vector<1x16xf32>
    %82 = vector.broadcast %81 : vector<1x16xf32> to vector<78x16xf32>
    %83 = arith.addf %80, %82 : vector<78x16xf32>
    %cst_94 = arith.constant 0.000000e+00 : f32
    %84 = vector.broadcast %cst_94 : f32 to vector<78x16xf32>
    %85 = arith.maximumf %83, %84 : vector<78x16xf32>
    %c0_95 = arith.constant 0 : index
    %c0_96 = arith.constant 0 : index
    %86 = vector.load %arg12[%c0_95, %c0_96] : memref<78x1xf32, #tpu.memory_space<vmem>>, vector<78x1xf32>
    %87 = vector.broadcast %86 : vector<78x1xf32> to vector<78x16xf32>
    %88 = arith.mulf %85, %87 : vector<78x16xf32>
    %c11_97 = arith.constant 11 : index
    %c0_98 = arith.constant 0 : index
    %89 = vector.load %arg19[%c11_97, %c0_98] : memref<328x16xf32, #tpu.memory_space<vmem>>, vector<78x16xf32>
    tpu.vector_store %arg19[%c11_97, %c0_98], %88 {strides = array<i32>} : memref<328x16xf32, #tpu.memory_space<vmem>>, vector<78x16xf32>,
    %c0_99 = arith.constant 0 : index
    %c0_100 = arith.constant 0 : index
    %90 = vector.load %arg19[%c0_99, %c0_100] : memref<328x16xf32, #tpu.memory_space<vmem>>, vector<78x16xf32>
    %c1_101 = arith.constant 1 : index
    %c0_102 = arith.constant 0 : index
    %91 = vector.load %arg19[%c1_101, %c0_102] : memref<328x16xf32, #tpu.memory_space<vmem>>, vector<78x16xf32>
    %c2_103 = arith.constant 2 : index
    %c0_104 = arith.constant 0 : index
    %92 = vector.load %arg19[%c2_103, %c0_104] : memref<328x16xf32, #tpu.memory_space<vmem>>, vector<78x16xf32>
    %c10_105 = arith.constant 10 : index
    %c0_106 = arith.constant 0 : index
    %93 = vector.load %arg19[%c10_105, %c0_106] : memref<328x16xf32, #tpu.memory_space<vmem>>, vector<78x16xf32>
    %c11_107 = arith.constant 11 : index
    %c0_108 = arith.constant 0 : index
    %94 = vector.load %arg19[%c11_107, %c0_108] : memref<328x16xf32, #tpu.memory_space<vmem>>, vector<78x16xf32>
    %c12_109 = arith.constant 12 : index
    %c0_110 = arith.constant 0 : index
    %95 = vector.load %arg19[%c12_109, %c0_110] : memref<328x16xf32, #tpu.memory_space<vmem>>, vector<78x16xf32>
    %c20_111 = arith.constant 20 : index
    %c0_112 = arith.constant 0 : index
    %96 = vector.load %arg19[%c20_111, %c0_112] : memref<328x16xf32, #tpu.memory_space<vmem>>, vector<78x16xf32>
    %c21_113 = arith.constant 21 : index
    %c0_114 = arith.constant 0 : index
    %97 = vector.load %arg19[%c21_113, %c0_114] : memref<328x16xf32, #tpu.memory_space<vmem>>, vector<78x16xf32>
    %c22_115 = arith.constant 22 : index
    %c0_116 = arith.constant 0 : index
    %98 = vector.load %arg19[%c22_115, %c0_116] : memref<328x16xf32, #tpu.memory_space<vmem>>, vector<78x16xf32>
    %99 = tpu.concatenate %90, %91, %92, %93, %94, %95, %96, %97, %98 in 1 : vector<78x16xf32>, vector<78x16xf32>, vector<78x16xf32>, vector<78x16xf32>, vector<78x16xf32>, vector<78x16xf32>, vector<78x16xf32>, vector<78x16xf32>, vector<78x16xf32> -> vector<78x144xf32>
    %100 = arith.truncf %99 : vector<78x144xf32> to vector<78x144xbf16>
    %c0_117 = arith.constant 0 : index
    %c0_118 = arith.constant 0 : index
    %101 = vector.load %arg10[%c0_117, %c0_118] : memref<144x16xbf16, #tpu.memory_space<vmem>>, vector<144x16xbf16>
    %cst_119 = arith.constant dense<0.000000e+00> : vector<78x16xf32>
    %102 = tpu.matmul %100, %101, %cst_119 {dimension_numbers = #tpu.dot_dimension_numbers<[1], [0], [0], [1], [0, 0, 1, 1], [], []>} : vector<78x144xbf16>, vector<144x16xbf16>, vector<78x16xf32> -> vector<78x16xf32>
    %c0_120 = arith.constant 0 : index
    %c0_121 = arith.constant 0 : index
    %103 = vector.load %arg11[%c0_120, %c0_121] : memref<1x16xf32, #tpu.memory_space<vmem>>, vector<1x16xf32>
    %104 = vector.broadcast %103 : vector<1x16xf32> to vector<78x16xf32>
    %105 = arith.addf %102, %104 : vector<78x16xf32>
    %cst_122 = arith.constant 0.000000e+00 : f32
    %106 = vector.broadcast %cst_122 : f32 to vector<78x16xf32>
    %107 = arith.maximumf %105, %106 : vector<78x16xf32>
    %c11_123 = arith.constant 11 : index
    %c0_124 = arith.constant 0 : index
    %108 = vector.load %arg19[%c11_123, %c0_124] : memref<328x16xf32, #tpu.memory_space<vmem>>, vector<78x16xf32>
    tpu.vector_store %arg19[%c11_123, %c0_124], %107 {strides = array<i32>} : memref<328x16xf32, #tpu.memory_space<vmem>>, vector<78x16xf32>,
    %c11_125 = arith.constant 11 : index
    %c0_126 = arith.constant 0 : index
    %109 = vector.load %arg19[%c11_125, %c0_126] : memref<328x16xf32, #tpu.memory_space<vmem>>, vector<78x16xf32>
    %c12_127 = arith.constant 12 : index
    %c0_128 = arith.constant 0 : index
    %110 = vector.load %arg19[%c12_127, %c0_128] : memref<328x16xf32, #tpu.memory_space<vmem>>, vector<78x16xf32>
    %111 = arith.maximumf %109, %110 : vector<78x16xf32>
    %c21_129 = arith.constant 21 : index
    %c0_130 = arith.constant 0 : index
    %112 = vector.load %arg19[%c21_129, %c0_130] : memref<328x16xf32, #tpu.memory_space<vmem>>, vector<78x16xf32>
    %c22_131 = arith.constant 22 : index
    %c0_132 = arith.constant 0 : index
    %113 = vector.load %arg19[%c22_131, %c0_132] : memref<328x16xf32, #tpu.memory_space<vmem>>, vector<78x16xf32>
    %114 = arith.maximumf %112, %113 : vector<78x16xf32>
    %115 = arith.maximumf %111, %114 : vector<78x16xf32>
    %c0_133 = arith.constant 0 : index
    %c0_134 = arith.constant 0 : index
    %116 = vector.load %arg13[%c0_133, %c0_134] : memref<1x78xf32, #tpu.memory_space<vmem>>, vector<1x78xf32>
    %cst_135 = arith.constant dense<0.000000e+00> : vector<1x16xf32>
    %117 = tpu.matmul %116, %115, %cst_135 {dimension_numbers = #tpu.dot_dimension_numbers<[1], [0], [0], [1], [0, 0, 1, 1], [], []>} : vector<1x78xf32>, vector<78x16xf32>, vector<1x16xf32> -> vector<1x16xf32>
    %c0_136 = arith.constant 0 : index
    %c0_137 = arith.constant 0 : index
    %c0_138 = arith.constant 0 : index
    %118 = vector.load %arg14[%c0_136, %c0_137, %c0_138] : memref<2x16x16xf32, #tpu.memory_space<vmem>>, vector<1x16x16xf32>
    %119 = vector.shape_cast %118 : vector<1x16x16xf32> to vector<16x16xf32>
    %cst_139 = arith.constant dense<0.000000e+00> : vector<1x16xf32>
    %120 = tpu.matmul %117, %119, %cst_139 {dimension_numbers = #tpu.dot_dimension_numbers<[1], [0], [0], [1], [0, 0, 1, 1], [], []>} : vector<1x16xf32>, vector<16x16xf32>, vector<1x16xf32> -> vector<1x16xf32>
    %c0_140 = arith.constant 0 : index
    %c0_141 = arith.constant 0 : index
    %c0_142 = arith.constant 0 : index
    %121 = vector.load %arg15[%c0_140, %c0_141, %c0_142] : memref<2x1x16xf32, #tpu.memory_space<vmem>>, vector<1x1x16xf32>
    %122 = vector.shape_cast %121 : vector<1x1x16xf32> to vector<1x16xf32>
    %123 = arith.addf %120, %122 : vector<1x16xf32>
    %cst_143 = arith.constant 0.000000e+00 : f32
    %124 = vector.broadcast %cst_143 : f32 to vector<1x16xf32>
    %125 = arith.maximumf %123, %124 : vector<1x16xf32>
    %c1_144 = arith.constant 1 : index
    %c0_145 = arith.constant 0 : index
    %c0_146 = arith.constant 0 : index
    %126 = vector.load %arg14[%c1_144, %c0_145, %c0_146] : memref<2x16x16xf32, #tpu.memory_space<vmem>>, vector<1x16x16xf32>
    %127 = vector.shape_cast %126 : vector<1x16x16xf32> to vector<16x16xf32>
    %cst_147 = arith.constant dense<0.000000e+00> : vector<1x16xf32>
    %128 = tpu.matmul %125, %127, %cst_147 {dimension_numbers = #tpu.dot_dimension_numbers<[1], [0], [0], [1], [0, 0, 1, 1], [], []>} : vector<1x16xf32>, vector<16x16xf32>, vector<1x16xf32> -> vector<1x16xf32>
    %c1_148 = arith.constant 1 : index
    %c0_149 = arith.constant 0 : index
    %c0_150 = arith.constant 0 : index
    %129 = vector.load %arg15[%c1_148, %c0_149, %c0_150] : memref<2x1x16xf32, #tpu.memory_space<vmem>>, vector<1x1x16xf32>
    %130 = vector.shape_cast %129 : vector<1x1x16xf32> to vector<1x16xf32>
    %131 = arith.addf %128, %130 : vector<1x16xf32>
    %cst_151 = arith.constant 0.000000e+00 : f32
    %132 = vector.broadcast %cst_151 : f32 to vector<1x16xf32>
    %133 = arith.maximumf %131, %132 : vector<1x16xf32>
    %c0_152 = arith.constant 0 : index
    %c0_153 = arith.constant 0 : index
    %134 = vector.load %arg16[%c0_152, %c0_153] : memref<16x1xf32, #tpu.memory_space<vmem>>, vector<16x1xf32>
    %cst_154 = arith.constant dense<0.000000e+00> : vector<1x1xf32>
    %135 = tpu.matmul %133, %134, %cst_154 {dimension_numbers = #tpu.dot_dimension_numbers<[1], [0], [0], [1], [0, 0, 1, 1], [], []>} : vector<1x16xf32>, vector<16x1xf32>, vector<1x1xf32> -> vector<1x1xf32>
    %c0_155 = arith.constant 0 : index
    %c0_156 = arith.constant 0 : index
    %136 = vector.load %arg17[%c0_155, %c0_156] : memref<1x1xf32, #tpu.memory_space<vmem>>, vector<1x1xf32>
    %137 = arith.addf %135, %136 : vector<1x1xf32>
    %138 = vector.shape_cast %137 : vector<1x1xf32> to vector<1x1xf32>
    %139 = vector.broadcast %138 : vector<1x1xf32> to vector<1x128xf32>
    %c0_157 = arith.constant 0 : index
    %c0_158 = arith.constant 0 : index
    %c0_159 = arith.constant 0 : index
    %140 = vector.load %arg18[%c0_157, %c0_158, %c0_159] : memref<1x1x128xf32, #tpu.memory_space<vmem>>, vector<1x1x128xf32>
    %141 = vector.shape_cast %140 : vector<1x1x128xf32> to vector<1x128xf32>
    %142 = vector.shape_cast %139 : vector<1x128xf32> to vector<1x1x128xf32>
    tpu.vector_store %arg18[%c0_157, %c0_158, %c0_159], %142 {strides = array<i32>} : memref<1x1x128xf32, #tpu.memory_space<vmem>>, vector<1x1x128xf32>,
    return
  }
  func.func @transform_0(%arg0: i32) -> (i32, i32, i32) {
    %c0_i32 = arith.constant 0 : i32
    %c0_i32_0 = arith.constant 0 : i32
    %c0_i32_1 = arith.constant 0 : i32
    return %arg0, %c0_i32, %c0_i32_0 : i32, i32, i32
  }
  func.func @transform_1(%arg0: i32) -> (i32, i32) {
    %c0_i32 = arith.constant 0 : i32
    %c0_i32_0 = arith.constant 0 : i32
    %c0_i32_1 = arith.constant 0 : i32
    return %c0_i32, %c0_i32_0 : i32, i32
  }
  func.func @transform_2(%arg0: i32) -> (i32, i32) {
    %c0_i32 = arith.constant 0 : i32
    %c0_i32_0 = arith.constant 0 : i32
    %c0_i32_1 = arith.constant 0 : i32
    return %c0_i32, %c0_i32_0 : i32, i32
  }
  func.func @transform_3(%arg0: i32) -> (i32, i32) {
    %c0_i32 = arith.constant 0 : i32
    %c0_i32_0 = arith.constant 0 : i32
    %c0_i32_1 = arith.constant 0 : i32
    return %c0_i32, %c0_i32_0 : i32, i32
  }
  func.func @transform_4(%arg0: i32) -> (i32, i32) {
    %c0_i32 = arith.constant 0 : i32
    %c0_i32_0 = arith.constant 0 : i32
    %c0_i32_1 = arith.constant 0 : i32
    return %c0_i32, %c0_i32_0 : i32, i32
  }
  func.func @transform_5(%arg0: i32) -> (i32, i32) {
    %c0_i32 = arith.constant 0 : i32
    %c0_i32_0 = arith.constant 0 : i32
    %c0_i32_1 = arith.constant 0 : i32
    return %c0_i32, %c0_i32_0 : i32, i32
  }
  func.func @transform_6(%arg0: i32) -> (i32, i32) {
    %c0_i32 = arith.constant 0 : i32
    %c0_i32_0 = arith.constant 0 : i32
    %c0_i32_1 = arith.constant 0 : i32
    return %c0_i32, %c0_i32_0 : i32, i32
  }
  func.func @transform_7(%arg0: i32) -> (i32, i32) {
    %c0_i32 = arith.constant 0 : i32
    %c0_i32_0 = arith.constant 0 : i32
    %c0_i32_1 = arith.constant 0 : i32
    return %c0_i32, %c0_i32_0 : i32, i32
  }
  func.func @transform_8(%arg0: i32) -> (i32, i32) {
    %c0_i32 = arith.constant 0 : i32
    %c0_i32_0 = arith.constant 0 : i32
    %c0_i32_1 = arith.constant 0 : i32
    return %c0_i32, %c0_i32_0 : i32, i32
  }
  func.func @transform_9(%arg0: i32) -> (i32, i32) {
    %c0_i32 = arith.constant 0 : i32
    %c0_i32_0 = arith.constant 0 : i32
    %c0_i32_1 = arith.constant 0 : i32
    return %c0_i32, %c0_i32_0 : i32, i32
  }
  func.func @transform_10(%arg0: i32) -> (i32, i32) {
    %c0_i32 = arith.constant 0 : i32
    %c0_i32_0 = arith.constant 0 : i32
    %c0_i32_1 = arith.constant 0 : i32
    return %c0_i32, %c0_i32_0 : i32, i32
  }
  func.func @transform_11(%arg0: i32) -> (i32, i32) {
    %c0_i32 = arith.constant 0 : i32
    %c0_i32_0 = arith.constant 0 : i32
    %c0_i32_1 = arith.constant 0 : i32
    return %c0_i32, %c0_i32_0 : i32, i32
  }
  func.func @transform_12(%arg0: i32) -> (i32, i32) {
    %c0_i32 = arith.constant 0 : i32
    %c0_i32_0 = arith.constant 0 : i32
    %c0_i32_1 = arith.constant 0 : i32
    return %c0_i32, %c0_i32_0 : i32, i32
  }
  func.func @transform_13(%arg0: i32) -> (i32, i32, i32) {
    %c0_i32 = arith.constant 0 : i32
    %c0_i32_0 = arith.constant 0 : i32
    %c0_i32_1 = arith.constant 0 : i32
    %c0_i32_2 = arith.constant 0 : i32
    return %c0_i32, %c0_i32_0, %c0_i32_1 : i32, i32, i32
  }
  func.func @transform_14(%arg0: i32) -> (i32, i32, i32) {
    %c0_i32 = arith.constant 0 : i32
    %c0_i32_0 = arith.constant 0 : i32
    %c0_i32_1 = arith.constant 0 : i32
    %c0_i32_2 = arith.constant 0 : i32
    return %c0_i32, %c0_i32_0, %c0_i32_1 : i32, i32, i32
  }
  func.func @transform_15(%arg0: i32) -> (i32, i32) {
    %c0_i32 = arith.constant 0 : i32
    %c0_i32_0 = arith.constant 0 : i32
    %c0_i32_1 = arith.constant 0 : i32
    return %c0_i32, %c0_i32_0 : i32, i32
  }
  func.func @transform_16(%arg0: i32) -> (i32, i32) {
    %c0_i32 = arith.constant 0 : i32
    %c0_i32_0 = arith.constant 0 : i32
    %c0_i32_1 = arith.constant 0 : i32
    return %c0_i32, %c0_i32_0 : i32, i32
  }
  func.func @transform_17(%arg0: i32) -> (i32, i32, i32) {
    %c0_i32 = arith.constant 0 : i32
    %c0_i32_0 = arith.constant 0 : i32
    %c0_i32_1 = arith.constant 0 : i32
    return %arg0, %c0_i32, %c0_i32_0 : i32, i32, i32
  }
}

</mosaic_0001>

<bundles_post_ra>
// kernel: tpu_custom_call.1
= control target key start
LH: loop header
LB: loop body
LE: loop exit
PB: predicated region body
PF: predicated region fallthrough
CT: control target
= control target key end

     0   :  { %s12600_s0 = inlined_call_operand.vmem [shape: f32[2,324,8], index: 0, kind: input, shape index: {}]   ;;  %s12601_s1 = inlined_call_operand.vmem [shape: bf16[72,8], index: 1, kind: input, shape index: {}]   ;;  %s12602_s2 = inlined_call_operand.vmem [shape: f32[1,8], index: 2, kind: input, shape index: {}]   ;;  %s12603_s3 = inlined_call_operand.vmem [shape: bf16[72,8], index: 3, kind: input, shape index: {}]   ;;  %s12604_s4 = inlined_call_operand.vmem [shape: f32[1,8], index: 4, kind: input, shape index: {}]   ;;  %s12605_s5 = inlined_call_operand.vmem [shape: f32[286,1], index: 5, kind: input, shape index: {}]   ;;  %s12606_s6 = inlined_call_operand.vmem [shape: f32[78,286], index: 6, kind: input, shape index: {}]   ;;  %s12607_s7 = inlined_call_operand.vmem [shape: bf16[72,16], index: 7, kind: input, shape index: {}]   ;;  %s12608_s8 = inlined_call_operand.vmem [shape: f32[1,16], index: 8, kind: input, shape index: {}]   ;;  %s12609_s9 = inlined_call_operand.vmem [shape: bf16[144,16], index: 9, kind: input, shape index: {}]   ;;  %s12610_s10 = inlined_call_operand.vmem [shape: f32[1,16], index: 10, kind: input, shape index: {}]   ;;  %s12611_s11 = inlined_call_operand.vmem [shape: f32[78,1], index: 11, kind: input, shape index: {}]   ;;  %s12612_s12 = inlined_call_operand.vmem [shape: f32[1,78], index: 12, kind: input, shape index: {}]   ;;  %s12613_s13 = inlined_call_operand.vmem [shape: f32[2,16,16], index: 13, kind: input, shape index: {}]   ;;  %s12614_s14 = inlined_call_operand.vmem [shape: f32[2,1,16], index: 14, kind: input, shape index: {}]   ;;  %s12615_s15 = inlined_call_operand.vmem [shape: f32[16,1], index: 15, kind: input, shape index: {}]   ;;  %s12616_s16 = inlined_call_operand.<no memory space> [shape: f32[1,1], index: 16, kind: input, shape index: {}]   ;;  %s12617_s17 = inlined_call_operand.hbm [shape: f32[2,1,128], index: 17, kind: output, shape index: {}]  }
   0x1   :  { %12647 = sst [smem:[#allocation16_spill]] %s12600_s0  ;;  %v22_v0 = vstv %s12616_s16 }
   0x2   :  { %12648 = sst [smem:[#allocation17_spill]] %s12601_s1  ;;  %23 = vst [vmem:[#allocation3] sm:$0x1] %v22_v0 }
   0x3   :  { %12649 = sst [smem:[#allocation18_spill]] %s12602_s2 }
   0x4   :  { %12650 = sst [smem:[#allocation19_spill]] %s12617_s17 }
   0x5   :  { %24 = vsyncpa [#allocation5], 0 }
   0x6   :  { %26 = vsyncpa [#allocation5 + $0x1], 0  ;;  %s9640_s26 = smov 0   ;;  %s9642_s27 = smov 0  }
   0x7   :  { %s9644_s28 = smov 0   ;;  %s9646_s29 = smov 0  }
   0x8 LB: > { %12651 = sst [smem:[#allocation7_spill]] %s9518_s26  ;;  %s9661_s16 = sadd.s32 4294967295, %s9530_s29   ;;  %s9530_s29 = sphi %s9646_s29, %s12680_s29   ;;  %s9526_s28 = sphi %s9644_s28, %s12683_s28   ;;  %s9522_s27 = sphi %s9642_s27, %s12682_s27   ;;  %s9518_s26 = sphi %s9640_s26, %s12681_s26  }
   0x9   : > { %12652 = sst [smem:[#allocation8_spill]] %s9522_s27  ;;  %s7128_s0 = sadd.s32 4294967294, %s9530_s29  }
   0xa   : > { %12653 = sst [smem:[#allocation9_spill]] %s9526_s28  ;;  %s9665_s30 = sadd.s32 1, %s9530_s29  }
   0xb   : > { %12654 = sst [smem:[#allocation10_spill]] %s9530_s29  ;;  %s401_s18 = sadd.s32 1, %s9526_s28 }
   0xc   : > { %12655 = sst [smem:[#allocation11_spill]] %s9661_s16  ;;  %s398_s19 = ssub.s32 %s9530_s29, %s9665_s30 }
   0xd   : > { %12656 = sst [smem:[#allocation12_spill]] %s9665_s30  ;;  %p411_p0 = scmp.ne.s32.totalorder %s9526_s28, %s9522_s27 }
   0xe   : > { %p399_p1 = scmp.eq.s32.totalorder %s398_s19, 0  ;;  %p412_p2 = scmp.eq.s32.totalorder %s9661_s16, 1 }
   0xf   : > { %p417_p3 = scmp.ne.s32.totalorder %s9522_s27, %s9518_s26  ;;  %p418_p4 = scmp.eq.s32.totalorder %s7128_s0, 1 }
  0x10   : > { %s9676_s1 = scalar_select %p399_p1, %s9526_s28, %s401_s18  }
  0x11   : > { %p9678_p5 = por %p412_p2, %p411_p0  ;;  %p9682_p6 = por %p418_p4, %p417_p3 }
  0x12   : > { %12657 = sst [smem:[#allocation13_spill]] %s9676_s1  ;;  %p7131_p7 = scmp.ge.s32.totalorder %s9530_s29, 1 }
  0x13   : > { %s12658_s20 = scalar_select %p9678_p5, 1, 0 }
  0x14   : > { %s12660_s21 = scalar_select %p9682_p6, 1, 0 }
  0x15   : > { %12659 = sst [smem:[#allocation14_spill]] %s12658_s20  ;;  %p492_p8 = scmp.lt.s32.totalorder %s9530_s29, 3 }
  0x16   : > { %12661 = sst [smem:[#allocation15_spill]] %s12660_s21 }
  0x17   : > { %p493_p9 = pnand %p7131_p7, %p492_p8 }
  0x18   : > { %p543_p10 = scmp.lt.s32.totalorder (!%p493_p9), %s9661_s16, 1  ;;  %s12662_s0 = sld [smem:[#allocation16_spill]] (!%p493_p9) }
  0x19   : > { %496 = sbr.rel (%p493_p9) target bundleno = 3028 (0xbd4), region = 88  ;;  %s12629_s19 = smov (!%p493_p9), 16  }
  0x1a   : > { %s12625_s24 = smov (!%p493_p9), 32   ;;  %s12619_s25 = smov (!%p493_p9), 40  }
  0x1b   : > { %s12666_s1 = smov (!%p493_p9), 32   ;;  %s12668_s28 = smov (!%p493_p9), 48  }
  0x1c   : > { %s12672_s2 = sld [smem:[#allocation18_spill]] (!%p493_p9)  ;;  %s9543_s21 = smov (!%p493_p9), 80  }
  0x1e   : > { %s544_s22 = scalar_select %p543_p10, %s9661_s16, 1  ;;  %vm2312_vm0 = vcmask 1043456   ;;  %vm1901_vm1 = vcmask 64512   ;;  %vm549_vm2 = vcmask 130048   ;;  %vm1974_vm3 = vcmask 195584  }
  0x1f   : > { %vm2011_vm4 = vcmask 261120   ;;  %vm2048_vm5 = vcmask 326656   ;;  %vm2085_vm6 = vcmask 392192   ;;  %vm2122_vm7 = vcmask 457728  }
  0x20   : > { %s7572_s23 = smul.u32 328, %s544_s22  ;;  %s12631_s22 = smov 8   ;;  %vm2159_vm8 = vcmask 523264   ;;  %vm2257_vm9 = vcmask 588800   ;;  %vm552_vm10 = vcmask 124928   ;;  %vm2816_vm11 = vcmask 62464  }
  0x21   : > { %vm5099_vm12 = vcmask 244736   ;;  %vm5130_vm13 = vcmask 1045504   ;;  %vm9542_vm14 = vmmov 0   ;;  %vm6064_vm15 = vcmask 128000  }
  0x22   : > { %s9693_s18 = scalar_lea.vmem %s12662_s0, %s7572_s23  ;;  %s12627_s23 = smov 24  }
  0x23   : > { %v629_v1 = vld [vmem:[%s9693_s18 + $0x2] sm:$0xff]  ;;  %v630_v2 = vld [vmem:[%s9693_s18 + $0xa] sm:$0xff]  ;;  %v631_v6 = vld [vmem:[%s9693_s18 + $0x12] sm:$0xff]  ;;  %s12621_s0 = smov 48  }
  0x24   : > { %v593_v3 = vld [vmem:[%s9693_s18 + $0x1] sm:$0xff]  ;;  %v7636_v4 = vpack.i.bf16 %v630_v2, %v629_v1  ;;  %v594_v5 = vld [vmem:[%s9693_s18 + $0x9] sm:$0xff]  ;;  %v595_v9 = vld [vmem:[%s9693_s18 + $0x11] sm:$0xff] }
  0x25   : > { %v632_v7 = vld [vmem:[%s9693_s18 + $0x1a] sm:$0xff]  ;;  %v7626_v8 = vpack.i.bf16 %v594_v5, %v593_v3  ;;  %v633_v13 = vld [vmem:[%s9693_s18 + $0x22] sm:$0xff]  ;;  %v634_v14 = vld [vmem:[%s9693_s18 + $0x2a] sm:$0xff] }
  0x26   : > { %v596_v10 = vld [vmem:[%s9693_s18 + $0x19] sm:$0xff]  ;;  %7637 = vrot.lane.b32.xlu1 %v7636_v4, %s12629_s19  ;;  %v7641_v11 = vpack.i.bf16 %v632_v7, %v631_v6  ;;  %v9708_v15 = vpack.i.bf16 %v634_v14, %v633_v13  ;;  %v670_v16 = vld [vmem:[%s9693_s18 + $0x23] sm:$0xff]  ;;  %v671_v17 = vld [vmem:[%s9693_s18 + $0x2b] sm:$0xff] }
  0x27   : > { %7627 = vrot.lane.b32.xlu0 %v7626_v8, %s12631_s22  ;;  %v7631_v12 = vpack.i.bf16 %v596_v10, %v595_v9  ;;  %v668_v18 = vld [vmem:[%s9693_s18 + $0x13] sm:$0xff]  ;;  %v669_v19 = vld [vmem:[%s9693_s18 + $0x1b] sm:$0xff]  ;;  %v7661_v20 = vpack.i.bf16 %v671_v17, %v670_v16  ;;  %v706_v22 = vld [vmem:[%s9693_s18 + $0x24] sm:$0xff] }
  0x28   : > { %v7656_v21 = vpack.i.bf16 %v669_v19, %v668_v18  ;;  %v707_v23 = vld [vmem:[%s9693_s18 + $0x2c] sm:$0xff]  ;;  %v704_v24 = vld [vmem:[%s9693_s18 + $0x14] sm:$0xff]  ;;  %v705_v25 = vld [vmem:[%s9693_s18 + $0x1c] sm:$0xff] }
  0x29   : > { %v7671_v26 = vpack.i.bf16 %v707_v23, %v706_v22  ;;  %v7666_v27 = vpack.i.bf16 %v705_v25, %v704_v24  ;;  %v708_v28 = vld [vmem:[%s9693_s18 + $0x34] sm:$0xff]  ;;  %v709_v29 = vld [vmem:[%s9693_s18 + $0x3c] sm:$0xff]  ;;  %v743_v33 = vld [vmem:[%s9693_s18 + $0x25] sm:$0xff] }
  0x2a   : > { %7642 = vrot.lane.b32.xlu1 %v7641_v11, %s12629_s19  ;;  %v9727_v30 = vpack.i.bf16 %v709_v29, %v708_v28  ;;  %v745_v31 = vld [vmem:[%s9693_s18 + $0x35] sm:$0xff]  ;;  %v746_v32 = vld [vmem:[%s9693_s18 + $0x3d] sm:$0xff]  ;;  %v744_v34 = vld [vmem:[%s9693_s18 + $0x2d] sm:$0xff]  ;;  %s12665_s19 = smov 24  }
  0x2b   : > { %7632 = vrot.lane.b32.xlu0 %v7631_v12, %s12631_s22  ;;  %v7691_v35 = vpack.i.bf16 %v746_v32, %v745_v31  ;;  %v7686_v36 = vpack.i.bf16 %v744_v34, %v743_v33  ;;  %v597_v37 = vld [vmem:[%s9693_s18 + $0x21] sm:$0xff]  ;;  %v598_v38 = vld [vmem:[%s9693_s18 + $0x29] sm:$0xff]  ;;  %v599_v43 = vld [vmem:[%s9693_s18 + $0x31] sm:$0xff] }
  0x2c   : > { %v779_v39 = vld [vmem:[%s9693_s18 + $0x26] sm:$0xff]  ;;  %v780_v40 = vld [vmem:[%s9693_s18 + $0x2e] sm:$0xff]  ;;  %v7701_v41 = vpack.i.bf16 %v598_v38, %v597_v37  ;;  %v600_v44 = vld [vmem:[%s9693_s18 + $0x39] sm:$0xff] }
  0x2d   : > { %v7696_v42 = vpack.i.bf16 %v780_v40, %v779_v39  ;;  %v781_v45 = vld [vmem:[%s9693_s18 + $0x36] sm:$0xff]  ;;  %v782_v46 = vld [vmem:[%s9693_s18 + $0x3e] sm:$0xff]  ;;  %v7711_v47 = vpack.i.bf16 %v600_v44, %v599_v43  ;;  %v638_v53 = vld [vmem:[%s9693_s18 + $0x4a] sm:$0xff] }
  0x2e   : > { %7652 = vrot.lane.b32.xlu1 %v9708_v15, %s12627_s23  ;;  %v7706_v48 = vpack.i.bf16 %v782_v46, %v781_v45  ;;  %v635_v49 = vld [vmem:[%s9693_s18 + $0x32] sm:$0xff]  ;;  %v636_v50 = vld [vmem:[%s9693_s18 + $0x3a] sm:$0xff]  ;;  %v637_v52 = vld [vmem:[%s9693_s18 + $0x42] sm:$0xff] }
  0x2f   : > { %7647 = vrot.lane.b32.xlu0 %v7641_v11, %s12627_s23  ;;  %v7721_v51 = vpack.i.bf16 %v636_v50, %v635_v49  ;;  %s12663_s23 = sld [smem:[#allocation17_spill]]  ;;  %v9764_v57 = vpack.i.bf16 %v638_v53, %v637_v52  ;;  %v674_v58 = vld [vmem:[%s9693_s18 + $0x43] sm:$0xff]  ;;  %v675_v59 = vld [vmem:[%s9693_s18 + $0x4b] sm:$0xff]  ;;  %v672_v61 = vld [vmem:[%s9693_s18 + $0x33] sm:$0xff] }
  0x30   : > { %v673_v62 = vld [vmem:[%s9693_s18 + $0x3b] sm:$0xff]  ;;  %v7741_v63 = vpack.i.bf16 %v675_v59, %v674_v58  ;;  %v710_v1 = vld [vmem:[%s9693_s18 + $0x44] sm:$0xff]  ;;  %v711_v2 = vld [vmem:[%s9693_s18 + $0x4c] sm:$0xff] }
  0x31   : > { %v7736_v0 = vpack.i.bf16 %v673_v62, %v672_v61  ;;  %v7751_v4 = vpack.i.bf16 %v711_v2, %v710_v1  ;;  %v712_v5 = vld [vmem:[%s9693_s18 + $0x54] sm:$0xff]  ;;  %v713_v6 = vld [vmem:[%s9693_s18 + $0x5c] sm:$0xff]  ;;  %v747_v11 = vld [vmem:[%s9693_s18 + $0x45] sm:$0xff] }
  0x32   : > { %7662 = vrot.lane.b32.xlu1 %v7661_v20, %s12625_s24  ;;  %v749_v8 = vld [vmem:[%s9693_s18 + $0x55] sm:$0xff]  ;;  %v750_v9 = vld [vmem:[%s9693_s18 + $0x5d] sm:$0xff]  ;;  %v7761_v10 = vpack.i.bf16 %v713_v6, %v712_v5  ;;  %v748_v12 = vld [vmem:[%s9693_s18 + $0x4d] sm:$0xff] }
  0x33   : > { %7657 = vrot.lane.b32.xlu0 %v7656_v21, %s12625_s24  ;;  %v601_v13 = vld [vmem:[%s9693_s18 + $0x41] sm:$0xff]  ;;  %v602_v14 = vld [vmem:[%s9693_s18 + $0x49] sm:$0xff]  ;;  %v7766_v16 = vpack.i.bf16 %v748_v12, %v747_v11  ;;  %v603_v19 = vld [vmem:[%s9693_s18 + $0x51] sm:$0xff]  ;;  %s12670_s24 = smov 8  }
  0x34   : > { %v783_v17 = vld [vmem:[%s9693_s18 + $0x46] sm:$0xff]  ;;  %v784_v18 = vld [vmem:[%s9693_s18 + $0x4e] sm:$0xff]  ;;  %v604_v20 = vld [vmem:[%s9693_s18 + $0x59] sm:$0xff]  ;;  %v7781_v21 = vpack.i.bf16 %v602_v14, %v601_v13 }
  0x35   : > { %v9443_v54 = vld [vmem:[%s12663_s23 + $0x20] ss:$0 sps:$4 sm:$0xff]   ;;  %v9444_v55 = vld [vmem:[%s12663_s23 + $0x18] sm:$0xff]   ;;  %v9445_v60 = vld [vmem:[%s12663_s23 + $0x10] sm:$0xff]   ;;  %v7776_v22 = vpack.i.bf16 %v784_v18, %v783_v17 }
  0x36   : > { %7672 = vrot.lane.b32.xlu1 %v7671_v26, %s12619_s25  ;;  %7570 = vmatprep.subr.msk.bf16.mxu0 %vm2312_vm0, %v9443_v54  ;;  %v2314_v56 = vsel %vm2312_vm0, %v9443_v54, 0  ;;  %v9446_v3 = vld [vmem:[%s12663_s23 + $0x8] sm:$0xff]   ;;  %v9447_v7 = vld [vmem:[%s12663_s23] sm:$0xff]   ;;  %v785_v23 = vld [vmem:[%s9693_s18 + $0x56] sm:$0xff]  ;;  %s12671_s23 = smov 64  }
  0x37   : > { %7667 = vrot.lane.b32.xlu0 %v7666_v27, %s12619_s25  ;;  %s12623_s25 = smov 56   ;;  %7382 = vmatpush3.bf16.msra.mxu0 %v2314_v56  ;;  %v786_v24 = vld [vmem:[%s9693_s18 + $0x5e] sm:$0xff]  ;;  %v639_v25 = vld [vmem:[%s9693_s18 + $0x52] sm:$0xff]  ;;  %v7791_v27 = vpack.i.bf16 %v604_v20, %v603_v19  ;;  %v642_v31 = vld [vmem:[%s9693_s18 + $0x6a] sm:$0xff] }
  0x38   : > { %7383 = vmatprep.subr.bf16.mxu0 %v9444_v55  ;;  %v7786_v28 = vpack.i.bf16 %v786_v24, %v785_v23  ;;  %v678_v33 = vld [vmem:[%s9693_s18 + $0x63] sm:$0xff]  ;;  %v679_v34 = vld [vmem:[%s9693_s18 + $0x6b] sm:$0xff]  ;;  %v753_v45 = vld [vmem:[%s9693_s18 + $0x75] sm:$0xff] }
  0x39   : > { %v7821_v37 = vpack.i.bf16 %v679_v34, %v678_v33  ;;  %v714_v39 = vld [vmem:[%s9693_s18 + $0x64] sm:$0xff]  ;;  %v715_v40 = vld [vmem:[%s9693_s18 + $0x6c] sm:$0xff]  ;;  %v717_v43 = vld [vmem:[%s9693_s18 + $0x7c] sm:$0xff] }
  0x3a   : > { %7682 = vrot.lane.b32.xlu1 %v9727_v30, %s12621_s0  ;;  %v754_v46 = vld [vmem:[%s9693_s18 + $0x7d] sm:$0xff]  ;;  %v606_v52 = vld [vmem:[%s9693_s18 + $0x69] sm:$0xff]  ;;  %v720_v14 = vld [vmem:[%s9693_s18 + $0x94] sm:$0xff] }
  0x3b   : > { %7677 = vrot.lane.b32.xlu0 %v7671_v26, %s12621_s0  ;;  %s12633_s0 = smov 64   ;;  %7384 = vmatpush3.bf16.msra.mxu0 %v9444_v55  ;;  %v640_v26 = vld [vmem:[%s9693_s18 + $0x5a] sm:$0xff]  ;;  %v7851_v49 = vpack.i.bf16 %v754_v46, %v753_v45  ;;  %v787_v53 = vld [vmem:[%s9693_s18 + $0x66] sm:$0xff]  ;;  %v788_v54 = vld [vmem:[%s9693_s18 + $0x6e] sm:$0xff] }
  0x3c   : > { %7385 = vmatprep.subr.bf16.mxu0 %v9445_v60  ;;  %v7801_v29 = vpack.i.bf16 %v640_v26, %v639_v25  ;;  %v7856_v56 = vpack.i.bf16 %v788_v54, %v787_v53  ;;  %v608_v58 = vld [vmem:[%s9693_s18 + $0x79] sm:$0xff]  ;;  %v645_v2 = vld [vmem:[%s9693_s18 + $0x82] sm:$0xff]  ;;  %v683_v6 = vld [vmem:[%s9693_s18 + $0x8b] sm:$0xff] }
  0x3d   : > { %v789_v59 = vld [vmem:[%s9693_s18 + $0x76] sm:$0xff]  ;;  %v682_v5 = vld [vmem:[%s9693_s18 + $0x83] sm:$0xff]  ;;  %v719_v12 = vld [vmem:[%s9693_s18 + $0x8c] sm:$0xff] }
  0x3e   : > { %7692 = vrot.lane.b32.xlu1 %v7691_v35, %s12623_s25  ;;  %v676_v35 = vld [vmem:[%s9693_s18 + $0x53] sm:$0xff]  ;;  %v718_v11 = vld [vmem:[%s9693_s18 + $0x84] sm:$0xff] }
  0x3f   : > { %7687 = vrot.lane.b32.xlu0 %v7686_v36, %s12623_s25  ;;  %7386 = vmatpush3.bf16.msra.mxu0 %v9445_v60  ;;  %s12667_s25 = smov 40   ;;  %v677_v36 = vld [vmem:[%s9693_s18 + $0x5b] sm:$0xff]  ;;  %v7911_v13 = vpack.i.bf16 %v719_v12, %v718_v11  ;;  %v755_v20 = vld [vmem:[%s9693_s18 + $0x85] sm:$0xff]  ;;  %v611_v33 = vld [vmem:[%s9693_s18 + $0x91] sm:$0xff] }
  0x40   : > { %7387 = vmatprep.subr.bf16.mxu0 %v9446_v3  ;;  %v7816_v38 = vpack.i.bf16 %v677_v36, %v676_v35  ;;  %v790_v60 = vld [vmem:[%s9693_s18 + $0x7e] sm:$0xff]  ;;  %v757_v17 = vld [vmem:[%s9693_s18 + $0x95] sm:$0xff]  ;;  %v610_v26 = vld [vmem:[%s9693_s18 + $0x89] sm:$0xff] }
  0x41   : > { %v7866_v62 = vpack.i.bf16 %v790_v60, %v789_v59  ;;  %v758_v18 = vld [vmem:[%s9693_s18 + $0x9d] sm:$0xff]  ;;  %v558_v54 = vld [vmem:[%s9693_s18 + $0x8] sm:$0xff] }
  0x42   : > { %7702 = vrot.lane.b32.xlu1 %v7701_v41, %s12631_s22  ;;  %v7831_v41 = vpack.i.bf16 %v715_v40, %v714_v39  ;;  %v7931_v23 = vpack.i.bf16 %v758_v18, %v757_v17  ;;  %v609_v25 = vld [vmem:[%s9693_s18 + $0x81] sm:$0xff]  ;;  %v612_v34 = vld [vmem:[%s9693_s18 + $0x99] sm:$0xff] }
  0x43   : > { %7697 = vrot.lane.b32.xlu0 %v7696_v42, %s12633_s0  ;;  %7388 = vmatpush3.bf16.msra.mxu0 %v9446_v3  ;;  %v716_v42 = vld [vmem:[%s9693_s18 + $0x74] sm:$0xff]  ;;  %v646_v3 = vld [vmem:[%s9693_s18 + $0x8a] sm:$0xff]  ;;  %v7951_v39 = vpack.i.bf16 %v612_v34, %v611_v33  ;;  %v649_v46 = vld [vmem:[%s9693_s18 + $0xa2] sm:$0xff] }
  0x44   : > { %7389 = vmatprep.subr.bf16.mxu0 %v9447_v7  ;;  %v7841_v44 = vpack.i.bf16 %v717_v43, %v716_v42  ;;  %v793_v36 = vld [vmem:[%s9693_s18 + $0x96] sm:$0xff]  ;;  %v557_v53 = vld [vmem:[%s9693_s18] sm:$0xff] }
  0x45   : > { %v648_v42 = vld [vmem:[%s9693_s18 + $0x9a] sm:$0xff] }
  0x46   : > { %7712 = vrot.lane.b32.xlu1 %v7711_v47, %s12631_s22  ;;  %s12664_s22 = smov 16   ;;  %v751_v47 = vld [vmem:[%s9693_s18 + $0x65] sm:$0xff]  ;;  %v560_v59 = vld [vmem:[%s9693_s18 + $0x18] sm:$0xff] }
  0x47   : > { %7707 = vrot.lane.b32.xlu0 %v7706_v48, %s12633_s0  ;;  %7390 = vmatpush3.bf16.msra.mxu0 %v9447_v7  ;;  %s12669_s0 = smov 56   ;;  %v752_v48 = vld [vmem:[%s9693_s18 + $0x6d] sm:$0xff]  ;;  %v725_v11 = vld [vmem:[%s9693_s18 + $0xbc] sm:$0xff] }
  0x48   : > { %v7846_v50 = vpack.i.bf16 %v752_v48, %v751_v47  ;;  %v680_v7 = vld [vmem:[%s9693_s18 + $0x73] sm:$0xff]  ;;  %v650_v47 = vld [vmem:[%s9693_s18 + $0xaa] sm:$0xff] }
  0x49   : > { %v9935_v60 = vpack.i.bf16 %v650_v47, %v649_v46 }
  0x4a   : > { %7722 = vrot.lane.b32.xlu1 %v7721_v51, %s12664_s22 }
  0x4b   : > { %7717 = vrot.lane.b32.xlu0 %v9708_v15, %s12664_s22  ;;  %v7771_v15 = vpack.i.bf16 %v750_v9, %v749_v8  ;;  %v681_v8 = vld [vmem:[%s9693_s18 + $0x7b] sm:$0xff]  ;;  %v7901_v9 = vpack.i.bf16 %v683_v6, %v682_v5 }
  0x4e   : > { %7732 = vrot.lane.b32.xlu1 %v9764_v57, %s12665_s19 }
  0x4f   : > { %7727 = vrot.lane.b32.xlu0 %v7721_v51, %s12665_s19  ;;  %v605_v51 = vld [vmem:[%s9693_s18 + $0x61] sm:$0xff] }
  0x50   : > { %v7861_v55 = vpack.i.bf16 %v606_v52, %v605_v51  ;;  %v686_v51 = vld [vmem:[%s9693_s18 + $0xa3] sm:$0xff]  ;;  %v687_v52 = vld [vmem:[%s9693_s18 + $0xab] sm:$0xff] }
  0x52   : > { %7742 = vrot.lane.b32.xlu1 %v7741_v63, %s12666_s1  ;;  %v643_v63 = vld [vmem:[%s9693_s18 + $0x72] sm:$0xff] }
  0x53   : > { %7737 = vrot.lane.b32.xlu0 %v7736_v0, %s12666_s1  ;;  %v644_v0 = vld [vmem:[%s9693_s18 + $0x7a] sm:$0xff] }
  0x54   : > { %v7881_v1 = vpack.i.bf16 %v644_v0, %v643_v63  ;;  %v7981_v0 = vpack.i.bf16 %v687_v52, %v686_v51 }
  0x56   : > { %7752 = vrot.lane.b32.xlu1 %v7751_v4, %s12667_s25 }
  0x57   : > { %7747 = vrot.lane.b32.xlu0 %v9727_v30, %s12667_s25  ;;  %v641_v30 = vld [vmem:[%s9693_s18 + $0x62] sm:$0xff] }
  0x58   : > { %v7811_v32 = vpack.i.bf16 %v642_v31, %v641_v30  ;;  %v7941_v31 = vpack.i.bf16 %v610_v26, %v609_v25 }
  0x5a   : > { %7762 = vrot.lane.b32.xlu1 %v7761_v10, %s12668_s28 }
  0x5b   : > { %7757 = vrot.lane.b32.xlu0 %v7751_v4, %s12668_s28  ;;  %v9859_v4 = vpack.i.bf16 %v646_v3, %v645_v2  ;;  %v722_v2 = vld [vmem:[%s9693_s18 + $0xa4] sm:$0xff]  ;;  %v723_v3 = vld [vmem:[%s9693_s18 + $0xac] sm:$0xff] }
  0x5e   : > { %7772 = vrot.lane.b32.xlu1 %v7771_v15, %s12669_s0  ;;  %v721_v15 = vld [vmem:[%s9693_s18 + $0x9c] sm:$0xff] }
  0x5f   : > { %7767 = vrot.lane.b32.xlu0 %v7766_v16, %s12669_s0  ;;  %v9876_v16 = vpack.i.bf16 %v721_v15, %v720_v14 }
  0x62   : > { %7782 = vrot.lane.b32.xlu1 %v7781_v21, %s12670_s24  ;;  %v756_v21 = vld [vmem:[%s9693_s18 + $0x8d] sm:$0xff] }
  0x63   : > { %7777 = vrot.lane.b32.xlu0 %v7776_v22, %s12671_s23  ;;  %v7926_v24 = vpack.i.bf16 %v756_v21, %v755_v20  ;;  %v9961_v20 = vpack.i.bf16 %v723_v3, %v722_v2 }
  0x66   : > { %7792 = vrot.lane.b32.xlu1 %v7791_v27, %s12670_s24 }
  0x67   : > { %7787 = vrot.lane.b32.xlu0 %v7786_v28, %s12671_s23  ;;  %v791_v28 = vld [vmem:[%s9693_s18 + $0x86] sm:$0xff] }
  0x6a   : > { %7802 = vrot.lane.b32.xlu1 %v7801_v29, %s12664_s22 }
  0x6b   : > { %7797 = vrot.lane.b32.xlu0 %v9764_v57, %s12664_s22  ;;  %v607_v57 = vld [vmem:[%s9693_s18 + $0x71] sm:$0xff] }
  0x6c   : > { %v7871_v61 = vpack.i.bf16 %v608_v58, %v607_v57  ;;  %v559_v58 = vld [vmem:[%s9693_s18 + $0x10] sm:$0xff] }
  0x6e   : > { %7812 = vrot.lane.b32.xlu1 %v7811_v32, %s12665_s19 }
  0x6f   : > { %7807 = vrot.lane.b32.xlu0 %v7801_v29, %s12665_s19  ;;  %v792_v29 = vld [vmem:[%s9693_s18 + $0x8e] sm:$0xff] }
  0x72   : > { %7822 = vrot.lane.b32.xlu1 %v7821_v37, %s12666_s1  ;;  %v794_v37 = vld [vmem:[%s9693_s18 + $0x9e] sm:$0xff] }
  0x73   : > { %7817 = vrot.lane.b32.xlu0 %v7816_v38, %s12666_s1  ;;  %v7946_v40 = vpack.i.bf16 %v794_v37, %v793_v36 }
  0x76   : > { %7832 = vrot.lane.b32.xlu1 %v7831_v41, %s12667_s25 }
  0x77   : > { %7827 = vrot.lane.b32.xlu0 %v7761_v10, %s12667_s25  ;;  %v7896_v10 = vpack.i.bf16 %v681_v8, %v680_v7 }
  0x7a   : > { %7842 = vrot.lane.b32.xlu1 %v7841_v44, %s12668_s28 }
  0x7b   : > { %7837 = vrot.lane.b32.xlu0 %v7831_v41, %s12668_s28  ;;  %v647_v41 = vld [vmem:[%s9693_s18 + $0x92] sm:$0xff] }
  0x7c   : > { %v7961_v45 = vpack.i.bf16 %v648_v42, %v647_v41 }
  0x7e   : > { %7852 = vrot.lane.b32.xlu1 %v7851_v49, %s12669_s0 }
  0x7f   : > { %7847 = vrot.lane.b32.xlu0 %v7846_v50, %s12669_s0 }
  0x82   : > { %7862 = vrot.lane.b32.xlu1 %v7861_v55, %s12670_s24 }
  0x83   : > { %7857 = vrot.lane.b32.xlu0 %v7856_v56, %s12671_s23 }
  0x86   : > { %7872 = vrot.lane.b32.xlu1 %v7871_v61, %s12670_s24  ;;  %v684_v61 = vld [vmem:[%s9693_s18 + $0x93] sm:$0xff] }
  0x87   : > { %7867 = vrot.lane.b32.xlu0 %v7866_v62, %s12671_s23 }
  0x8a   : > { %7882 = vrot.lane.b32.xlu1 %v7881_v1, %s12664_s22 }
  0x8b   : > { %7877 = vrot.lane.b32.xlu0 %v7811_v32, %s12664_s22  ;;  %v7936_v32 = vpack.i.bf16 %v792_v29, %v791_v28 }
  0x8e   : > { %7892 = vrot.lane.b32.xlu1 %v9859_v4, %s12665_s19 }
  0x8f   : > { %7887 = vrot.lane.b32.xlu0 %v7881_v1, %s12665_s19  ;;  %v685_v1 = vld [vmem:[%s9693_s18 + $0x9b] sm:$0xff] }
  0x92   : > { %7902 = vrot.lane.b32.xlu1 %v7901_v9, %s12666_s1 }
  0x93   : > { %7897 = vrot.lane.b32.xlu0 %v7896_v10, %s12666_s1  ;;  %v724_v10 = vld [vmem:[%s9693_s18 + $0xb4] sm:$0xff] }
  0x96   : > { %7912 = vrot.lane.b32.xlu1 %v7911_v13, %s12667_s25 }
  0x97   : > { %7907 = vrot.lane.b32.xlu0 %v7841_v44, %s12667_s25 }
  0x98   : > { %v9881_v19 = vpop.permute.xlu1 %7637 }
  0x99   : > { %v9885_v22 = vpop.permute.xlu0 %7627  ;;  %v7640_v62 = vunpack.i.h.bf16 %v9881_v19  ;;  %v7639_v63 = vunpack.i.l.bf16 %v9881_v19  ;;  %v7976_v19 = vpack.i.bf16 %v685_v1, %v684_v61 }
  0x9a   : > { %7922 = vrot.lane.b32.xlu1 %v9876_v16, %s12668_s28  ;;  %v7630_v48 = vunpack.i.h.bf16 %v9885_v22  ;;  %v7629_v49 = vunpack.i.l.bf16 %v9885_v22 }
  0x9b   : > { %7917 = vrot.lane.b32.xlu0 %v7911_v13, %s12668_s28 }
  0x9c   : > { %v9892_v27 = vpop.permute.xlu1 %7642  ;;  %v1902_v5 = vsel %vm1901_vm1, %v557_v53, %v7629_v49  ;;  %v1903_v6 = vsel %vm1901_vm1, %v558_v54, %v7630_v48 }
  0x9d   : > { %v9896_v30 = vpop.permute.xlu0 %7632  ;;  %v7645_v7 = vunpack.i.h.bf16 %v9892_v27  ;;  %v7644_v8 = vunpack.i.l.bf16 %v9892_v27  ;;  %v1938_v21 = vsel %vm549_vm2, %v1902_v5, %v7639_v63  ;;  %v1939_v22 = vsel %vm549_vm2, %v1903_v6, %v7640_v62  ;;  %v759_v5 = vld [vmem:[%s9693_s18 + $0xa5] sm:$0xff]  ;;  %v760_v6 = vld [vmem:[%s9693_s18 + $0xad] sm:$0xff] }
  0x9e   : > { %7932 = vrot.lane.b32.xlu1 %v7931_v23, %s12669_s0  ;;  %v7635_v55 = vunpack.i.h.bf16 %v9896_v30  ;;  %v7634_v56 = vunpack.i.l.bf16 %v9896_v30  ;;  %v9966_v23 = vpack.i.bf16 %v725_v11, %v724_v10 }
  0x9f   : > { %7927 = vrot.lane.b32.xlu0 %v7926_v24, %s12669_s0 }
  0xa0   : > { %v9902_v35 = vpop.permute.xlu1 %7652  ;;  %v1905_v12 = vsel %vm1901_vm1, %v560_v59, %v7635_v55 }
  0xa1   : > { %v9906_v38 = vpop.permute.xlu0 %7647  ;;  %v7655_v13 = vunpack.i.h.bf16 %v9902_v35  ;;  %v7654_v14 = vunpack.i.l.bf16 %v9902_v35  ;;  %v1941_v25 = vsel %vm549_vm2, %v1905_v12, %v7645_v7 }
  0xa2   : > { %7942 = vrot.lane.b32.xlu1 %v7941_v31, %s12670_s24  ;;  %v7650_v17 = vunpack.i.h.bf16 %v9906_v38  ;;  %v7649_v18 = vunpack.i.l.bf16 %v9906_v38 }
  0xa3   : > { %7937 = vrot.lane.b32.xlu0 %v7936_v32, %s12671_s23  ;;  %v1978_v30 = vsel %vm1974_vm3, %v1941_v25, %v7655_v13  ;;  %v795_v25 = vld [vmem:[%s9693_s18 + $0xa6] sm:$0xff] }
  0xa4   : > { %v9912_v43 = vpop.permute.xlu1 %7662  ;;  %v1975_v34 = vsel %vm1974_vm3, %v1938_v21, %v7649_v18  ;;  %v1976_v35 = vsel %vm1974_vm3, %v1939_v22, %v7650_v17  ;;  %v8006_v17 = vpack.i.bf16 %v760_v6, %v759_v5  ;;  %v613_v18 = vld [vmem:[%s9693_s18 + $0xa1] sm:$0xff] }
  0xa5   : > { %v9914_v44 = vpop.permute.xlu0 %7657  ;;  %v7665_v38 = vunpack.i.h.bf16 %v9912_v43 }
  0xa6   : > { %7952 = vrot.lane.b32.xlu1 %v7951_v39, %s12670_s24  ;;  %v7660_v26 = vunpack.i.h.bf16 %v9914_v44  ;;  %v7659_v27 = vunpack.i.l.bf16 %v9914_v44  ;;  %v7664_v39 = vunpack.i.l.bf16 %v9912_v43 }
  0xa7   : > { %7947 = vrot.lane.b32.xlu0 %v7946_v40, %s12671_s23 }
  0xa8   : > { %v9922_v50 = vpop.permute.xlu1 %7672  ;;  %v2012_v42 = vsel %vm2011_vm4, %v1975_v34, %v7659_v27  ;;  %v2013_v44 = vsel %vm2011_vm4, %v1976_v35, %v7660_v26  ;;  %v796_v26 = vld [vmem:[%s9693_s18 + $0xae] sm:$0xff]  ;;  %v798_v34 = vld [vmem:[%s9693_s18 + $0xbe] sm:$0xff] }
  0xa9   : > { %v9930_v57 = vpop.permute.xlu0 %7667  ;;  %v7674_v46 = vunpack.i.l.bf16 %v9922_v50 }
  0xaa   : > { %7962 = vrot.lane.b32.xlu1 %v7961_v45, %s12664_s22  ;;  %v7670_v31 = vunpack.i.h.bf16 %v9930_v57  ;;  %v7669_v32 = vunpack.i.l.bf16 %v9930_v57  ;;  %v762_v57 = vld [vmem:[%s9693_s18 + $0xbd] sm:$0xff] }
  0xab   : > { %7957 = vrot.lane.b32.xlu0 %v9859_v4, %s12664_s22  ;;  %v1904_v4 = vsel %vm1901_vm1, %v559_v58, %v7634_v56  ;;  %v761_v56 = vld [vmem:[%s9693_s18 + $0xb5] sm:$0xff] }
  0xac   : > { %v9949_v9 = vpop.permute.xlu1 %7682  ;;  %v1940_v24 = vsel %vm549_vm2, %v1904_v4, %v7644_v8  ;;  %v2049_v48 = vsel %vm2048_vm5, %v2012_v42, %v7669_v32  ;;  %v2050_v43 = vsel %vm2048_vm5, %v2013_v44, %v7670_v31  ;;  %v8011_v10 = vpack.i.bf16 %v762_v57, %v761_v56  ;;  %v616_v31 = vld [vmem:[%s9693_s18 + $0xb9] sm:$0xff]  ;;  %v653_v44 = vld [vmem:[%s9693_s18 + $0xc2] sm:$0xff] }
  0xad   : > { %v7678_v15 = vpop.permute.xlu0 %7677  ;;  %v1977_v29 = vsel %vm1974_vm3, %v1940_v24, %v7654_v14  ;;  %v7685_v49 = vunpack.i.h.bf16 %v9949_v9  ;;  %v7684_v51 = vunpack.i.l.bf16 %v9949_v9 }
  0xae   : > { %7972 = vrot.lane.b32.xlu1 %v9935_v60, %s12665_s19  ;;  %v7680_v36 = vunpack.i.h.bf16 %v7678_v15  ;;  %v7679_v37 = vunpack.i.l.bf16 %v7678_v15  ;;  %v2014_v63 = vsel %vm2011_vm4, %v1977_v29, %v7664_v39  ;;  %v8016_v29 = vpack.i.bf16 %v796_v26, %v795_v25  ;;  %v652_v39 = vld [vmem:[%s9693_s18 + $0xba] sm:$0xff] }
  0xaf   : > { %7967 = vrot.lane.b32.xlu0 %v7961_v45, %s12665_s19  ;;  %v7675_v45 = vunpack.i.h.bf16 %v9922_v50  ;;  %v2051_v7 = vsel %vm2048_vm5, %v2014_v63, %v7674_v46  ;;  %v690_v46 = vld [vmem:[%s9693_s18 + $0xc3] sm:$0xff] }
  0xb0   : > { %v7693_v28 = vpop.permute.xlu1 %7692  ;;  %v2086_v50 = vsel %vm2085_vm6, %v2049_v48, %v7679_v37  ;;  %v2087_v55 = vsel %vm2085_vm6, %v2050_v43, %v7680_v36  ;;  %v2088_v11 = vsel %vm2085_vm6, %v2051_v7, %v7684_v51  ;;  %v9540_v48 = vmov 0   ;;  %v691_v43 = vld [vmem:[%s9693_s18 + $0xcb] sm:$0xff]  ;;  %v689_v51 = vld [vmem:[%s9693_s18 + $0xbb] sm:$0xff] }
  0xb1   : > { %v7688_v33 = vpop.permute.xlu0 %7687  ;;  %v7695_v58 = vunpack.i.h.bf16 %v7693_v28  ;;  %v7694_v59 = vunpack.i.l.bf16 %v7693_v28  ;;  %8346 = vset.pattern.permute.xlu0 %v9540_v48  ;;  %8347 = vset.pattern.permute.xlu1 %v9540_v48  ;;  %v562_v7 = vld [vmem:[%s9693_s18 + $0x28] sm:$0xff] }
  0xb2   : > { %7982 = vrot.lane.b32.xlu1 %v7981_v0, %s12666_s1  ;;  %v7690_v40 = vunpack.i.h.bf16 %v7688_v33  ;;  %v7689_v41 = vunpack.i.l.bf16 %v7688_v33  ;;  %v2015_v0 = vsel %vm2011_vm4, %v1978_v30, %v7665_v38  ;;  %v615_v30 = vld [vmem:[%s9693_s18 + $0xb1] sm:$0xff] }
  0xb3   : > { %7977 = vrot.lane.b32.xlu0 %v7976_v19, %s12666_s1  ;;  %v2125_v14 = vsel %vm2122_vm7, %v2088_v11, %v7694_v59  ;;  %v614_v19 = vld [vmem:[%s9693_s18 + $0xa9] sm:$0xff]  ;;  %v797_v33 = vld [vmem:[%s9693_s18 + $0xb6] sm:$0xff]  ;;  %v8031_v36 = vpack.i.bf16 %v616_v31, %v615_v30 }
  0xb4   : > { %v9986_v47 = vpop.permute.xlu1 %7702  ;;  %v2123_v61 = vsel %vm2122_vm7, %v2086_v50, %v7689_v41  ;;  %v2124_v62 = vsel %vm2122_vm7, %v2087_v55, %v7690_v40  ;;  %v8021_v28 = vpack.i.bf16 %v614_v19, %v613_v18  ;;  %v8026_v37 = vpack.i.bf16 %v798_v34, %v797_v33  ;;  %v651_v38 = vld [vmem:[%s9693_s18 + $0xb2] sm:$0xff]  ;;  %v726_v50 = vld [vmem:[%s9693_s18 + $0xc4] sm:$0xff] }
  0xb5   : > { %v7698_v52 = vpop.permute.xlu0 %7697  ;;  %v8041_v42 = vpack.i.bf16 %v652_v39, %v651_v38  ;;  %v727_v55 = vld [vmem:[%s9693_s18 + $0xcc] sm:$0xff]  ;;  %v7705_v63 = vunpack.i.h.bf16 %v9986_v47 }
  0xb6   : > { %v7700_v53 = vunpack.i.h.bf16 %v7698_v52  ;;  %v7699_v54 = vunpack.i.l.bf16 %v7698_v52  ;;  %7992 = vrot.lane.b32.xlu1 %v9961_v20, %s12667_s25 }
  0xb7   : > { %7987 = vrot.lane.b32.xlu0 %v9876_v16, %s12667_s25  ;;  %v2052_v16 = vsel %vm2048_vm5, %v2015_v0, %v7675_v45  ;;  %v654_v45 = vld [vmem:[%s9693_s18 + $0xca] sm:$0xff]  ;;  %v7704_v0 = vunpack.i.l.bf16 %v9986_v47  ;;  %v1907_v18 = vsel %vm1901_vm1, %v562_v7, %v7705_v63 }
  0xb8   : > { %v10004_v1 = vpop.permute.xlu1 %7712  ;;  %v2160_v2 = vsel %vm2159_vm8, %v2123_v61, %v7699_v54  ;;  %v2161_v3 = vsel %vm2159_vm8, %v2124_v62, %v7700_v53  ;;  %v2089_v4 = vsel %vm2085_vm6, %v2052_v16, %v7685_v49  ;;  %v688_v49 = vld [vmem:[%s9693_s18 + $0xb3] sm:$0xff]  ;;  %v10064_v54 = vpack.i.bf16 %v654_v45, %v653_v44  ;;  %v729_v62 = vld [vmem:[%s9693_s18 + $0xdc] sm:$0xff] }
  0xb9   : > { %v7708_v8 = vpop.permute.xlu0 %7707  ;;  %v2196_v9 = vpack.c.bf16 %v2161_v3, %v2160_v2  ;;  %v2126_v15 = vsel %vm2122_vm7, %v2089_v4, %v7695_v58  ;;  %v7715_v56 = vunpack.i.h.bf16 %v10004_v1  ;;  %v7714_v57 = vunpack.i.l.bf16 %v10004_v1  ;;  %v728_v61 = vld [vmem:[%s9693_s18 + $0xd4] sm:$0xff]  ;;  %v561_v1 = vld [vmem:[%s9693_s18 + $0x20] sm:$0xff] }
  0xba   : > { %v7710_v12 = vunpack.i.h.bf16 %v7708_v8  ;;  %v7709_v13 = vunpack.i.l.bf16 %v7708_v8  ;;  %8002 = vrot.lane.b32.xlu1 %v9966_v23, %s12668_s28  ;;  %v8061_v58 = vpack.i.bf16 %v691_v43, %v690_v46  ;;  %v8056_v59 = vpack.i.bf16 %v689_v51, %v688_v49  ;;  %v563_v2 = vld [vmem:[%s9693_s18 + $0x30] sm:$0xff]  ;;  %v564_v3 = vld [vmem:[%s9693_s18 + $0x38] sm:$0xff] }
  0xbb   : > { %7997 = vrot.lane.b32.xlu0 %v9961_v20, %s12668_s28  ;;  %7391 = vmatprep.mubr.msk.bf16.mxu0 %vm2257_vm9, %v2196_v9  ;;  %v764_v7 = vld [vmem:[%s9693_s18 + $0xcd] sm:$0xff] }
  0xbc   : > { %v2162_v21 = vsel %vm2159_vm8, %v2125_v14, %v7709_v13  ;;  %v2163_v22 = vsel %vm2159_vm8, %v2126_v15, %v7710_v12  ;;  %v10025_v24 = vpop.permute.xlu1 %7722  ;;  %v10091_v12 = vpack.i.bf16 %v729_v62, %v728_v61  ;;  %v1908_v13 = vsel %vm1901_vm1, %v563_v2, %v7714_v57 }
  0xbd   : > { %v10029_v27 = vpop.permute.xlu0 %7717  ;;  %v2197_v20 = vpack.c.bf16 %v2163_v22, %v2162_v21  ;;  %v7725_v5 = vunpack.i.h.bf16 %v10025_v24  ;;  %v7724_v6 = vunpack.i.l.bf16 %v10025_v24 }
  0xbe   : > { %8012 = vrot.lane.b32.xlu1 %v8011_v10, %s12669_s0  ;;  %v7720_v16 = vunpack.i.h.bf16 %v10029_v27  ;;  %v7719_v8 = vunpack.i.l.bf16 %v10029_v27  ;;  %v10087_v10 = vpack.i.bf16 %v727_v55, %v726_v50 }
  0xbf   : > { %8007 = vrot.lane.b32.xlu0 %v8006_v17, %s12669_s0  ;;  %7392 = vmatmul.mubr.msk.bf16.vlgmr.msra.gmra.mxu0 %vm2257_vm9, %v2197_v20  ;;  %v1906_v17 = vsel %vm1901_vm1, %v561_v1, %v7704_v0  ;;  %v1944_v19 = vsel %vm549_vm2, %v1908_v13, %v7724_v6  ;;  %v763_v1 = vld [vmem:[%s9693_s18 + $0xc5] sm:$0xff] }
  0xc0   : > { %v10036_v32 = vpop.permute.xlu1 %7732  ;;  %v1942_v22 = vsel %vm549_vm2, %v1906_v17, %v7719_v8  ;;  %v1943_v24 = vsel %vm549_vm2, %v1907_v18, %v7720_v16  ;;  %v8086_v17 = vpack.i.bf16 %v764_v7, %v763_v1  ;;  %v617_v18 = vld [vmem:[%s9693_s18 + $0xc1] sm:$0xff] }
  0xc1   : > { %v10040_v35 = vpop.permute.xlu0 %7727  ;;  %v7735_v47 = vunpack.i.h.bf16 %v10036_v32  ;;  %v7734_v11 = vunpack.i.l.bf16 %v10036_v32  ;;  %v565_v7 = vld [vmem:[%s9693_s18 + $0x40] sm:$0xff] }
  0xc2   : > { %8022 = vrot.lane.b32.xlu1 %v8021_v28, %s12670_s24  ;;  %v7730_v14 = vunpack.i.h.bf16 %v10040_v35  ;;  %v7729_v15 = vunpack.i.l.bf16 %v10040_v35 }
  0xc3   : > { %8017 = vrot.lane.b32.xlu0 %v8016_v29, %s12671_s23  ;;  %v1981_v20 = vsel %vm1974_vm3, %v1944_v19, %v7734_v11  ;;  %v618_v19 = vld [vmem:[%s9693_s18 + $0xc9] sm:$0xff] }
  0xc4   : > { %v10046_v40 = vpop.permute.xlu1 %7742  ;;  %v1979_v32 = vsel %vm1974_vm3, %v1942_v22, %v7729_v15  ;;  %v1980_v33 = vsel %vm1974_vm3, %v1943_v24, %v7730_v14 }
  0xc5   : > { %v10048_v41 = vpop.permute.xlu0 %7737 }
  0xc6   : > { %8032 = vrot.lane.b32.xlu1 %v8031_v36, %s12670_s24  ;;  %v7740_v25 = vunpack.i.h.bf16 %v10048_v41  ;;  %v7739_v26 = vunpack.i.l.bf16 %v10048_v41  ;;  %v7745_v36 = vunpack.i.h.bf16 %v10046_v40 }
  0xc7   : > { %8027 = vrot.lane.b32.xlu0 %v8026_v37, %s12671_s23  ;;  %v7744_v37 = vunpack.i.l.bf16 %v10046_v40 }
  0xc8   : > { %v10060_v52 = vpop.permute.xlu1 %7752  ;;  %v2016_v41 = vsel %vm2011_vm4, %v1979_v32, %v7739_v26  ;;  %v800_v26 = vld [vmem:[%s9693_s18 + $0xce] sm:$0xff]  ;;  %v801_v32 = vld [vmem:[%s9693_s18 + $0xd6] sm:$0xff] }
  0xc9   : > { %v10062_v53 = vpop.permute.xlu0 %7747  ;;  %v7755_v44 = vunpack.i.h.bf16 %v10060_v52  ;;  %v7754_v45 = vunpack.i.l.bf16 %v10060_v52  ;;  %v765_v52 = vld [vmem:[%s9693_s18 + $0xd5] sm:$0xff]  ;;  %v2018_v0 = vsel %vm2011_vm4, %v1981_v20, %v7744_v37  ;;  %v8101_v20 = vpack.i.bf16 %v618_v19, %v617_v18 }
  0xca   : > { %8042 = vrot.lane.b32.xlu1 %v8041_v42, %s12664_s22  ;;  %v7750_v29 = vunpack.i.h.bf16 %v10062_v53  ;;  %v7749_v30 = vunpack.i.l.bf16 %v10062_v53  ;;  %v655_v37 = vld [vmem:[%s9693_s18 + $0xd2] sm:$0xff] }
  0xcb   : > { %8037 = vrot.lane.b32.xlu0 %v9935_v60, %s12664_s22  ;;  %v1909_v60 = vsel %vm1901_vm1, %v564_v3, %v7715_v56  ;;  %v2055_v16 = vsel %vm2048_vm5, %v2018_v0, %v7754_v45  ;;  %v658_v45 = vld [vmem:[%s9693_s18 + $0xea] sm:$0xff] }
  0xcc   : > { %v10085_v9 = vpop.permute.xlu1 %7762  ;;  %v1945_v21 = vsel %vm549_vm2, %v1909_v60, %v7725_v5  ;;  %v2053_v43 = vsel %vm2048_vm5, %v2016_v41, %v7749_v30  ;;  %v620_v30 = vld [vmem:[%s9693_s18 + $0xd9] sm:$0xff] }
  0xcd   : > { %v7758_v4 = vpop.permute.xlu0 %7757  ;;  %v1982_v28 = vsel %vm1974_vm3, %v1945_v21, %v7735_v47  ;;  %v7765_v49 = vunpack.i.h.bf16 %v10085_v9  ;;  %v7764_v51 = vunpack.i.l.bf16 %v10085_v9 }
  0xce   : > { %8052 = vrot.lane.b32.xlu1 %v10064_v54, %s12665_s19  ;;  %v7760_v34 = vunpack.i.h.bf16 %v7758_v4  ;;  %v7759_v35 = vunpack.i.l.bf16 %v7758_v4  ;;  %v2019_v2 = vsel %vm2011_vm4, %v1982_v28, %v7745_v36 }
  0xcf   : > { %8047 = vrot.lane.b32.xlu0 %v8041_v42, %s12665_s19  ;;  %v2017_v42 = vsel %vm2011_vm4, %v1980_v33, %v7740_v25  ;;  %v2056_v8 = vsel %vm2048_vm5, %v2019_v2, %v7755_v44  ;;  %v2092_v11 = vsel %vm2085_vm6, %v2055_v16, %v7764_v51  ;;  %v799_v25 = vld [vmem:[%s9693_s18 + $0xc6] sm:$0xff]  ;;  %v802_v33 = vld [vmem:[%s9693_s18 + $0xde] sm:$0xff]  ;;  %v692_v51 = vld [vmem:[%s9693_s18 + $0xd3] sm:$0xff] }
  0xd0   : > { %v7773_v27 = vpop.permute.xlu1 %7772  ;;  %v2054_v40 = vsel %vm2048_vm5, %v2017_v42, %v7750_v29  ;;  %v2090_v50 = vsel %vm2085_vm6, %v2053_v43, %v7759_v35  ;;  %v2093_v4 = vsel %vm2085_vm6, %v2056_v8, %v7765_v49  ;;  %v8096_v28 = vpack.i.bf16 %v800_v26, %v799_v25  ;;  %v619_v29 = vld [vmem:[%s9693_s18 + $0xd1] sm:$0xff]  ;;  %v657_v44 = vld [vmem:[%s9693_s18 + $0xe2] sm:$0xff] }
  0xd1   : > { %v7768_v31 = vpop.permute.xlu0 %7767  ;;  %v2091_v55 = vsel %vm2085_vm6, %v2054_v40, %v7760_v34  ;;  %v7774_v61 = vunpack.i.l.bf16 %v7773_v27  ;;  %v8111_v35 = vpack.i.bf16 %v620_v30, %v619_v29  ;;  %v8106_v36 = vpack.i.bf16 %v802_v33, %v801_v32  ;;  %v694_v43 = vld [vmem:[%s9693_s18 + $0xe3] sm:$0xff]  ;;  %v695_v40 = vld [vmem:[%s9693_s18 + $0xeb] sm:$0xff] }
  0xd2   : > { %8062 = vrot.lane.b32.xlu1 %v8061_v58, %s12666_s1  ;;  %v7770_v38 = vunpack.i.h.bf16 %v7768_v31  ;;  %v7769_v39 = vunpack.i.l.bf16 %v7768_v31  ;;  %v766_v58 = vld [vmem:[%s9693_s18 + $0xdd] sm:$0xff]  ;;  %v567_v2 = vld [vmem:[%s9693_s18 + $0x50] sm:$0xff] }
  0xd3   : > { %8057 = vrot.lane.b32.xlu0 %v8056_v59, %s12666_s1  ;;  %v7775_v59 = vunpack.i.h.bf16 %v7773_v27  ;;  %v8091_v47 = vpack.i.bf16 %v766_v58, %v765_v52  ;;  %v2129_v14 = vsel %vm2122_vm7, %v2092_v11, %v7774_v61  ;;  %v732_v61 = vld [vmem:[%s9693_s18 + $0xf4] sm:$0xff] }
  0xd4   : > { %v10122_v46 = vpop.permute.xlu1 %7782  ;;  %v2127_v62 = vsel %vm2122_vm7, %v2090_v50, %v7769_v39  ;;  %v2128_v63 = vsel %vm2122_vm7, %v2091_v55, %v7770_v38  ;;  %v656_v38 = vld [vmem:[%s9693_s18 + $0xda] sm:$0xff]  ;;  %v10197_v50 = vpack.i.bf16 %v658_v45, %v657_v44 }
  0xd5   : > { %v7778_v53 = vpop.permute.xlu0 %7777  ;;  %v2130_v15 = vsel %vm2122_vm7, %v2093_v4, %v7775_v59  ;;  %v8121_v42 = vpack.i.bf16 %v656_v38, %v655_v37  ;;  %v693_v55 = vld [vmem:[%s9693_s18 + $0xdb] sm:$0xff]  ;;  %v8141_v59 = vpack.i.bf16 %v695_v40, %v694_v43  ;;  %v7784_v0 = vunpack.i.l.bf16 %v10122_v46 }
  0xd6   : > { %v7780_v56 = vunpack.i.h.bf16 %v7778_v53  ;;  %v7779_v57 = vunpack.i.l.bf16 %v7778_v53  ;;  %8072 = vrot.lane.b32.xlu1 %v10087_v10, %s12667_s25 }
  0xd7   : > { %8067 = vrot.lane.b32.xlu0 %v9966_v23, %s12667_s25 }
  0xd8   : > { %v2164_v3 = vsel %vm2159_vm8, %v2127_v62, %v7779_v57  ;;  %v2165_v5 = vsel %vm2159_vm8, %v2128_v63, %v7780_v56  ;;  %v10142_v6 = vpop.permute.xlu1 %7792  ;;  %v730_v56 = vld [vmem:[%s9693_s18 + $0xe4] sm:$0xff]  ;;  %v731_v57 = vld [vmem:[%s9693_s18 + $0xec] sm:$0xff]  ;;  %v733_v62 = vld [vmem:[%s9693_s18 + $0xfc] sm:$0xff]  ;;  %v7785_v63 = vunpack.i.h.bf16 %v10122_v46 }
  0xd9   : > { %v7788_v9 = vpop.permute.xlu0 %7787  ;;  %v2198_v23 = vpack.c.bf16 %v2165_v5, %v2164_v3  ;;  %v7795_v52 = vunpack.i.h.bf16 %v10142_v6  ;;  %v7794_v58 = vunpack.i.l.bf16 %v10142_v6  ;;  %v568_v3 = vld [vmem:[%s9693_s18 + $0x58] sm:$0xff]  ;;  %v566_v6 = vld [vmem:[%s9693_s18 + $0x48] sm:$0xff] }
  0xda   : > { %v7790_v13 = vunpack.i.h.bf16 %v7788_v9  ;;  %v7789_v60 = vunpack.i.l.bf16 %v7788_v9  ;;  %8082 = vrot.lane.b32.xlu1 %v10091_v12, %s12668_s28  ;;  %v1911_v18 = vsel %vm1901_vm1, %v566_v6, %v7785_v63  ;;  %v767_v6 = vld [vmem:[%s9693_s18 + $0xe5] sm:$0xff] }
  0xdb   : > { %8077 = vrot.lane.b32.xlu0 %v10087_v10, %s12668_s28  ;;  %7395 = vmatprep.mubr.msk.bf16.mxu0 %vm2257_vm9, %v2198_v23  ;;  %v8136_v23 = vpack.i.bf16 %v693_v55, %v692_v51 }
  0xdc   : > { %v2166_v21 = vsel %vm2159_vm8, %v2129_v14, %v7789_v60  ;;  %v2167_v22 = vsel %vm2159_vm8, %v2130_v15, %v7790_v13  ;;  %v10161_v24 = vpop.permute.xlu1 %7802  ;;  %v10225_v13 = vpack.i.bf16 %v733_v62, %v732_v61  ;;  %v1913_v60 = vsel %vm1901_vm1, %v568_v3, %v7795_v52 }
  0xdd   : > { %v10165_v27 = vpop.permute.xlu0 %7797  ;;  %v2199_v10 = vpack.c.bf16 %v2167_v22, %v2166_v21  ;;  %v7805_v5 = vunpack.i.h.bf16 %v10161_v24  ;;  %v7804_v1 = vunpack.i.l.bf16 %v10161_v24 }
  0xde   : > { %8092 = vrot.lane.b32.xlu1 %v8091_v47, %s12669_s0  ;;  %v7800_v16 = vunpack.i.h.bf16 %v10165_v27  ;;  %v7799_v8 = vunpack.i.l.bf16 %v10165_v27  ;;  %v10221_v47 = vpack.i.bf16 %v731_v57, %v730_v56 }
  0xdf   : > { %8087 = vrot.lane.b32.xlu0 %v8086_v17, %s12669_s0  ;;  %7396 = vmatmul.mubr.msk.bf16.gmra.mxu0 %vm2257_vm9, %v2199_v10  ;;  %v1910_v17 = vsel %vm1901_vm1, %v565_v7, %v7784_v0  ;;  %v1949_v21 = vsel %vm549_vm2, %v1913_v60, %v7805_v5 }
  0xe0   : > { %v10172_v31 = vpop.permute.xlu1 %7812  ;;  %v1946_v22 = vsel %vm549_vm2, %v1910_v17, %v7799_v8  ;;  %v1947_v24 = vsel %vm549_vm2, %v1911_v18, %v7800_v16  ;;  %v768_v16 = vld [vmem:[%s9693_s18 + $0xed] sm:$0xff]  ;;  %v621_v18 = vld [vmem:[%s9693_s18 + $0xe1] sm:$0xff] }
  0xe1   : > { %v10176_v34 = vpop.permute.xlu0 %7807  ;;  %v7815_v46 = vunpack.i.h.bf16 %v10172_v31  ;;  %v7814_v11 = vunpack.i.l.bf16 %v10172_v31  ;;  %v8166_v17 = vpack.i.bf16 %v768_v16, %v767_v6 }
  0xe2   : > { %8102 = vrot.lane.b32.xlu1 %v8101_v20, %s12670_s24  ;;  %v7810_v14 = vunpack.i.h.bf16 %v10176_v34  ;;  %v7809_v15 = vunpack.i.l.bf16 %v10176_v34 }
  0xe3   : > { %8097 = vrot.lane.b32.xlu0 %v8096_v28, %s12671_s23  ;;  %v1986_v20 = vsel %vm1974_vm3, %v1949_v21, %v7815_v46 }
  0xe4   : > { %v10182_v39 = vpop.permute.xlu1 %7822  ;;  %v1983_v31 = vsel %vm1974_vm3, %v1946_v22, %v7809_v15  ;;  %v1984_v32 = vsel %vm1974_vm3, %v1947_v24, %v7810_v14 }
  0xe5   : > { %v10184_v41 = vpop.permute.xlu0 %7817 }
  0xe6   : > { %8112 = vrot.lane.b32.xlu1 %v8111_v35, %s12670_s24  ;;  %v7820_v25 = vunpack.i.h.bf16 %v10184_v41  ;;  %v7819_v26 = vunpack.i.l.bf16 %v10184_v41  ;;  %v7825_v35 = vunpack.i.h.bf16 %v10182_v39 }
  0xe7   : > { %8107 = vrot.lane.b32.xlu0 %v8106_v36, %s12671_s23  ;;  %v7824_v36 = vunpack.i.l.bf16 %v10182_v39 }
  0xe8   : > { %v10192_v49 = vpop.permute.xlu1 %7832  ;;  %v2020_v41 = vsel %vm2011_vm4, %v1983_v31, %v7819_v26  ;;  %v2023_v3 = vsel %vm2011_vm4, %v1986_v20, %v7825_v35  ;;  %v804_v26 = vld [vmem:[%s9693_s18 + $0xee] sm:$0xff]  ;;  %v805_v31 = vld [vmem:[%s9693_s18 + $0xf6] sm:$0xff] }
  0xe9   : > { %v10195_v53 = vpop.permute.xlu0 %7827  ;;  %v7835_v44 = vunpack.i.h.bf16 %v10192_v49  ;;  %v7834_v45 = vunpack.i.l.bf16 %v10192_v49  ;;  %v769_v49 = vld [vmem:[%s9693_s18 + $0xf5] sm:$0xff] }
  0xea   : > { %8122 = vrot.lane.b32.xlu1 %v8121_v42, %s12664_s22  ;;  %v7830_v28 = vunpack.i.h.bf16 %v10195_v53  ;;  %v7829_v29 = vunpack.i.l.bf16 %v10195_v53 }
  0xeb   : > { %8117 = vrot.lane.b32.xlu0 %v10064_v54, %s12664_s22  ;;  %v1912_v54 = vsel %vm1901_vm1, %v567_v2, %v7794_v58 }
  0xec   : > { %v10219_v9 = vpop.permute.xlu1 %7842  ;;  %v1948_v19 = vsel %vm549_vm2, %v1912_v54, %v7804_v1  ;;  %v2057_v40 = vsel %vm2048_vm5, %v2020_v41, %v7829_v29  ;;  %v624_v29 = vld [vmem:[%s9693_s18 + $0xf9] sm:$0xff] }
  0xed   : > { %v7838_v4 = vpop.permute.xlu0 %7837  ;;  %v1985_v10 = vsel %vm1974_vm3, %v1948_v19, %v7814_v11  ;;  %v7845_v51 = vunpack.i.h.bf16 %v10219_v9  ;;  %v7844_v53 = vunpack.i.l.bf16 %v10219_v9  ;;  %v2060_v9 = vsel %vm2048_vm5, %v2023_v3, %v7835_v44  ;;  %v622_v19 = vld [vmem:[%s9693_s18 + $0xe9] sm:$0xff] }
  0xee   : > { %8132 = vrot.lane.b32.xlu1 %v10197_v50, %s12665_s19  ;;  %v7840_v33 = vunpack.i.h.bf16 %v7838_v4  ;;  %v7839_v34 = vunpack.i.l.bf16 %v7838_v4  ;;  %v2022_v2 = vsel %vm2011_vm4, %v1985_v10, %v7824_v36  ;;  %v8181_v10 = vpack.i.bf16 %v622_v19, %v621_v18  ;;  %v659_v36 = vld [vmem:[%s9693_s18 + $0xf2] sm:$0xff]  ;;  %v661_v44 = vld [vmem:[%s9693_s18 + $0x102] sm:$0xff] }
  0xef   : > { %8127 = vrot.lane.b32.xlu0 %v8121_v42, %s12665_s19  ;;  %v2021_v42 = vsel %vm2011_vm4, %v1984_v32, %v7820_v25  ;;  %v2059_v8 = vsel %vm2048_vm5, %v2022_v2, %v7834_v45  ;;  %v2097_v4 = vsel %vm2085_vm6, %v2060_v9, %v7845_v51  ;;  %v803_v25 = vld [vmem:[%s9693_s18 + $0xe6] sm:$0xff]  ;;  %v806_v32 = vld [vmem:[%s9693_s18 + $0xfe] sm:$0xff]  ;;  %v696_v51 = vld [vmem:[%s9693_s18 + $0xf3] sm:$0xff] }
  0xf0   : > { %v7853_v27 = vpop.permute.xlu1 %7852  ;;  %v2058_v39 = vsel %vm2048_vm5, %v2021_v42, %v7830_v28  ;;  %v2094_v56 = vsel %vm2085_vm6, %v2057_v40, %v7839_v34  ;;  %v2096_v11 = vsel %vm2085_vm6, %v2059_v8, %v7844_v53  ;;  %v8176_v20 = vpack.i.bf16 %v804_v26, %v803_v25  ;;  %v623_v28 = vld [vmem:[%s9693_s18 + $0xf1] sm:$0xff]  ;;  %v698_v40 = vld [vmem:[%s9693_s18 + $0x103] sm:$0xff]  ;;  %v697_v53 = vld [vmem:[%s9693_s18 + $0xfb] sm:$0xff] }
  0xf1   : > { %v7848_v30 = vpop.permute.xlu0 %7847  ;;  %v2095_v57 = vsel %vm2085_vm6, %v2058_v39, %v7840_v33  ;;  %v7855_v61 = vunpack.i.h.bf16 %v7853_v27  ;;  %v7854_v62 = vunpack.i.l.bf16 %v7853_v27  ;;  %v8191_v34 = vpack.i.bf16 %v624_v29, %v623_v28  ;;  %v662_v45 = vld [vmem:[%s9693_s18 + $0x10a] sm:$0xff] }
  0xf2   : > { %8142 = vrot.lane.b32.xlu1 %v8141_v59, %s12666_s1  ;;  %v7850_v37 = vunpack.i.h.bf16 %v7848_v30  ;;  %v7849_v38 = vunpack.i.l.bf16 %v7848_v30  ;;  %v770_v59 = vld [vmem:[%s9693_s18 + $0xfd] sm:$0xff]  ;;  %v8186_v35 = vpack.i.bf16 %v806_v32, %v805_v31  ;;  %v699_v39 = vld [vmem:[%s9693_s18 + $0x10b] sm:$0xff] }
  0xf3   : > { %8137 = vrot.lane.b32.xlu0 %v8136_v23, %s12666_s1  ;;  %v8171_v46 = vpack.i.bf16 %v770_v59, %v769_v49  ;;  %v2133_v14 = vsel %vm2122_vm7, %v2096_v11, %v7854_v62  ;;  %v2134_v15 = vsel %vm2122_vm7, %v2097_v4, %v7855_v61  ;;  %v8221_v61 = vpack.i.bf16 %v699_v39, %v698_v40  ;;  %v570_v8 = vld [vmem:[%s9693_s18 + $0x68] sm:$0xff] }
  0xf4   : > { %v10256_v43 = vpop.permute.xlu1 %7862  ;;  %v2131_v63 = vsel %vm2122_vm7, %v2094_v56, %v7849_v38  ;;  %v2132_v0 = vsel %vm2122_vm7, %v2095_v57, %v7850_v37  ;;  %v660_v37 = vld [vmem:[%s9693_s18 + $0xfa] sm:$0xff]  ;;  %v10332_v57 = vpack.i.bf16 %v662_v45, %v661_v44  ;;  %v8216_v62 = vpack.i.bf16 %v697_v53, %v696_v51 }
  0xf5   : > { %v7858_v55 = vpop.permute.xlu0 %7857  ;;  %v8201_v42 = vpack.i.bf16 %v660_v37, %v659_v36  ;;  %v7865_v2 = vunpack.i.h.bf16 %v10256_v43  ;;  %v7864_v3 = vunpack.i.l.bf16 %v10256_v43 }
  0xf6   : > { %v7860_v52 = vunpack.i.h.bf16 %v7858_v55  ;;  %v7859_v58 = vunpack.i.l.bf16 %v7858_v55  ;;  %8152 = vrot.lane.b32.xlu1 %v10221_v47, %s12667_s25 }
  0xf7   : > { %8147 = vrot.lane.b32.xlu0 %v10091_v12, %s12667_s25  ;;  %v1915_v18 = vsel %vm1901_vm1, %v570_v8, %v7865_v2  ;;  %v772_v8 = vld [vmem:[%s9693_s18 + $0x10d] sm:$0xff] }
  0xf8   : > { %v2168_v5 = vsel %vm2159_vm8, %v2131_v63, %v7859_v58  ;;  %v2169_v1 = vsel %vm2159_vm8, %v2132_v0, %v7860_v52  ;;  %v10276_v7 = vpop.permute.xlu1 %7872  ;;  %v734_v52 = vld [vmem:[%s9693_s18 + $0x104] sm:$0xff]  ;;  %v735_v58 = vld [vmem:[%s9693_s18 + $0x10c] sm:$0xff]  ;;  %v736_v63 = vld [vmem:[%s9693_s18 + $0x114] sm:$0xff] }
  0xf9   : > { %v7868_v23 = vpop.permute.xlu0 %7867  ;;  %v2200_v12 = vpack.c.bf16 %v2169_v1, %v2168_v5  ;;  %v7875_v49 = vunpack.i.h.bf16 %v10276_v7  ;;  %v7874_v59 = vunpack.i.l.bf16 %v10276_v7  ;;  %v737_v0 = vld [vmem:[%s9693_s18 + $0x11c] sm:$0xff]  ;;  %v571_v5 = vld [vmem:[%s9693_s18 + $0x70] sm:$0xff] }
  0xfa   : > { %v7870_v54 = vunpack.i.h.bf16 %v7868_v23  ;;  %v7869_v60 = vunpack.i.l.bf16 %v7868_v23  ;;  %8162 = vrot.lane.b32.xlu1 %v10225_v13, %s12668_s28  ;;  %v572_v1 = vld [vmem:[%s9693_s18 + $0x78] sm:$0xff]  ;;  %v569_v7 = vld [vmem:[%s9693_s18 + $0x60] sm:$0xff] }
  0xfb   : > { %8157 = vrot.lane.b32.xlu0 %v10221_v47, %s12668_s28  ;;  %7399 = vmatprep.mubr.msk.bf16.mxu0 %vm2257_vm9, %v2200_v12 }
  0xfc   : > { %v2170_v21 = vsel %vm2159_vm8, %v2133_v14, %v7869_v60  ;;  %v2171_v22 = vsel %vm2159_vm8, %v2134_v15, %v7870_v54  ;;  %v10295_v24 = vpop.permute.xlu1 %7882  ;;  %v10359_v54 = vpack.i.bf16 %v737_v0, %v736_v63  ;;  %v1916_v60 = vsel %vm1901_vm1, %v571_v5, %v7874_v59 }
  0xfd   : > { %v10299_v27 = vpop.permute.xlu0 %7877  ;;  %v2201_v47 = vpack.c.bf16 %v2171_v22, %v2170_v21  ;;  %v7885_v6 = vunpack.i.h.bf16 %v10295_v24  ;;  %v7884_v16 = vunpack.i.l.bf16 %v10295_v24 }
  0xfe   : > { %8172 = vrot.lane.b32.xlu1 %v8171_v46, %s12669_s0  ;;  %v7880_v9 = vunpack.i.h.bf16 %v10299_v27  ;;  %v7879_v23 = vunpack.i.l.bf16 %v10299_v27  ;;  %v10355_v46 = vpack.i.bf16 %v735_v58, %v734_v52 }
  0xff   : > { %8167 = vrot.lane.b32.xlu0 %v8166_v17, %s12669_s0  ;;  %7400 = vmatmul.mubr.msk.bf16.gmra.mxu0 %vm2257_vm9, %v2201_v47  ;;  %v1914_v17 = vsel %vm1901_vm1, %v569_v7, %v7864_v3  ;;  %v1952_v19 = vsel %vm549_vm2, %v1916_v60, %v7884_v16  ;;  %v771_v7 = vld [vmem:[%s9693_s18 + $0x105] sm:$0xff] }
 0x100   : > { %v10306_v30 = vpop.permute.xlu1 %7892  ;;  %v1950_v22 = vsel %vm549_vm2, %v1914_v17, %v7879_v23  ;;  %v1951_v24 = vsel %vm549_vm2, %v1915_v18, %v7880_v9  ;;  %v8246_v17 = vpack.i.bf16 %v772_v8, %v771_v7  ;;  %v625_v18 = vld [vmem:[%s9693_s18 + $0x101] sm:$0xff]  ;;  %v575_v8 = vld [vmem:[%s9693_s18 + $0x90] sm:$0xff] }
 0x101   : > { %v10310_v33 = vpop.permute.xlu0 %7887  ;;  %v7895_v43 = vunpack.i.h.bf16 %v10306_v30  ;;  %v7894_v11 = vunpack.i.l.bf16 %v10306_v30 }
 0x102   : > { %8182 = vrot.lane.b32.xlu1 %v8181_v10, %s12670_s24  ;;  %v7890_v14 = vunpack.i.h.bf16 %v10310_v33  ;;  %v7889_v15 = vunpack.i.l.bf16 %v10310_v33 }
 0x103   : > { %8177 = vrot.lane.b32.xlu0 %v8176_v20, %s12671_s23  ;;  %v1989_v47 = vsel %vm1974_vm3, %v1952_v19, %v7894_v11  ;;  %v626_v19 = vld [vmem:[%s9693_s18 + $0x109] sm:$0xff] }
 0x104   : > { %v10316_v38 = vpop.permute.xlu1 %7902  ;;  %v1987_v30 = vsel %vm1974_vm3, %v1950_v22, %v7889_v15  ;;  %v1988_v31 = vsel %vm1974_vm3, %v1951_v24, %v7890_v14 }
 0x105   : > { %v10318_v41 = vpop.permute.xlu0 %7897 }
 0x106   : > { %8192 = vrot.lane.b32.xlu1 %v8191_v34, %s12670_s24  ;;  %v7900_v25 = vunpack.i.h.bf16 %v10318_v41  ;;  %v7899_v26 = vunpack.i.l.bf16 %v10318_v41  ;;  %v7905_v34 = vunpack.i.h.bf16 %v10316_v38 }
 0x107   : > { %8187 = vrot.lane.b32.xlu0 %v8186_v35, %s12671_s23  ;;  %v7904_v35 = vunpack.i.l.bf16 %v10316_v38 }
 0x108   : > { %v10328_v55 = vpop.permute.xlu1 %7912  ;;  %v2024_v41 = vsel %vm2011_vm4, %v1987_v30, %v7899_v26  ;;  %v808_v26 = vld [vmem:[%s9693_s18 + $0x10e] sm:$0xff]  ;;  %v809_v30 = vld [vmem:[%s9693_s18 + $0x116] sm:$0xff] }
 0x109   : > { %v10330_v56 = vpop.permute.xlu0 %7907  ;;  %v7915_v44 = vunpack.i.h.bf16 %v10328_v55  ;;  %v7914_v45 = vunpack.i.l.bf16 %v10328_v55  ;;  %v773_v55 = vld [vmem:[%s9693_s18 + $0x115] sm:$0xff]  ;;  %v2026_v3 = vsel %vm2011_vm4, %v1989_v47, %v7904_v35  ;;  %v8261_v47 = vpack.i.bf16 %v626_v19, %v625_v18 }
 0x10a   : > { %8202 = vrot.lane.b32.xlu1 %v8201_v42, %s12664_s22  ;;  %v7910_v20 = vunpack.i.h.bf16 %v10330_v56  ;;  %v7909_v28 = vunpack.i.l.bf16 %v10330_v56  ;;  %v663_v35 = vld [vmem:[%s9693_s18 + $0x112] sm:$0xff] }
 0x10b   : > { %8197 = vrot.lane.b32.xlu0 %v10197_v50, %s12664_s22  ;;  %v1917_v50 = vsel %vm1901_vm1, %v572_v1, %v7875_v49  ;;  %v2063_v9 = vsel %vm2048_vm5, %v2026_v3, %v7914_v45  ;;  %v667_v45 = vld [vmem:[%s9693_s18 + $0x12a] sm:$0x3f]  ;;  %v10480_v3 = vld [vmem:[%s9693_s18 + $0x134] sm:$0xff] }
 0x10c   : > { %v10353_v12 = vpop.permute.xlu1 %7922  ;;  %v1953_v21 = vsel %vm549_vm2, %v1917_v50, %v7885_v6  ;;  %v2061_v39 = vsel %vm2048_vm5, %v2024_v41, %v7909_v28  ;;  %v628_v28 = vld [vmem:[%s9693_s18 + $0x119] sm:$0x3f] }
 0x10d   : > { %v7918_v4 = vpop.permute.xlu0 %7917  ;;  %v1990_v10 = vsel %vm1974_vm3, %v1953_v21, %v7895_v43  ;;  %v7925_v51 = vunpack.i.h.bf16 %v10353_v12  ;;  %v7924_v53 = vunpack.i.l.bf16 %v10353_v12 }
 0x10e   : > { %8212 = vrot.lane.b32.xlu1 %v10332_v57, %s12665_s19  ;;  %v7920_v32 = vunpack.i.h.bf16 %v7918_v4  ;;  %v7919_v33 = vunpack.i.l.bf16 %v7918_v4  ;;  %v2027_v5 = vsel %vm2011_vm4, %v1990_v10, %v7905_v34 }
 0x10f   : > { %8207 = vrot.lane.b32.xlu0 %v8201_v42, %s12665_s19  ;;  %v2025_v42 = vsel %vm2011_vm4, %v1988_v31, %v7900_v25  ;;  %v2064_v23 = vsel %vm2048_vm5, %v2027_v5, %v7915_v44  ;;  %v2100_v11 = vsel %vm2085_vm6, %v2063_v9, %v7924_v53  ;;  %v807_v25 = vld [vmem:[%s9693_s18 + $0x106] sm:$0xff]  ;;  %v810_v31 = vld [vmem:[%s9693_s18 + $0x11e] sm:$0xff]  ;;  %v10462_v53 = vld [vmem:[%s9693_s18 + $0x113] sm:$0xff] }
 0x110   : > { %v7933_v27 = vpop.permute.xlu1 %7932  ;;  %v2062_v38 = vsel %vm2048_vm5, %v2025_v42, %v7910_v20  ;;  %v2098_v52 = vsel %vm2085_vm6, %v2061_v39, %v7919_v33  ;;  %v2101_v4 = vsel %vm2085_vm6, %v2064_v23, %v7925_v51  ;;  %v8256_v10 = vpack.i.bf16 %v808_v26, %v807_v25  ;;  %v627_v20 = vld [vmem:[%s9693_s18 + $0x111] sm:$0xff]  ;;  %v666_v42 = vld [vmem:[%s9693_s18 + $0x122] sm:$0xff]  ;;  %v665_v39 = vld [vmem:[%s9693_s18 + $0x11a] sm:$0xff] }
 0x111   : > { %v7928_v29 = vpop.permute.xlu0 %7927  ;;  %v2099_v58 = vsel %vm2085_vm6, %v2062_v38, %v7920_v32  ;;  %v7934_v63 = vunpack.i.l.bf16 %v7933_v27  ;;  %v8271_v33 = vpack.i.bf16 %v628_v28, %v627_v20  ;;  %v8266_v34 = vpack.i.bf16 %v810_v31, %v809_v30  ;;  %v702_v38 = vld [vmem:[%s9693_s18 + $0x123] sm:$0xff]  ;;  %v703_v51 = vld [vmem:[%s9693_s18 + $0x12b] sm:$0x3f]  ;;  %v10483_v5 = vld [vmem:[%s9693_s18 + $0x13c] sm:$0x3f] }
 0x112   : > { %8222 = vrot.lane.b32.xlu1 %v8221_v61, %s12666_s1  ;;  %v7930_v36 = vunpack.i.h.bf16 %v7928_v29  ;;  %v7929_v37 = vunpack.i.l.bf16 %v7928_v29  ;;  %v774_v61 = vld [vmem:[%s9693_s18 + $0x11d] sm:$0xff] }
 0x113   : > { %8217 = vrot.lane.b32.xlu0 %v8216_v62, %s12666_s1  ;;  %v7935_v62 = vunpack.i.h.bf16 %v7933_v27  ;;  %v8251_v43 = vpack.i.bf16 %v774_v61, %v773_v55  ;;  %v2137_v14 = vsel %vm2122_vm7, %v2100_v11, %v7934_v63  ;;  %v10470_v55 = vld [vmem:[%s9693_s18 + $0x124] sm:$0xff]  ;;  %v10473_v61 = vld [vmem:[%s9693_s18 + $0x12c] sm:$0x3f]  ;;  %v576_v9 = vld [vmem:[%s9693_s18 + $0x98] sm:$0xff] }
 0x114   : > { %v10390_v40 = vpop.permute.xlu1 %7942  ;;  %v2135_v0 = vsel %vm2122_vm7, %v2098_v52, %v7929_v37  ;;  %v2136_v2 = vsel %vm2122_vm7, %v2099_v58, %v7930_v36  ;;  %v664_v36 = vld [vmem:[%s9693_s18 + $0x11a] sm:$0x3f] }
 0x115   : > { %v7938_v56 = vpop.permute.xlu0 %7937  ;;  %v2138_v15 = vsel %vm2122_vm7, %v2101_v4, %v7935_v62  ;;  %v8281_v44 = vpack.i.bf16 %v664_v36, %v663_v35  ;;  %v7944_v7 = vunpack.i.l.bf16 %v10390_v40 }
 0x116   : > { %v7940_v49 = vunpack.i.h.bf16 %v7938_v56  ;;  %v7939_v59 = vunpack.i.l.bf16 %v7938_v56  ;;  %8232 = vrot.lane.b32.xlu1 %v10355_v46, %s12667_s25  ;;  %v701_v56 = vld [vmem:[%s9693_s18 + $0x11b] sm:$0xff] }
 0x117   : > { %8227 = vrot.lane.b32.xlu0 %v10225_v13, %s12667_s25 }
 0x118   : > { %v2172_v1 = vsel %vm2159_vm8, %v2135_v0, %v7939_v59  ;;  %v2173_v6 = vsel %vm2159_vm8, %v2136_v2, %v7940_v49  ;;  %v10410_v16 = vpop.permute.xlu1 %7952  ;;  %v8291_v49 = vpack.i.bf16 %v667_v45, %v666_v42  ;;  %v8286_v59 = vpack.i.bf16 %v665_v39, %v663_v35 }
 0x119   : > { %v7948_v12 = vpop.permute.xlu0 %7947  ;;  %v2202_v13 = vpack.c.bf16 %v2173_v6, %v2172_v1  ;;  %v7955_v62 = vunpack.i.h.bf16 %v10410_v16  ;;  %v7954_v63 = vunpack.i.l.bf16 %v10410_v16  ;;  %v8301_v0 = vpack.i.bf16 %v703_v51, %v702_v38  ;;  %v10486_v1 = vld [vmem:[%s9693_s18 + $0x12c] sm:$0xff] }
 0x11a   : > { %v7950_v60 = vunpack.i.h.bf16 %v7948_v12  ;;  %v7949_v50 = vunpack.i.l.bf16 %v7948_v12  ;;  %8242 = vrot.lane.b32.xlu1 %v10359_v54, %s12668_s28  ;;  %v8296_v2 = vpack.i.bf16 %v701_v56, %v10462_v53  ;;  %v7945_v6 = vunpack.i.h.bf16 %v10390_v40  ;;  %v573_v12 = vld [vmem:[%s9693_s18 + $0x80] sm:$0xff] }
 0x11b   : > { %8237 = vrot.lane.b32.xlu0 %v10355_v46, %s12668_s28  ;;  %7403 = vmatprep.mubr.msk.bf16.mxu0 %vm2257_vm9, %v2202_v13  ;;  %v574_v13 = vld [vmem:[%s9693_s18 + $0x88] sm:$0xff]  ;;  %v8311_v40 = vpack.i.bf16 %v10473_v61, %v10470_v55  ;;  %v1921_v18 = vsel %vm1901_vm1, %v576_v9, %v7955_v62 }
 0x11c   : > { %v2174_v21 = vsel %vm2159_vm8, %v2137_v14, %v7949_v50  ;;  %v2175_v22 = vsel %vm2159_vm8, %v2138_v15, %v7950_v60  ;;  %v10429_v24 = vpop.permute.xlu1 %7962  ;;  %v8321_v15 = vpack.i.bf16 %v10483_v5, %v10480_v3  ;;  %v811_v5 = vld [vmem:[%s9693_s18 + $0x126] sm:$0xff] }
 0x11d   : > { %v10433_v27 = vpop.permute.xlu0 %7957  ;;  %v2203_v46 = vpack.c.bf16 %v2175_v22, %v2174_v21  ;;  %v7965_v23 = vunpack.i.h.bf16 %v10429_v24  ;;  %v7964_v16 = vunpack.i.l.bf16 %v10429_v24  ;;  %v1918_v22 = vsel %vm1901_vm1, %v573_v12, %v7944_v7 }
 0x11e   : > { %8252 = vrot.lane.b32.xlu1 %v8251_v43, %s12669_s0  ;;  %v7960_v43 = vunpack.i.h.bf16 %v10433_v27  ;;  %v7959_v11 = vunpack.i.l.bf16 %v10433_v27  ;;  %v1919_v24 = vsel %vm1901_vm1, %v574_v13, %v7945_v6  ;;  %v778_v6 = vld [vmem:[%s9693_s18 + $0x13d] sm:$0x3f] }
 0x11f   : > { %8247 = vrot.lane.b32.xlu0 %v8246_v17, %s12669_s0  ;;  %7404 = vmatmul.mubr.msk.bf16.gmra.mxu0 %vm2257_vm9, %v2203_v46  ;;  %v1920_v17 = vsel %vm1901_vm1, %v575_v8, %v7954_v63  ;;  %v1957_v26 = vsel %vm549_vm2, %v1921_v18, %v7965_v23 }
 0x120   : > { %v10440_v29 = vpop.permute.xlu1 %7972  ;;  %v1956_v25 = vsel %vm549_vm2, %v1920_v17, %v7964_v16  ;;  %v1954_v27 = vsel %vm549_vm2, %v1918_v22, %v7959_v11  ;;  %v1955_v46 = vsel %vm549_vm2, %v1919_v24, %v7960_v43 }
 0x121   : > { %v10444_v32 = vpop.permute.xlu0 %7967  ;;  %v7975_v60 = vunpack.i.h.bf16 %v10440_v29  ;;  %v7974_v50 = vunpack.i.l.bf16 %v10440_v29 }
 0x122   : > { %8262 = vrot.lane.b32.xlu1 %v8261_v47, %s12670_s24  ;;  %v7970_v19 = vunpack.i.h.bf16 %v10444_v32  ;;  %v7969_v21 = vunpack.i.l.bf16 %v10444_v32 }
 0x123   : > { %8257 = vrot.lane.b32.xlu0 %v8256_v10, %s12671_s23  ;;  %v1993_v28 = vsel %vm1974_vm3, %v1956_v25, %v7974_v50  ;;  %v1994_v29 = vsel %vm1974_vm3, %v1957_v26, %v7975_v60 }
 0x124   : > { %v10450_v37 = vpop.permute.xlu1 %7982 }
 0x125   : > { %v10452_v41 = vpop.permute.xlu0 %7977  ;;  %v7984_v42 = vunpack.i.l.bf16 %v10450_v37 }
 0x126   : > { %8272 = vrot.lane.b32.xlu1 %v8271_v33, %s12670_s24  ;;  %v7980_v47 = vunpack.i.h.bf16 %v10452_v41  ;;  %v7979_v10 = vunpack.i.l.bf16 %v10452_v41  ;;  %v1991_v33 = vsel %vm1974_vm3, %v1954_v27, %v7969_v21  ;;  %v7985_v41 = vunpack.i.h.bf16 %v10450_v37  ;;  %v813_v27 = vld [vmem:[%s9693_s18 + $0x136] sm:$0xff] }
 0x127   : > { %8267 = vrot.lane.b32.xlu0 %v8266_v34, %s12671_s23  ;;  %v1992_v34 = vsel %vm1974_vm3, %v1955_v46, %v7970_v19  ;;  %v2030_v16 = vsel %vm2011_vm4, %v1993_v28, %v7984_v42  ;;  %v814_v46 = vld [vmem:[%s9693_s18 + $0x13e] sm:$0x3f] }
 0x128   : > { %v10465_v52 = vpop.permute.xlu1 %7992  ;;  %v2028_v39 = vsel %vm2011_vm4, %v1991_v33, %v7979_v10  ;;  %v2029_v38 = vsel %vm2011_vm4, %v1992_v34, %v7980_v47  ;;  %v2031_v12 = vsel %vm2011_vm4, %v1994_v29, %v7985_v41  ;;  %v9541_v29 = vmov 0.0   ;;  %v2529_v33 = vld [vmem:[%s12605_s5] sm:$0xff]  ;;  %v2532_v41 = vld [vmem:[%s12605_s5 + $0x18] sm:$0xff] }
 0x129   : > { %v10467_v58 = vpop.permute.xlu0 %7987  ;;  %v7995_v51 = vunpack.i.h.bf16 %v10465_v52  ;;  %v7994_v53 = vunpack.i.l.bf16 %v10465_v52  ;;  %v777_v52 = vld [vmem:[%s9693_s18 + $0x135] sm:$0xff]  ;;  %550 = vst.msk [vmem:[#allocation2] sm:$0xff] %vm549_vm2, %v9541_v29  ;;  %551 = vst.msk [vmem:[#allocation2 + $0x8] sm:$0xff] %vm549_vm2, %v9541_v29 }
 0x12a   : > { %8282 = vrot.lane.b32.xlu1 %v8281_v44, %s12664_s22  ;;  %v7990_v30 = vunpack.i.h.bf16 %v10467_v58  ;;  %v7989_v31 = vunpack.i.l.bf16 %v10467_v58  ;;  %v8331_v17 = vpack.i.bf16 %v778_v6, %v777_v52  ;;  %553 = vst.msk [vmem:[#allocation2 + $0x10] sm:$0x7] %vm552_vm10, %v9541_v29  ;;  %556 = vst.msk [vmem:[#allocation2 + $0x141] sm:$0x7] %vm552_vm10, %v9541_v29 }
 0x12b   : > { %8277 = vrot.lane.b32.xlu0 %v10332_v57, %s12664_s22  ;;  %v8316_v57 = vpack.i.bf16 %v10486_v1, %v10470_v55  ;;  %v2067_v60 = vsel %vm2048_vm5, %v2030_v16, %v7994_v53  ;;  %v2068_v50 = vsel %vm2048_vm5, %v2031_v12, %v7995_v51  ;;  %554 = vst.msk [vmem:[#allocation2 + $0x131] sm:$0xff] %vm549_vm2, %v9541_v29  ;;  %555 = vst.msk [vmem:[#allocation2 + $0x139] sm:$0xff] %vm549_vm2, %v9541_v29  ;;  %v579_v51 = vld [vmem:[%s9693_s18 + $0xb0] sm:$0xff]  ;;  %v580_v53 = vld [vmem:[%s9693_s18 + $0xb8] sm:$0xff] }
 0x12c   : > { %v10500_v4 = vpop.permute.xlu1 %8002  ;;  %v2065_v58 = vsel %vm2048_vm5, %v2028_v39, %v7989_v31  ;;  %v2066_v37 = vsel %vm2048_vm5, %v2029_v38, %v7990_v30  ;;  %v8341_v55 = vpack.i.bf16 %v814_v46, %v813_v27  ;;  %v2530_v31 = vld [vmem:[%s12605_s5 + $0x8] sm:$0xff] }
 0x12d   : > { %v7998_v14 = vpop.permute.xlu0 %7997 }
 0x12e   : > { %8292 = vrot.lane.b32.xlu1 %v8291_v49, %s12665_s19  ;;  %v8000_v35 = vunpack.i.h.bf16 %v7998_v14  ;;  %v7999_v36 = vunpack.i.l.bf16 %v7998_v14  ;;  %v8005_v49 = vunpack.i.h.bf16 %v10500_v4 }
 0x12f   : > { %8287 = vrot.lane.b32.xlu0 %v8286_v59, %s12665_s19  ;;  %v8004_v59 = vunpack.i.l.bf16 %v10500_v4  ;;  %v775_v4 = vld [vmem:[%s9693_s18 + $0x125] sm:$0xff] }
 0x130   : > { %v8013_v20 = vpop.permute.xlu1 %8012  ;;  %v2102_v62 = vsel %vm2085_vm6, %v2065_v58, %v7999_v36  ;;  %v2103_v63 = vsel %vm2085_vm6, %v2066_v37, %v8000_v35  ;;  %v2105_v19 = vsel %vm2085_vm6, %v2068_v50, %v8005_v49  ;;  %v2531_v35 = vld [vmem:[%s12605_s5 + $0x10] sm:$0xff]  ;;  %v2533_v49 = vld [vmem:[%s12605_s5 + $0x20] sm:$0xff] }
 0x131   : > { %v8008_v32 = vpop.permute.xlu0 %8007  ;;  %v8015_v7 = vunpack.i.h.bf16 %v8013_v20  ;;  %v8014_v8 = vunpack.i.l.bf16 %v8013_v20  ;;  %v2104_v18 = vsel %vm2085_vm6, %v2067_v60, %v8004_v59  ;;  %v577_v59 = vld [vmem:[%s9693_s18 + $0xa0] sm:$0xff] }
 0x132   : > { %8302 = vrot.lane.b32.xlu1 %v8301_v0, %s12666_s1  ;;  %v8010_v44 = vunpack.i.h.bf16 %v8008_v32  ;;  %v8009_v45 = vunpack.i.l.bf16 %v8008_v32 }
 0x133   : > { %8297 = vrot.lane.b32.xlu0 %v8296_v2, %s12666_s1  ;;  %v2141_v24 = vsel %vm2122_vm7, %v2104_v18, %v8014_v8  ;;  %v2142_v25 = vsel %vm2122_vm7, %v2105_v19, %v8015_v7 }
 0x134   : > { %v10538_v56 = vpop.permute.xlu1 %8022  ;;  %v2139_v9 = vsel %vm2122_vm7, %v2102_v62, %v8009_v45  ;;  %v2140_v23 = vsel %vm2122_vm7, %v2103_v63, %v8010_v44 }
 0x135   : > { %v8018_v61 = vpop.permute.xlu0 %8017  ;;  %v8025_v39 = vunpack.i.h.bf16 %v10538_v56  ;;  %v8024_v38 = vunpack.i.l.bf16 %v10538_v56 }
 0x136   : > { %v8020_v0 = vunpack.i.h.bf16 %v8018_v61  ;;  %v8019_v2 = vunpack.i.l.bf16 %v8018_v61  ;;  %8312 = vrot.lane.b32.xlu1 %v8311_v40, %s12667_s25  ;;  %v776_v40 = vld [vmem:[%s9693_s18 + $0x12d] sm:$0xff] }
 0x137   : > { %8307 = vrot.lane.b32.xlu0 %v10359_v54, %s12667_s25  ;;  %v8326_v26 = vpack.i.bf16 %v776_v40, %v775_v4  ;;  %v578_v61 = vld [vmem:[%s9693_s18 + $0xa8] sm:$0xff]  ;;  %v1922_v16 = vsel %vm1901_vm1, %v577_v59, %v8024_v38 }
 0x138   : > { %v2176_v13 = vsel %vm2159_vm8, %v2139_v9, %v8019_v2  ;;  %v2177_v43 = vsel %vm2159_vm8, %v2140_v23, %v8020_v0  ;;  %v10557_v11 = vpop.permute.xlu1 %8032  ;;  %v2534_v2 = vld [vmem:[%s12605_s5 + $0x28] sm:$0xff]  ;;  %v1923_v12 = vsel %vm1901_vm1, %v578_v61, %v8025_v39  ;;  %v2540_v61 = vld [vmem:[%s12605_s5 + $0x58] sm:$0xff] }
 0x139   : > { %v8028_v14 = vpop.permute.xlu0 %8027  ;;  %v2204_v54 = vpack.c.bf16 %v2177_v43, %v2176_v13  ;;  %v8035_v44 = vunpack.i.h.bf16 %v10557_v11  ;;  %v8034_v45 = vunpack.i.l.bf16 %v10557_v11  ;;  %v2535_v11 = vld [vmem:[%s12605_s5 + $0x30] sm:$0xff] }
 0x13a   : > { %v8030_v21 = vunpack.i.h.bf16 %v8028_v14  ;;  %v8029_v22 = vunpack.i.l.bf16 %v8028_v14  ;;  %8322 = vrot.lane.b32.xlu1 %v8321_v15, %s12668_s28  ;;  %v812_v15 = vld [vmem:[%s9693_s18 + $0x12e] sm:$0xff] }
 0x13b   : > { %8317 = vrot.lane.b32.xlu0 %v8316_v57, %s12668_s28  ;;  %7407 = vmatprep.mubr.msk.bf16.mxu0 %vm2257_vm9, %v2204_v54  ;;  %v8336_v1 = vpack.i.bf16 %v812_v15, %v811_v5  ;;  %v1924_v7 = vsel %vm1901_vm1, %v579_v51, %v8034_v45  ;;  %v1925_v8 = vsel %vm1901_vm1, %v580_v53, %v8035_v44  ;;  %v2536_v54 = vld [vmem:[%s12605_s5 + $0x38] sm:$0xff]  ;;  %v2537_v5 = vld [vmem:[%s12605_s5 + $0x40] sm:$0xff]  ;;  %v2539_v51 = vld [vmem:[%s12605_s5 + $0x50] sm:$0xff] }
 0x13c   : > { %v2178_v47 = vsel %vm2159_vm8, %v2141_v24, %v8029_v22  ;;  %v2179_v10 = vsel %vm2159_vm8, %v2142_v25, %v8030_v21  ;;  %v8043_v3 = vpop.permute.xlu1 %8042 }
 0x13d   : > { %v8038_v20 = vpop.permute.xlu0 %8037  ;;  %v2205_v28 = vpack.c.bf16 %v2179_v10, %v2178_v47  ;;  %v8045_v58 = vunpack.i.h.bf16 %v8043_v3  ;;  %v8044_v37 = vunpack.i.l.bf16 %v8043_v3 }
 0x13e   : > { %8332 = vrot.lane.b32.xlu1 %v8331_v17, %s12669_s0  ;;  %v8040_v62 = vunpack.i.h.bf16 %v8038_v20  ;;  %v8039_v63 = vunpack.i.l.bf16 %v8038_v20 }
 0x13f   : > { %8327 = vrot.lane.b32.xlu0 %v8326_v26, %s12669_s0  ;;  %7408 = vmatmul.mubr.msk.bf16.gmra.mxu0 %vm2257_vm9, %v2205_v28  ;;  %v1960_v13 = vsel %vm549_vm2, %v1924_v7, %v8044_v37  ;;  %v1961_v43 = vsel %vm549_vm2, %v1925_v8, %v8045_v58 }
 0x140   : > { %v8053_v57 = vpop.permute.xlu1 %8052  ;;  %v1958_v4 = vsel %vm549_vm2, %v1922_v16, %v8039_v63  ;;  %v1959_v40 = vsel %vm549_vm2, %v1923_v12, %v8040_v62 }
 0x141   : > { %v8048_v30 = vpop.permute.xlu0 %8047  ;;  %v8055_v56 = vunpack.i.h.bf16 %v8053_v57  ;;  %v8054_v52 = vunpack.i.l.bf16 %v8053_v57  ;;  %v2538_v57 = vld [vmem:[%s12605_s5 + $0x48] sm:$0xff] }
 0x142   : > { %8342 = vrot.lane.b32.xlu1 %v8341_v55, %s12671_s23  ;;  %v8050_v9 = vunpack.i.h.bf16 %v8048_v30  ;;  %v8049_v23 = vunpack.i.l.bf16 %v8048_v30 }
 0x143   : > { %8337 = vrot.lane.b32.xlu0 %v8336_v1, %s12671_s23  ;;  %v1997_v17 = vsel %vm1974_vm3, %v1960_v13, %v8054_v52  ;;  %v1998_v18 = vsel %vm1974_vm3, %v1961_v43, %v8055_v56  ;;  %v2542_v43 = vld [vmem:[%s12605_s5 + $0x68] sm:$0xff] }
 0x144   : > { %v10602_v32 = vpop.permute.xlu1 %8062  ;;  %v1995_v24 = vsel %vm1974_vm3, %v1958_v4, %v8049_v23  ;;  %v1996_v25 = vsel %vm1974_vm3, %v1959_v40, %v8050_v9  ;;  %v2541_v23 = vld [vmem:[%s12605_s5 + $0x60] sm:$0xff]  ;;  %v2543_v40 = vld [vmem:[%s12605_s5 + $0x70] sm:$0xff] }
 0x145   : > { %v10607_v34 = vpop.permute.xlu0 %8057  ;;  %v8065_v46 = vunpack.i.h.bf16 %v10602_v32  ;;  %v8064_v47 = vunpack.i.l.bf16 %v10602_v32 }
 0x146   : > { %2572 = vperm.xlu1 %8347, %v2530_v31   ;;  %v8060_v60 = vunpack.i.h.bf16 %v10607_v34  ;;  %v8059_v50 = vunpack.i.l.bf16 %v10607_v34 }
 0x147   : > { %2567 = vperm.xlu0 %8346, %v2529_v33   ;;  %v2034_v53 = vsel %vm2011_vm4, %v1997_v17, %v8064_v47  ;;  %v2035_v58 = vsel %vm2011_vm4, %v1998_v18, %v8065_v46  ;;  %v2546_v18 = vld [vmem:[%s12605_s5 + $0x88] sm:$0xff] }
 0x148   : > { %v10612_v36 = vpop.permute.xlu1 %8072  ;;  %v2032_v15 = vsel %vm2011_vm4, %v1995_v24, %v8059_v50  ;;  %v2033_v20 = vsel %vm2011_vm4, %v1996_v25, %v8060_v60  ;;  %v2544_v50 = vld [vmem:[%s12605_s5 + $0x78] sm:$0xff] }
 0x149   : > { %v10617_v42 = vpop.permute.xlu0 %8067  ;;  %v8075_v28 = vunpack.i.h.bf16 %v10612_v36  ;;  %v8074_v55 = vunpack.i.l.bf16 %v10612_v36  ;;  %v2548_v24 = vld [vmem:[%s12605_s5 + $0x98] sm:$0xff] }
 0x14a   : > { %2577 = vperm.xlu1 %8347, %v2531_v35   ;;  %v8070_v19 = vunpack.i.h.bf16 %v10617_v42  ;;  %v8069_v21 = vunpack.i.l.bf16 %v10617_v42 }
 0x14b   : > { %2582 = vperm.xlu0 %8346, %v2532_v41   ;;  %v2071_v62 = vsel %vm2048_vm5, %v2034_v53, %v8074_v55  ;;  %v2072_v63 = vsel %vm2048_vm5, %v2035_v58, %v8075_v28  ;;  %v581_v28 = vld [vmem:[%s9693_s18 + $0xc0] sm:$0xff]  ;;  %v582_v55 = vld [vmem:[%s9693_s18 + $0xc8] sm:$0xff] }
 0x14c   : > { %v10630_v0 = vpop.permute.xlu1 %8082  ;;  %v2069_v30 = vsel %vm2048_vm5, %v2032_v15, %v8069_v21  ;;  %v2070_v31 = vsel %vm2048_vm5, %v2033_v20, %v8070_v19  ;;  %v2547_v21 = vld [vmem:[%s12605_s5 + $0x90] sm:$0xff]  ;;  %v2549_v20 = vld [vmem:[%s12605_s5 + $0xa0] sm:$0xff] }
 0x14d   : > { %v8078_v6 = vpop.permute.xlu0 %8077  ;;  %v8085_v32 = vunpack.i.h.bf16 %v10630_v0  ;;  %v8084_v33 = vunpack.i.l.bf16 %v10630_v0 }
 0x14e   : > { %2587 = vperm.xlu1 %8347, %v2533_v49   ;;  %v8080_v26 = vunpack.i.h.bf16 %v8078_v6  ;;  %v8079_v27 = vunpack.i.l.bf16 %v8078_v6 }
 0x14f   : > { %2592 = vperm.xlu0 %8346, %v2534_v2   ;;  %v2108_v56 = vsel %vm2085_vm6, %v2071_v62, %v8084_v33  ;;  %v2109_v52 = vsel %vm2085_vm6, %v2072_v63, %v8085_v32  ;;  %v2550_v32 = vld [vmem:[%s12605_s5 + $0xa8] sm:$0xff] }
 0x150   : > { %v8093_v14 = vpop.permute.xlu1 %8092  ;;  %v2106_v35 = vsel %vm2085_vm6, %v2069_v30, %v8079_v27  ;;  %v2107_v41 = vsel %vm2085_vm6, %v2070_v31, %v8080_v26 }
 0x151   : > { %v8088_v22 = vpop.permute.xlu0 %8087  ;;  %v8095_v44 = vunpack.i.h.bf16 %v8093_v14  ;;  %v8094_v45 = vunpack.i.l.bf16 %v8093_v14 }
 0x152   : > { %2597 = vperm.xlu1 %8347, %v2535_v11   ;;  %v8090_v10 = vunpack.i.h.bf16 %v8088_v22  ;;  %v8089_v3 = vunpack.i.l.bf16 %v8088_v22 }
 0x153   : > { %2602 = vperm.xlu0 %8346, %v2536_v54   ;;  %v2145_v8 = vsel %vm2122_vm7, %v2108_v56, %v8094_v45  ;;  %v2146_v9 = vsel %vm2122_vm7, %v2109_v52, %v8095_v44  ;;  %v2545_v54 = vld [vmem:[%s12605_s5 + $0x80] sm:$0xff] }
 0x154   : > { %v10666_v1 = vpop.permute.xlu1 %8102  ;;  %v2143_v39 = vsel %vm2122_vm7, %v2106_v35, %v8089_v3  ;;  %v2144_v38 = vsel %vm2122_vm7, %v2107_v41, %v8090_v10  ;;  %v583_v10 = vld [vmem:[%s9693_s18 + $0xd0] sm:$0xff]  ;;  %v584_v3 = vld [vmem:[%s9693_s18 + $0xd8] sm:$0xff] }
 0x155   : > { %v8098_v34 = vpop.permute.xlu0 %8097  ;;  %v8105_v46 = vunpack.i.h.bf16 %v10666_v1  ;;  %v8104_v47 = vunpack.i.l.bf16 %v10666_v1 }
 0x156   : > { %v8100_v36 = vunpack.i.h.bf16 %v8098_v34  ;;  %v8099_v42 = vunpack.i.l.bf16 %v8098_v34  ;;  %2607 = vperm.xlu1 %8347, %v2537_v5  }
 0x157   : > { %2612 = vperm.xlu0 %8346, %v2538_v57   ;;  %v1926_v44 = vsel %vm1901_vm1, %v581_v28, %v8104_v47  ;;  %v1927_v45 = vsel %vm1901_vm1, %v582_v55, %v8105_v46  ;;  %v2556_v55 = vld [vmem:[%s12605_s5 + $0xd8] sm:$0xff] }
 0x158   : > { %v2180_v37 = vsel %vm2159_vm8, %v2143_v39, %v8099_v42  ;;  %v2181_v49 = vsel %vm2159_vm8, %v2144_v38, %v8100_v36  ;;  %v10686_v59 = vpop.permute.xlu1 %8112 }
 0x159   : > { %v8108_v0 = vpop.permute.xlu0 %8107  ;;  %v2206_v2 = vpack.c.bf16 %v2181_v49, %v2180_v37  ;;  %v8115_v26 = vunpack.i.h.bf16 %v10686_v59  ;;  %v8114_v27 = vunpack.i.l.bf16 %v10686_v59 }
 0x15a   : > { %v8110_v6 = vunpack.i.h.bf16 %v8108_v0  ;;  %v8109_v7 = vunpack.i.l.bf16 %v8108_v0  ;;  %2617 = vperm.xlu1 %8347, %v2539_v51   ;;  %v2551_v51 = vld [vmem:[%s12605_s5 + $0xb0] sm:$0xff] }
 0x15b   : > { %2622 = vperm.xlu0 %8346, %v2540_v61   ;;  %7411 = vmatprep.mubr.msk.bf16.mxu0 %vm2257_vm9, %v2206_v2  ;;  %v1928_v35 = vsel %vm1901_vm1, %v583_v10, %v8114_v27  ;;  %v1929_v41 = vsel %vm1901_vm1, %v584_v3, %v8115_v26  ;;  %v2552_v61 = vld [vmem:[%s12605_s5 + $0xb8] sm:$0xff]  ;;  %v2555_v10 = vld [vmem:[%s12605_s5 + $0xd0] sm:$0xff] }
 0x15c   : > { %v2182_v16 = vsel %vm2159_vm8, %v2145_v8, %v8109_v7  ;;  %v2183_v12 = vsel %vm2159_vm8, %v2146_v9, %v8110_v6  ;;  %v8123_v13 = vpop.permute.xlu1 %8122 }
 0x15d   : > { %v8118_v11 = vpop.permute.xlu0 %8117  ;;  %v2207_v4 = vpack.c.bf16 %v2183_v12, %v2182_v16  ;;  %v8125_v5 = vunpack.i.h.bf16 %v8123_v13  ;;  %v8124_v15 = vunpack.i.l.bf16 %v8123_v13  ;;  %v2553_v13 = vld [vmem:[%s12605_s5 + $0xc0] sm:$0xff] }
 0x15e   : > { %2627 = vperm.xlu1 %8347, %v2541_v23   ;;  %v8120_v57 = vunpack.i.h.bf16 %v8118_v11  ;;  %v8119_v30 = vunpack.i.l.bf16 %v8118_v11 }
 0x15f   : > { %2632 = vperm.xlu0 %8346, %v2542_v43   ;;  %7412 = vmatmul.mubr.msk.bf16.gmra.mxu0 %vm2257_vm9, %v2207_v4  ;;  %v1964_v39 = vsel %vm549_vm2, %v1928_v35, %v8124_v15  ;;  %v1965_v38 = vsel %vm549_vm2, %v1929_v41, %v8125_v5 }
 0x160   : > { %v8133_v60 = vpop.permute.xlu1 %8132  ;;  %v1962_v53 = vsel %vm549_vm2, %v1926_v44, %v8119_v30  ;;  %v1963_v58 = vsel %vm549_vm2, %v1927_v45, %v8120_v57 }
 0x161   : > { %v8128_v14 = vpop.permute.xlu0 %8127  ;;  %v8135_v1 = vunpack.i.h.bf16 %v8133_v60  ;;  %v8134_v33 = vunpack.i.l.bf16 %v8133_v60 }
 0x162   : > { %2637 = vperm.xlu1 %8347, %v2543_v40   ;;  %v8130_v36 = vunpack.i.h.bf16 %v8128_v14  ;;  %v8129_v42 = vunpack.i.l.bf16 %v8128_v14 }
 0x163   : > { %2642 = vperm.xlu0 %8346, %v2544_v50   ;;  %v2001_v62 = vsel %vm1974_vm3, %v1964_v39, %v8134_v33  ;;  %v2002_v63 = vsel %vm1974_vm3, %v1965_v38, %v8135_v1  ;;  %v2554_v50 = vld [vmem:[%s12605_s5 + $0xc8] sm:$0xff] }
 0x164   : > { %v10716_v17 = vpop.permute.xlu1 %8142  ;;  %v1999_v52 = vsel %vm1974_vm3, %v1962_v53, %v8129_v42  ;;  %v2000_v6 = vsel %vm1974_vm3, %v1963_v58, %v8130_v36  ;;  %v2557_v42 = vld [vmem:[%s12605_s5 + $0xe0] sm:$0xff]  ;;  %v2558_v38 = vld [vmem:[%s12605_s5 + $0xe8] sm:$0xff]  ;;  %v2559_v58 = vld [vmem:[%s12605_s5 + $0xf0] sm:$0xff] }
 0x165   : > { %v10721_v19 = vpop.permute.xlu0 %8137  ;;  %v8145_v9 = vunpack.i.h.bf16 %v10716_v17  ;;  %v8144_v23 = vunpack.i.l.bf16 %v10716_v17 }
 0x166   : > { %2647 = vperm.xlu1 %8347, %v2545_v54   ;;  %v8140_v37 = vunpack.i.h.bf16 %v10721_v19  ;;  %v8139_v49 = vunpack.i.l.bf16 %v10721_v19 }
 0x167   : > { %2652 = vperm.xlu0 %8346, %v2546_v18   ;;  %v2038_v3 = vsel %vm2011_vm4, %v2001_v62, %v8144_v23  ;;  %v2039_v5 = vsel %vm2011_vm4, %v2002_v63, %v8145_v9  ;;  %v2562_v63 = vld [vmem:[%s12605_s5 + $0x108] sm:$0xff] }
 0x168   : > { %v10726_v22 = vpop.permute.xlu1 %8152  ;;  %v2036_v43 = vsel %vm2011_vm4, %v1999_v52, %v8139_v49  ;;  %v2037_v11 = vsel %vm2011_vm4, %v2000_v6, %v8140_v37  ;;  %v2560_v49 = vld [vmem:[%s12605_s5 + $0xf8] sm:$0xff]  ;;  %v2855_v52 = vld [vmem:[#allocation2 + $0x9] sm:$0xff] }
 0x169   : > { %v10731_v25 = vpop.permute.xlu0 %8147  ;;  %v8155_v4 = vunpack.i.h.bf16 %v10726_v22  ;;  %v8154_v40 = vunpack.i.l.bf16 %v10726_v22 }
 0x16a   : > { %2657 = vperm.xlu1 %8347, %v2547_v21   ;;  %v8150_v0 = vunpack.i.h.bf16 %v10731_v25  ;;  %v8149_v2 = vunpack.i.l.bf16 %v10731_v25 }
 0x16b   : > { %2662 = vperm.xlu0 %8346, %v2548_v24   ;;  %v2075_v57 = vsel %vm2048_vm5, %v2038_v3, %v8154_v40  ;;  %v2076_v30 = vsel %vm2048_vm5, %v2039_v5, %v8155_v4  ;;  %v587_v4 = vld [vmem:[%s9693_s18 + $0xf0] sm:$0xff]  ;;  %v588_v40 = vld [vmem:[%s9693_s18 + $0xf8] sm:$0xff] }
 0x16c   : > { %v10744_v31 = vpop.permute.xlu1 %8162  ;;  %v2073_v14 = vsel %vm2048_vm5, %v2036_v43, %v8149_v2  ;;  %v2074_v54 = vsel %vm2048_vm5, %v2037_v11, %v8150_v0  ;;  %v2563_v2 = vld [vmem:[%s12605_s5 + $0x110] sm:$0xff] }
 0x16d   : > { %v8158_v34 = vpop.permute.xlu0 %8157  ;;  %v8165_v17 = vunpack.i.h.bf16 %v10744_v31  ;;  %v8164_v18 = vunpack.i.l.bf16 %v10744_v31 }
 0x16e   : > { %2667 = vperm.xlu1 %8347, %v2549_v20   ;;  %v8160_v7 = vunpack.i.h.bf16 %v8158_v34  ;;  %v8159_v8 = vunpack.i.l.bf16 %v8158_v34 }
 0x16f   : > { %2672 = vperm.xlu0 %8346, %v2550_v32   ;;  %v2112_v1 = vsel %vm2085_vm6, %v2075_v57, %v8164_v18  ;;  %v2113_v33 = vsel %vm2085_vm6, %v2076_v30, %v8165_v17  ;;  %v586_v17 = vld [vmem:[%s9693_s18 + $0xe8] sm:$0xff] }
 0x170   : > { %v8173_v59 = vpop.permute.xlu1 %8172  ;;  %v2110_v21 = vsel %vm2085_vm6, %v2073_v14, %v8159_v8  ;;  %v2111_v24 = vsel %vm2085_vm6, %v2074_v54, %v8160_v7  ;;  %v2564_v7 = vld [vmem:[%s12605_s5 + $0x118] sm:$0x3f]  ;;  %v585_v54 = vld [vmem:[%s9693_s18 + $0xe0] sm:$0xff] }
 0x171   : > { %v8168_v56 = vpop.permute.xlu0 %8167  ;;  %v8175_v26 = vunpack.i.h.bf16 %v8173_v59  ;;  %v8174_v27 = vunpack.i.l.bf16 %v8173_v59 }
 0x172   : > { %2677 = vperm.xlu1 %8347, %v2551_v51   ;;  %v8170_v16 = vunpack.i.h.bf16 %v8168_v56  ;;  %v8169_v12 = vunpack.i.l.bf16 %v8168_v56  ;;  %v2854_v56 = vld [vmem:[#allocation2 + $0x1] sm:$0xff] }
 0x173   : > { %2682 = vperm.xlu0 %8346, %v2552_v61   ;;  %v2149_v41 = vsel %vm2122_vm7, %v2112_v1, %v8174_v27  ;;  %v2150_v36 = vsel %vm2122_vm7, %v2113_v33, %v8175_v26  ;;  %v2561_v61 = vld [vmem:[%s12605_s5 + $0x100] sm:$0xff] }
 0x174   : > { %v10780_v60 = vpop.permute.xlu1 %8182  ;;  %v2147_v46 = vsel %vm2122_vm7, %v2110_v21, %v8169_v12  ;;  %v2148_v47 = vsel %vm2122_vm7, %v2111_v24, %v8170_v16  ;;  %v8348_v16 = vpack.i.bf16 %v2855_v52, %v2854_v56  ;;  %v2890_v12 = vld [vmem:[#allocation2 + $0x2] sm:$0xff] }
 0x175   : > { %v8178_v19 = vpop.permute.xlu0 %8177  ;;  %v8185_v43 = vunpack.i.h.bf16 %v10780_v60  ;;  %v8184_v11 = vunpack.i.l.bf16 %v10780_v60 }
 0x176   : > { %v8180_v22 = vunpack.i.h.bf16 %v8178_v19  ;;  %v8179_v25 = vunpack.i.l.bf16 %v8178_v19  ;;  %2687 = vperm.xlu1 %8347, %v2553_v13   ;;  %v2891_v13 = vld [vmem:[#allocation2 + $0xa] sm:$0xff] }
 0x177   : > { %2692 = vperm.xlu0 %8346, %v2554_v50   ;;  %v8358_v26 = vpack.i.bf16 %v2891_v13, %v2890_v12  ;;  %v1931_v3 = vsel %vm1901_vm1, %v586_v17, %v8185_v43 }
 0x178   : > { %v2184_v15 = vsel %vm2159_vm8, %v2147_v46, %v8179_v25  ;;  %v2185_v20 = vsel %vm2159_vm8, %v2148_v47, %v8180_v22  ;;  %v10800_v28 = vpop.permute.xlu1 %8192 }
 0x179   : > { %v8188_v31 = vpop.permute.xlu0 %8187  ;;  %v2208_v32 = vpack.c.bf16 %v2185_v20, %v2184_v15  ;;  %v8195_v9 = vunpack.i.h.bf16 %v10800_v28  ;;  %v8194_v23 = vunpack.i.l.bf16 %v10800_v28 }
 0x17a   : > { %v8190_v34 = vunpack.i.h.bf16 %v8188_v31  ;;  %v8189_v35 = vunpack.i.l.bf16 %v8188_v31  ;;  %2697 = vperm.xlu1 %8347, %v2555_v10   ;;  %v1930_v10 = vsel %vm1901_vm1, %v585_v54, %v8184_v11 }
 0x17b   : > { %2702 = vperm.xlu0 %8346, %v2556_v55   ;;  %7415 = vmatprep.mubr.msk.bf16.mxu0 %vm2257_vm9, %v2208_v32  ;;  %v1932_v27 = vsel %vm1901_vm1, %v587_v4, %v8194_v23  ;;  %v1933_v46 = vsel %vm1901_vm1, %v588_v40, %v8195_v9 }
 0x17c   : > { %v2186_v44 = vsel %vm2159_vm8, %v2149_v41, %v8189_v35  ;;  %v2187_v45 = vsel %vm2159_vm8, %v2150_v36, %v8190_v34  ;;  %v8203_v39 = vpop.permute.xlu1 %8202 }
 0x17d   : > { %v8198_v51 = vpop.permute.xlu0 %8197  ;;  %v2209_v53 = vpack.c.bf16 %v2187_v45, %v2186_v44  ;;  %v8205_v50 = vunpack.i.h.bf16 %v8203_v39  ;;  %v8204_v14 = vunpack.i.l.bf16 %v8203_v39 }
 0x17e   : > { %2707 = vperm.xlu1 %8347, %v2557_v42   ;;  %v8200_v18 = vunpack.i.h.bf16 %v8198_v51  ;;  %v8199_v19 = vunpack.i.l.bf16 %v8198_v51 }
 0x17f   : > { %2712 = vperm.xlu0 %8346, %v2558_v38   ;;  %7416 = vmatmul.mubr.msk.bf16.gmra.mxu0 %vm2257_vm9, %v2209_v53  ;;  %v1968_v5 = vsel %vm549_vm2, %v1932_v27, %v8204_v14  ;;  %v1969_v15 = vsel %vm549_vm2, %v1933_v46, %v8205_v50 }
 0x180   : > { %v8213_v37 = vpop.permute.xlu1 %8212  ;;  %v1966_v20 = vsel %vm549_vm2, %v1930_v10, %v8199_v19  ;;  %v1967_v28 = vsel %vm549_vm2, %v1931_v3, %v8200_v18  ;;  %v10897_v10 = vpop.f32.mrf.mxu0 }
 0x181   : > { %v8208_v59 = vpop.permute.xlu0 %8207  ;;  %v8215_v24 = vunpack.i.h.bf16 %v8213_v37  ;;  %v8214_v22 = vunpack.i.l.bf16 %v8213_v37 }
 0x182   : > { %2717 = vperm.xlu1 %8347, %v2559_v58   ;;  %v8210_v60 = vunpack.i.h.bf16 %v8208_v59  ;;  %v8209_v47 = vunpack.i.l.bf16 %v8208_v59 }
 0x183   : > { %2722 = vperm.xlu0 %8346, %v2560_v49   ;;  %v2005_v31 = vsel %vm1974_vm3, %v1968_v5, %v8214_v22  ;;  %v2006_v32 = vsel %vm1974_vm3, %v1969_v15, %v8215_v24  ;;  %v10899_v15 = vpop.f32.mrf.mxu0 }
 0x184   : > { %v10830_v62 = vpop.permute.xlu1 %8222  ;;  %v2003_v35 = vsel %vm1974_vm3, %v1966_v20, %v8209_v47  ;;  %v2004_v41 = vsel %vm1974_vm3, %v1967_v28, %v8210_v60 }
 0x185   : > { %v8218_v0 = vpop.permute.xlu0 %8217  ;;  %v8225_v44 = vunpack.i.h.bf16 %v10830_v62  ;;  %v8224_v45 = vunpack.i.l.bf16 %v10830_v62 }
 0x186   : > { %2727 = vperm.xlu1 %8347, %v2561_v61   ;;  %v8220_v55 = vunpack.i.h.bf16 %v8218_v0  ;;  %v8219_v57 = vunpack.i.l.bf16 %v8218_v0 }
 0x187   : > { %2732 = vperm.xlu0 %8346, %v2562_v63   ;;  %v2043_v12 = vsel %vm2011_vm4, %v2006_v32, %v8225_v44 }
 0x188   : > { %v10838_v6 = vpop.permute.xlu1 %8232  ;;  %v2040_v51 = vsel %vm2011_vm4, %v2003_v35, %v8219_v57  ;;  %v2041_v53 = vsel %vm2011_vm4, %v2004_v41, %v8220_v55  ;;  %v590_v35 = vld [vmem:[%s9693_s18 + $0x108] sm:$0xff] }
 0x189   : > { %v8228_v8 = vpop.permute.xlu0 %8227  ;;  %v8235_v58 = vunpack.i.h.bf16 %v10838_v6  ;;  %v8234_v37 = vunpack.i.l.bf16 %v10838_v6 }
 0x18a   : > { %2737 = vperm.xlu1 %8347, %v2563_v2   ;;  %v8230_v1 = vunpack.i.h.bf16 %v8228_v8  ;;  %v8229_v33 = vunpack.i.l.bf16 %v8228_v8 }
 0x18b   : > { %2742 = vperm.xlu0 %8346, %v2564_v7   ;;  %v2080_v40 = vsel %vm2048_vm5, %v2043_v12, %v8235_v58 }
 0x18c   : > { %v10851_v21 = vpop.permute.xlu1 %8242  ;;  %v2077_v59 = vsel %vm2048_vm5, %v2040_v51, %v8229_v33  ;;  %v2078_v61 = vsel %vm2048_vm5, %v2041_v53, %v8230_v1 }
 0x18d   : > { %v8238_v25 = vpop.permute.xlu0 %8237  ;;  %v8245_v63 = vunpack.i.h.bf16 %v10851_v21  ;;  %v8244_v62 = vunpack.i.l.bf16 %v10851_v21 }
 0x18e   : > { %8349 = vrot.lane.b32.xlu1 %v8348_v16, %s12670_s24  ;;  %v8240_v36 = vunpack.i.h.bf16 %v8238_v25  ;;  %v8239_v42 = vunpack.i.l.bf16 %v8238_v25  ;;  %v2042_v16 = vsel %vm2011_vm4, %v2005_v31, %v8224_v45  ;;  %v592_v31 = vld [vmem:[%s9693_s18 + $0x118] sm:$0x3f] }
 0x18f   : > { %v2079_v4 = vsel %vm2048_vm5, %v2042_v16, %v8234_v37  ;;  %v2117_v17 = vsel %vm2085_vm6, %v2080_v40, %v8245_v63 }
 0x190   : > { %v8253_v30 = vpop.permute.xlu1 %8252  ;;  %v2114_v2 = vsel %vm2085_vm6, %v2077_v59, %v8239_v42  ;;  %v2115_v56 = vsel %vm2085_vm6, %v2078_v61, %v8240_v36  ;;  %v2116_v54 = vsel %vm2085_vm6, %v2079_v4, %v8244_v62 }
 0x191   : > { %v8248_v34 = vpop.permute.xlu0 %8247  ;;  %v8255_v8 = vunpack.i.h.bf16 %v8253_v30  ;;  %v8254_v9 = vunpack.i.l.bf16 %v8253_v30  ;;  %v591_v30 = vld [vmem:[%s9693_s18 + $0x110] sm:$0xff] }
 0x192   : > { %8359 = vrot.lane.b32.xlu1 %v8358_v26, %s12664_s22  ;;  %v8250_v39 = vunpack.i.h.bf16 %v8248_v34  ;;  %v8249_v38 = vunpack.i.l.bf16 %v8248_v34  ;;  %v589_v34 = vld [vmem:[%s9693_s18 + $0x100] sm:$0xff]  ;;  %s9544_s18 = smov 96  }
 0x193   : > { %v2153_v21 = vsel %vm2122_vm7, %v2116_v54, %v8254_v9  ;;  %v2154_v24 = vsel %vm2122_vm7, %v2117_v17, %v8255_v8 }
 0x194   : > { %v10873_v49 = vpop.permute.xlu1 %8262  ;;  %v2151_v6 = vsel %vm2122_vm7, %v2114_v2, %v8249_v38  ;;  %v2152_v23 = vsel %vm2122_vm7, %v2115_v56, %v8250_v39  ;;  %v10907_v39 = vpop.f32.mrf.mxu0 }
 0x195   : > { %v8258_v0 = vpop.permute.xlu0 %8257  ;;  %v8265_v55 = vunpack.i.h.bf16 %v10873_v49  ;;  %v8264_v57 = vunpack.i.l.bf16 %v10873_v49 }
 0x196   : > { %v8260_v52 = vunpack.i.h.bf16 %v8258_v0  ;;  %v8259_v7 = vunpack.i.l.bf16 %v8258_v0 }
 0x197   : > { %v1934_v37 = vsel %vm1901_vm1, %v589_v34, %v8264_v57  ;;  %v1935_v49 = vsel %vm1901_vm1, %v590_v35, %v8265_v55 }
 0x198   : > { %v2188_v13 = vsel %vm2159_vm8, %v2151_v6, %v8259_v7  ;;  %v2189_v43 = vsel %vm2159_vm8, %v2152_v23, %v8260_v52  ;;  %v8273_v11 = vpop.permute.xlu1 %8272  ;;  %v2353_v23 = vpop.f32.mrf.mxu0 }
 0x199   : > { %v8268_v50 = vpop.permute.xlu0 %8267  ;;  %v2210_v14 = vpack.c.bf16 %v2189_v43, %v2188_v13  ;;  %v8275_v20 = vunpack.i.h.bf16 %v8273_v11  ;;  %v8274_v28 = vunpack.i.l.bf16 %v8273_v11 }
 0x19a   : > { %v8270_v18 = vunpack.i.h.bf16 %v8268_v50  ;;  %v8269_v19 = vunpack.i.l.bf16 %v8268_v50 }
 0x19b   : > { %7419 = vmatprep.mubr.msk.bf16.mxu0 %vm2257_vm9, %v2210_v14  ;;  %v1936_v38 = vsel %vm1901_vm1, %v591_v30, %v8274_v28  ;;  %v1937_v51 = vsel %vm1901_vm1, %v592_v31, %v8275_v20 }
 0x19c   : > { %v2190_v22 = vsel %vm2159_vm8, %v2153_v21, %v8269_v19  ;;  %v2191_v25 = vsel %vm2159_vm8, %v2154_v24, %v8270_v18  ;;  %v8283_v26 = vpop.permute.xlu1 %8282 }
 0x19d   : > { %v8278_v27 = vpop.permute.xlu0 %8277  ;;  %v2211_v46 = vpack.c.bf16 %v2191_v25, %v2190_v22  ;;  %v8285_v32 = vunpack.i.h.bf16 %v8283_v26  ;;  %v8284_v1 = vunpack.i.l.bf16 %v8283_v26 }
 0x19e   : > { %v8280_v41 = vunpack.i.h.bf16 %v8278_v27  ;;  %v8279_v36 = vunpack.i.l.bf16 %v8278_v27 }
 0x19f   : > { %7420 = vmatmul.mubr.msk.bf16.gmra.mxu0 %vm2257_vm9, %v2211_v46  ;;  %v1972_v59 = vsel %vm549_vm2, %v1936_v38, %v8284_v1  ;;  %v1973_v61 = vsel %vm549_vm2, %v1937_v51, %v8285_v32  ;;  %v10921_v54 = vpop.f32.mrf.mxu0 }
 0x1a0   : > { %v8293_v60 = vpop.permute.xlu1 %8292  ;;  %v1970_v62 = vsel %vm549_vm2, %v1934_v37, %v8279_v36  ;;  %v1971_v0 = vsel %vm549_vm2, %v1935_v49, %v8280_v41  ;;  %v10943_v49 = vld [vmem:[#allocation2] sm:$0xff] }
 0x1a1   : > { %v8288_v47 = vpop.permute.xlu0 %8287  ;;  %v8295_v44 = vunpack.i.h.bf16 %v8293_v60  ;;  %v8294_v45 = vunpack.i.l.bf16 %v8293_v60  ;;  %v2366_v30 = vpop.f32.mrf.mxu0  ;;  %5374 = vst.msk [vmem:[#allocation2] sm:$0xff] %vm549_vm2, %v9541_v29 }
 0x1a2   : > { %v8290_v53 = vunpack.i.h.bf16 %v8288_v47  ;;  %v8289_v58 = vunpack.i.l.bf16 %v8288_v47 }
 0x1a3   : > { %v2009_v7 = vsel %vm1974_vm3, %v1972_v59, %v8294_v45  ;;  %v2010_v8 = vsel %vm1974_vm3, %v1973_v61, %v8295_v44  ;;  %v10945_v59 = vld [vmem:[#allocation2 + $0x8] sm:$0xff]  ;;  %v7398_v61 = vpop.f32.mrf.mxu0 }
 0x1a4   : > { %v8303_v3 = vpop.permute.xlu1 %8302  ;;  %v2007_v16 = vsel %vm1974_vm3, %v1970_v62, %v8289_v58  ;;  %v2008_v12 = vsel %vm1974_vm3, %v1971_v0, %v8290_v53  ;;  %5375 = vst.msk [vmem:[#allocation2 + $0x8] sm:$0x7] %vm552_vm10, %v9541_v29  ;;  %v10954_v62 = vld [vmem:[%s12672_s2] ss:$0 sm:$0xff] }
 0x1a5   : > { %v8298_v5 = vpop.permute.xlu0 %8297  ;;  %v8305_v2 = vunpack.i.h.bf16 %v8303_v3  ;;  %v8304_v56 = vunpack.i.l.bf16 %v8303_v3  ;;  %v2354_v0 = vadd.f32 %v10954_v62, %v2353_v23 }
 0x1a6   : > { %v8300_v9 = vunpack.i.h.bf16 %v8298_v5  ;;  %v8299_v6 = vunpack.i.l.bf16 %v8298_v5 }
 0x1a7   : > { %v2046_v17 = vsel %vm2011_vm4, %v2009_v7, %v8304_v56  ;;  %v2047_v18 = vsel %vm2011_vm4, %v2010_v8, %v8305_v2  ;;  %v2351_v2 = vadd.f32 %v10954_v62, %v10899_v15  ;;  %v2369_v56 = vpop.f32.mrf.mxu0  ;;  %v2359_v7 = vadd.f32 %v10897_v10, %v10954_v62 }
 0x1a8   : > { %v8313_v33 = vpop.permute.xlu1 %8312  ;;  %v2044_v22 = vsel %vm2011_vm4, %v2007_v16, %v8299_v6  ;;  %v2045_v25 = vsel %vm2011_vm4, %v2008_v12, %v8300_v9  ;;  %v2494_v8 = vmax.f32 %v2354_v0, 0.0  ;;  %v2362_v6 = vadd.f32 %v10907_v39, %v10954_v62 }
 0x1a9   : > { %v8308_v42 = vpop.permute.xlu0 %8307  ;;  %v8315_v13 = vunpack.i.h.bf16 %v8313_v33  ;;  %v8314_v43 = vunpack.i.l.bf16 %v8313_v33  ;;  %v2493_v9 = vmax.f32 %v2351_v2, 0.0 }
 0x1aa   : > { %v8310_v11 = vunpack.i.h.bf16 %v8308_v42  ;;  %v8309_v4 = vunpack.i.l.bf16 %v8308_v42  ;;  %v2496_v15 = vmax.f32 %v2362_v6, 0.0 }
 0x1ab   : > { %v2083_v46 = vsel %vm2048_vm5, %v2046_v17, %v8314_v43  ;;  %v2084_v60 = vsel %vm2048_vm5, %v2047_v18, %v8315_v13  ;;  %v2375_v18 = vadd.f32 %v10921_v54, %v10954_v62 }
 0x1ac   : > { %v8323_v63 = vpop.permute.xlu1 %8322  ;;  %v2081_v5 = vsel %vm2048_vm5, %v2044_v22, %v8309_v4  ;;  %v2082_v20 = vsel %vm2048_vm5, %v2045_v25, %v8310_v11  ;;  %v2495_v11 = vmax.f32 %v2359_v7, 0.0  ;;  %v2367_v4 = vadd.f32 %v10954_v62, %v2366_v30 }
 0x1ad   : > { %v8318_v52 = vpop.permute.xlu0 %8317  ;;  %v8325_v40 = vunpack.i.h.bf16 %v8323_v63  ;;  %v8324_v50 = vunpack.i.l.bf16 %v8323_v63 }
 0x1ae   : > { %v8320_v19 = vunpack.i.h.bf16 %v8318_v52  ;;  %v8319_v21 = vunpack.i.l.bf16 %v8318_v52 }
 0x1af   : > { %v2120_v28 = vsel %vm2085_vm6, %v2083_v46, %v8324_v50  ;;  %v2121_v55 = vsel %vm2085_vm6, %v2084_v60, %v8325_v40  ;;  %v2370_v40 = vadd.f32 %v10954_v62, %v2369_v56  ;;  %v2499_v60 = vmax.f32 %v2375_v18, 0.0 }
 0x1b0   : > { %v8333_v14 = vpop.permute.xlu1 %8332  ;;  %v2118_v31 = vsel %vm2085_vm6, %v2081_v5, %v8319_v21  ;;  %v2119_v32 = vsel %vm2085_vm6, %v2082_v20, %v8320_v19  ;;  %v2497_v19 = vmax.f32 %v2367_v4, 0.0  ;;  %v2378_v21 = vadd.f32 %v7398_v61, %v10954_v62 }
 0x1b1   : > { %v8328_v24 = vpop.permute.xlu0 %8327  ;;  %v8335_v26 = vunpack.i.h.bf16 %v8333_v14  ;;  %v8334_v27 = vunpack.i.l.bf16 %v8333_v14 }
 0x1b2   : > { %v8330_v47 = vunpack.i.h.bf16 %v8328_v24  ;;  %v8329_v3 = vunpack.i.l.bf16 %v8328_v24  ;;  %v2498_v24 = vmax.f32 %v2370_v40, 0.0  ;;  %v2500_v20 = vmax.f32 %v2378_v21, 0.0 }
 0x1b3   : > { %v2157_v35 = vsel %vm2122_vm7, %v2120_v28, %v8334_v27  ;;  %v2158_v41 = vsel %vm2122_vm7, %v2121_v55, %v8335_v26 }
 0x1b4   : > { %v8343_v57 = vpop.permute.xlu1 %8342  ;;  %v2155_v44 = vsel %vm2122_vm7, %v2118_v31, %v8329_v3  ;;  %v2156_v45 = vsel %vm2122_vm7, %v2119_v32, %v8330_v47 }
 0x1b5   : > { %v8345_v1 = vunpack.i.h.bf16 %v8343_v57  ;;  %v8344_v33 = vunpack.i.l.bf16 %v8343_v57  ;;  %v8338_v34 = vpop.permute.xlu0 %8337 }
 0x1b6   : > { %v8340_v36 = vunpack.i.h.bf16 %v8338_v34  ;;  %v8339_v42 = vunpack.i.l.bf16 %v8338_v34 }
 0x1b7   : > { %v2194_v38 = vsel %vm2159_vm8, %v2157_v35, %v8344_v33  ;;  %v2195_v51 = vsel %vm2159_vm8, %v2158_v41, %v8345_v1  ;;  %v9448_v35 = vld [vmem:[%s12603_s3 + $0x20] ss:$0 sps:$4 sm:$0xff]  }
 0x1b8   : > { %v2192_v53 = vsel %vm2159_vm8, %v2155_v44, %v8339_v42  ;;  %v2193_v58 = vsel %vm2159_vm8, %v2156_v45, %v8340_v36  ;;  %v2213_v37 = vpack.c.bf16 %v2195_v51, %v2194_v38  ;;  %7571 = vmatprep.subr.msk.bf16.mxu1 %vm2312_vm0, %v9448_v35  ;;  %v4566_v44 = vsel %vm2312_vm0, %v9448_v35, 0 }
 0x1b9   : > { %v2212_v63 = vpack.c.bf16 %v2193_v58, %v2192_v53  ;;  %7428 = vmatpush3.bf16.msra.mxu1 %v4566_v44 }
 0x1bb   : > { %7423 = vmatprep.mubr.msk.bf16.mxu0 %vm2257_vm9, %v2212_v63  ;;  %v9449_v63 = vld [vmem:[%s12603_s3 + $0x18] sm:$0xff]  }
 0x1bc   : > { %7424 = vmatmul.mubr.msk.bf16.gmra.mxu0 %vm2257_vm9, %v2213_v37  ;;  %7429 = vmatprep.subr.bf16.mxu1 %v9449_v63 }
 0x1bd   : > { %7430 = vmatpush3.bf16.msra.mxu1 %v9449_v63 }
 0x1bf   : > { %v7401_v52 = vpop.f32.mrf.mxu0 }
 0x1c0   : > { %v2391_v36 = vadd.f32 %v7401_v52, %v10954_v62 }
 0x1c1   : > { %v2573_v16 = vpop.permute.xlu1 %2572  ;;  %v2382_v12 = vpop.f32.mrf.mxu0 }
 0x1c2   : > { %v2746_v13 = vmul.f32 %v2573_v16, %v2494_v8  ;;  %v2568_v43 = vpop.permute.xlu0 %2567  ;;  %v2383_v47 = vadd.f32 %v10954_v62, %v2382_v12  ;;  %v2503_v52 = vmax.f32 %v2391_v36, 0.0 }
 0x1c3   : > { %v2745_v23 = vmul.f32 %v2568_v43, %v2493_v9  ;;  %v7402_v50 = vpop.f32.mrf.mxu0 }
 0x1c4   : > { %2782 = vst.msk [vmem:[#allocation2 + $0x1b] sm:$0xff] %vm1901_vm1, %v2746_v13  ;;  %v2501_v42 = vmax.f32 %v2383_v47, 0.0  ;;  %v2394_v45 = vadd.f32 %v7402_v50, %v10954_v62 }
 0x1c5   : > { %2781 = vst.msk [vmem:[#allocation2 + $0x13] sm:$0xff] %vm1901_vm1, %v2745_v23  ;;  %v2578_v10 = vpop.permute.xlu1 %2577  ;;  %v2385_v25 = vpop.f32.mrf.mxu0 }
 0x1c6   : > { %v2747_v14 = vmul.f32 %v2578_v10, %v2495_v11  ;;  %v2583_v17 = vpop.permute.xlu0 %2582  ;;  %v2386_v28 = vadd.f32 %v10954_v62, %v2385_v25  ;;  %v2504_v8 = vmax.f32 %v2394_v45, 0.0 }
 0x1c7   : > { %v2748_v39 = vmul.f32 %v2583_v17, %v2496_v15 }
 0x1c8   : > { %2783 = vst.msk [vmem:[#allocation2 + $0x23] sm:$0xff] %vm1901_vm1, %v2747_v14  ;;  %v2502_v38 = vmax.f32 %v2386_v28, 0.0 }
 0x1c9   : > { %2784 = vst.msk [vmem:[#allocation2 + $0x2b] sm:$0xff] %vm1901_vm1, %v2748_v39  ;;  %v2588_v22 = vpop.permute.xlu1 %2587 }
 0x1ca   : > { %v2749_v26 = vmul.f32 %v2588_v22, %v2497_v19  ;;  %v2593_v27 = vpop.permute.xlu0 %2592 }
 0x1cb   : > { %v2750_v46 = vmul.f32 %v2593_v27, %v2498_v24  ;;  %v2930_v34 = vld [vmem:[#allocation2 + $0x1b] sm:$0xff] }
 0x1cc   : > { %2785 = vst.msk [vmem:[#allocation2 + $0x33] sm:$0xff] %vm1901_vm1, %v2749_v26  ;;  %v2892_v3 = vld [vmem:[#allocation2 + $0x12] sm:$0xff]  ;;  %v2893_v54 = vld [vmem:[#allocation2 + $0x1a] sm:$0xff] }
 0x1cd   : > { %v2856_v5 = vld [vmem:[#allocation2 + $0x11] sm:$0xff]  ;;  %2786 = vst.msk [vmem:[#allocation2 + $0x3b] sm:$0xff] %vm1901_vm1, %v2750_v46  ;;  %v2598_v55 = vpop.permute.xlu1 %2597  ;;  %v8368_v57 = vpack.i.bf16 %v2893_v54, %v2892_v3  ;;  %v2857_v30 = vld [vmem:[#allocation2 + $0x19] sm:$0xff] }
 0x1ce   : > { %v2751_v31 = vmul.f32 %v2598_v55, %v2499_v60  ;;  %v2603_v32 = vpop.permute.xlu0 %2602  ;;  %v8353_v1 = vpack.i.bf16 %v2857_v30, %v2856_v5  ;;  %v2929_v33 = vld [vmem:[#allocation2 + $0x13] sm:$0xff] }
 0x1cf   : > { %v2752_v41 = vmul.f32 %v2603_v32, %v2500_v20  ;;  %8369 = vrot.lane.b32.xlu1 %v8368_v57, %s12665_s19  ;;  %v8378_v53 = vpack.i.bf16 %v2930_v34, %v2929_v33  ;;  %v2966_v61 = vld [vmem:[#allocation2 + $0x1c] sm:$0xff]  ;;  %v2965_v7 = vld [vmem:[#allocation2 + $0x14] sm:$0xff] }
 0x1d0   : > { %2787 = vst.msk [vmem:[#allocation2 + $0x43] sm:$0xff] %vm1901_vm1, %v2751_v31  ;;  %8354 = vrot.lane.b32.xlu0 %v8353_v1, %s12670_s24  ;;  %v2894_v2 = vld [vmem:[#allocation2 + $0x22] sm:$0xff]  ;;  %v2895_v56 = vld [vmem:[#allocation2 + $0x2a] sm:$0xff]  ;;  %v8388_v6 = vpack.i.bf16 %v2966_v61, %v2965_v7 }
 0x1d1   : > { %2788 = vst.msk [vmem:[#allocation2 + $0x4b] sm:$0xff] %vm1901_vm1, %v2752_v41  ;;  %v2608_v51 = vpop.permute.xlu1 %2607  ;;  %v10996_v13 = vpack.i.bf16 %v2895_v56, %v2894_v2  ;;  %v2931_v11 = vld [vmem:[#allocation2 + $0x23] sm:$0xff]  ;;  %v2932_v4 = vld [vmem:[#allocation2 + $0x2b] sm:$0xff] }
 0x1d2   : > { %v2753_v58 = vmul.f32 %v2608_v51, %v2501_v42  ;;  %v2613_v37 = vpop.permute.xlu0 %2612  ;;  %v2967_v15 = vld [vmem:[#allocation2 + $0x24] sm:$0xff]  ;;  %v8383_v10 = vpack.i.bf16 %v2932_v4, %v2931_v11  ;;  %v9450_v55 = vld [vmem:[%s12603_s3 + $0x10] sm:$0xff]  }
 0x1d3   : > { %v2754_v0 = vmul.f32 %v2613_v37, %v2502_v38  ;;  %8379 = vrot.lane.b32.xlu1 %v8378_v53, %s12666_s1  ;;  %v2968_v43 = vld [vmem:[#allocation2 + $0x2c] sm:$0xff]  ;;  %7431 = vmatprep.subr.bf16.mxu1 %v9450_v55  ;;  %v2858_v38 = vld [vmem:[#allocation2 + $0x21] sm:$0xff] }
 0x1d4   : > { %2789 = vst.msk [vmem:[#allocation2 + $0x53] sm:$0xff] %vm1901_vm1, %v2753_v58  ;;  %8364 = vrot.lane.b32.xlu0 %v8368_v57, %s12664_s22  ;;  %v8398_v40 = vpack.i.bf16 %v2968_v43, %v2967_v15  ;;  %v3005_v50 = vld [vmem:[#allocation2 + $0x2d] sm:$0xff]  ;;  %v3004_v14 = vld [vmem:[#allocation2 + $0x25] sm:$0xff]  ;;  %v3042_v1 = vld [vmem:[#allocation2 + $0x36] sm:$0xff]  ;;  %7432 = vmatpush3.bf16.msra.mxu1 %v9450_v55 }
 0x1d5   : > { %2790 = vst.msk [vmem:[#allocation2 + $0x5b] sm:$0xff] %vm1901_vm1, %v2754_v0  ;;  %v2618_v9 = vpop.permute.xlu1 %2617  ;;  %v8408_v39 = vpack.i.bf16 %v3005_v50, %v3004_v14  ;;  %v3041_v18 = vld [vmem:[#allocation2 + $0x2e] sm:$0xff]  ;;  %v3040_v22 = vld [vmem:[#allocation2 + $0x26] sm:$0xff]  ;;  %v2897_v2 = vld [vmem:[#allocation2 + $0x3a] sm:$0xff] }
 0x1d6   : > { %v2755_v16 = vmul.f32 %v2618_v9, %v2503_v52  ;;  %v2623_v12 = vpop.permute.xlu0 %2622  ;;  %v8418_v27 = vpack.i.bf16 %v3041_v18, %v3040_v22  ;;  %v2969_v46 = vld [vmem:[#allocation2 + $0x34] sm:$0xff]  ;;  %v9451_v57 = vld [vmem:[%s12603_s3 + $0x8] sm:$0xff]   ;;  %v9452_v53 = vld [vmem:[%s12603_s3] sm:$0xff]  }
 0x1d7   : > { %v2756_v23 = vmul.f32 %v2623_v12, %v2504_v8  ;;  %8389 = vrot.lane.b32.xlu1 %v8388_v6, %s12667_s25  ;;  %v2970_v21 = vld [vmem:[#allocation2 + $0x3c] sm:$0xff]  ;;  %v2859_v51 = vld [vmem:[#allocation2 + $0x29] sm:$0xff]  ;;  %7433 = vmatprep.subr.bf16.mxu1 %v9451_v57  ;;  %v2896_v0 = vld [vmem:[#allocation2 + $0x32] sm:$0xff] }
 0x1d8   : > { %2791 = vst.msk [vmem:[#allocation2 + $0x63] sm:$0xff] %vm1901_vm1, %v2755_v16  ;;  %8374 = vrot.lane.b32.xlu0 %v10996_v13, %s12665_s19  ;;  %v8403_v3 = vpack.i.bf16 %v2970_v21, %v2969_v46  ;;  %v3043_v54 = vld [vmem:[#allocation2 + $0x3e] sm:$0xff]  ;;  %v3006_v35 = vld [vmem:[#allocation2 + $0x35] sm:$0xff]  ;;  %v8423_v63 = vpack.i.bf16 %v2859_v51, %v2858_v38  ;;  %7434 = vmatpush3.bf16.msra.mxu1 %v9451_v57  ;;  %v2936_v4 = vld [vmem:[#allocation2 + $0x4b] sm:$0xff] }
 0x1d9   : > { %2792 = vst.msk [vmem:[#allocation2 + $0x6b] sm:$0xff] %vm1901_vm1, %v2756_v23  ;;  %v2628_v17 = vpop.permute.xlu1 %2627  ;;  %v3007_v28 = vld [vmem:[#allocation2 + $0x3d] sm:$0xff]  ;;  %v8428_v34 = vpack.i.bf16 %v3043_v54, %v3042_v1  ;;  %v2860_v56 = vld [vmem:[#allocation2 + $0x31] sm:$0xff]  ;;  %7435 = vmatprep.subr.bf16.mxu1 %v9452_v53  ;;  %v8448_v7 = vpack.i.bf16 %v2897_v2, %v2896_v0  ;;  %v2863_v38 = vld [vmem:[#allocation2 + $0x49] sm:$0xff] }
 0x1da   : > { %v2633_v25 = vpop.permute.xlu0 %2632  ;;  %v8413_v44 = vpack.i.bf16 %v3007_v28, %v3006_v35  ;;  %v2861_v52 = vld [vmem:[#allocation2 + $0x39] sm:$0xff]  ;;  %v2898_v12 = vld [vmem:[#allocation2 + $0x42] sm:$0xff] }
 0x1db   : > { %8399 = vrot.lane.b32.xlu1 %v8398_v40, %s12668_s28  ;;  %v8433_v8 = vpack.i.bf16 %v2861_v52, %v2860_v56  ;;  %v2933_v9 = vld [vmem:[#allocation2 + $0x33] sm:$0xff]  ;;  %v2934_v6 = vld [vmem:[#allocation2 + $0x3b] sm:$0xff]  ;;  %v2935_v11 = vld [vmem:[#allocation2 + $0x43] sm:$0xff] }
 0x1dc   : > { %8384 = vrot.lane.b32.xlu0 %v8383_v10, %s12666_s1  ;;  %7436 = vmatpush3.bf16.msra.mxu1 %v9452_v53  ;;  %v8458_v16 = vpack.i.bf16 %v2934_v6, %v2933_v9  ;;  %v2972_v23 = vld [vmem:[#allocation2 + $0x4c] sm:$0xff]  ;;  %v2971_v15 = vld [vmem:[#allocation2 + $0x44] sm:$0xff]  ;;  %v8463_v10 = vpack.i.bf16 %v2936_v4, %v2935_v11  ;;  %v2865_v2 = vld [vmem:[#allocation2 + $0x59] sm:$0xff] }
 0x1dd   : > { %v2638_v5 = vpop.permute.xlu1 %2637  ;;  %v3009_v50 = vld [vmem:[#allocation2 + $0x4d] sm:$0xff]  ;;  %v2938_v9 = vld [vmem:[#allocation2 + $0x5b] sm:$0xff] }
 0x1de   : > { %v2643_v45 = vpop.permute.xlu0 %2642  ;;  %v3045_v18 = vld [vmem:[#allocation2 + $0x4e] sm:$0xff] }
 0x1df   : > { %v7405_v19 = vpop.f32.mrf.mxu0  ;;  %8409 = vrot.lane.b32.xlu1 %v8408_v39, %s12669_s0  ;;  %v2974_v21 = vld [vmem:[#allocation2 + $0x5c] sm:$0xff]  ;;  %v2864_v0 = vld [vmem:[#allocation2 + $0x51] sm:$0xff] }
 0x1e0   : > { %v2407_v24 = vadd.f32 %v7405_v19, %v10954_v62  ;;  %8394 = vrot.lane.b32.xlu0 %v8398_v40, %s12667_s25  ;;  %v8478_v40 = vpack.i.bf16 %v2972_v23, %v2971_v15  ;;  %v3011_v28 = vld [vmem:[#allocation2 + $0x5d] sm:$0xff]  ;;  %v2940_v15 = vld [vmem:[#allocation2 + $0x6b] sm:$0xff] }
 0x1e1   : > { %v2398_v26 = vpop.f32.mrf.mxu0  ;;  %v2648_v14 = vpop.permute.xlu1 %2647  ;;  %v2939_v4 = vld [vmem:[#allocation2 + $0x63] sm:$0xff] }
 0x1e2   : > { %v2507_v60 = vmax.f32 %v2407_v24, 0.0  ;;  %v2399_v47 = vadd.f32 %v10954_v62, %v2398_v26  ;;  %v2653_v24 = vpop.permute.xlu0 %2652 }
 0x1e3   : > { %v7406_v20 = vpop.f32.mrf.mxu0  ;;  %8419 = vrot.lane.b32.xlu1 %v8418_v27, %s12671_s23 }
 0x1e4   : > { %v2759_v30 = vmul.f32 %v2638_v5, %v2507_v60  ;;  %v2505_v31 = vmax.f32 %v2399_v47, 0.0  ;;  %v2410_v32 = vadd.f32 %v7406_v20, %v10954_v62  ;;  %8404 = vrot.lane.b32.xlu0 %v8403_v3, %s12668_s28  ;;  %v2973_v60 = vld [vmem:[#allocation2 + $0x54] sm:$0xff]  ;;  %v3047_v5 = vld [vmem:[#allocation2 + $0x5e] sm:$0xff] }
 0x1e5   : > { %v2401_v33 = vpop.f32.mrf.mxu0  ;;  %v2658_v26 = vpop.permute.xlu1 %2657  ;;  %v8483_v54 = vpack.i.bf16 %v2974_v21, %v2973_v60  ;;  %v3048_v60 = vld [vmem:[#allocation2 + $0x66] sm:$0xff] }
 0x1e6   : > { %2795 = vst.msk [vmem:[#allocation2 + $0x83] sm:$0xff] %vm1901_vm1, %v2759_v30  ;;  %v2757_v41 = vmul.f32 %v2628_v17, %v2505_v31  ;;  %v2508_v36 = vmax.f32 %v2410_v32, 0.0  ;;  %v2402_v42 = vadd.f32 %v10954_v62, %v2401_v33  ;;  %v3008_v17 = vld [vmem:[#allocation2 + $0x45] sm:$0xff]  ;;  %v3046_v31 = vld [vmem:[#allocation2 + $0x56] sm:$0xff] }
 0x1e7   : > { %8429 = vrot.lane.b32.xlu1 %v8428_v34, %s12671_s23  ;;  %v8488_v39 = vpack.i.bf16 %v3009_v50, %v3008_v17  ;;  %v8508_v1 = vpack.i.bf16 %v3047_v5, %v3046_v31  ;;  %v3010_v33 = vld [vmem:[#allocation2 + $0x55] sm:$0xff]  ;;  %v8543_v17 = vpack.i.bf16 %v2940_v15, %v2939_v4 }
 0x1e8   : > { %2793 = vst.msk [vmem:[#allocation2 + $0x73] sm:$0xff] %vm1901_vm1, %v2757_v41  ;;  %v2760_v58 = vmul.f32 %v2643_v45, %v2508_v36  ;;  %v2506_v37 = vmax.f32 %v2402_v42, 0.0  ;;  %8414 = vrot.lane.b32.xlu0 %v8413_v44, %s12669_s0  ;;  %v8493_v36 = vpack.i.bf16 %v3011_v28, %v3010_v33  ;;  %v2663_v42 = vpop.permute.xlu0 %2662  ;;  %v2862_v45 = vld [vmem:[#allocation2 + $0x41] sm:$0xff] }
 0x1e9   : > { %v11048_v44 = vpop.permute.xlu1 %2667 }
 0x1ea   : > { %2796 = vst.msk [vmem:[#allocation2 + $0x8b] sm:$0xff] %vm1901_vm1, %v2760_v58  ;;  %v2758_v61 = vmul.f32 %v2633_v25, %v2506_v37  ;;  %v3044_v25 = vld [vmem:[#allocation2 + $0x46] sm:$0xff]  ;;  %v2900_v58 = vld [vmem:[#allocation2 + $0x52] sm:$0xff] }
 0x1eb   : > { %8439 = vrot.lane.b32.xlu1 %v10996_v13, %s12664_s22  ;;  %v2899_v13 = vld [vmem:[#allocation2 + $0x4a] sm:$0xff]  ;;  %v8498_v46 = vpack.i.bf16 %v3045_v18, %v3044_v25 }
 0x1ec   : > { %2794 = vst.msk [vmem:[#allocation2 + $0x7b] sm:$0xff] %vm1901_vm1, %v2758_v61  ;;  %8424 = vrot.lane.b32.xlu0 %v8423_v63, %s12670_s24  ;;  %v8453_v43 = vpack.i.bf16 %v2899_v13, %v2898_v12  ;;  %v8503_v61 = vpack.i.bf16 %v2863_v38, %v2862_v45  ;;  %v2901_v63 = vld [vmem:[#allocation2 + $0x5a] sm:$0xff]  ;;  %v2902_v12 = vld [vmem:[#allocation2 + $0x62] sm:$0xff]  ;;  %v2903_v13 = vld [vmem:[#allocation2 + $0x6a] sm:$0xff] }
 0x1ed   : > { %v2678_v56 = vpop.permute.xlu1 %2677  ;;  %v8528_v52 = vpack.i.bf16 %v2901_v63, %v2900_v58  ;;  %v8533_v23 = vpack.i.bf16 %v2903_v13, %v2902_v12  ;;  %v3012_v18 = vld [vmem:[#allocation2 + $0x65] sm:$0xff] }
 0x1ee   : > { %v2867_v58 = vld [vmem:[#allocation2 + $0x69] sm:$0xff] }
 0x1ef   : > { %8449 = vrot.lane.b32.xlu1 %v8448_v7, %s12665_s19  ;;  %v2976_v11 = vld [vmem:[#allocation2 + $0x6c] sm:$0xff] }
 0x1f0   : > { %8434 = vrot.lane.b32.xlu0 %v8433_v8, %s12670_s24  ;;  %v2937_v8 = vld [vmem:[#allocation2 + $0x53] sm:$0xff] }
 0x1f1   : > { %v8538_v6 = vpack.i.bf16 %v2938_v9, %v2937_v8  ;;  %v3049_v21 = vld [vmem:[#allocation2 + $0x6e] sm:$0xff] }
 0x1f2   : > { %v2868_v9 = vld [vmem:[#allocation2 + $0x71] sm:$0xff] }
 0x1f3   : > { %8459 = vrot.lane.b32.xlu1 %v8458_v16, %s12666_s1  ;;  %v11059_v16 = vpop.permute.xlu1 %2687  ;;  %v2977_v25 = vld [vmem:[#allocation2 + $0x74] sm:$0xff]  ;;  %v3015_v31 = vld [vmem:[#allocation2 + $0x7d] sm:$0xff]  ;;  %v2907_v15 = vld [vmem:[#allocation2 + $0x8a] sm:$0xff] }
 0x1f4   : > { %8444 = vrot.lane.b32.xlu0 %v8448_v7, %s12664_s22  ;;  %v8513_v7 = vpack.i.bf16 %v2865_v2, %v2864_v0  ;;  %v3050_v28 = vld [vmem:[#allocation2 + $0x76] sm:$0xff]  ;;  %v2906_v4 = vld [vmem:[#allocation2 + $0x82] sm:$0xff] }
 0x1f5   : > { %v2905_v2 = vld [vmem:[#allocation2 + $0x7a] sm:$0xff] }
 0x1f6   : > { %v2942_v12 = vld [vmem:[#allocation2 + $0x7b] sm:$0xff]  ;;  %v2941_v13 = vld [vmem:[#allocation2 + $0x73] sm:$0xff] }
 0x1f7   : > { %8469 = vrot.lane.b32.xlu1 %v8403_v3, %s12667_s25 }
 0x1f8   : > { %8454 = vrot.lane.b32.xlu0 %v8453_v43, %s12665_s19 }
 0x1fb   : > { %8479 = vrot.lane.b32.xlu1 %v8478_v40, %s12668_s28 }
 0x1fc   : > { %8464 = vrot.lane.b32.xlu0 %v8463_v10, %s12666_s1  ;;  %v11065_v10 = vpop.permute.xlu1 %2697 }
 0x1ff   : > { %v7409_v19 = vpop.f32.mrf.mxu0  ;;  %8489 = vrot.lane.b32.xlu1 %v8488_v39, %s12669_s0  ;;  %v3013_v39 = vld [vmem:[#allocation2 + $0x6d] sm:$0xff] }
 0x200   : > { %v2423_v22 = vadd.f32 %v7409_v19, %v10954_v62  ;;  %8474 = vrot.lane.b32.xlu0 %v8478_v40, %s12667_s25  ;;  %v2975_v40 = vld [vmem:[#allocation2 + $0x64] sm:$0xff]  ;;  %v8568_v19 = vpack.i.bf16 %v3013_v39, %v3012_v18 }
 0x201   : > { %v2414_v27 = vpop.f32.mrf.mxu0  ;;  %v8558_v50 = vpack.i.bf16 %v2976_v11, %v2975_v40  ;;  %v2979_v18 = vld [vmem:[#allocation2 + $0x84] sm:$0xff] }
 0x202   : > { %v2511_v47 = vmax.f32 %v2423_v22, 0.0  ;;  %v2415_v3 = vadd.f32 %v10954_v62, %v2414_v27 }
 0x203   : > { %v7410_v20 = vpop.f32.mrf.mxu0  ;;  %8499 = vrot.lane.b32.xlu1 %v8498_v46, %s12671_s23 }
 0x204   : > { %v2763_v55 = vmul.f32 %v2658_v26, %v2511_v47  ;;  %v2509_v57 = vmax.f32 %v2415_v3, 0.0  ;;  %v2426_v30 = vadd.f32 %v7410_v20, %v10954_v62  ;;  %8484 = vrot.lane.b32.xlu0 %v8483_v54, %s12668_s28  ;;  %v2978_v26 = vld [vmem:[#allocation2 + $0x7c] sm:$0xff]  ;;  %v8578_v3 = vpack.i.bf16 %v3049_v21, %v3048_v60 }
 0x205   : > { %v2417_v32 = vpop.f32.mrf.mxu0  ;;  %v8563_v20 = vpack.i.bf16 %v2978_v26, %v2977_v25  ;;  %v2943_v21 = vld [vmem:[#allocation2 + $0x83] sm:$0xff] }
 0x206   : > { %2799 = vst.msk [vmem:[#allocation2 + $0xa3] sm:$0xff] %vm1901_vm1, %v2763_v55  ;;  %v2761_v34 = vmul.f32 %v2648_v14, %v2509_v57  ;;  %v2512_v35 = vmax.f32 %v2426_v30, 0.0  ;;  %v2418_v41 = vadd.f32 %v10954_v62, %v2417_v32  ;;  %v3051_v55 = vld [vmem:[#allocation2 + $0x7e] sm:$0xff]  ;;  %v3014_v30 = vld [vmem:[#allocation2 + $0x75] sm:$0xff] }
 0x207   : > { %8509 = vrot.lane.b32.xlu1 %v8508_v1, %s12671_s23 }
 0x208   : > { %2797 = vst.msk [vmem:[#allocation2 + $0x93] sm:$0xff] %vm1901_vm1, %v2761_v34  ;;  %v2764_v51 = vmul.f32 %v2663_v42, %v2512_v35  ;;  %v2510_v53 = vmax.f32 %v2418_v41, 0.0  ;;  %8494 = vrot.lane.b32.xlu0 %v8493_v36, %s12669_s0  ;;  %v8588_v41 = vpack.i.bf16 %v3051_v55, %v3050_v28  ;;  %v3052_v55 = vld [vmem:[#allocation2 + $0x86] sm:$0xff] }
 0x20a   : > { %2800 = vst.msk [vmem:[#allocation2 + $0xab] sm:$0xff] %vm1901_vm1, %v2764_v51  ;;  %v2762_v37 = vmul.f32 %v2653_v24, %v2510_v53  ;;  %v11069_v24 = vpop.permute.xlu1 %2707  ;;  %v8573_v51 = vpack.i.bf16 %v3015_v31, %v3014_v30  ;;  %v2866_v53 = vld [vmem:[#allocation2 + $0x61] sm:$0xff] }
 0x20b   : > { %8519 = vrot.lane.b32.xlu1 %v8453_v43, %s12664_s22  ;;  %v2673_v43 = vpop.permute.xlu0 %2672  ;;  %v8583_v0 = vpack.i.bf16 %v2867_v58, %v2866_v53 }
 0x20c   : > { %2798 = vst.msk [vmem:[#allocation2 + $0x9b] sm:$0xff] %vm1901_vm1, %v2762_v37  ;;  %8504 = vrot.lane.b32.xlu0 %v8503_v61, %s12670_s24 }
 0x20e   : > { %v11080_v34 = vpop.permute.xlu1 %2717 }
 0x20f   : > { %8529 = vrot.lane.b32.xlu1 %v8528_v52, %s12665_s19  ;;  %v2683_v14 = vpop.permute.xlu0 %2682  ;;  %v3017_v25 = vld [vmem:[#allocation2 + $0x8d] sm:$0xff] }
 0x210   : > { %8514 = vrot.lane.b32.xlu0 %v8513_v7, %s12670_s24  ;;  %v2904_v7 = vld [vmem:[#allocation2 + $0x72] sm:$0xff] }
 0x211   : > { %v8608_v8 = vpack.i.bf16 %v2905_v2, %v2904_v7 }
 0x213   : > { %8539 = vrot.lane.b32.xlu1 %v8538_v6, %s12666_s1  ;;  %v11072_v27 = vpop.permute.xlu0 %2692 }
 0x214   : > { %8524 = vrot.lane.b32.xlu0 %v8528_v52, %s12664_s22 }
 0x217   : > { %8549 = vrot.lane.b32.xlu1 %v8483_v54, %s12667_s25  ;;  %v11082_v36 = vpop.permute.xlu0 %2702 }
 0x218   : > { %8534 = vrot.lane.b32.xlu0 %v8533_v23, %s12665_s19 }
 0x21b   : > { %8559 = vrot.lane.b32.xlu1 %v8558_v50, %s12668_s28  ;;  %v11094_v52 = vpop.permute.xlu0 %2712 }
 0x21c   : > { %8544 = vrot.lane.b32.xlu0 %v8543_v17, %s12666_s1  ;;  %v2944_v17 = vld [vmem:[#allocation2 + $0x8b] sm:$0xff] }
 0x21f   : > { %v7413_v22 = vpop.f32.mrf.mxu0  ;;  %8569 = vrot.lane.b32.xlu1 %v8568_v19, %s12669_s0  ;;  %v11102_v11 = vpop.permute.xlu0 %2722 }
 0x220   : > { %v2439_v46 = vadd.f32 %v7413_v22, %v10954_v62  ;;  %8554 = vrot.lane.b32.xlu0 %v8558_v50, %s12667_s25  ;;  %v11108_v50 = vpack.i.bf16 %v2907_v15, %v2906_v4  ;;  %v8623_v22 = vpack.i.bf16 %v2944_v17, %v2943_v21  ;;  %v2909_v21 = vld [vmem:[#allocation2 + $0x9a] sm:$0xff] }
 0x221   : > { %v2430_v47 = vpop.f32.mrf.mxu0 }
 0x222   : > { %v2515_v54 = vmax.f32 %v2439_v46, 0.0  ;;  %v2431_v5 = vadd.f32 %v10954_v62, %v2430_v47  ;;  %v3016_v46 = vld [vmem:[#allocation2 + $0x85] sm:$0xff] }
 0x223   : > { %v7414_v57 = vpop.f32.mrf.mxu0  ;;  %8579 = vrot.lane.b32.xlu1 %v8578_v3, %s12671_s23  ;;  %v11111_v39 = vpop.permute.xlu0 %2732  ;;  %v8648_v60 = vpack.i.bf16 %v3017_v25, %v3016_v46  ;;  %v3053_v3 = vld [vmem:[#allocation2 + $0x8e] sm:$0xff] }
 0x224   : > { %v2767_v32 = vmul.f32 %v2678_v56, %v2515_v54  ;;  %v2513_v1 = vmax.f32 %v2431_v5, 0.0  ;;  %v2442_v33 = vadd.f32 %v7414_v57, %v10954_v62  ;;  %8564 = vrot.lane.b32.xlu0 %v8563_v20, %s12668_s28  ;;  %v2869_v56 = vld [vmem:[#allocation2 + $0x79] sm:$0xff]  ;;  %v8658_v31 = vpack.i.bf16 %v3053_v3, %v3052_v55 }
 0x225   : > { %v2433_v35 = vpop.f32.mrf.mxu0  ;;  %v8593_v6 = vpack.i.bf16 %v2869_v56, %v2868_v9  ;;  %v2981_v5 = vld [vmem:[#allocation2 + $0x94] sm:$0xff] }
 0x226   : > { %2803 = vst.msk [vmem:[#allocation2 + $0xc3] sm:$0xff] %vm1901_vm1, %v2767_v32  ;;  %v2765_v42 = vmul.f32 %v11048_v44, %v2513_v1  ;;  %v2516_v45 = vmax.f32 %v2442_v33, 0.0  ;;  %v2434_v38 = vadd.f32 %v10954_v62, %v2433_v35  ;;  %v11091_v44 = vpop.permute.xlu1 %2727 }
 0x227   : > { %8589 = vrot.lane.b32.xlu1 %v8588_v41, %s12671_s23  ;;  %v11119_v47 = vpop.permute.xlu0 %2742  ;;  %v3054_v41 = vld [vmem:[#allocation2 + $0x96] sm:$0xff] }
 0x228   : > { %2801 = vst.msk [vmem:[#allocation2 + $0xb3] sm:$0xff] %vm1901_vm1, %v2765_v42  ;;  %v2768_v37 = vmul.f32 %v2683_v14, %v2516_v45  ;;  %v2514_v61 = vmax.f32 %v2434_v38, 0.0  ;;  %8574 = vrot.lane.b32.xlu0 %v8573_v51, %s12669_s0  ;;  %v2980_v14 = vld [vmem:[#allocation2 + $0x8c] sm:$0xff]  ;;  %v3055_v42 = vld [vmem:[#allocation2 + $0x9e] sm:$0xff]  ;;  %v3018_v38 = vld [vmem:[#allocation2 + $0x95] sm:$0xff] }
 0x229   : > { %v8638_v19 = vpack.i.bf16 %v2980_v14, %v2979_v18  ;;  %v3019_v51 = vld [vmem:[#allocation2 + $0x9d] sm:$0xff]  ;;  %v8668_v2 = vpack.i.bf16 %v3055_v42, %v3054_v41  ;;  %v2911_v42 = vld [vmem:[#allocation2 + $0xaa] sm:$0xff] }
 0x22a   : > { %2804 = vst.msk [vmem:[#allocation2 + $0xcb] sm:$0xff] %vm1901_vm1, %v2768_v37  ;;  %v2766_v63 = vmul.f32 %v2673_v43, %v2514_v61  ;;  %v11100_v43 = vpop.permute.xlu1 %2737  ;;  %v8653_v9 = vpack.i.bf16 %v3019_v51, %v3018_v38 }
 0x22b   : > { %8599 = vrot.lane.b32.xlu1 %v8533_v23, %s12664_s22  ;;  %v8618_v23 = vpack.i.bf16 %v2942_v12, %v2941_v13  ;;  %v2870_v12 = vld [vmem:[#allocation2 + $0x81] sm:$0xff] }
 0x22c   : > { %2802 = vst.msk [vmem:[#allocation2 + $0xbb] sm:$0xff] %vm1901_vm1, %v2766_v63  ;;  %8584 = vrot.lane.b32.xlu0 %v8583_v0, %s12670_s24 }
 0x22e   : > { %v11106_v40 = vpop.permute.xlu1 %8349 }
 0x22f   : > { %8609 = vrot.lane.b32.xlu1 %v8608_v8, %s12665_s19  ;;  %v8351_v37 = vunpack.i.l.bf16 %v11106_v40  ;;  %v8352_v56 = vunpack.i.h.bf16 %v11106_v40  ;;  %v2871_v40 = vld [vmem:[#allocation2 + $0x89] sm:$0xff] }
 0x230   : > { %8594 = vrot.lane.b32.xlu0 %v8593_v6, %s12670_s24 }
 0x231   : > { %v4162_v4 = vsel %vm1901_vm1, %v10943_v49, %v8351_v37  ;;  %v4163_v14 = vsel %vm1901_vm1, %v10945_v59, %v8352_v56  ;;  %v2873_v49 = vld [vmem:[#allocation2 + $0x99] sm:$0xff] }
 0x232   : > { %v11116_v26 = vpop.permute.xlu1 %8359  ;;  %v2908_v59 = vld [vmem:[#allocation2 + $0x92] sm:$0xff] }
 0x233   : > { %8619 = vrot.lane.b32.xlu1 %v8618_v23, %s12666_s1  ;;  %v8361_v13 = vunpack.i.l.bf16 %v11116_v26  ;;  %v8688_v3 = vpack.i.bf16 %v2909_v21, %v2908_v59  ;;  %v2821_v37 = vld [vmem:[#allocation2 + $0x18] sm:$0xff]  ;;  %v2984_v59 = vld [vmem:[#allocation2 + $0xac] sm:$0xff] }
 0x234   : > { %8604 = vrot.lane.b32.xlu0 %v8608_v8, %s12664_s22 }
 0x237   : > { %8629 = vrot.lane.b32.xlu1 %v8563_v20, %s12667_s25  ;;  %v2982_v20 = vld [vmem:[#allocation2 + $0x9c] sm:$0xff] }
 0x238   : > { %8614 = vrot.lane.b32.xlu0 %v11108_v50, %s12665_s19  ;;  %v11129_v35 = vpack.i.bf16 %v2982_v20, %v2981_v5  ;;  %v11171_v5 = vld [vmem:[#allocation2 + $0xa3] sm:$0xff] }
 0x23b   : > { %8639 = vrot.lane.b32.xlu1 %v8638_v19, %s12668_s28 }
 0x23c   : > { %8624 = vrot.lane.b32.xlu0 %v8623_v22, %s12666_s1  ;;  %v11163_v22 = vld [vmem:[#allocation2 + $0xab] sm:$0xff] }
 0x23f   : > { %v7417_v54 = vpop.f32.mrf.mxu0  ;;  %8649 = vrot.lane.b32.xlu1 %v8648_v60, %s12669_s0 }
 0x240   : > { %v2455_v28 = vadd.f32 %v7417_v54, %v10954_v62  ;;  %8634 = vrot.lane.b32.xlu0 %v8638_v19, %s12667_s25  ;;  %v8663_v19 = vpack.i.bf16 %v2871_v40, %v2870_v12  ;;  %v2910_v54 = vld [vmem:[#allocation2 + $0xa2] sm:$0xff] }
 0x241   : > { %v2446_v57 = vpop.f32.mrf.mxu0  ;;  %v11124_v30 = vpop.permute.xlu1 %8369 }
 0x242   : > { %v2519_v32 = vmax.f32 %v2455_v28, 0.0  ;;  %v2447_v1 = vadd.f32 %v10954_v62, %v2446_v57  ;;  %v11127_v33 = vpop.permute.xlu0 %8354  ;;  %v8371_v46 = vunpack.i.l.bf16 %v11124_v30 }
 0x243   : > { %v7418_v45 = vpop.f32.mrf.mxu0  ;;  %8659 = vrot.lane.b32.xlu1 %v8658_v31, %s12671_s23  ;;  %v8357_v20 = vunpack.i.h.bf16 %v11127_v33  ;;  %v8356_v28 = vunpack.i.l.bf16 %v11127_v33  ;;  %v2945_v31 = vld [vmem:[#allocation2 + $0x93] sm:$0xff]  ;;  %v11185_v33 = vpack.i.bf16 %v2911_v42, %v2910_v54  ;;  %v2983_v54 = vld [vmem:[#allocation2 + $0xa4] sm:$0xff] }
 0x244   : > { %v2771_v53 = vmul.f32 %v11065_v10, %v2519_v32  ;;  %v2517_v58 = vmax.f32 %v2447_v1, 0.0  ;;  %8644 = vrot.lane.b32.xlu0 %v11129_v35, %s12668_s28  ;;  %v2458_v61 = vadd.f32 %v7418_v45, %v10954_v62  ;;  %v8703_v32 = vpack.i.bf16 %v11163_v22, %v11171_v5  ;;  %v2985_v5 = vld [vmem:[#allocation2 + $0xb4] sm:$0xff] }
 0x245   : > { %v2449_v63 = vpop.f32.mrf.mxu0  ;;  %v11137_v0 = vpop.permute.xlu1 %8379  ;;  %v4165_v56 = vsel %vm1901_vm1, %v2821_v37, %v8357_v20 }
 0x246   : > { %2807 = vst.msk [vmem:[#allocation2 + $0xe3] sm:$0xff] %vm1901_vm1, %v2771_v53  ;;  %v2769_v7 = vmul.f32 %v11059_v16, %v2517_v58  ;;  %v2450_v10 = vadd.f32 %v10954_v62, %v2449_v63  ;;  %v11143_v8 = vpop.permute.xlu0 %8364  ;;  %v2520_v6 = vmax.f32 %v2458_v61, 0.0  ;;  %v8362_v16 = vunpack.i.h.bf16 %v11116_v26  ;;  %v2820_v58 = vld [vmem:[#allocation2 + $0x10] sm:$0xff] }
 0x247   : > { %8669 = vrot.lane.b32.xlu1 %v8668_v2, %s12671_s23  ;;  %v8372_v26 = vunpack.i.h.bf16 %v11124_v30  ;;  %v8382_v1 = vunpack.i.h.bf16 %v11137_v0  ;;  %v8381_v30 = vunpack.i.l.bf16 %v11137_v0  ;;  %v8367_v45 = vunpack.i.h.bf16 %v11143_v8 }
 0x248   : > { %2805 = vst.msk [vmem:[#allocation2 + $0xd3] sm:$0xff] %vm1901_vm1, %v2769_v7  ;;  %v2518_v23 = vmax.f32 %v2450_v10, 0.0  ;;  %8654 = vrot.lane.b32.xlu0 %v8653_v9, %s12669_s0  ;;  %v2772_v62 = vmul.f32 %v11082_v36, %v2520_v6  ;;  %v4198_v36 = vsel %vm549_vm2, %v4162_v4, %v8361_v13  ;;  %v4199_v25 = vsel %vm549_vm2, %v4163_v14, %v8362_v16 }
 0x249   : > { %v11153_v15 = vpop.permute.xlu1 %8389  ;;  %v8366_v38 = vunpack.i.l.bf16 %v11143_v8  ;;  %v4235_v51 = vsel %vm1974_vm3, %v4199_v25, %v8372_v26  ;;  %v4234_v53 = vsel %vm1974_vm3, %v4198_v36, %v8371_v46  ;;  %v4164_v2 = vsel %vm1901_vm1, %v2820_v58, %v8356_v28 }
 0x24a   : > { %v2770_v17 = vmul.f32 %v11072_v27, %v2518_v23  ;;  %v11158_v18 = vpop.permute.xlu0 %8374  ;;  %2808 = vst.msk [vmem:[#allocation2 + $0xeb] sm:$0xff] %vm1901_vm1, %v2772_v62  ;;  %v2946_v27 = vld [vmem:[#allocation2 + $0x9b] sm:$0xff]  ;;  %v8392_v61 = vunpack.i.h.bf16 %v11153_v15  ;;  %v8391_v63 = vunpack.i.l.bf16 %v11153_v15  ;;  %v4270_v9 = vsel %vm2011_vm4, %v4234_v53, %v8381_v30 }
 0x24b   : > { %8679 = vrot.lane.b32.xlu1 %v11108_v50, %s12664_s22  ;;  %v2872_v50 = vld [vmem:[#allocation2 + $0x91] sm:$0xff]  ;;  %v8698_v41 = vpack.i.bf16 %v2946_v27, %v2945_v31  ;;  %v4271_v6 = vsel %vm2011_vm4, %v4235_v51, %v8382_v1  ;;  %v4200_v23 = vsel %vm549_vm2, %v4164_v2, %v8366_v38  ;;  %v4201_v4 = vsel %vm549_vm2, %v4165_v56, %v8367_v45  ;;  %v3020_v2 = vld [vmem:[#allocation2 + $0xa5] sm:$0xff] }
 0x24c   : > { %2806 = vst.msk [vmem:[#allocation2 + $0xdb] sm:$0xff] %vm1901_vm1, %v2770_v17  ;;  %8664 = vrot.lane.b32.xlu0 %v8663_v19, %s12670_s24  ;;  %v8673_v57 = vpack.i.bf16 %v2873_v49, %v2872_v50  ;;  %v8377_v16 = vunpack.i.h.bf16 %v11158_v18  ;;  %v8376_v62 = vunpack.i.l.bf16 %v11158_v18  ;;  %v4306_v15 = vsel %vm2048_vm5, %v4270_v9, %v8391_v63  ;;  %v3021_v51 = vld [vmem:[#allocation2 + $0xad] sm:$0xff] }
 0x24d   : > { %v8400_v60 = vpop.permute.xlu1 %8399  ;;  %v4307_v40 = vsel %vm2048_vm5, %v4271_v6, %v8392_v61 }
 0x24e   : > { %v11175_v55 = vpop.permute.xlu0 %8384  ;;  %v8402_v7 = vunpack.i.h.bf16 %v8400_v60  ;;  %v8401_v10 = vunpack.i.l.bf16 %v8400_v60 }
 0x24f   : > { %8689 = vrot.lane.b32.xlu1 %v8688_v3, %s12665_s19  ;;  %v8387_v14 = vunpack.i.h.bf16 %v11175_v55  ;;  %v8386_v17 = vunpack.i.l.bf16 %v11175_v55  ;;  %v4236_v55 = vsel %vm1974_vm3, %v4200_v23, %v8376_v62  ;;  %v3056_v62 = vld [vmem:[#allocation2 + $0xa6] sm:$0xff] }
 0x250   : > { %8674 = vrot.lane.b32.xlu0 %v8673_v57, %s12670_s24  ;;  %v4342_v27 = vsel %vm2085_vm6, %v4306_v15, %v8401_v10  ;;  %v4343_v25 = vsel %vm2085_vm6, %v4307_v40, %v8402_v7  ;;  %v4237_v57 = vsel %vm1974_vm3, %v4201_v4, %v8377_v16  ;;  %v11241_v4 = vld [vmem:[%s12672_s2] ss:$0 sm:$0xff] }
 0x251   : > { %v8410_v0 = vpop.permute.xlu1 %8409  ;;  %v4272_v30 = vsel %vm2011_vm4, %v4236_v55, %v8386_v17 }
 0x252   : > { %v8395_v8 = vpop.permute.xlu0 %8394  ;;  %v8412_v12 = vunpack.i.h.bf16 %v8410_v0  ;;  %v8411_v13 = vunpack.i.l.bf16 %v8410_v0 }
 0x253   : > { %8699 = vrot.lane.b32.xlu1 %v8698_v41, %s12666_s1  ;;  %v8397_v18 = vunpack.i.h.bf16 %v8395_v8  ;;  %v8396_v26 = vunpack.i.l.bf16 %v8395_v8  ;;  %v4273_v41 = vsel %vm2011_vm4, %v4237_v57, %v8387_v14  ;;  %v8728_v8 = vpack.i.bf16 %v3021_v51, %v3020_v2 }
 0x254   : > { %8684 = vrot.lane.b32.xlu0 %v8688_v3, %s12664_s22  ;;  %v4378_v46 = vsel %vm2122_vm7, %v4342_v27, %v8411_v13  ;;  %v4379_v60 = vsel %vm2122_vm7, %v4343_v25, %v8412_v12  ;;  %v3057_v13 = vld [vmem:[#allocation2 + $0xae] sm:$0xff] }
 0x255   : > { %v8420_v19 = vpop.permute.xlu1 %8419  ;;  %v4308_v53 = vsel %vm2048_vm5, %v4272_v30, %v8396_v26  ;;  %v4309_v58 = vsel %vm2048_vm5, %v4273_v41, %v8397_v18  ;;  %v8738_v14 = vpack.i.bf16 %v3057_v13, %v3056_v62  ;;  %v3022_v25 = vld [vmem:[#allocation2 + $0xb5] sm:$0xff]  ;;  %v3023_v18 = vld [vmem:[#allocation2 + $0xbd] sm:$0xff] }
 0x256   : > { %v8422_v21 = vunpack.i.h.bf16 %v8420_v19  ;;  %v8421_v49 = vunpack.i.l.bf16 %v8420_v19  ;;  %v8405_v36 = vpop.permute.xlu0 %8404  ;;  %v8733_v57 = vpack.i.bf16 %v3023_v18, %v3022_v25 }
 0x257   : > { %8709 = vrot.lane.b32.xlu1 %v11129_v35, %s12667_s25  ;;  %v8407_v3 = vunpack.i.h.bf16 %v8405_v36  ;;  %v8406_v50 = vunpack.i.l.bf16 %v8405_v36  ;;  %v8718_v35 = vpack.i.bf16 %v2984_v59, %v2983_v54  ;;  %v3058_v36 = vld [vmem:[#allocation2 + $0xb6] sm:$0xff]  ;;  %v3059_v59 = vld [vmem:[#allocation2 + $0xbe] sm:$0xff] }
 0x258   : > { %8694 = vrot.lane.b32.xlu0 %v11185_v33, %s12665_s19  ;;  %v4414_v20 = vsel %vm2159_vm8, %v4378_v46, %v8421_v49  ;;  %v4415_v28 = vsel %vm2159_vm8, %v4379_v60, %v8422_v21  ;;  %v8748_v54 = vpack.i.bf16 %v3059_v59, %v3058_v36 }
 0x259   : > { %v8430_v31 = vpop.permute.xlu1 %8429  ;;  %v4450_v1 = vpack.c.bf16 %v4415_v28, %v4414_v20  ;;  %v4344_v63 = vsel %vm2085_vm6, %v4308_v53, %v8406_v50  ;;  %v4345_v0 = vsel %vm2085_vm6, %v4309_v58, %v8407_v3 }
 0x25a   : > { %v8432_v42 = vunpack.i.h.bf16 %v8430_v31  ;;  %v8431_v45 = vunpack.i.l.bf16 %v8430_v31  ;;  %v8415_v38 = vpop.permute.xlu0 %8414  ;;  %v2874_v31 = vld [vmem:[#allocation2 + $0xa1] sm:$0xff] }
 0x25b   : > { %v8417_v37 = vunpack.i.h.bf16 %v8415_v38  ;;  %v8416_v61 = vunpack.i.l.bf16 %v8415_v38  ;;  %8719 = vrot.lane.b32.xlu1 %v8718_v35, %s12668_s28  ;;  %7437 = vmatprep.mubr.msk.bf16.mxu1 %vm2257_vm9, %v4450_v1  ;;  %v11268_v1 = vld [vmem:[#allocation2 + $0xcb] sm:$0xff]  ;;  %v2913_v38 = vld [vmem:[#allocation2 + $0xba] sm:$0xff] }
 0x25c   : > { %8704 = vrot.lane.b32.xlu0 %v8703_v32, %s12666_s1  ;;  %v2986_v32 = vld [vmem:[#allocation2 + $0xbc] sm:$0xff] }
 0x25d   : > { %v4380_v56 = vsel %vm2122_vm7, %v4344_v63, %v8416_v61  ;;  %v4381_v7 = vsel %vm2122_vm7, %v4345_v0, %v8417_v37  ;;  %v11231_v10 = vpop.permute.xlu1 %8439  ;;  %v11251_v49 = vpack.i.bf16 %v2986_v32, %v2985_v5  ;;  %v11278_v37 = vld [vmem:[#allocation2 + $0xc3] sm:$0xff]  ;;  %v2912_v61 = vld [vmem:[#allocation2 + $0xb2] sm:$0xff]  ;;  %v2950_v0 = vld [vmem:[#allocation2 + $0xbb] sm:$0xff] }
 0x25e   : > { %v11233_v9 = vpop.permute.xlu0 %8424  ;;  %v4416_v6 = vsel %vm2159_vm8, %v4380_v56, %v8431_v45  ;;  %v4417_v12 = vsel %vm2159_vm8, %v4381_v7, %v8432_v42  ;;  %v2875_v45 = vld [vmem:[#allocation2 + $0xa9] sm:$0xff]  ;;  %v2877_v63 = vld [vmem:[#allocation2 + $0xb9] sm:$0xff]  ;;  %v8442_v2 = vunpack.i.h.bf16 %v11231_v10 }
 0x25f   : > { %v7421_v23 = vpop.f32.mrf.mxu0  ;;  %8729 = vrot.lane.b32.xlu1 %v8728_v8, %s12669_s0  ;;  %v4451_v22 = vpack.c.bf16 %v4417_v12, %v4416_v6  ;;  %v8427_v30 = vunpack.i.h.bf16 %v11233_v9  ;;  %v8743_v58 = vpack.i.bf16 %v2875_v45, %v2874_v31  ;;  %v2822_v56 = vld [vmem:[#allocation2 + $0x20] sm:$0xff]  ;;  %v2823_v7 = vld [vmem:[#allocation2 + $0x28] sm:$0xff]  ;;  %v8768_v8 = vpack.i.bf16 %v2913_v38, %v2912_v61  ;;  %v2949_v5 = vld [vmem:[#allocation2 + $0xb3] sm:$0xff] }
 0x260   : > { %v2471_v16 = vadd.f32 %v11241_v4, %v7421_v23  ;;  %8714 = vrot.lane.b32.xlu0 %v8718_v35, %s12667_s25 }
 0x261   : > { %7438 = vmatmul.mubr.msk.bf16.vlgmr.msra.gmra.mxu1 %vm2257_vm9, %v4451_v22  ;;  %v2462_v15 = vpop.f32.mrf.mxu0  ;;  %v11246_v40 = vpop.permute.xlu1 %8449  ;;  %v2876_v22 = vld [vmem:[#allocation2 + $0xb1] sm:$0xff] }
 0x262   : > { %v2523_v17 = vmax.f32 %v2471_v16, 0.0  ;;  %v2463_v19 = vadd.f32 %v11241_v4, %v2462_v15  ;;  %v11249_v21 = vpop.permute.xlu0 %8434  ;;  %v8452_v12 = vunpack.i.h.bf16 %v11246_v40  ;;  %v8451_v13 = vunpack.i.l.bf16 %v11246_v40 }
 0x263   : > { %v7422_v27 = vpop.f32.mrf.mxu0  ;;  %8739 = vrot.lane.b32.xlu1 %v8738_v14, %s12671_s23  ;;  %v8436_v32 = vunpack.i.l.bf16 %v11249_v21  ;;  %v8753_v62 = vpack.i.bf16 %v2877_v63, %v2876_v22  ;;  %v8778_v15 = vpack.i.bf16 %v2950_v0, %v2949_v5  ;;  %v2915_v14 = vld [vmem:[#allocation2 + $0xca] sm:$0xff] }
 0x264   : > { %v2775_v26 = vmul.f32 %v11080_v34, %v2523_v17  ;;  %v2521_v46 = vmax.f32 %v2463_v19, 0.0  ;;  %8724 = vrot.lane.b32.xlu0 %v11251_v49, %s12668_s28  ;;  %v2474_v60 = vadd.f32 %v11241_v4, %v7422_v27  ;;  %v2987_v5 = vld [vmem:[#allocation2 + $0xc4] sm:$0xff] }
 0x265   : > { %v2465_v3 = vpop.f32.mrf.mxu0  ;;  %v11258_v50 = vpop.permute.xlu1 %8459 }
 0x266   : > { %2811 = vst.msk [vmem:[#allocation2 + $0x103] sm:$0xff] %vm1901_vm1, %v2775_v26  ;;  %v2773_v20 = vmul.f32 %v11069_v24, %v2521_v46  ;;  %v2466_v28 = vadd.f32 %v11241_v4, %v2465_v3  ;;  %v11263_v55 = vpop.permute.xlu0 %8444  ;;  %v2524_v34 = vmax.f32 %v2474_v60, 0.0  ;;  %v8426_v24 = vunpack.i.l.bf16 %v11233_v9  ;;  %v2914_v9 = vld [vmem:[#allocation2 + $0xc2] sm:$0xff]  ;;  %v2824_v26 = vld [vmem:[#allocation2 + $0x30] sm:$0xff]  ;;  %v2825_v46 = vld [vmem:[#allocation2 + $0x38] sm:$0xff] }
 0x267   : > { %8749 = vrot.lane.b32.xlu1 %v8748_v54, %s12671_s23  ;;  %v8462_v17 = vunpack.i.h.bf16 %v11258_v50  ;;  %v8461_v19 = vunpack.i.l.bf16 %v11258_v50  ;;  %v11300_v36 = vpack.i.bf16 %v2915_v14, %v2914_v9  ;;  %v8447_v27 = vunpack.i.h.bf16 %v11263_v55  ;;  %v2988_v9 = vld [vmem:[#allocation2 + $0xcc] sm:$0xff] }
 0x268   : > { %2809 = vst.msk [vmem:[#allocation2 + $0xf3] sm:$0xff] %vm1901_vm1, %v2773_v20  ;;  %v2522_v35 = vmax.f32 %v2466_v28, 0.0  ;;  %8734 = vrot.lane.b32.xlu0 %v8733_v57, %s12669_s0  ;;  %v2776_v41 = vmul.f32 %v11102_v11, %v2524_v34  ;;  %v8783_v11 = vpack.i.bf16 %v11268_v1, %v11278_v37  ;;  %v4166_v6 = vsel %vm1901_vm1, %v2822_v56, %v8426_v24  ;;  %v3061_v1 = vld [vmem:[#allocation2 + $0xce] sm:$0xff] }
 0x269   : > { %v11273_v42 = vpop.permute.xlu1 %8469  ;;  %v4168_v20 = vsel %vm1901_vm1, %v2824_v26, %v8436_v32 }
 0x26a   : > { %v2774_v51 = vmul.f32 %v11094_v52, %v2522_v35  ;;  %v11276_v53 = vpop.permute.xlu0 %8454  ;;  %2812 = vst.msk [vmem:[#allocation2 + $0x10b] sm:$0xff] %vm1901_vm1, %v2776_v41  ;;  %v8441_v52 = vunpack.i.l.bf16 %v11231_v10  ;;  %v8437_v10 = vunpack.i.h.bf16 %v11249_v21  ;;  %v8446_v21 = vunpack.i.l.bf16 %v11263_v55 }
 0x26b   : > { %8759 = vrot.lane.b32.xlu1 %v11185_v33, %s12664_s22  ;;  %v4167_v33 = vsel %vm1901_vm1, %v2823_v7, %v8427_v30  ;;  %v8472_v60 = vunpack.i.h.bf16 %v11273_v42  ;;  %v8471_v3 = vunpack.i.l.bf16 %v11273_v42  ;;  %v8457_v42 = vunpack.i.h.bf16 %v11276_v53 }
 0x26c   : > { %2810 = vst.msk [vmem:[#allocation2 + $0xfb] sm:$0xff] %vm1901_vm1, %v2774_v51  ;;  %8744 = vrot.lane.b32.xlu0 %v8743_v58, %s12670_s24  ;;  %v4202_v40 = vsel %vm549_vm2, %v4166_v6, %v8441_v52  ;;  %v4203_v59 = vsel %vm549_vm2, %v4167_v33, %v8442_v2  ;;  %v4169_v54 = vsel %vm1901_vm1, %v2825_v46, %v8437_v10  ;;  %v8456_v45 = vunpack.i.l.bf16 %v11276_v53 }
 0x26d   : > { %v8480_v23 = vpop.permute.xlu1 %8479  ;;  %v4238_v25 = vsel %vm1974_vm3, %v4202_v40, %v8451_v13  ;;  %v4239_v18 = vsel %vm1974_vm3, %v4203_v59, %v8452_v12  ;;  %v4204_v24 = vsel %vm549_vm2, %v4168_v20, %v8446_v21  ;;  %v4205_v41 = vsel %vm549_vm2, %v4169_v54, %v8447_v27  ;;  %v3025_v59 = vld [vmem:[#allocation2 + $0xcd] sm:$0xff] }
 0x26e   : > { %v11295_v16 = vpop.permute.xlu0 %8464  ;;  %v8482_v28 = vunpack.i.h.bf16 %v8480_v23  ;;  %v8481_v57 = vunpack.i.l.bf16 %v8480_v23  ;;  %v4274_v34 = vsel %vm2011_vm4, %v4238_v25, %v8461_v19  ;;  %v4275_v31 = vsel %vm2011_vm4, %v4239_v18, %v8462_v17 }
 0x26f   : > { %8769 = vrot.lane.b32.xlu1 %v8768_v8, %s12665_s19  ;;  %v4310_v38 = vsel %vm2048_vm5, %v4274_v34, %v8471_v3  ;;  %v4311_v51 = vsel %vm2048_vm5, %v4275_v31, %v8472_v60  ;;  %v8467_v58 = vunpack.i.h.bf16 %v11295_v16  ;;  %v8466_v61 = vunpack.i.l.bf16 %v11295_v16  ;;  %v3024_v3 = vld [vmem:[#allocation2 + $0xc5] sm:$0xff] }
 0x270   : > { %8754 = vrot.lane.b32.xlu0 %v8753_v62, %s12670_s24  ;;  %v4346_v0 = vsel %vm2085_vm6, %v4310_v38, %v8481_v57  ;;  %v4347_v2 = vsel %vm2085_vm6, %v4311_v51, %v8482_v28  ;;  %v4240_v10 = vsel %vm1974_vm3, %v4204_v24, %v8456_v45  ;;  %v4241_v32 = vsel %vm1974_vm3, %v4205_v41, %v8457_v42  ;;  %v2990_v24 = vld [vmem:[#allocation2 + $0xdc] sm:$0xff]  ;;  %v3060_v45 = vld [vmem:[#allocation2 + $0xc6] sm:$0xff] }
 0x271   : > { %v8490_v50 = vpop.permute.xlu1 %8489  ;;  %v8798_v62 = vpack.i.bf16 %v2988_v9, %v2987_v5  ;;  %v4276_v14 = vsel %vm2011_vm4, %v4240_v10, %v8466_v61  ;;  %v8808_v57 = vpack.i.bf16 %v3025_v59, %v3024_v3  ;;  %v8818_v61 = vpack.i.bf16 %v3061_v1, %v3060_v45  ;;  %v2878_v5 = vld [vmem:[#allocation2 + $0xc1] sm:$0xff]  ;;  %v11386_v10 = vld [vmem:[#allocation2 + $0xeb] sm:$0xff] }
 0x272   : > { %v8475_v55 = vpop.permute.xlu0 %8474  ;;  %v8492_v35 = vunpack.i.h.bf16 %v8490_v50  ;;  %v8491_v30 = vunpack.i.l.bf16 %v8490_v50  ;;  %v2919_v1 = vld [vmem:[#allocation2 + $0xea] sm:$0xff] }
 0x273   : > { %8779 = vrot.lane.b32.xlu1 %v8778_v15, %s12666_s1  ;;  %v8477_v33 = vunpack.i.h.bf16 %v8475_v55  ;;  %v8476_v6 = vunpack.i.l.bf16 %v8475_v55 }
 0x274   : > { %8764 = vrot.lane.b32.xlu0 %v8768_v8, %s12664_s22  ;;  %v4382_v53 = vsel %vm2122_vm7, %v4346_v0, %v8491_v30  ;;  %v4383_v8 = vsel %vm2122_vm7, %v4347_v2, %v8492_v35  ;;  %v2989_v30 = vld [vmem:[#allocation2 + $0xd4] sm:$0xff] }
 0x275   : > { %v8500_v63 = vpop.permute.xlu1 %8499  ;;  %v4312_v27 = vsel %vm2048_vm5, %v4276_v14, %v8476_v6 }
 0x276   : > { %v8502_v52 = vunpack.i.h.bf16 %v8500_v63  ;;  %v8501_v56 = vunpack.i.l.bf16 %v8500_v63  ;;  %v8485_v7 = vpop.permute.xlu0 %8484 }
 0x277   : > { %8789 = vrot.lane.b32.xlu1 %v11251_v49, %s12667_s25  ;;  %v8487_v23 = vunpack.i.h.bf16 %v8485_v7  ;;  %v8486_v22 = vunpack.i.l.bf16 %v8485_v7  ;;  %v4277_v49 = vsel %vm2011_vm4, %v4241_v32, %v8467_v58  ;;  %v3063_v7 = vld [vmem:[#allocation2 + $0xde] sm:$0xff] }
 0x278   : > { %v4418_v12 = vsel %vm2159_vm8, %v4382_v53, %v8501_v56  ;;  %v4419_v13 = vsel %vm2159_vm8, %v4383_v8, %v8502_v52  ;;  %8774 = vrot.lane.b32.xlu0 %v11300_v36, %s12665_s19  ;;  %v4313_v21 = vsel %vm2048_vm5, %v4277_v49, %v8477_v33  ;;  %v11368_v52 = vpack.i.bf16 %v2990_v24, %v2989_v30  ;;  %v3062_v56 = vld [vmem:[#allocation2 + $0xd6] sm:$0xff] }
 0x279   : > { %v8510_v16 = vpop.permute.xlu1 %8509  ;;  %v4452_v15 = vpack.c.bf16 %v4419_v13, %v4418_v12  ;;  %v4348_v26 = vsel %vm2085_vm6, %v4312_v27, %v8486_v22  ;;  %v4349_v46 = vsel %vm2085_vm6, %v4313_v21, %v8487_v23  ;;  %v3027_v53 = vld [vmem:[#allocation2 + $0xdd] sm:$0xff]  ;;  %v8828_v12 = vpack.i.bf16 %v3063_v7, %v3062_v56 }
 0x27a   : > { %v8512_v17 = vunpack.i.h.bf16 %v8510_v16  ;;  %v8511_v19 = vunpack.i.l.bf16 %v8510_v16  ;;  %v8495_v40 = vpop.permute.xlu0 %8494 }
 0x27b   : > { %v8497_v25 = vunpack.i.h.bf16 %v8495_v40  ;;  %v8496_v18 = vunpack.i.l.bf16 %v8495_v40  ;;  %8799 = vrot.lane.b32.xlu1 %v8798_v62, %s12668_s28  ;;  %7441 = vmatprep.mubr.msk.bf16.mxu1 %vm2257_vm9, %v4452_v15  ;;  %v2917_v15 = vld [vmem:[#allocation2 + $0xda] sm:$0xff] }
 0x27c   : > { %8784 = vrot.lane.b32.xlu0 %v8783_v11, %s12666_s1  ;;  %v7425_v60 = vpop.f32.mrf.mxu0  ;;  %v2954_v40 = vld [vmem:[#allocation2 + $0xdb] sm:$0xff] }
 0x27d   : > { %v4384_v50 = vsel %vm2122_vm7, %v4348_v26, %v8496_v18  ;;  %v4385_v54 = vsel %vm2122_vm7, %v4349_v46, %v8497_v25  ;;  %v2487_v20 = vadd.f32 %v11241_v4, %v7425_v60  ;;  %v11352_v28 = vpop.permute.xlu1 %8519  ;;  %v2826_v25 = vld [vmem:[#allocation2 + $0x40] sm:$0xff]  ;;  %v2827_v18 = vld [vmem:[#allocation2 + $0x48] sm:$0xff] }
 0x27e   : > { %v11354_v55 = vpop.permute.xlu0 %8504  ;;  %v2478_v34 = vpop.f32.mrf.mxu0  ;;  %v4420_v31 = vsel %vm2159_vm8, %v4384_v50, %v8511_v19  ;;  %v4421_v35 = vsel %vm2159_vm8, %v4385_v54, %v8512_v17  ;;  %v11395_v17 = vld [vmem:[#allocation2 + $0xe3] sm:$0xff]  ;;  %v2881_v19 = vld [vmem:[#allocation2 + $0xd9] sm:$0xff]  ;;  %v8522_v27 = vunpack.i.h.bf16 %v11352_v28  ;;  %v8521_v21 = vunpack.i.l.bf16 %v11352_v28 }
 0x27f   : > { %v2527_v37 = vmax.f32 %v2487_v20, 0.0  ;;  %v2479_v11 = vadd.f32 %v11241_v4, %v2478_v34  ;;  %8809 = vrot.lane.b32.xlu1 %v8808_v57, %s12669_s0  ;;  %v4453_v42 = vpack.c.bf16 %v4421_v35, %v4420_v31  ;;  %v8507_v32 = vunpack.i.h.bf16 %v11354_v55  ;;  %v2918_v46 = vld [vmem:[#allocation2 + $0xe2] sm:$0xff]  ;;  %v2880_v20 = vld [vmem:[#allocation2 + $0xd1] sm:$0xff] }
 0x280   : > { %8794 = vrot.lane.b32.xlu0 %v8798_v62, %s12667_s25  ;;  %v7426_v41 = vpop.f32.mrf.mxu0  ;;  %v8506_v16 = vunpack.i.l.bf16 %v11354_v55  ;;  %v2879_v62 = vld [vmem:[#allocation2 + $0xc9] sm:$0xff]  ;;  %v8863_v59 = vpack.i.bf16 %v11386_v10, %v11395_v17  ;;  %v2953_v57 = vld [vmem:[#allocation2 + $0xd3] sm:$0xff]  ;;  %v8833_v31 = vpack.i.bf16 %v2881_v19, %v2880_v20  ;;  %v11415_v30 = vpack.i.bf16 %v2919_v1, %v2918_v46  ;;  %v2994_v10 = vld [vmem:[#allocation2 + $0xfc] sm:$0xff] }
 0x281   : > { %v2779_v38 = vmul.f32 %v11100_v43, %v2527_v37  ;;  %v2525_v51 = vmax.f32 %v2479_v11, 0.0  ;;  %v11362_v58 = vpop.permute.xlu1 %8529  ;;  %v2490_v63 = vadd.f32 %v11241_v4, %v7426_v41  ;;  %7442 = vmatmul.mubr.msk.bf16.gmra.mxu1 %vm2257_vm9, %v4453_v42  ;;  %v3026_v43 = vld [vmem:[#allocation2 + $0xd5] sm:$0xff]  ;;  %v8823_v49 = vpack.i.bf16 %v2879_v62, %v2878_v5  ;;  %v3064_v17 = vld [vmem:[#allocation2 + $0xe6] sm:$0xff] }
 0x282   : > { %v11366_v0 = vpop.permute.xlu0 %8514  ;;  %v2481_v2 = vpop.f32.mrf.mxu0  ;;  %v8813_v22 = vpack.i.bf16 %v3027_v53, %v3026_v43  ;;  %v4171_v60 = vsel %vm1901_vm1, %v2827_v18, %v8507_v32  ;;  %v8532_v3 = vunpack.i.h.bf16 %v11362_v58  ;;  %v8531_v50 = vunpack.i.l.bf16 %v11362_v58  ;;  %v2828_v58 = vld [vmem:[#allocation2 + $0x50] sm:$0xff] }
 0x283   : > { %2815 = vst.msk [vmem:[#allocation2 + $0x123] sm:$0xff] %vm1901_vm1, %v2779_v38  ;;  %v2777_v9 = vmul.f32 %v11091_v44, %v2525_v51  ;;  %8819 = vrot.lane.b32.xlu1 %v8818_v61, %s12671_s23  ;;  %v2528_v8 = vmax.f32 %v2490_v63, 0.0  ;;  %v2482_v33 = vadd.f32 %v11241_v4, %v2481_v2  ;;  %v8517_v55 = vunpack.i.h.bf16 %v11366_v0  ;;  %v2829_v61 = vld [vmem:[#allocation2 + $0x58] sm:$0xff] }
 0x284   : > { %8804 = vrot.lane.b32.xlu0 %v11368_v52, %s12668_s28  ;;  %v8516_v28 = vunpack.i.l.bf16 %v11366_v0  ;;  %v8858_v35 = vpack.i.bf16 %v2954_v40, %v2953_v57  ;;  %v4207_v41 = vsel %vm549_vm2, %v4171_v60, %v8522_v27  ;;  %v2992_v40 = vld [vmem:[#allocation2 + $0xec] sm:$0xff] }
 0x285   : > { %2813 = vst.msk [vmem:[#allocation2 + $0x113] sm:$0xff] %vm1901_vm1, %v2777_v9  ;;  %v11377_v6 = vpop.permute.xlu1 %8539  ;;  %v2780_v13 = vmul.f32 %v11119_v47, %v2528_v8  ;;  %v2526_v23 = vmax.f32 %v2482_v33, 0.0  ;;  %v4243_v51 = vsel %vm1974_vm3, %v4207_v41, %v8532_v3  ;;  %v4173_v56 = vsel %vm1901_vm1, %v2829_v61, %v8517_v55 }
 0x286   : > { %v11380_v44 = vpop.permute.xlu0 %8524  ;;  %v8542_v37 = vunpack.i.h.bf16 %v11377_v6  ;;  %v8541_v11 = vunpack.i.l.bf16 %v11377_v6  ;;  %v4172_v7 = vsel %vm1901_vm1, %v2828_v58, %v8516_v28 }
 0x287   : > { %8829 = vrot.lane.b32.xlu1 %v8828_v12, %s12671_s23  ;;  %2817 = vst.msk [vmem:[#allocation2 + $0x12b] sm:$0x3f] %vm2816_vm11, %v2780_v13  ;;  %v2778_v4 = vmul.f32 %v11111_v39, %v2526_v23  ;;  %v2916_v39 = vld [vmem:[#allocation2 + $0xd2] sm:$0xff]  ;;  %v8527_v42 = vunpack.i.h.bf16 %v11380_v44  ;;  %v8526_v45 = vunpack.i.l.bf16 %v11380_v44 }
 0x288   : > { %8814 = vrot.lane.b32.xlu0 %v8813_v22, %s12669_s0  ;;  %v8848_v26 = vpack.i.bf16 %v2917_v15, %v2916_v39  ;;  %v4279_v33 = vsel %vm2011_vm4, %v4243_v51, %v8542_v37 }
 0x289   : > { %v11390_v47 = vpop.permute.xlu1 %8549  ;;  %2814 = vst.msk [vmem:[#allocation2 + $0x11b] sm:$0xff] %vm1901_vm1, %v2778_v4  ;;  %v4208_v13 = vsel %vm549_vm2, %v4172_v7, %v8526_v45  ;;  %v4209_v23 = vsel %vm549_vm2, %v4173_v56, %v8527_v42  ;;  %v3028_v45 = vld [vmem:[#allocation2 + $0xe5] sm:$0xff]  ;;  %v3065_v56 = vld [vmem:[#allocation2 + $0xee] sm:$0xff] }
 0x28a   : > { %v11393_v14 = vpop.permute.xlu0 %8534  ;;  %v8552_v63 = vunpack.i.h.bf16 %v11390_v47  ;;  %v8551_v0 = vunpack.i.l.bf16 %v11390_v47 }
 0x28b   : > { %8839 = vrot.lane.b32.xlu1 %v11300_v36, %s12664_s22  ;;  %v4170_v36 = vsel %vm1901_vm1, %v2826_v25, %v8506_v16  ;;  %v8537_v44 = vunpack.i.h.bf16 %v11393_v14  ;;  %v8536_v22 = vunpack.i.l.bf16 %v11393_v14 }
 0x28c   : > { %8824 = vrot.lane.b32.xlu0 %v8823_v49, %s12670_s24  ;;  %v4206_v24 = vsel %vm549_vm2, %v4170_v36, %v8521_v21  ;;  %v4315_v4 = vsel %vm2048_vm5, %v4279_v33, %v8552_v63  ;;  %v2991_v36 = vld [vmem:[#allocation2 + $0xe4] sm:$0xff]  ;;  %v3066_v33 = vld [vmem:[#allocation2 + $0xf6] sm:$0xff] }
 0x28d   : > { %v8560_v54 = vpop.permute.xlu1 %8559  ;;  %v4242_v38 = vsel %vm1974_vm3, %v4206_v24, %v8531_v50  ;;  %v4244_v3 = vsel %vm1974_vm3, %v4208_v13, %v8536_v22  ;;  %v4245_v50 = vsel %vm1974_vm3, %v4209_v23, %v8537_v44  ;;  %v8878_v20 = vpack.i.bf16 %v2992_v40, %v2991_v36  ;;  %v3031_v13 = vld [vmem:[#allocation2 + $0xfd] sm:$0xff] }
 0x28e   : > { %v11410_v34 = vpop.permute.xlu0 %8544  ;;  %v8562_v9 = vunpack.i.h.bf16 %v8560_v54  ;;  %v8561_v43 = vunpack.i.l.bf16 %v8560_v54  ;;  %v4278_v8 = vsel %vm2011_vm4, %v4242_v38, %v8541_v11  ;;  %v11494_v40 = vld [vmem:[#allocation2 + $0x103] sm:$0xff] }
 0x28f   : > { %8849 = vrot.lane.b32.xlu1 %v8848_v26, %s12665_s19  ;;  %v4314_v5 = vsel %vm2048_vm5, %v4278_v8, %v8551_v0  ;;  %v8547_v32 = vunpack.i.h.bf16 %v11410_v34  ;;  %v8546_v16 = vunpack.i.l.bf16 %v11410_v34 }
 0x290   : > { %8834 = vrot.lane.b32.xlu0 %v8833_v31, %s12670_s24  ;;  %v4350_v62 = vsel %vm2085_vm6, %v4314_v5, %v8561_v43  ;;  %v4351_v15 = vsel %vm2085_vm6, %v4315_v4, %v8562_v9  ;;  %v2993_v9 = vld [vmem:[#allocation2 + $0xf4] sm:$0xff]  ;;  %v8898_v43 = vpack.i.bf16 %v3065_v56, %v3064_v17  ;;  %v2882_v4 = vld [vmem:[#allocation2 + $0xe1] sm:$0xff] }
 0x291   : > { %v8570_v2 = vpop.permute.xlu1 %8569  ;;  %v4280_v55 = vsel %vm2011_vm4, %v4244_v3, %v8546_v16  ;;  %v11477_v8 = vpack.i.bf16 %v2994_v10, %v2993_v9  ;;  %v2922_v3 = vld [vmem:[#allocation2 + $0x102] sm:$0xff] }
 0x292   : > { %v8555_v53 = vpop.permute.xlu0 %8554  ;;  %v8572_v6 = vunpack.i.h.bf16 %v8570_v2  ;;  %v8571_v12 = vunpack.i.l.bf16 %v8570_v2 }
 0x293   : > { %8859 = vrot.lane.b32.xlu1 %v8858_v35, %s12666_s1  ;;  %v8557_v21 = vunpack.i.h.bf16 %v8555_v53  ;;  %v8556_v25 = vunpack.i.l.bf16 %v8555_v53  ;;  %v3029_v35 = vld [vmem:[#allocation2 + $0xed] sm:$0xff] }
 0x294   : > { %8844 = vrot.lane.b32.xlu0 %v8848_v26, %s12664_s22  ;;  %v4386_v14 = vsel %vm2122_vm7, %v4350_v62, %v8571_v12  ;;  %v4387_v27 = vsel %vm2122_vm7, %v4351_v15, %v8572_v6  ;;  %v8888_v61 = vpack.i.bf16 %v3029_v35, %v3028_v45  ;;  %v3067_v6 = vld [vmem:[#allocation2 + $0xfe] sm:$0xff]  ;;  %v3030_v12 = vld [vmem:[#allocation2 + $0xf5] sm:$0xff]  ;;  %v2883_v15 = vld [vmem:[#allocation2 + $0xe9] sm:$0xff] }
 0x295   : > { %v8580_v47 = vpop.permute.xlu1 %8579  ;;  %v4316_v1 = vsel %vm2048_vm5, %v4280_v55, %v8556_v25  ;;  %v8908_v44 = vpack.i.bf16 %v3067_v6, %v3066_v33  ;;  %v8893_v5 = vpack.i.bf16 %v3031_v13, %v3030_v12  ;;  %v2884_v55 = vld [vmem:[#allocation2 + $0xf1] sm:$0xff] }
 0x296   : > { %v8582_v49 = vunpack.i.h.bf16 %v8580_v47  ;;  %v8581_v39 = vunpack.i.l.bf16 %v8580_v47  ;;  %v8565_v19 = vpop.permute.xlu0 %8564 }
 0x297   : > { %8869 = vrot.lane.b32.xlu1 %v11368_v52, %s12667_s25  ;;  %v8567_v46 = vunpack.i.h.bf16 %v8565_v19  ;;  %v8566_v60 = vunpack.i.l.bf16 %v8565_v19  ;;  %v4281_v52 = vsel %vm2011_vm4, %v4245_v50, %v8547_v32  ;;  %v11488_v32 = vld [vmem:[#allocation2 + $0x10b] sm:$0xff]  ;;  %v8903_v19 = vpack.i.bf16 %v2883_v15, %v2882_v4 }
 0x298   : > { %v4422_v18 = vsel %vm2159_vm8, %v4386_v14, %v8581_v39  ;;  %v4423_v26 = vsel %vm2159_vm8, %v4387_v27, %v8582_v49  ;;  %8854 = vrot.lane.b32.xlu0 %v11415_v30, %s12665_s19  ;;  %v4317_v37 = vsel %vm2048_vm5, %v4281_v52, %v8557_v21  ;;  %v2921_v49 = vld [vmem:[#allocation2 + $0xfa] sm:$0xff]  ;;  %v2920_v14 = vld [vmem:[#allocation2 + $0xf2] sm:$0xff]  ;;  %v8943_v25 = vpack.i.bf16 %v11488_v32, %v11494_v40  ;;  %v3068_v40 = vld [vmem:[#allocation2 + $0x106] sm:$0xff] }
 0x299   : > { %v8590_v54 = vpop.permute.xlu1 %8589  ;;  %v4454_v57 = vpack.c.bf16 %v4423_v26, %v4422_v18  ;;  %v4352_v41 = vsel %vm2085_vm6, %v4316_v1, %v8566_v60  ;;  %v4353_v42 = vsel %vm2085_vm6, %v4317_v37, %v8567_v46  ;;  %v2885_v27 = vld [vmem:[#allocation2 + $0xf9] sm:$0xff]  ;;  %v2831_v60 = vld [vmem:[#allocation2 + $0x68] sm:$0xff]  ;;  %v8928_v36 = vpack.i.bf16 %v2921_v49, %v2920_v14 }
 0x29a   : > { %v8592_v28 = vunpack.i.h.bf16 %v8590_v54  ;;  %v8591_v34 = vunpack.i.l.bf16 %v8590_v54  ;;  %v8575_v31 = vpop.permute.xlu0 %8574  ;;  %v2958_v21 = vld [vmem:[#allocation2 + $0xfb] sm:$0xff]  ;;  %v2957_v52 = vld [vmem:[#allocation2 + $0xf3] sm:$0xff]  ;;  %v8913_v35 = vpack.i.bf16 %v2885_v27, %v2884_v55  ;;  %v2923_v37 = vld [vmem:[#allocation2 + $0x10a] sm:$0xff] }
 0x29b   : > { %v8577_v11 = vunpack.i.h.bf16 %v8575_v31  ;;  %v8576_v24 = vunpack.i.l.bf16 %v8575_v31  ;;  %8879 = vrot.lane.b32.xlu1 %v8878_v20, %s12668_s28  ;;  %7445 = vmatprep.mubr.msk.bf16.mxu1 %vm2257_vm9, %v4454_v57  ;;  %v2830_v46 = vld [vmem:[#allocation2 + $0x60] sm:$0xff]  ;;  %v8938_v1 = vpack.i.bf16 %v2958_v21, %v2957_v52  ;;  %v2996_v21 = vld [vmem:[#allocation2 + $0x10c] sm:$0xff] }
 0x29c   : > { %8864 = vrot.lane.b32.xlu0 %v8863_v59, %s12666_s1  ;;  %v2998_v32 = vld [vmem:[#allocation2 + $0x11c] sm:$0xff] }
 0x29d   : > { %v4388_v38 = vsel %vm2122_vm7, %v4352_v41, %v8576_v24  ;;  %v4389_v51 = vsel %vm2122_vm7, %v4353_v42, %v8577_v11  ;;  %v11466_v58 = vpop.permute.xlu1 %8599  ;;  %v11514_v41 = vpack.i.bf16 %v2923_v37, %v2922_v3 }
 0x29e   : > { %v8585_v63 = vpop.permute.xlu0 %8584  ;;  %v4424_v0 = vsel %vm2159_vm8, %v4388_v38, %v8591_v34  ;;  %v4425_v2 = vsel %vm2159_vm8, %v4389_v51, %v8592_v28  ;;  %v8602_v18 = vunpack.i.h.bf16 %v11466_v58  ;;  %v8601_v26 = vunpack.i.l.bf16 %v11466_v58 }
 0x29f   : > { %8889 = vrot.lane.b32.xlu1 %v8888_v61, %s12669_s0  ;;  %v4455_v7 = vpack.c.bf16 %v4425_v2, %v4424_v0  ;;  %v8587_v16 = vunpack.i.h.bf16 %v8585_v63  ;;  %v8586_v47 = vunpack.i.l.bf16 %v8585_v63  ;;  %v2832_v63 = vld [vmem:[#allocation2 + $0x70] sm:$0xff]  ;;  %v2833_v0 = vld [vmem:[#allocation2 + $0x78] sm:$0xff] }
 0x2a0   : > { %8874 = vrot.lane.b32.xlu0 %v8878_v20, %s12667_s25 }
 0x2a1   : > { %7446 = vmatmul.mubr.msk.bf16.gmra.mxu1 %vm2257_vm9, %v4455_v7  ;;  %v11473_v59 = vpop.permute.xlu1 %8609  ;;  %v4175_v50 = vsel %vm1901_vm1, %v2831_v60, %v8587_v16 }
 0x2a2   : > { %v11475_v53 = vpop.permute.xlu0 %8594  ;;  %v8612_v54 = vunpack.i.h.bf16 %v11473_v59  ;;  %v8611_v20 = vunpack.i.l.bf16 %v11473_v59  ;;  %v4211_v45 = vsel %vm549_vm2, %v4175_v50, %v8602_v18 }
 0x2a3   : > { %8899 = vrot.lane.b32.xlu1 %v8898_v43, %s12671_s23  ;;  %v8597_v28 = vunpack.i.h.bf16 %v11475_v53  ;;  %v8596_v34 = vunpack.i.l.bf16 %v11475_v53 }
 0x2a4   : > { %8884 = vrot.lane.b32.xlu0 %v11477_v8, %s12668_s28  ;;  %v4247_v61 = vsel %vm1974_vm3, %v4211_v45, %v8612_v54 }
 0x2a5   : > { %v11482_v23 = vpop.permute.xlu1 %8619  ;;  %v4177_v9 = vsel %vm1901_vm1, %v2833_v0, %v8597_v28  ;;  %v4176_v10 = vsel %vm1901_vm1, %v2832_v63, %v8596_v34 }
 0x2a6   : > { %v11484_v22 = vpop.permute.xlu0 %8604  ;;  %v8622_v11 = vunpack.i.h.bf16 %v11482_v23  ;;  %v8621_v24 = vunpack.i.l.bf16 %v11482_v23 }
 0x2a7   : > { %8909 = vrot.lane.b32.xlu1 %v8908_v44, %s12671_s23  ;;  %v8607_v38 = vunpack.i.h.bf16 %v11484_v22  ;;  %v8606_v51 = vunpack.i.l.bf16 %v11484_v22 }
 0x2a8   : > { %8894 = vrot.lane.b32.xlu0 %v8893_v5, %s12669_s0  ;;  %v4283_v33 = vsel %vm2011_vm4, %v4247_v61, %v8622_v11 }
 0x2a9   : > { %v11490_v62 = vpop.permute.xlu1 %8629  ;;  %v4212_v13 = vsel %vm549_vm2, %v4176_v10, %v8606_v51  ;;  %v4213_v23 = vsel %vm549_vm2, %v4177_v9, %v8607_v38  ;;  %v3032_v51 = vld [vmem:[#allocation2 + $0x105] sm:$0xff]  ;;  %v3069_v9 = vld [vmem:[#allocation2 + $0x10e] sm:$0xff] }
 0x2aa   : > { %v11492_v39 = vpop.permute.xlu0 %8614  ;;  %v8632_v2 = vunpack.i.h.bf16 %v11490_v62  ;;  %v8631_v56 = vunpack.i.l.bf16 %v11490_v62 }
 0x2ab   : > { %8919 = vrot.lane.b32.xlu1 %v11415_v30, %s12664_s22  ;;  %v4174_v30 = vsel %vm1901_vm1, %v2830_v46, %v8586_v47  ;;  %v8617_v44 = vunpack.i.h.bf16 %v11492_v39  ;;  %v8616_v22 = vunpack.i.l.bf16 %v11492_v39 }
 0x2ac   : > { %8904 = vrot.lane.b32.xlu0 %v8903_v19, %s12670_s24  ;;  %v4210_v42 = vsel %vm549_vm2, %v4174_v30, %v8601_v26  ;;  %v4319_v4 = vsel %vm2048_vm5, %v4283_v33, %v8632_v2  ;;  %v2995_v30 = vld [vmem:[#allocation2 + $0x104] sm:$0xff]  ;;  %v3070_v33 = vld [vmem:[#allocation2 + $0x116] sm:$0xff] }
 0x2ad   : > { %v8640_v57 = vpop.permute.xlu1 %8639  ;;  %v4246_v58 = vsel %vm1974_vm3, %v4210_v42, %v8611_v20  ;;  %v4248_v54 = vsel %vm1974_vm3, %v4212_v13, %v8616_v22  ;;  %v4249_v20 = vsel %vm1974_vm3, %v4213_v23, %v8617_v44  ;;  %v8958_v55 = vpack.i.bf16 %v2996_v21, %v2995_v30  ;;  %v3035_v13 = vld [vmem:[#allocation2 + $0x11d] sm:$0xff] }
 0x2ae   : > { %v11509_v31 = vpop.permute.xlu0 %8624  ;;  %v8642_v17 = vunpack.i.h.bf16 %v8640_v57  ;;  %v8641_v59 = vunpack.i.l.bf16 %v8640_v57  ;;  %v4282_v53 = vsel %vm2011_vm4, %v4246_v58, %v8621_v24 }
 0x2af   : > { %8929 = vrot.lane.b32.xlu1 %v8928_v36, %s12665_s19  ;;  %v4318_v5 = vsel %vm2048_vm5, %v4282_v53, %v8631_v56  ;;  %v8627_v16 = vunpack.i.h.bf16 %v11509_v31  ;;  %v8626_v47 = vunpack.i.l.bf16 %v11509_v31 }
 0x2b0   : > { %8914 = vrot.lane.b32.xlu0 %v8913_v35, %s12670_s24  ;;  %v4354_v15 = vsel %vm2085_vm6, %v4318_v5, %v8641_v59  ;;  %v4355_v49 = vsel %vm2085_vm6, %v4319_v4, %v8642_v17  ;;  %v2997_v17 = vld [vmem:[#allocation2 + $0x114] sm:$0xff]  ;;  %v8978_v59 = vpack.i.bf16 %v3069_v9, %v3068_v40  ;;  %v2886_v4 = vld [vmem:[#allocation2 + $0x101] sm:$0xff] }
 0x2b1   : > { %v8650_v7 = vpop.permute.xlu1 %8649  ;;  %v4284_v28 = vsel %vm2011_vm4, %v4248_v54, %v8626_v47  ;;  %v11576_v53 = vpack.i.bf16 %v2998_v32, %v2997_v17  ;;  %v11589_v47 = vld [vmem:[#allocation2 + $0x12c] sm:$0xff]  ;;  %v2925_v54 = vld [vmem:[#allocation2 + $0x11a] sm:$0x3f] }
 0x2b2   : > { %v8635_v43 = vpop.permute.xlu0 %8634  ;;  %v8652_v6 = vunpack.i.h.bf16 %v8650_v7  ;;  %v8651_v12 = vunpack.i.l.bf16 %v8650_v7  ;;  %v2837_v9 = vld [vmem:[#allocation2 + $0x98] sm:$0xff] }
 0x2b3   : > { %8939 = vrot.lane.b32.xlu1 %v8938_v1, %s12666_s1  ;;  %v8637_v26 = vunpack.i.h.bf16 %v8635_v43  ;;  %v8636_v46 = vunpack.i.l.bf16 %v8635_v43  ;;  %v3033_v1 = vld [vmem:[#allocation2 + $0x10d] sm:$0xff] }
 0x2b4   : > { %8924 = vrot.lane.b32.xlu0 %v8928_v36, %s12664_s22  ;;  %v4390_v39 = vsel %vm2122_vm7, %v4354_v15, %v8651_v12  ;;  %v4391_v18 = vsel %vm2122_vm7, %v4355_v49, %v8652_v6  ;;  %v8968_v0 = vpack.i.bf16 %v3033_v1, %v3032_v51  ;;  %v3071_v6 = vld [vmem:[#allocation2 + $0x11e] sm:$0xff]  ;;  %v3034_v12 = vld [vmem:[#allocation2 + $0x115] sm:$0xff] }
 0x2b5   : > { %v8660_v62 = vpop.permute.xlu1 %8659  ;;  %v4320_v37 = vsel %vm2048_vm5, %v4284_v28, %v8636_v46  ;;  %v8988_v44 = vpack.i.bf16 %v3071_v6, %v3070_v33  ;;  %v8973_v5 = vpack.i.bf16 %v3035_v13, %v3034_v12  ;;  %v2962_v46 = vld [vmem:[#allocation2 + $0x11b] sm:$0xff] }
 0x2b6   : > { %v8662_v19 = vunpack.i.h.bf16 %v8660_v62  ;;  %v8661_v14 = vunpack.i.l.bf16 %v8660_v62  ;;  %v8645_v27 = vpop.permute.xlu0 %8644 }
 0x2b7   : > { %8949 = vrot.lane.b32.xlu1 %v11477_v8, %s12667_s25  ;;  %v8647_v3 = vunpack.i.h.bf16 %v8645_v27  ;;  %v8646_v50 = vunpack.i.l.bf16 %v8645_v27  ;;  %v4285_v8 = vsel %vm2011_vm4, %v4249_v20, %v8627_v16  ;;  %v11587_v16 = vld [vmem:[#allocation2 + $0x124] sm:$0xff] }
 0x2b8   : > { %v4426_v60 = vsel %vm2159_vm8, %v4390_v39, %v8661_v14  ;;  %v4427_v36 = vsel %vm2159_vm8, %v4391_v18, %v8662_v19  ;;  %8934 = vrot.lane.b32.xlu0 %v11514_v41, %s12665_s19  ;;  %v4321_v11 = vsel %vm2048_vm5, %v4285_v8, %v8637_v26  ;;  %v2887_v19 = vld [vmem:[#allocation2 + $0x109] sm:$0xff]  ;;  %v2926_v14 = vld [vmem:[#allocation2 + $0x11a] sm:$0xff]  ;;  %v2924_v18 = vld [vmem:[#allocation2 + $0x112] sm:$0xff] }
 0x2b9   : > { %v8670_v57 = vpop.permute.xlu1 %8669  ;;  %v4456_v52 = vpack.c.bf16 %v4427_v36, %v4426_v60  ;;  %v4356_v45 = vsel %vm2085_vm6, %v4320_v37, %v8646_v50  ;;  %v4357_v38 = vsel %vm2085_vm6, %v4321_v11, %v8647_v3  ;;  %v2834_v27 = vld [vmem:[#allocation2 + $0x80] sm:$0xff]  ;;  %v8983_v39 = vpack.i.bf16 %v2887_v19, %v2886_v4  ;;  %v2889_v26 = vld [vmem:[#allocation2 + $0x119] sm:$0x3f]  ;;  %v2835_v50 = vld [vmem:[#allocation2 + $0x88] sm:$0xff] }
 0x2ba   : > { %v8672_v34 = vunpack.i.h.bf16 %v8670_v57  ;;  %v8671_v31 = vunpack.i.l.bf16 %v8670_v57  ;;  %v8655_v35 = vpop.permute.xlu0 %8654  ;;  %v9038_v60 = vpack.i.bf16 %v11589_v47, %v11587_v16  ;;  %v9008_v30 = vpack.i.bf16 %v2926_v14, %v2924_v18  ;;  %v11602_v20 = vld [vmem:[#allocation2 + $0x122] sm:$0xff]  ;;  %v2888_v8 = vld [vmem:[#allocation2 + $0x111] sm:$0xff] }
 0x2bb   : > { %v8657_v24 = vunpack.i.h.bf16 %v8655_v35  ;;  %v8656_v42 = vunpack.i.l.bf16 %v8655_v35  ;;  %8959 = vrot.lane.b32.xlu1 %v8958_v55, %s12668_s28  ;;  %7449 = vmatprep.mubr.msk.bf16.mxu1 %vm2257_vm9, %v4456_v52  ;;  %v8993_v37 = vpack.i.bf16 %v2889_v26, %v2888_v8 }
 0x2bc   : > { %8944 = vrot.lane.b32.xlu0 %v8943_v25, %s12666_s1 }
 0x2bd   : > { %v4392_v58 = vsel %vm2122_vm7, %v4356_v45, %v8656_v42  ;;  %v4393_v61 = vsel %vm2122_vm7, %v4357_v38, %v8657_v24  ;;  %v11565_v63 = vpop.permute.xlu1 %8679  ;;  %v2928_v24 = vld [vmem:[#allocation2 + $0x12a] sm:$0x3f]  ;;  %v9003_v38 = vpack.i.bf16 %v2925_v54, %v2924_v18 }
 0x2be   : > { %v8665_v2 = vpop.permute.xlu0 %8664  ;;  %v4428_v56 = vsel %vm2159_vm8, %v4392_v58, %v8671_v31  ;;  %v4429_v7 = vsel %vm2159_vm8, %v4393_v61, %v8672_v34  ;;  %v8682_v36 = vunpack.i.h.bf16 %v11565_v63  ;;  %v8681_v3 = vunpack.i.l.bf16 %v11565_v63  ;;  %v2961_v34 = vld [vmem:[#allocation2 + $0x113] sm:$0xff] }
 0x2bf   : > { %8969 = vrot.lane.b32.xlu1 %v8968_v0, %s12669_s0  ;;  %v4457_v10 = vpack.c.bf16 %v4429_v7, %v4428_v56  ;;  %v8667_v62 = vunpack.i.h.bf16 %v8665_v2  ;;  %v8666_v15 = vunpack.i.l.bf16 %v8665_v2  ;;  %v9018_v11 = vpack.i.bf16 %v2962_v46, %v2961_v34  ;;  %v2836_v7 = vld [vmem:[#allocation2 + $0x90] sm:$0xff] }
 0x2c0   : > { %8954 = vrot.lane.b32.xlu0 %v8958_v55, %s12667_s25  ;;  %v9013_v51 = vpack.i.bf16 %v2928_v24, %v11602_v20  ;;  %v3036_v24 = vld [vmem:[#allocation2 + $0x125] sm:$0xff] }
 0x2c1   : > { %7450 = vmatmul.mubr.msk.bf16.gmra.mxu1 %vm2257_vm9, %v4457_v10  ;;  %v11572_v25 = vpop.permute.xlu1 %8689  ;;  %v4179_v57 = vsel %vm1901_vm1, %v2835_v50, %v8667_v62 }
 0x2c2   : > { %v11574_v43 = vpop.permute.xlu0 %8674  ;;  %v8692_v55 = vunpack.i.h.bf16 %v11572_v25  ;;  %v8691_v52 = vunpack.i.l.bf16 %v11572_v25  ;;  %v4215_v61 = vsel %vm549_vm2, %v4179_v57, %v8682_v36  ;;  %v2964_v36 = vld [vmem:[#allocation2 + $0x12b] sm:$0x3f] }
 0x2c3   : > { %8979 = vrot.lane.b32.xlu1 %v8978_v59, %s12671_s23  ;;  %v8677_v31 = vunpack.i.h.bf16 %v11574_v43  ;;  %v8676_v35 = vunpack.i.l.bf16 %v11574_v43 }
 0x2c4   : > { %8964 = vrot.lane.b32.xlu0 %v11576_v53, %s12668_s28  ;;  %v4251_v56 = vsel %vm1974_vm3, %v4215_v61, %v8692_v55  ;;  %v2963_v55 = vld [vmem:[#allocation2 + $0x123] sm:$0xff]  ;;  %v3000_v61 = vld [vmem:[#allocation2 + $0x12c] sm:$0x3f] }
 0x2c5   : > { %v11581_v23 = vpop.permute.xlu1 %8699  ;;  %v4181_v40 = vsel %vm1901_vm1, %v2837_v9, %v8677_v31  ;;  %v4180_v25 = vsel %vm1901_vm1, %v2836_v7, %v8676_v35  ;;  %v9023_v34 = vpack.i.bf16 %v2964_v36, %v2963_v55  ;;  %v9033_v47 = vpack.i.bf16 %v3000_v61, %v11587_v16 }
 0x2c6   : > { %v11583_v22 = vpop.permute.xlu0 %8684  ;;  %v8702_v42 = vunpack.i.h.bf16 %v11581_v23  ;;  %v8701_v45 = vunpack.i.l.bf16 %v11581_v23 }
 0x2c7   : > { %8989 = vrot.lane.b32.xlu1 %v8988_v44, %s12671_s23  ;;  %v8687_v63 = vunpack.i.h.bf16 %v11583_v22  ;;  %v8686_v0 = vunpack.i.l.bf16 %v11583_v22 }
 0x2c8   : > { %8974 = vrot.lane.b32.xlu0 %v8973_v5, %s12669_s0  ;;  %v4287_v12 = vsel %vm2011_vm4, %v4251_v56, %v8702_v42  ;;  %v3037_v42 = vld [vmem:[#allocation2 + $0x12d] sm:$0xff] }
 0x2c9   : > { %v11591_v49 = vpop.permute.xlu1 %8709  ;;  %v4216_v44 = vsel %vm549_vm2, %v4180_v25, %v8686_v0  ;;  %v4217_v22 = vsel %vm549_vm2, %v4181_v40, %v8687_v63  ;;  %v9048_v9 = vpack.i.bf16 %v3037_v42, %v3036_v24  ;;  %v3072_v25 = vld [vmem:[#allocation2 + $0x126] sm:$0xff] }
 0x2ca   : > { %v11593_v21 = vpop.permute.xlu0 %8694  ;;  %v8712_v10 = vunpack.i.h.bf16 %v11591_v49  ;;  %v8711_v17 = vunpack.i.l.bf16 %v11591_v49 }
 0x2cb   : > { %8999 = vrot.lane.b32.xlu1 %v11514_v41, %s12664_s22  ;;  %v4178_v41 = vsel %vm1901_vm1, %v2834_v27, %v8666_v15  ;;  %v8697_v5 = vunpack.i.h.bf16 %v11593_v21  ;;  %v8696_v4 = vunpack.i.l.bf16 %v11593_v21 }
 0x2cc   : > { %8984 = vrot.lane.b32.xlu0 %v8983_v39, %s12670_s24  ;;  %v4214_v58 = vsel %vm549_vm2, %v4178_v41, %v8681_v3  ;;  %v4323_v15 = vsel %vm2048_vm5, %v4287_v12, %v8712_v10  ;;  %v3002_v10 = vld [vmem:[#allocation2 + $0x134] sm:$0xff] }
 0x2cd   : > { %v8720_v28 = vpop.permute.xlu1 %8719  ;;  %v4250_v2 = vsel %vm1974_vm3, %v4214_v58, %v8691_v52  ;;  %v4252_v52 = vsel %vm1974_vm3, %v4216_v44, %v8696_v4  ;;  %v3075_v4 = vld [vmem:[#allocation2 + $0x13e] sm:$0x3f] }
 0x2ce   : > { %v11610_v1 = vpop.permute.xlu0 %8704  ;;  %v8722_v59 = vunpack.i.h.bf16 %v8720_v28  ;;  %v8721_v43 = vunpack.i.l.bf16 %v8720_v28  ;;  %v4286_v6 = vsel %vm2011_vm4, %v4250_v2, %v8701_v45  ;;  %v4253_v28 = vsel %vm1974_vm3, %v4217_v22, %v8697_v5  ;;  %v3074_v5 = vld [vmem:[#allocation2 + $0x136] sm:$0xff] }
 0x2cf   : > { %9009 = vrot.lane.b32.xlu1 %v9008_v30, %s12665_s19  ;;  %v4322_v62 = vsel %vm2048_vm5, %v4286_v6, %v8711_v17  ;;  %v8707_v49 = vunpack.i.h.bf16 %v11610_v1  ;;  %v8706_v19 = vunpack.i.l.bf16 %v11610_v1  ;;  %v3003_v17 = vld [vmem:[#allocation2 + $0x13c] sm:$0x3f] }
 0x2d0   : > { %8994 = vrot.lane.b32.xlu0 %v8993_v37, %s12670_s24  ;;  %v4358_v27 = vsel %vm2085_vm6, %v4322_v62, %v8721_v43  ;;  %v4359_v39 = vsel %vm2085_vm6, %v4323_v15, %v8722_v59  ;;  %v3073_v59 = vld [vmem:[#allocation2 + $0x12e] sm:$0xff]  ;;  %v9063_v15 = vpack.i.bf16 %v3075_v4, %v3074_v5 }
 0x2d1   : > { %v8730_v32 = vpop.permute.xlu1 %8729  ;;  %v4288_v35 = vsel %vm2011_vm4, %v4252_v52, %v8706_v19  ;;  %v9058_v12 = vpack.i.bf16 %v3073_v59, %v3072_v25 }
 0x2d2   : > { %v8715_v33 = vpop.permute.xlu0 %8714  ;;  %v8732_v13 = vunpack.i.h.bf16 %v8730_v32  ;;  %v8731_v23 = vunpack.i.l.bf16 %v8730_v32 }
 0x2d3   : > { %9019 = vrot.lane.b32.xlu1 %v9018_v11, %s12666_s1  ;;  %v8717_v50 = vunpack.i.h.bf16 %v8715_v33  ;;  %v8716_v30 = vunpack.i.l.bf16 %v8715_v33  ;;  %v9043_v33 = vpack.i.bf16 %v3003_v17, %v3002_v10 }
 0x2d4   : > { %9004 = vrot.lane.b32.xlu0 %v9003_v38, %s12664_s22  ;;  %v4394_v21 = vsel %vm2122_vm7, %v4358_v27, %v8731_v23  ;;  %v4395_v3 = vsel %vm2122_vm7, %v4359_v39, %v8732_v13  ;;  %v3038_v13 = vld [vmem:[#allocation2 + $0x135] sm:$0xff]  ;;  %v3039_v23 = vld [vmem:[#allocation2 + $0x13d] sm:$0x3f] }
 0x2d5   : > { %v8740_v14 = vpop.permute.xlu1 %8739  ;;  %v4324_v45 = vsel %vm2048_vm5, %v4288_v35, %v8716_v30  ;;  %v9053_v16 = vpack.i.bf16 %v3039_v23, %v3038_v13 }
 0x2d6   : > { %v8742_v18 = vunpack.i.h.bf16 %v8740_v14  ;;  %v8741_v26 = vunpack.i.l.bf16 %v8740_v14  ;;  %v8725_v46 = vpop.permute.xlu0 %8724 }
 0x2d7   : > { %9029 = vrot.lane.b32.xlu1 %v11576_v53, %s12667_s25  ;;  %v8727_v57 = vunpack.i.h.bf16 %v8725_v46  ;;  %v8726_v41 = vunpack.i.l.bf16 %v8725_v46  ;;  %v4289_v53 = vsel %vm2011_vm4, %v4253_v28, %v8707_v49  ;;  %v2839_v46 = vld [vmem:[#allocation2 + $0xa8] sm:$0xff] }
 0x2d8   : > { %v4430_v54 = vsel %vm2159_vm8, %v4394_v21, %v8741_v26  ;;  %v4431_v20 = vsel %vm2159_vm8, %v4395_v3, %v8742_v18  ;;  %9014 = vrot.lane.b32.xlu0 %v9013_v51, %s12665_s19  ;;  %v4325_v38 = vsel %vm2048_vm5, %v4289_v53, %v8717_v50  ;;  %v2838_v26 = vld [vmem:[#allocation2 + $0xa0] sm:$0xff]  ;;  %v2840_v53 = vld [vmem:[#allocation2 + $0xb0] sm:$0xff] }
 0x2d9   : > { %v8750_v8 = vpop.permute.xlu1 %8749  ;;  %v4458_v31 = vpack.c.bf16 %v4431_v20, %v4430_v54  ;;  %v4360_v63 = vsel %vm2085_vm6, %v4324_v45, %v8726_v41  ;;  %v4361_v0 = vsel %vm2085_vm6, %v4325_v38, %v8727_v57 }
 0x2da   : > { %v8752_v1 = vunpack.i.h.bf16 %v8750_v8  ;;  %v8751_v37 = vunpack.i.l.bf16 %v8750_v8  ;;  %v8735_v11 = vpop.permute.xlu0 %8734 }
 0x2db   : > { %v8737_v51 = vunpack.i.h.bf16 %v8735_v11  ;;  %v8736_v58 = vunpack.i.l.bf16 %v8735_v11  ;;  %9039 = vrot.lane.b32.xlu1 %v9038_v60, %s12668_s28  ;;  %7453 = vmatprep.mubr.msk.bf16.mxu1 %vm2257_vm9, %v4458_v31 }
 0x2dc   : > { %9024 = vrot.lane.b32.xlu0 %v9023_v34, %s12666_s1 }
 0x2dd   : > { %v4396_v2 = vsel %vm2122_vm7, %v4360_v63, %v8736_v58  ;;  %v4397_v56 = vsel %vm2122_vm7, %v4361_v0, %v8737_v51  ;;  %v8760_v7 = vpop.permute.xlu1 %8759 }
 0x2de   : > { %v8745_v32 = vpop.permute.xlu0 %8744  ;;  %v4432_v60 = vsel %vm2159_vm8, %v4396_v2, %v8751_v37  ;;  %v4433_v40 = vsel %vm2159_vm8, %v4397_v56, %v8752_v1  ;;  %v8762_v39 = vunpack.i.h.bf16 %v8760_v7  ;;  %v8761_v18 = vunpack.i.l.bf16 %v8760_v7  ;;  %v2841_v1 = vld [vmem:[#allocation2 + $0xb8] sm:$0xff] }
 0x2df   : > { %9049 = vrot.lane.b32.xlu1 %v9048_v9, %s12669_s0  ;;  %v4459_v43 = vpack.c.bf16 %v4433_v40, %v4432_v60  ;;  %v8747_v49 = vunpack.i.h.bf16 %v8745_v32  ;;  %v8746_v19 = vunpack.i.l.bf16 %v8745_v32 }
 0x2e0   : > { %9034 = vrot.lane.b32.xlu0 %v9033_v47, %s12667_s25 }
 0x2e1   : > { %7454 = vmatmul.mubr.msk.bf16.gmra.mxu1 %vm2257_vm9, %v4459_v43  ;;  %v8770_v6 = vpop.permute.xlu1 %8769  ;;  %v4183_v36 = vsel %vm1901_vm1, %v2839_v46, %v8747_v49  ;;  %v4182_v21 = vsel %vm1901_vm1, %v2838_v26, %v8746_v19 }
 0x2e2   : > { %v8755_v44 = vpop.permute.xlu0 %8754  ;;  %v8772_v3 = vunpack.i.h.bf16 %v8770_v6  ;;  %v8771_v50 = vunpack.i.l.bf16 %v8770_v6  ;;  %v4218_v52 = vsel %vm549_vm2, %v4182_v21, %v8761_v18  ;;  %v4219_v28 = vsel %vm549_vm2, %v4183_v36, %v8762_v39 }
 0x2e3   : > { %9059 = vrot.lane.b32.xlu1 %v9058_v12, %s12671_s23  ;;  %v8757_v54 = vunpack.i.h.bf16 %v8755_v44  ;;  %v8756_v20 = vunpack.i.l.bf16 %v8755_v44 }
 0x2e4   : > { %9044 = vrot.lane.b32.xlu0 %v9043_v33, %s12668_s28  ;;  %v4254_v31 = vsel %vm1974_vm3, %v4218_v52, %v8771_v50  ;;  %v4255_v35 = vsel %vm1974_vm3, %v4219_v28, %v8772_v3 }
 0x2e5   : > { %v8780_v22 = vpop.permute.xlu1 %8779  ;;  %v4185_v42 = vsel %vm1901_vm1, %v2841_v1, %v8757_v54  ;;  %v4184_v45 = vsel %vm1901_vm1, %v2840_v53, %v8756_v20 }
 0x2e6   : > { %v8765_v62 = vpop.permute.xlu0 %8764  ;;  %v8782_v41 = vunpack.i.h.bf16 %v8780_v22  ;;  %v8781_v55 = vunpack.i.l.bf16 %v8780_v22 }
 0x2e7   : > { %v8767_v8 = vunpack.i.h.bf16 %v8765_v62  ;;  %v8766_v34 = vunpack.i.l.bf16 %v8765_v62 }
 0x2e8   : > { %9054 = vrot.lane.b32.xlu0 %v9053_v16, %s12669_s0  ;;  %v4290_v61 = vsel %vm2011_vm4, %v4254_v31, %v8781_v55  ;;  %v4291_v63 = vsel %vm2011_vm4, %v4255_v35, %v8782_v41 }
 0x2e9   : > { %v8790_v14 = vpop.permute.xlu1 %8789  ;;  %v4220_v56 = vsel %vm549_vm2, %v4184_v45, %v8766_v34  ;;  %v4221_v7 = vsel %vm549_vm2, %v4185_v42, %v8767_v8  ;;  %v2842_v45 = vld [vmem:[#allocation2 + $0xc0] sm:$0xff] }
 0x2ea   : > { %v8775_v27 = vpop.permute.xlu0 %8774  ;;  %v8792_v37 = vunpack.i.h.bf16 %v8790_v14  ;;  %v8791_v11 = vunpack.i.l.bf16 %v8790_v14 }
 0x2eb   : > { %v8777_v9 = vunpack.i.h.bf16 %v8775_v27  ;;  %v8776_v10 = vunpack.i.l.bf16 %v8775_v27 }
 0x2ec   : > { %9064 = vrot.lane.b32.xlu0 %v9063_v15, %s12671_s23  ;;  %v4326_v17 = vsel %vm2048_vm5, %v4290_v61, %v8791_v11  ;;  %v4327_v32 = vsel %vm2048_vm5, %v4291_v63, %v8792_v37 }
 0x2ed   : > { %v8800_v30 = vpop.permute.xlu1 %8799  ;;  %v4256_v62 = vsel %vm1974_vm3, %v4220_v56, %v8776_v10  ;;  %v4257_v15 = vsel %vm1974_vm3, %v4221_v7, %v8777_v9 }
 0x2ee   : > { %v8785_v57 = vpop.permute.xlu0 %8784  ;;  %v8802_v38 = vunpack.i.h.bf16 %v8800_v30  ;;  %v8801_v51 = vunpack.i.l.bf16 %v8800_v30 }
 0x2ef   : > { %v8787_v47 = vunpack.i.h.bf16 %v8785_v57  ;;  %v8786_v60 = vunpack.i.l.bf16 %v8785_v57 }
 0x2f0   : > { %v4362_v25 = vsel %vm2085_vm6, %v4326_v17, %v8801_v51  ;;  %v4363_v59 = vsel %vm2085_vm6, %v4327_v32, %v8802_v38  ;;  %v2843_v38 = vld [vmem:[#allocation2 + $0xc8] sm:$0xff] }
 0x2f1   : > { %v8810_v24 = vpop.permute.xlu1 %8809  ;;  %v4292_v14 = vsel %vm2011_vm4, %v4256_v62, %v8786_v60  ;;  %v4293_v27 = vsel %vm2011_vm4, %v4257_v15, %v8787_v47 }
 0x2f2   : > { %v8795_v58 = vpop.permute.xlu0 %8794  ;;  %v8812_v0 = vunpack.i.h.bf16 %v8810_v24  ;;  %v8811_v2 = vunpack.i.l.bf16 %v8810_v24 }
 0x2f3   : > { %v8797_v23 = vunpack.i.h.bf16 %v8795_v58  ;;  %v8796_v44 = vunpack.i.l.bf16 %v8795_v58 }
 0x2f4   : > { %v4398_v12 = vsel %vm2122_vm7, %v4362_v25, %v8811_v2  ;;  %v4399_v13 = vsel %vm2122_vm7, %v4363_v59, %v8812_v0  ;;  %v2844_v59 = vld [vmem:[#allocation2 + $0xd0] sm:$0xff] }
 0x2f5   : > { %v8820_v40 = vpop.permute.xlu1 %8819  ;;  %v4328_v46 = vsel %vm2048_vm5, %v4292_v14, %v8796_v44  ;;  %v4329_v36 = vsel %vm2048_vm5, %v4293_v27, %v8797_v23 }
 0x2f6   : > { %v8822_v43 = vunpack.i.h.bf16 %v8820_v40  ;;  %v8821_v33 = vunpack.i.l.bf16 %v8820_v40  ;;  %v8805_v6 = vpop.permute.xlu0 %8804 }
 0x2f7   : > { %v8807_v5 = vunpack.i.h.bf16 %v8805_v6  ;;  %v8806_v4 = vunpack.i.l.bf16 %v8805_v6 }
 0x2f8   : > { %v4434_v16 = vsel %vm2159_vm8, %v4398_v12, %v8821_v33  ;;  %v4435_v22 = vsel %vm2159_vm8, %v4399_v13, %v8822_v43  ;;  %v2845_v43 = vld [vmem:[#allocation2 + $0xd8] sm:$0xff] }
 0x2f9   : > { %v8830_v49 = vpop.permute.xlu1 %8829  ;;  %v4460_v19 = vpack.c.bf16 %v4435_v22, %v4434_v16  ;;  %v4364_v50 = vsel %vm2085_vm6, %v4328_v46, %v8806_v4  ;;  %v4365_v30 = vsel %vm2085_vm6, %v4329_v36, %v8807_v5 }
 0x2fa   : > { %v8832_v39 = vunpack.i.h.bf16 %v8830_v49  ;;  %v8831_v18 = vunpack.i.l.bf16 %v8830_v49  ;;  %v8815_v26 = vpop.permute.xlu0 %8814 }
 0x2fb   : > { %v8817_v21 = vunpack.i.h.bf16 %v8815_v26  ;;  %v8816_v3 = vunpack.i.l.bf16 %v8815_v26  ;;  %7457 = vmatprep.mubr.msk.bf16.mxu1 %vm2257_vm9, %v4460_v19 }
 0x2fd   : > { %v4400_v54 = vsel %vm2122_vm7, %v4364_v50, %v8816_v3  ;;  %v4401_v20 = vsel %vm2122_vm7, %v4365_v30, %v8817_v21  ;;  %v8840_v57 = vpop.permute.xlu1 %8839 }
 0x2fe   : > { %v8825_v41 = vpop.permute.xlu0 %8824  ;;  %v4436_v55 = vsel %vm2159_vm8, %v4400_v54, %v8831_v18  ;;  %v4437_v52 = vsel %vm2159_vm8, %v4401_v20, %v8832_v39  ;;  %v8842_v24 = vunpack.i.h.bf16 %v8840_v57  ;;  %v8841_v42 = vunpack.i.l.bf16 %v8840_v57 }
 0x2ff   : > { %v4461_v28 = vpack.c.bf16 %v4437_v52, %v4436_v55  ;;  %v8827_v53 = vunpack.i.h.bf16 %v8825_v41  ;;  %v8826_v1 = vunpack.i.l.bf16 %v8825_v41 }
 0x301   : > { %7458 = vmatmul.mubr.msk.bf16.gmra.mxu1 %vm2257_vm9, %v4461_v28  ;;  %v8850_v8 = vpop.permute.xlu1 %8849  ;;  %v4187_v51 = vsel %vm1901_vm1, %v2843_v38, %v8827_v53  ;;  %v4186_v58 = vsel %vm1901_vm1, %v2842_v45, %v8826_v1 }
 0x302   : > { %v8835_v34 = vpop.permute.xlu0 %8834  ;;  %v8852_v61 = vunpack.i.h.bf16 %v8850_v8  ;;  %v8851_v63 = vunpack.i.l.bf16 %v8850_v8  ;;  %v4222_v17 = vsel %vm549_vm2, %v4186_v58, %v8841_v42  ;;  %v4223_v32 = vsel %vm549_vm2, %v4187_v51, %v8842_v24 }
 0x303   : > { %v8837_v2 = vunpack.i.h.bf16 %v8835_v34  ;;  %v8836_v56 = vunpack.i.l.bf16 %v8835_v34 }
 0x304   : > { %v4258_v40 = vsel %vm1974_vm3, %v4222_v17, %v8851_v63  ;;  %v4259_v25 = vsel %vm1974_vm3, %v4223_v32, %v8852_v61  ;;  %v11744_v32 = vld [vmem:[%s12604_s4] ss:$0 sm:$0xff] }
 0x305   : > { %v8860_v31 = vpop.permute.xlu1 %8859  ;;  %v4189_v13 = vsel %vm1901_vm1, %v2845_v43, %v8837_v2  ;;  %v4188_v23 = vsel %vm1901_vm1, %v2844_v59, %v8836_v56 }
 0x306   : > { %v8845_v35 = vpop.permute.xlu0 %8844  ;;  %v8862_v9 = vunpack.i.h.bf16 %v8860_v31  ;;  %v8861_v10 = vunpack.i.l.bf16 %v8860_v31 }
 0x307   : > { %v8847_v47 = vunpack.i.h.bf16 %v8845_v35  ;;  %v8846_v60 = vunpack.i.l.bf16 %v8845_v35 }
 0x308   : > { %v4294_v5 = vsel %vm2011_vm4, %v4258_v40, %v8861_v10  ;;  %v4295_v4 = vsel %vm2011_vm4, %v4259_v25, %v8862_v9 }
 0x309   : > { %v8870_v37 = vpop.permute.xlu1 %8869  ;;  %v4224_v49 = vsel %vm549_vm2, %v4188_v23, %v8846_v60  ;;  %v4225_v19 = vsel %vm549_vm2, %v4189_v13, %v8847_v47 }
 0x30a   : > { %v8855_v11 = vpop.permute.xlu0 %8854  ;;  %v8872_v33 = vunpack.i.h.bf16 %v8870_v37  ;;  %v8871_v6 = vunpack.i.l.bf16 %v8870_v37 }
 0x30b   : > { %v8857_v14 = vunpack.i.h.bf16 %v8855_v11  ;;  %v8856_v27 = vunpack.i.l.bf16 %v8855_v11 }
 0x30c   : > { %v4330_v39 = vsel %vm2048_vm5, %v4294_v5, %v8871_v6  ;;  %v4331_v18 = vsel %vm2048_vm5, %v4295_v4, %v8872_v33 }
 0x30d   : > { %v8880_v0 = vpop.permute.xlu1 %8879  ;;  %v4260_v31 = vsel %vm1974_vm3, %v4224_v49, %v8856_v27  ;;  %v4261_v35 = vsel %vm1974_vm3, %v4225_v19, %v8857_v14 }
 0x30e   : > { %v8865_v7 = vpop.permute.xlu0 %8864  ;;  %v8882_v44 = vunpack.i.h.bf16 %v8880_v0  ;;  %v8881_v16 = vunpack.i.l.bf16 %v8880_v0 }
 0x30f   : > { %v8867_v26 = vunpack.i.h.bf16 %v8865_v7  ;;  %v8866_v46 = vunpack.i.l.bf16 %v8865_v7 }
 0x310   : > { %v4366_v21 = vsel %vm2085_vm6, %v4330_v39, %v8881_v16  ;;  %v4367_v3 = vsel %vm2085_vm6, %v4331_v18, %v8882_v44  ;;  %v2846_v18 = vld [vmem:[#allocation2 + $0xe0] sm:$0xff] }
 0x311   : > { %v8890_v12 = vpop.permute.xlu1 %8889  ;;  %v4296_v37 = vsel %vm2011_vm4, %v4260_v31, %v8866_v46  ;;  %v4297_v11 = vsel %vm2011_vm4, %v4261_v35, %v8867_v26  ;;  %v2847_v26 = vld [vmem:[#allocation2 + $0xe8] sm:$0xff]  ;;  %v2848_v35 = vld [vmem:[#allocation2 + $0xf0] sm:$0xff] }
 0x312   : > { %v8875_v22 = vpop.permute.xlu0 %8874  ;;  %v8892_v62 = vunpack.i.h.bf16 %v8890_v12  ;;  %v8891_v15 = vunpack.i.l.bf16 %v8890_v12 }
 0x313   : > { %v8877_v41 = vunpack.i.h.bf16 %v8875_v22  ;;  %v8876_v55 = vunpack.i.l.bf16 %v8875_v22 }
 0x314   : > { %v4402_v20 = vsel %vm2122_vm7, %v4366_v21, %v8891_v15  ;;  %v4403_v57 = vsel %vm2122_vm7, %v4367_v3, %v8892_v62 }
 0x315   : > { %v8900_v36 = vpop.permute.xlu1 %8899  ;;  %v4332_v38 = vsel %vm2048_vm5, %v4296_v37, %v8876_v55  ;;  %v4333_v51 = vsel %vm2048_vm5, %v4297_v11, %v8877_v41 }
 0x316   : > { %v8902_v50 = vunpack.i.h.bf16 %v8900_v36  ;;  %v8901_v30 = vunpack.i.l.bf16 %v8900_v36  ;;  %v8885_v54 = vpop.permute.xlu0 %8884 }
 0x317   : > { %v8887_v8 = vunpack.i.h.bf16 %v8885_v54  ;;  %v8886_v34 = vunpack.i.l.bf16 %v8885_v54 }
 0x318   : > { %v4438_v52 = vsel %vm2159_vm8, %v4402_v20, %v8901_v30  ;;  %v4439_v28 = vsel %vm2159_vm8, %v4403_v57, %v8902_v50 }
 0x319   : > { %v8910_v53 = vpop.permute.xlu1 %8909  ;;  %v4462_v1 = vpack.c.bf16 %v4439_v28, %v4438_v52  ;;  %v4368_v63 = vsel %vm2085_vm6, %v4332_v38, %v8886_v34  ;;  %v4369_v0 = vsel %vm2085_vm6, %v4333_v51, %v8887_v8 }
 0x31a   : > { %v8912_v24 = vunpack.i.h.bf16 %v8910_v53  ;;  %v8911_v42 = vunpack.i.l.bf16 %v8910_v53  ;;  %v8895_v45 = vpop.permute.xlu0 %8894  ;;  %v2849_v53 = vld [vmem:[#allocation2 + $0xf8] sm:$0xff] }
 0x31b   : > { %v8897_v58 = vunpack.i.h.bf16 %v8895_v45  ;;  %v8896_v61 = vunpack.i.l.bf16 %v8895_v45  ;;  %7461 = vmatprep.mubr.msk.bf16.mxu1 %vm2257_vm9, %v4462_v1 }
 0x31d   : > { %v4404_v2 = vsel %vm2122_vm7, %v4368_v63, %v8896_v61  ;;  %v4405_v56 = vsel %vm2122_vm7, %v4369_v0, %v8897_v58  ;;  %v8920_v7 = vpop.permute.xlu1 %8919 }
 0x31e   : > { %v8905_v9 = vpop.permute.xlu0 %8904  ;;  %v4440_v10 = vsel %vm2159_vm8, %v4404_v2, %v8911_v42  ;;  %v4441_v17 = vsel %vm2159_vm8, %v4405_v56, %v8912_v24  ;;  %v8922_v27 = vunpack.i.h.bf16 %v8920_v7  ;;  %v8921_v39 = vunpack.i.l.bf16 %v8920_v7 }
 0x31f   : > { %v4463_v47 = vpack.c.bf16 %v4441_v17, %v4440_v10  ;;  %v8907_v62 = vunpack.i.h.bf16 %v8905_v9  ;;  %v8906_v15 = vunpack.i.l.bf16 %v8905_v9 }
 0x321   : > { %v7439_v60 = vpop.f32.mrf.mxu1  ;;  %7462 = vmatmul.mubr.msk.bf16.gmra.mxu1 %vm2257_vm9, %v4463_v47  ;;  %v8930_v40 = vpop.permute.xlu1 %8929  ;;  %v4191_v46 = vsel %vm1901_vm1, %v2847_v26, %v8907_v62  ;;  %v4190_v36 = vsel %vm1901_vm1, %v2846_v18, %v8906_v15 }
 0x322   : > { %v4611_v25 = vadd.f32 %v7439_v60, %v11744_v32  ;;  %v8915_v59 = vpop.permute.xlu0 %8914  ;;  %v8932_v21 = vunpack.i.h.bf16 %v8930_v40  ;;  %v8931_v3 = vunpack.i.l.bf16 %v8930_v40  ;;  %v4226_v55 = vsel %vm549_vm2, %v4190_v36, %v8921_v39 }
 0x323   : > { %v4602_v43 = vpop.f32.mrf.mxu1  ;;  %v8917_v30 = vunpack.i.h.bf16 %v8915_v59  ;;  %v8916_v54 = vunpack.i.l.bf16 %v8915_v59  ;;  %v4227_v52 = vsel %vm549_vm2, %v4191_v46, %v8922_v27 }
 0x324   : > { %v4747_v33 = vmax.f32 %v4611_v25, 0.0  ;;  %v4603_v6 = vadd.f32 %v11744_v32, %v4602_v43  ;;  %v4262_v34 = vsel %vm1974_vm3, %v4226_v55, %v8931_v3  ;;  %v4263_v31 = vsel %vm1974_vm3, %v4227_v52, %v8932_v21 }
 0x325   : > { %v7440_v12 = vpop.f32.mrf.mxu1  ;;  %v8940_v13 = vpop.permute.xlu1 %8939  ;;  %v4193_v24 = vsel %vm1901_vm1, %v2849_v53, %v8917_v30  ;;  %v4192_v42 = vsel %vm1901_vm1, %v2848_v35, %v8916_v54 }
 0x326   : > { %4783 = vst.msk [vmem:[#allocation2 + $0x23] sm:$0xff] %vm1901_vm1, %v4747_v33  ;;  %v4745_v23 = vmax.f32 %v4603_v6, 0.0  ;;  %v4614_v44 = vadd.f32 %v7440_v12, %v11744_v32  ;;  %v8925_v16 = vpop.permute.xlu0 %8924  ;;  %v8942_v57 = vunpack.i.h.bf16 %v8940_v13  ;;  %v8941_v41 = vunpack.i.l.bf16 %v8940_v13 }
 0x327   : > { %v4605_v22 = vpop.f32.mrf.mxu1  ;;  %v8927_v28 = vunpack.i.h.bf16 %v8925_v16  ;;  %v8926_v8 = vunpack.i.l.bf16 %v8925_v16 }
 0x328   : > { %4781 = vst.msk [vmem:[#allocation2 + $0x13] sm:$0xff] %vm1901_vm1, %v4745_v23  ;;  %v4748_v5 = vmax.f32 %v4614_v44, 0.0  ;;  %v4606_v4 = vadd.f32 %v11744_v32, %v4605_v22  ;;  %v4298_v58 = vsel %vm2011_vm4, %v4262_v34, %v8941_v41  ;;  %v4299_v61 = vsel %vm2011_vm4, %v4263_v31, %v8942_v57 }
 0x329   : > { %v8950_v49 = vpop.permute.xlu1 %8949  ;;  %v4228_v2 = vsel %vm549_vm2, %v4192_v42, %v8926_v8  ;;  %v4229_v56 = vsel %vm549_vm2, %v4193_v24, %v8927_v28 }
 0x32a   : > { %4784 = vst.msk [vmem:[#allocation2 + $0x2b] sm:$0xff] %vm1901_vm1, %v4748_v5  ;;  %v4746_v19 = vmax.f32 %v4606_v4, 0.0  ;;  %v8935_v14 = vpop.permute.xlu0 %8934  ;;  %v8952_v1 = vunpack.i.h.bf16 %v8950_v49  ;;  %v8951_v37 = vunpack.i.l.bf16 %v8950_v49 }
 0x32b   : > { %v8937_v7 = vunpack.i.h.bf16 %v8935_v14  ;;  %v8936_v9 = vunpack.i.l.bf16 %v8935_v14 }
 0x32c   : > { %4782 = vst.msk [vmem:[#allocation2 + $0x1b] sm:$0xff] %vm1901_vm1, %v4746_v19  ;;  %v4334_v10 = vsel %vm2048_vm5, %v4298_v58, %v8951_v37  ;;  %v4335_v17 = vsel %vm2048_vm5, %v4299_v61, %v8952_v1 }
 0x32d   : > { %v8960_v50 = vpop.permute.xlu1 %8959  ;;  %v4264_v62 = vsel %vm1974_vm3, %v4228_v2, %v8936_v9  ;;  %v4265_v15 = vsel %vm1974_vm3, %v4229_v56, %v8937_v7 }
 0x32e   : > { %v8945_v20 = vpop.permute.xlu0 %8944  ;;  %v8962_v45 = vunpack.i.h.bf16 %v8960_v50  ;;  %v8961_v38 = vunpack.i.l.bf16 %v8960_v50 }
 0x32f   : > { %v8947_v47 = vunpack.i.h.bf16 %v8945_v20  ;;  %v8946_v60 = vunpack.i.l.bf16 %v8945_v20 }
 0x330   : > { %v4370_v25 = vsel %vm2085_vm6, %v4334_v10, %v8961_v38  ;;  %v4371_v59 = vsel %vm2085_vm6, %v4335_v17, %v8962_v45 }
 0x331   : > { %v8970_v11 = vpop.permute.xlu1 %8969  ;;  %v4300_v14 = vsel %vm2011_vm4, %v4264_v62, %v8946_v60  ;;  %v4301_v27 = vsel %vm2011_vm4, %v4265_v15, %v8947_v47  ;;  %v2850_v47 = vld [vmem:[#allocation2 + $0x100] sm:$0xff]  ;;  %v2851_v60 = vld [vmem:[#allocation2 + $0x108] sm:$0xff] }
 0x332   : > { %v8955_v51 = vpop.permute.xlu0 %8954  ;;  %v8972_v63 = vunpack.i.h.bf16 %v8970_v11  ;;  %v8971_v0 = vunpack.i.l.bf16 %v8970_v11 }
 0x333   : > { %v8957_v23 = vunpack.i.h.bf16 %v8955_v51  ;;  %v8956_v44 = vunpack.i.l.bf16 %v8955_v51 }
 0x334   : > { %v4406_v12 = vsel %vm2122_vm7, %v4370_v25, %v8971_v0  ;;  %v4407_v13 = vsel %vm2122_vm7, %v4371_v59, %v8972_v63 }
 0x335   : > { %v8980_v40 = vpop.permute.xlu1 %8979  ;;  %v4336_v46 = vsel %vm2048_vm5, %v4300_v14, %v8956_v44  ;;  %v4337_v36 = vsel %vm2048_vm5, %v4301_v27, %v8957_v23 }
 0x336   : > { %v8982_v43 = vunpack.i.h.bf16 %v8980_v40  ;;  %v8981_v33 = vunpack.i.l.bf16 %v8980_v40  ;;  %v8965_v6 = vpop.permute.xlu0 %8964 }
 0x337   : > { %v8967_v5 = vunpack.i.h.bf16 %v8965_v6  ;;  %v8966_v4 = vunpack.i.l.bf16 %v8965_v6 }
 0x338   : > { %v4442_v16 = vsel %vm2159_vm8, %v4406_v12, %v8981_v33  ;;  %v4443_v22 = vsel %vm2159_vm8, %v4407_v13, %v8982_v43 }
 0x339   : > { %v8990_v49 = vpop.permute.xlu1 %8989  ;;  %v4464_v19 = vpack.c.bf16 %v4443_v22, %v4442_v16  ;;  %v4372_v50 = vsel %vm2085_vm6, %v4336_v46, %v8966_v4  ;;  %v4373_v30 = vsel %vm2085_vm6, %v4337_v36, %v8967_v5 }
 0x33a   : > { %v8992_v39 = vunpack.i.h.bf16 %v8990_v49  ;;  %v8991_v18 = vunpack.i.l.bf16 %v8990_v49  ;;  %v8975_v26 = vpop.permute.xlu0 %8974 }
 0x33b   : > { %v8977_v21 = vunpack.i.h.bf16 %v8975_v26  ;;  %v8976_v3 = vunpack.i.l.bf16 %v8975_v26  ;;  %7465 = vmatprep.mubr.msk.bf16.mxu1 %vm2257_vm9, %v4464_v19 }
 0x33d   : > { %v4408_v54 = vsel %vm2122_vm7, %v4372_v50, %v8976_v3  ;;  %v4409_v20 = vsel %vm2122_vm7, %v4373_v30, %v8977_v21  ;;  %v9000_v57 = vpop.permute.xlu1 %8999 }
 0x33e   : > { %v8985_v41 = vpop.permute.xlu0 %8984  ;;  %v4444_v55 = vsel %vm2159_vm8, %v4408_v54, %v8991_v18  ;;  %v4445_v52 = vsel %vm2159_vm8, %v4409_v20, %v8992_v39  ;;  %v9002_v10 = vunpack.i.h.bf16 %v9000_v57  ;;  %v9001_v17 = vunpack.i.l.bf16 %v9000_v57 }
 0x33f   : > { %v4465_v28 = vpack.c.bf16 %v4445_v52, %v4444_v55  ;;  %v8987_v2 = vunpack.i.h.bf16 %v8985_v41  ;;  %v8986_v56 = vunpack.i.l.bf16 %v8985_v41 }
 0x341   : > { %7466 = vmatmul.mubr.msk.bf16.gmra.mxu1 %vm2257_vm9, %v4465_v28  ;;  %v9010_v8 = vpop.permute.xlu1 %9009  ;;  %v7443_v34 = vpop.f32.mrf.mxu1  ;;  %v4195_v25 = vsel %vm1901_vm1, %v2851_v60, %v8987_v2  ;;  %v4194_v59 = vsel %vm1901_vm1, %v2850_v47, %v8986_v56 }
 0x342   : > { %v11789_v31 = vpop.permute.xlu0 %8994  ;;  %v4627_v35 = vadd.f32 %v7443_v34, %v11744_v32  ;;  %v9012_v43 = vunpack.i.h.bf16 %v9010_v8  ;;  %v9011_v33 = vunpack.i.l.bf16 %v9010_v8  ;;  %v4230_v16 = vsel %vm549_vm2, %v4194_v59, %v9001_v17 }
 0x343   : > { %v4618_v53 = vpop.f32.mrf.mxu1  ;;  %v4231_v22 = vsel %vm549_vm2, %v4195_v25, %v9002_v10  ;;  %v8997_v18 = vunpack.i.h.bf16 %v11789_v31  ;;  %v8996_v26 = vunpack.i.l.bf16 %v11789_v31 }
 0x344   : > { %v4751_v1 = vmax.f32 %v4627_v35, 0.0  ;;  %v4619_v37 = vadd.f32 %v11744_v32, %v4618_v53  ;;  %v4266_v15 = vsel %vm1974_vm3, %v4230_v16, %v9011_v33  ;;  %v4267_v49 = vsel %vm1974_vm3, %v4231_v22, %v9012_v43  ;;  %v2852_v35 = vld [vmem:[#allocation2 + $0x110] sm:$0xff]  ;;  %v2853_v53 = vld [vmem:[#allocation2 + $0x118] sm:$0x3f] }
 0x345   : > { %v9020_v11 = vpop.permute.xlu1 %9019  ;;  %v7444_v24 = vpop.f32.mrf.mxu1 }
 0x346   : > { %v11793_v42 = vpop.permute.xlu0 %9004  ;;  %4787 = vst.msk [vmem:[#allocation2 + $0x43] sm:$0xff] %vm1901_vm1, %v4751_v1  ;;  %v4749_v45 = vmax.f32 %v4619_v37, 0.0  ;;  %v4630_v38 = vadd.f32 %v7444_v24, %v11744_v32  ;;  %v9022_v6 = vunpack.i.h.bf16 %v9020_v11  ;;  %v9021_v12 = vunpack.i.l.bf16 %v9020_v11 }
 0x347   : > { %v4621_v51 = vpop.f32.mrf.mxu1  ;;  %v9007_v57 = vunpack.i.h.bf16 %v11793_v42  ;;  %v9006_v41 = vunpack.i.l.bf16 %v11793_v42  ;;  %v4197_v24 = vsel %vm1901_vm1, %v2853_v53, %v8997_v18  ;;  %v4196_v42 = vsel %vm1901_vm1, %v2852_v35, %v8996_v26 }
 0x348   : > { %4785 = vst.msk [vmem:[#allocation2 + $0x33] sm:$0xff] %vm1901_vm1, %v4749_v45  ;;  %v4752_v58 = vmax.f32 %v4630_v38, 0.0  ;;  %v4622_v61 = vadd.f32 %v11744_v32, %v4621_v51  ;;  %v4302_v27 = vsel %vm2011_vm4, %v4266_v15, %v9021_v12  ;;  %v4303_v39 = vsel %vm2011_vm4, %v4267_v49, %v9022_v6 }
 0x349   : > { %v9030_v63 = vpop.permute.xlu1 %9029 }
 0x34a   : > { %v11799_v0 = vpop.permute.xlu0 %9014  ;;  %4788 = vst.msk [vmem:[#allocation2 + $0x4b] sm:$0xff] %vm1901_vm1, %v4752_v58  ;;  %v4750_v7 = vmax.f32 %v4622_v61, 0.0  ;;  %v9032_v13 = vunpack.i.h.bf16 %v9030_v63  ;;  %v9031_v23 = vunpack.i.l.bf16 %v9030_v63  ;;  %v4232_v58 = vsel %vm549_vm2, %v4196_v42, %v9006_v41 }
 0x34b   : > { %v9017_v28 = vunpack.i.h.bf16 %v11799_v0  ;;  %v9016_v8 = vunpack.i.l.bf16 %v11799_v0  ;;  %v4233_v61 = vsel %vm549_vm2, %v4197_v24, %v9007_v57 }
 0x34c   : > { %4786 = vst.msk [vmem:[#allocation2 + $0x3b] sm:$0xff] %vm1901_vm1, %v4750_v7  ;;  %v4338_v46 = vsel %vm2048_vm5, %v4302_v27, %v9031_v23  ;;  %v4339_v36 = vsel %vm2048_vm5, %v4303_v39, %v9032_v13 }
 0x34d   : > { %v9040_v9 = vpop.permute.xlu1 %9039  ;;  %v4268_v2 = vsel %vm1974_vm3, %v4232_v58, %v9016_v8  ;;  %v4269_v56 = vsel %vm1974_vm3, %v4233_v61, %v9017_v28 }
 0x34e   : > { %v9025_v40 = vpop.permute.xlu0 %9024  ;;  %v9042_v5 = vunpack.i.h.bf16 %v9040_v9  ;;  %v9041_v4 = vunpack.i.l.bf16 %v9040_v9 }
 0x34f   : > { %v9027_v1 = vunpack.i.h.bf16 %v9025_v40  ;;  %v9026_v37 = vunpack.i.l.bf16 %v9025_v40 }
 0x350   : > { %v4374_v3 = vsel %vm2085_vm6, %v4338_v46, %v9041_v4  ;;  %v4375_v50 = vsel %vm2085_vm6, %v4339_v36, %v9042_v5 }
 0x351   : > { %v9050_v44 = vpop.permute.xlu1 %9049  ;;  %v4304_v10 = vsel %vm2011_vm4, %v4268_v2, %v9026_v37  ;;  %v4305_v17 = vsel %vm2011_vm4, %v4269_v56, %v9027_v1 }
 0x352   : > { %v9035_v62 = vpop.permute.xlu0 %9034  ;;  %v9052_v19 = vunpack.i.h.bf16 %v9050_v44  ;;  %v9051_v14 = vunpack.i.l.bf16 %v9050_v44 }
 0x353   : > { %v9037_v45 = vunpack.i.h.bf16 %v9035_v62  ;;  %v9036_v38 = vunpack.i.l.bf16 %v9035_v62 }
 0x354   : > { %v4410_v55 = vsel %vm2122_vm7, %v4374_v3, %v9051_v14  ;;  %v4411_v52 = vsel %vm2122_vm7, %v4375_v50, %v9052_v19 }
 0x355   : > { %v9060_v21 = vpop.permute.xlu1 %9059  ;;  %v4340_v47 = vsel %vm2048_vm5, %v4304_v10, %v9036_v38  ;;  %v4341_v60 = vsel %vm2048_vm5, %v4305_v17, %v9037_v45 }
 0x356   : > { %v9062_v30 = vunpack.i.h.bf16 %v9060_v21  ;;  %v9061_v54 = vunpack.i.l.bf16 %v9060_v21  ;;  %v9045_v20 = vpop.permute.xlu0 %9044 }
 0x357   : > { %v9047_v63 = vunpack.i.h.bf16 %v9045_v20  ;;  %v9046_v0 = vunpack.i.l.bf16 %v9045_v20 }
 0x358   : > { %v4446_v34 = vsel %vm2159_vm8, %v4410_v55, %v9061_v54  ;;  %v4447_v31 = vsel %vm2159_vm8, %v4411_v52, %v9062_v30 }
 0x359   : > { %v4466_v11 = vpack.c.bf16 %v4447_v31, %v4446_v34  ;;  %v4376_v25 = vsel %vm2085_vm6, %v4340_v47, %v9046_v0  ;;  %v4377_v59 = vsel %vm2085_vm6, %v4341_v60, %v9047_v63 }
 0x35a   : > { %v9055_v51 = vpop.permute.xlu0 %9054 }
 0x35b   : > { %7469 = vmatprep.mubr.msk.bf16.mxu1 %vm2257_vm9, %v4466_v11  ;;  %v9057_v7 = vunpack.i.h.bf16 %v9055_v51  ;;  %v9056_v9 = vunpack.i.l.bf16 %v9055_v51 }
 0x35d   : > { %v4412_v6 = vsel %vm2122_vm7, %v4376_v25, %v9056_v9  ;;  %v4413_v12 = vsel %vm2122_vm7, %v4377_v59, %v9057_v7 }
 0x35e   : > { %v9065_v40 = vpop.permute.xlu0 %9064 }
 0x35f   : > { %v9067_v43 = vunpack.i.h.bf16 %v9065_v40  ;;  %v9066_v33 = vunpack.i.l.bf16 %v9065_v40 }
 0x361   : > { %v4448_v13 = vsel %vm2159_vm8, %v4412_v6, %v9066_v33  ;;  %v4449_v23 = vsel %vm2159_vm8, %v4413_v12, %v9067_v43  ;;  %v7447_v44 = vpop.f32.mrf.mxu1 }
 0x362   : > { %v4467_v16 = vpack.c.bf16 %v4449_v23, %v4448_v13  ;;  %v4643_v22 = vadd.f32 %v7447_v44, %v11744_v32  ;;  %v5070_v23 = vld [vmem:[%s12606_s6 + $0x8] sm:$0xff]  ;;  %v5071_v44 = vld [vmem:[%s12606_s6 + $0x10] sm:$0xff] }
 0x363   : > { %v4634_v5 = vpop.f32.mrf.mxu1  ;;  %5198 = vmatprep.mubr.f32.mxu0 %v5070_v23 }
 0x364   : > { %v4755_v4 = vmax.f32 %v4643_v22, 0.0  ;;  %v4635_v62 = vadd.f32 %v11744_v32, %v4634_v5  ;;  %7470 = vmatmul.mubr.msk.bf16.gmra.mxu1 %vm2257_vm9, %v4467_v16 }
 0x365   : > { %v7448_v15 = vpop.f32.mrf.mxu1  ;;  %7481 = vmatprep.mubr.msk.f32.mxu1 %vm5099_vm12, %v5071_v44 }
 0x366   : > { %4791 = vst.msk [vmem:[#allocation2 + $0x63] sm:$0xff] %vm1901_vm1, %v4755_v4  ;;  %v4753_v49 = vmax.f32 %v4635_v62, 0.0  ;;  %v4646_v19 = vadd.f32 %v7448_v15, %v11744_v32 }
 0x367   : > { %v4637_v14 = vpop.f32.mrf.mxu1 }
 0x368   : > { %4789 = vst.msk [vmem:[#allocation2 + $0x53] sm:$0xff] %vm1901_vm1, %v4753_v49  ;;  %v4756_v27 = vmax.f32 %v4646_v19, 0.0  ;;  %v4638_v39 = vadd.f32 %v11744_v32, %v4637_v14 }
 0x36a   : > { %4792 = vst.msk [vmem:[#allocation2 + $0x6b] sm:$0xff] %vm1901_vm1, %v4756_v27  ;;  %v4754_v18 = vmax.f32 %v4638_v39, 0.0 }
 0x36c   : > { %4790 = vst.msk [vmem:[#allocation2 + $0x5b] sm:$0xff] %vm1901_vm1, %v4754_v18 }
 0x36d   : > { %v11851_v26 = vld [vmem:[#allocation2 + $0x63] sm:$0xff] }
 0x36f   : > { %v11859_v3 = vld [vmem:[#allocation2 + $0x53] sm:$0xff] }
 0x373   : > { %v11853_v46 = vld [vmem:[#allocation2 + $0x5b] sm:$0xff] }
 0x374   : > { %v11855_v36 = vld [vmem:[#allocation2 + $0x5c] sm:$0xff]  ;;  %v11865_v54 = vld [vmem:[#allocation2 + $0x54] sm:$0xff] }
 0x375   : > { %v4898_v21 = vmax.f32 %v11853_v46, %v11855_v36  ;;  %v11861_v50 = vld [vmem:[#allocation2 + $0x5d] sm:$0xff]  ;;  %v11871_v57 = vld [vmem:[#allocation2 + $0x55] sm:$0xff] }
 0x376   : > { %v11863_v30 = vld [vmem:[#allocation2 + $0x5e] sm:$0xff]  ;;  %v11873_v41 = vld [vmem:[#allocation2 + $0x56] sm:$0xff] }
 0x377   : > { %v5004_v20 = vmax.f32 %v11861_v50, %v11863_v30  ;;  %5377 = vst.msk [vmem:[#allocation2 + $0x61] sm:$0x7] %vm552_vm10, %v9541_v29  ;;  %v12025_v46 = vld [vmem:[#allocation2 + $0x34] sm:$0xff]  ;;  %v5089_v36 = vld [vmem:[%s12606_s6 + $0xa0] sm:$0xff] }
 0x378   : > { %5376 = vst.msk [vmem:[#allocation2 + $0x59] sm:$0xff] %vm549_vm2, %v9541_v29  ;;  %v5095_v50 = vld [vmem:[%s12606_s6 + $0xd0] sm:$0xff] }
 0x381   : > { %v7451_v55 = vpop.f32.mrf.mxu1 }
 0x382   : > { %v4659_v52 = vadd.f32 %v7451_v55, %v11744_v32 }
 0x383   : > { %v4650_v28 = vpop.f32.mrf.mxu1 }
 0x384   : > { %v4759_v8 = vmax.f32 %v4659_v52, 0.0  ;;  %v4651_v34 = vadd.f32 %v11744_v32, %v4650_v28 }
 0x385   : > { %v7452_v31 = vpop.f32.mrf.mxu1 }
 0x386   : > { %4795 = vst.msk [vmem:[#allocation2 + $0x83] sm:$0xff] %vm1901_vm1, %v4759_v8  ;;  %v4757_v35 = vmax.f32 %v4651_v34, 0.0  ;;  %v4662_v53 = vadd.f32 %v7452_v31, %v11744_v32 }
 0x387   : > { %v4653_v1 = vpop.f32.mrf.mxu1 }
 0x388   : > { %4793 = vst.msk [vmem:[#allocation2 + $0x73] sm:$0xff] %vm1901_vm1, %v4757_v35  ;;  %v4760_v37 = vmax.f32 %v4662_v53, 0.0  ;;  %v4654_v11 = vadd.f32 %v11744_v32, %v4653_v1 }
 0x38a   : > { %4796 = vst.msk [vmem:[#allocation2 + $0x8b] sm:$0xff] %vm1901_vm1, %v4760_v37  ;;  %v4758_v24 = vmax.f32 %v4654_v11, 0.0 }
 0x38c   : > { %4794 = vst.msk [vmem:[#allocation2 + $0x7b] sm:$0xff] %vm1901_vm1, %v4758_v24 }
 0x391   : > { %v4832_v44 = vld [vmem:[#allocation2 + $0x8b] sm:$0xff] }
 0x3a1   : > { %v7455_v42 = vpop.f32.mrf.mxu1 }
 0x3a2   : > { %v4675_v45 = vadd.f32 %v7455_v42, %v11744_v32 }
 0x3a3   : > { %v4666_v38 = vpop.f32.mrf.mxu1 }
 0x3a4   : > { %v4763_v51 = vmax.f32 %v4675_v45, 0.0  ;;  %v4667_v58 = vadd.f32 %v11744_v32, %v4666_v38 }
 0x3a5   : > { %v7456_v61 = vpop.f32.mrf.mxu1 }
 0x3a6   : > { %4799 = vst.msk [vmem:[#allocation2 + $0xa3] sm:$0xff] %vm1901_vm1, %v4763_v51  ;;  %v4761_v63 = vmax.f32 %v4667_v58, 0.0  ;;  %v4678_v0 = vadd.f32 %v7456_v61, %v11744_v32 }
 0x3a7   : > { %v4669_v2 = vpop.f32.mrf.mxu1 }
 0x3a8   : > { %4797 = vst.msk [vmem:[#allocation2 + $0x93] sm:$0xff] %vm1901_vm1, %v4761_v63  ;;  %v4764_v56 = vmax.f32 %v4678_v0, 0.0  ;;  %v4670_v7 = vadd.f32 %v11744_v32, %v4669_v2 }
 0x3aa   : > { %4800 = vst.msk [vmem:[#allocation2 + $0xab] sm:$0xff] %vm1901_vm1, %v4764_v56  ;;  %v4762_v9 = vmax.f32 %v4670_v7, 0.0 }
 0x3ac   : > { %4798 = vst.msk [vmem:[#allocation2 + $0x9b] sm:$0xff] %vm1901_vm1, %v4762_v9 }
 0x3c1   : > { %v7459_v10 = vpop.f32.mrf.mxu1 }
 0x3c2   : > { %v4691_v17 = vadd.f32 %v7459_v10, %v11744_v32  ;;  %v4960_v10 = vld [vmem:[#allocation2 + $0x13d] sm:$0x3f] }
 0x3c3   : > { %v4682_v47 = vpop.f32.mrf.mxu1 }
 0x3c4   : > { %v4767_v60 = vmax.f32 %v4691_v17, 0.0  ;;  %v4683_v40 = vadd.f32 %v11744_v32, %v4682_v47  ;;  %v4996_v17 = vld [vmem:[#allocation2 + $0x13e] sm:$0x3f]  ;;  %v11932_v47 = vld [vmem:[#allocation2 + $0x84] sm:$0xff] }
 0x3c5   : > { %v7460_v25 = vpop.f32.mrf.mxu1 }
 0x3c6   : > { %4803 = vst.msk [vmem:[#allocation2 + $0xc3] sm:$0xff] %vm1901_vm1, %v4767_v60  ;;  %v4765_v59 = vmax.f32 %v4683_v40, 0.0  ;;  %v4694_v43 = vadd.f32 %v7460_v25, %v11744_v32  ;;  %v11934_v60 = vld [vmem:[#allocation2 + $0x8c] sm:$0xff]  ;;  %v11936_v40 = vld [vmem:[#allocation2 + $0x9d] sm:$0xff] }
 0x3c7   : > { %v4685_v33 = vpop.f32.mrf.mxu1  ;;  %v11938_v25 = vld [vmem:[#allocation2 + $0x7b] sm:$0xff] }
 0x3c8   : > { %4801 = vst.msk [vmem:[#allocation2 + $0xb3] sm:$0xff] %vm1901_vm1, %v4765_v59  ;;  %v4768_v6 = vmax.f32 %v4694_v43, 0.0  ;;  %v4686_v12 = vadd.f32 %v11744_v32, %v4685_v33  ;;  %v11940_v59 = vld [vmem:[#allocation2 + $0x7c] sm:$0xff] }
 0x3c9   : > { %v11942_v43 = vld [vmem:[#allocation2 + $0x9e] sm:$0xff]  ;;  %v11946_v33 = vld [vmem:[#allocation2 + $0x95] sm:$0xff] }
 0x3ca   : > { %4804 = vst.msk [vmem:[#allocation2 + $0xcb] sm:$0xff] %vm1901_vm1, %v4768_v6  ;;  %v4766_v13 = vmax.f32 %v4686_v12, 0.0  ;;  %v11948_v6 = vld [vmem:[#allocation2 + $0x96] sm:$0xff]  ;;  %v5032_v12 = vmax.f32 %v4960_v10, %v4996_v17 }
 0x3cc   : > { %4802 = vst.msk [vmem:[#allocation2 + $0xbb] sm:$0xff] %vm1901_vm1, %v4766_v13 }
 0x3e1   : > { %v7463_v16 = vpop.f32.mrf.mxu1 }
 0x3e2   : > { %v4707_v22 = vadd.f32 %v7463_v16, %v11744_v32 }
 0x3e3   : > { %v4698_v5 = vpop.f32.mrf.mxu1 }
 0x3e4   : > { %v4771_v4 = vmax.f32 %v4707_v22, 0.0  ;;  %v4699_v62 = vadd.f32 %v11744_v32, %v4698_v5 }
 0x3e5   : > { %v7464_v15 = vpop.f32.mrf.mxu1 }
 0x3e6   : > { %4807 = vst.msk [vmem:[#allocation2 + $0xe3] sm:$0xff] %vm1901_vm1, %v4771_v4  ;;  %v4769_v49 = vmax.f32 %v4699_v62, 0.0  ;;  %v4710_v19 = vadd.f32 %v7464_v15, %v11744_v32 }
 0x3e7   : > { %v4701_v14 = vpop.f32.mrf.mxu1 }
 0x3e8   : > { %4805 = vst.msk [vmem:[#allocation2 + $0xd3] sm:$0xff] %vm1901_vm1, %v4769_v49  ;;  %v4772_v27 = vmax.f32 %v4710_v19, 0.0  ;;  %v4702_v39 = vadd.f32 %v11744_v32, %v4701_v14  ;;  %v9468_v14 = vld [vmem:[#allocation2 + $0x135] sm:$0xff] }
 0x3ea   : > { %4808 = vst.msk [vmem:[#allocation2 + $0xeb] sm:$0xff] %vm1901_vm1, %v4772_v27  ;;  %v4770_v18 = vmax.f32 %v4702_v39, 0.0  ;;  %v9469_v27 = vld [vmem:[#allocation2 + $0x136] sm:$0xff] }
 0x3eb   : > { %v5031_v39 = vmax.f32 %v9468_v14, %v9469_v27  ;;  %v4973_v14 = vld [vmem:[#allocation2 + $0x86] sm:$0xff] }
 0x3ec   : > { %4806 = vst.msk [vmem:[#allocation2 + $0xdb] sm:$0xff] %vm1901_vm1, %v4770_v18 }
 0x401   : > { %v7467_v55 = vpop.f32.mrf.mxu1 }
 0x402   : > { %v4723_v52 = vadd.f32 %v7467_v55, %v11744_v32 }
 0x403   : > { %v4714_v28 = vpop.f32.mrf.mxu1 }
 0x404   : > { %v4775_v8 = vmax.f32 %v4723_v52, 0.0  ;;  %v4715_v34 = vadd.f32 %v11744_v32, %v4714_v28 }
 0x405   : > { %v7468_v31 = vpop.f32.mrf.mxu1 }
 0x406   : > { %4811 = vst.msk [vmem:[#allocation2 + $0x103] sm:$0xff] %vm1901_vm1, %v4775_v8  ;;  %v4773_v35 = vmax.f32 %v4715_v34, 0.0  ;;  %v4726_v53 = vadd.f32 %v7468_v31, %v11744_v32 }
 0x407   : > { %v4717_v1 = vpop.f32.mrf.mxu1 }
 0x408   : > { %4809 = vst.msk [vmem:[#allocation2 + $0xf3] sm:$0xff] %vm1901_vm1, %v4773_v35  ;;  %v4776_v37 = vmax.f32 %v4726_v53, 0.0  ;;  %v4718_v11 = vadd.f32 %v11744_v32, %v4717_v1  ;;  %v11962_v35 = vld [vmem:[#allocation2 + $0x8d] sm:$0xff] }
 0x409   : > { %v11964_v53 = vld [vmem:[#allocation2 + $0x8e] sm:$0xff] }
 0x40a   : > { %4812 = vst.msk [vmem:[#allocation2 + $0x10b] sm:$0xff] %vm1901_vm1, %v4776_v37  ;;  %v4774_v24 = vmax.f32 %v4718_v11, 0.0 }
 0x40c   : > { %4810 = vst.msk [vmem:[#allocation2 + $0xfb] sm:$0xff] %vm1901_vm1, %v4774_v24  ;;  %v4904_v24 = vmax.f32 %v4832_v44, %v11934_v60 }
 0x40d   : > { %v4847_v18 = vld [vmem:[#allocation2 + $0x103] sm:$0xff] }
 0x411   : > { %v11950_v16 = vld [vmem:[#allocation2 + $0x104] sm:$0xff] }
 0x412   : > { %v4848_v62 = vld [vmem:[#allocation2 + $0x10b] sm:$0xff]  ;;  %v4919_v10 = vmax.f32 %v4847_v18, %v11950_v16 }
 0x413   : > { %v11956_v8 = vld [vmem:[#allocation2 + $0xfb] sm:$0xff] }
 0x414   : > { %v11958_v34 = vld [vmem:[#allocation2 + $0xfc] sm:$0xff]  ;;  %v11966_v1 = vld [vmem:[#allocation2 + $0xf4] sm:$0xff] }
 0x415   : > { %v4988_v27 = vld [vmem:[#allocation2 + $0xfe] sm:$0xff] }
 0x424   : > { %v7471_v42 = vpop.f32.mrf.mxu1 }
 0x425   : > { %v4739_v45 = vadd.f32 %v7471_v42, %v11744_v32  ;;  %v5012_v42 = vmax.f32 %v11936_v40, %v11942_v43 }
 0x426   : > { %v4730_v38 = vpop.f32.mrf.mxu1 }
 0x427   : > { %v4779_v51 = vmax.f32 %v4739_v45, 0.0  ;;  %v4731_v58 = vadd.f32 %v11744_v32, %v4730_v38  ;;  %v5048_v16 = vmax.f32 %v4904_v24, %v5012_v42  ;;  %v4987_v24 = vld [vmem:[#allocation2 + $0xf6] sm:$0xff] }
 0x428   : > { %v7472_v61 = vpop.f32.mrf.mxu1 }
 0x429   : > { %4815 = vst.msk [vmem:[#allocation2 + $0x123] sm:$0xff] %vm1901_vm1, %v4779_v51  ;;  %v4777_v63 = vmax.f32 %v4731_v58, 0.0  ;;  %v4742_v0 = vadd.f32 %v7472_v61, %v11744_v32  ;;  %v4902_v51 = vmax.f32 %v11938_v25, %v11940_v59 }
 0x42a   : > { %v4733_v2 = vpop.f32.mrf.mxu1 }
 0x42b   : > { %4813 = vst.msk [vmem:[#allocation2 + $0x113] sm:$0xff] %vm1901_vm1, %v4777_v63  ;;  %v4780_v56 = vmax.f32 %v4742_v0, 0.0  ;;  %v4734_v7 = vadd.f32 %v11744_v32, %v4733_v2  ;;  %v11944_v32 = vld [vmem:[#allocation2 + $0x83] sm:$0xff] }
 0x42c   : > { %v4903_v28 = vmax.f32 %v11944_v32, %v11932_v47 }
 0x42d   : > { %4816 = vst.msk [vmem:[#allocation2 + $0x12b] sm:$0x3f] %vm2816_vm11, %v4780_v56  ;;  %v4778_v9 = vmax.f32 %v4734_v7, 0.0  ;;  %v5011_v7 = vmax.f32 %v11946_v33, %v11948_v6  ;;  %v4953_v33 = vld [vmem:[#allocation2 + $0x105] sm:$0xff] }
 0x42e   : > { %v4989_v6 = vld [vmem:[#allocation2 + $0x106] sm:$0xff] }
 0x42f   : > { %4814 = vst.msk [vmem:[#allocation2 + $0x11b] sm:$0xff] %vm1901_vm1, %v4778_v9  ;;  %v11975_v9 = vld [vmem:[#allocation2 + $0x74] sm:$0xff] }
 0x430   : > { %v4851_v23 = vld [vmem:[#allocation2 + $0x123] sm:$0xff] }
 0x432   : > { %v4884_v13 = vld [vmem:[#allocation2 + $0x10c] sm:$0xff] }
 0x433   : > { %v11952_v22 = vld [vmem:[#allocation2 + $0x10d] sm:$0xff]  ;;  %v4920_v61 = vmax.f32 %v4848_v62, %v4884_v13  ;;  %v4937_v62 = vld [vmem:[#allocation2 + $0x85] sm:$0xff] }
 0x434   : > { %v4852_v5 = vld [vmem:[#allocation2 + $0x12b] sm:$0x3f]  ;;  %v4849_v38 = vld [vmem:[#allocation2 + $0x113] sm:$0xff] }
 0x435   : > { %v4888_v4 = vld [vmem:[#allocation2 + $0x12c] sm:$0x3f]  ;;  %v4887_v15 = vld [vmem:[#allocation2 + $0x124] sm:$0xff] }
 0x436   : > { %v4924_v49 = vmax.f32 %v4852_v5, %v4888_v4  ;;  %v4923_v19 = vmax.f32 %v4851_v23, %v4887_v15  ;;  %v4958_v55 = vld [vmem:[#allocation2 + $0x12d] sm:$0xff]  ;;  %v4956_v37 = vld [vmem:[#allocation2 + $0x11d] sm:$0xff]  ;;  %v4955_v45 = vld [vmem:[#allocation2 + $0x115] sm:$0xff]  ;;  %v5010_v15 = vmax.f32 %v11962_v35, %v11964_v53 }
 0x437   : > { %v4994_v52 = vld [vmem:[#allocation2 + $0x12e] sm:$0xff]  ;;  %v4992_v11 = vld [vmem:[#allocation2 + $0x11e] sm:$0xff]  ;;  %v4991_v0 = vld [vmem:[#allocation2 + $0x116] sm:$0xff] }
 0x438   : > { %v11960_v31 = vld [vmem:[#allocation2 + $0x10e] sm:$0xff]  ;;  %v5068_v58 = vmax.f32 %v4924_v49, %v5032_v12  ;;  %v5028_v63 = vmax.f32 %v4956_v37, %v4992_v11  ;;  %v4850_v2 = vld [vmem:[#allocation2 + $0x11b] sm:$0xff]  ;;  %v5027_v17 = vmax.f32 %v4955_v45, %v4991_v0  ;;  %v4957_v43 = vld [vmem:[#allocation2 + $0x125] sm:$0xff]  ;;  %v5067_v13 = vmax.f32 %v4923_v19, %v5031_v39 }
 0x439   : > { %v4886_v56 = vld [vmem:[#allocation2 + $0x11c] sm:$0xff]  ;;  %v5026_v60 = vmax.f32 %v11952_v22, %v11960_v31  ;;  %v4885_v40 = vld [vmem:[#allocation2 + $0x114] sm:$0xff]  ;;  %v4993_v32 = vld [vmem:[#allocation2 + $0x126] sm:$0xff]  ;;  %v5030_v23 = vmax.f32 %v4958_v55, %v4994_v52  ;;  %v4918_v22 = vmax.f32 %v11956_v8, %v11958_v34  ;;  %v5047_v8 = vmax.f32 %v4903_v28, %v5011_v7 }
 0x43a   : > { %v4922_v47 = vmax.f32 %v4850_v2, %v4886_v56  ;;  %7473 = vmatprep.subr.msk.mxu1 %vm5130_vm13, %v5068_v58  ;;  %v5064_v12 = vmax.f32 %v4920_v61, %v5028_v63  ;;  %v4921_v44 = vmax.f32 %v4849_v38, %v4885_v40  ;;  %v4845_v5 = vld [vmem:[#allocation2 + $0xf3] sm:$0xff]  ;;  %v4952_v19 = vld [vmem:[#allocation2 + $0xfd] sm:$0xff]  ;;  %v5063_v39 = vmax.f32 %v4919_v10, %v5027_v17  ;;  %v4844_v38 = vld [vmem:[#allocation2 + $0xeb] sm:$0xff] }
 0x43b   : > { %v4829_v4 = vld [vmem:[#allocation2 + $0x73] sm:$0xff]  ;;  %7474 = vmatpush3.msk.msra.mxu1 %vm5130_vm13, %v5068_v58  ;;  %v4917_v49 = vmax.f32 %v4845_v5, %v11966_v1  ;;  %v5029_v55 = vmax.f32 %v4957_v43, %v4993_v32  ;;  %v4936_v31 = vld [vmem:[#allocation2 + $0x7d] sm:$0xff]  ;;  %v5025_v34 = vmax.f32 %v4953_v33, %v4989_v6  ;;  %v5062_v42 = vmax.f32 %v4918_v22, %v5026_v60  ;;  %v4828_v61 = vld [vmem:[#allocation2 + $0x6b] sm:$0xff] }
 0x43c   : > { %7275 = vmatprep.subr.mxu0 %v5064_v12  ;;  %7475 = vmatprep.subr.mxu1 %v5067_v13  ;;  %v5066_v18 = vmax.f32 %v4922_v47, %v5030_v23  ;;  %v4864_v52 = vld [vmem:[#allocation2 + $0x6c] sm:$0xff]  ;;  %v4972_v37 = vld [vmem:[#allocation2 + $0x7e] sm:$0xff]  ;;  %v11987_v11 = vld [vmem:[#allocation2 + $0x75] sm:$0xff]  ;;  %v4901_v35 = vmax.f32 %v4829_v4, %v11975_v9  ;;  %v5024_v58 = vmax.f32 %v4952_v19, %v4988_v27 }
 0x43d   : > { %7276 = vmatpush3.msra.mxu0 %v5048_v16  ;;  %7476 = vmatpush3.msra.mxu1 %v5067_v13  ;;  %v4880_v53 = vld [vmem:[#allocation2 + $0xec] sm:$0xff]  ;;  %v4951_v1 = vld [vmem:[#allocation2 + $0xf5] sm:$0xff]  ;;  %v5065_v45 = vmax.f32 %v4921_v44, %v5029_v55  ;;  %v4863_v63 = vld [vmem:[#allocation2 + $0x64] sm:$0xff]  ;;  %v5046_v56 = vmax.f32 %v4902_v51, %v5010_v15  ;;  %v5009_v7 = vmax.f32 %v4937_v62, %v4973_v14 }
 0x43e   : > { %7277 = vmatprep.subr.mxu0 %v5063_v39  ;;  %7477 = vmatprep.subr.mxu1 %v5066_v18  ;;  %v4971_v0 = vld [vmem:[#allocation2 + $0x76] sm:$0xff]  ;;  %v11990_v2 = vld [vmem:[#allocation2 + $0x6d] sm:$0xff]  ;;  %v5008_v9 = vmax.f32 %v4936_v31, %v4972_v37  ;;  %v4879_v10 = vld [vmem:[#allocation2 + $0xe4] sm:$0xff]  ;;  %v5061_v60 = vmax.f32 %v4917_v49, %v5025_v34  ;;  %v4916_v40 = vmax.f32 %v4844_v38, %v4880_v53 }
 0x43f   : > { %v5074_v28 = vld [vmem:[%s12606_s6 + $0x28] sm:$0xff]  ;;  %7278 = vmatpush3.msra.mxu0 %v5047_v8  ;;  %7478 = vmatpush3.msra.mxu1 %v5066_v18  ;;  %v5023_v32 = vmax.f32 %v4951_v1, %v4987_v24  ;;  %v5077_v13 = vld [vmem:[%s12606_s6 + $0x40] sm:$0xff]  ;;  %v5045_v25 = vmax.f32 %v4901_v35, %v5009_v7  ;;  %v4900_v59 = vmax.f32 %v4828_v61, %v4864_v52  ;;  %v4877_v5 = vld [vmem:[#allocation2 + $0xd4] sm:$0xff] }
 0x440   : > { %v4950_v17 = vld [vmem:[#allocation2 + $0xed] sm:$0xff]  ;;  %7279 = vmatprep.subr.mxu0 %v5062_v42  ;;  %7479 = vmatprep.subr.mxu1 %v5065_v45  ;;  %v4843_v43 = vld [vmem:[#allocation2 + $0xe3] sm:$0xff]  ;;  %v5007_v51 = vmax.f32 %v11987_v11, %v4971_v0  ;;  %v4842_v23 = vld [vmem:[#allocation2 + $0xdb] sm:$0xff]  ;;  %v5060_v33 = vmax.f32 %v4916_v40, %v5024_v58  ;;  %v4899_v49 = vmax.f32 %v11851_v26, %v4863_v63 }
 0x441   : > { %v4986_v47 = vld [vmem:[#allocation2 + $0xee] sm:$0xff]  ;;  %7280 = vmatpush3.msra.mxu0 %v5046_v56  ;;  %7480 = vmatpush3.msra.mxu1 %v5065_v45  ;;  %v4878_v44 = vld [vmem:[#allocation2 + $0xdc] sm:$0xff]  ;;  %v4915_v6 = vmax.f32 %v4843_v43, %v4879_v10  ;;  %v4949_v16 = vld [vmem:[#allocation2 + $0xe5] sm:$0xff]  ;;  %v5044_v15 = vmax.f32 %v4900_v59, %v5008_v9  ;;  %v4897_v34 = vmax.f32 %v11859_v3, %v11865_v54 }
 0x442   : > { %v4970_v12 = vld [vmem:[#allocation2 + $0x6e] sm:$0xff]  ;;  %7281 = vmatprep.subr.mxu0 %v5061_v60  ;;  %v5022_v4 = vmax.f32 %v4950_v17, %v4986_v47  ;;  %7482 = vmatmul.mubr.msk.f32.vlgmr.msra.gmra.mxu1 %vm5099_vm12, %v5074_v28  ;;  %v5080_v22 = vld [vmem:[%s12606_s6 + $0x58] sm:$0xff]  ;;  %v4985_v19 = vld [vmem:[#allocation2 + $0xe6] sm:$0xff]  ;;  %v4914_v55 = vmax.f32 %v4842_v23, %v4878_v44  ;;  %v5043_v26 = vmax.f32 %v4899_v49, %v5007_v51 }
 0x443   : > { %v4841_v62 = vld [vmem:[#allocation2 + $0xd3] sm:$0xff]  ;;  %7282 = vmatpush3.msra.mxu0 %v5045_v25  ;;  %v5006_v14 = vmax.f32 %v11990_v2, %v4970_v12  ;;  %v4948_v27 = vld [vmem:[#allocation2 + $0xdd] sm:$0xff]  ;;  %7484 = vmatprep.mubr.msk.f32.mxu1 %vm5099_vm12, %v5077_v13  ;;  %v5059_v18 = vmax.f32 %v4915_v6, %v5023_v32  ;;  %v4933_v31 = vld [vmem:[#allocation2 + $0x65] sm:$0xff]  ;;  %v5021_v42 = vmax.f32 %v4949_v16, %v4985_v19 }
 0x444   : > { %v4984_v39 = vld [vmem:[#allocation2 + $0xde] sm:$0xff]  ;;  %7283 = vmatprep.subr.mxu0 %v5060_v33  ;;  %v4913_v52 = vmax.f32 %v4841_v62, %v4877_v5  ;;  %v4969_v37 = vld [vmem:[#allocation2 + $0x66] sm:$0xff]  ;;  %v5083_v8 = vld [vmem:[%s12606_s6 + $0x70] sm:$0xff]  ;;  %7496 = vmatprep.subr.bf16.mxu1 %v9541_v29  ;;  %v5058_v24 = vmax.f32 %v4914_v55, %v5022_v4  ;;  %v5003_v12 = vmax.f32 %v11871_v57, %v11873_v41 }
 0x445   : > { %v4860_v11 = vld [vmem:[#allocation2 + $0x4c] sm:$0xff]  ;;  %7284 = vmatpush3.msra.mxu0 %v5044_v15  ;;  %v4947_v53 = vld [vmem:[#allocation2 + $0xd5] sm:$0xff]  ;;  %v5020_v38 = vmax.f32 %v4948_v27, %v4984_v39  ;;  %v4875_v61 = vld [vmem:[#allocation2 + $0xc4] sm:$0xff]  ;;  %v5042_v3 = vmax.f32 %v4898_v21, %v5006_v14  ;;  %v5005_v54 = vmax.f32 %v4933_v31, %v4969_v37 }
 0x446   : > { %v4876_v35 = vld [vmem:[#allocation2 + $0xcc] sm:$0xff]  ;;  %v4983_v1 = vld [vmem:[#allocation2 + $0xd6] sm:$0xff]  ;;  %7285 = vmatprep.subr.mxu0 %v5059_v18  ;;  %v4859_v63 = vld [vmem:[#allocation2 + $0x44] sm:$0xff]  ;;  %7485 = vmatmul.mubr.msk.f32.gmra.mxu1 %vm5099_vm12, %v5080_v22  ;;  %v5057_v7 = vmax.f32 %v4913_v52, %v5021_v42 }
 0x447   : > { %v4840_v45 = vld [vmem:[#allocation2 + $0xcb] sm:$0xff]  ;;  %7286 = vmatpush3.msra.mxu0 %v5043_v26  ;;  %7487 = vmatprep.mubr.msk.f32.mxu1 %vm5099_vm12, %v5083_v8  ;;  %v4839_v10 = vld [vmem:[#allocation2 + $0xc3] sm:$0xff]  ;;  %v5019_v17 = vmax.f32 %v4947_v53, %v4983_v1  ;;  %v4822_v60 = vld [vmem:[#allocation2 + $0x3b] sm:$0xff]  ;;  %v5041_v21 = vmax.f32 %v4897_v34, %v5005_v54 }
 0x448   : > { %v4824_v58 = vld [vmem:[#allocation2 + $0x4b] sm:$0xff]  ;;  %7287 = vmatprep.subr.mxu0 %v5058_v24  ;;  %v4912_v9 = vmax.f32 %v4840_v45, %v4876_v35  ;;  %v4823_v47 = vld [vmem:[#allocation2 + $0x43] sm:$0xff]  ;;  %v4838_v13 = vld [vmem:[#allocation2 + $0xbb] sm:$0xff]  ;;  %v4911_v23 = vmax.f32 %v4839_v10, %v4875_v61 }
 0x449   : > { %v12015_v0 = vld [vmem:[#allocation2 + $0x4d] sm:$0xff]  ;;  %v4858_v40 = vld [vmem:[#allocation2 + $0x3c] sm:$0xff]  ;;  %7288 = vmatpush3.msra.mxu0 %v5042_v3  ;;  %v4896_v32 = vmax.f32 %v4824_v58, %v4860_v11  ;;  %v4945_v33 = vld [vmem:[#allocation2 + $0xc5] sm:$0xff]  ;;  %v4895_v41 = vmax.f32 %v4823_v47, %v4859_v63 }
 0x44a   : > { %v4946_v2 = vld [vmem:[#allocation2 + $0xcd] sm:$0xff]  ;;  %v4874_v25 = vld [vmem:[#allocation2 + $0xbc] sm:$0xff]  ;;  %7289 = vmatprep.subr.mxu0 %v5057_v7  ;;  %v5056_v51 = vmax.f32 %v4912_v9, %v5020_v38  ;;  %v4929_v62 = vld [vmem:[#allocation2 + $0x45] sm:$0xff]  ;;  %v5055_v27 = vmax.f32 %v4911_v23, %v5019_v17 }
 0x44b   : > { %v4982_v28 = vld [vmem:[#allocation2 + $0xce] sm:$0xff]  ;;  %v4981_v6 = vld [vmem:[#allocation2 + $0xc6] sm:$0xff]  ;;  %v12032_v22 = vld [vmem:[#allocation2 + $0x3d] sm:$0xff]  ;;  %7290 = vmatpush3.msra.mxu0 %v5041_v21  ;;  %v5040_v57 = vmax.f32 %v4896_v32, %v5004_v20  ;;  %v4910_v39 = vmax.f32 %v4838_v13, %v4874_v25  ;;  %v5039_v30 = vmax.f32 %v4895_v41, %v5003_v12  ;;  %v4894_v20 = vmax.f32 %v4822_v60, %v4858_v40 }
 0x44c   : > { %v5086_v56 = vld [vmem:[%s12606_s6 + $0x88] sm:$0xff]  ;;  %v4873_v59 = vld [vmem:[#allocation2 + $0xb4] sm:$0xff]  ;;  %v5018_v44 = vmax.f32 %v4946_v2, %v4982_v28  ;;  %v4944_v49 = vld [vmem:[#allocation2 + $0xbd] sm:$0xff]  ;;  %7291 = vmatprep.subr.mxu0 %v5056_v51  ;;  %v5017_v35 = vmax.f32 %v4945_v33, %v4981_v6 }
 0x44d   : > { %v4966_v43 = vld [vmem:[#allocation2 + $0x4e] sm:$0xff]  ;;  %v4965_v16 = vld [vmem:[#allocation2 + $0x46] sm:$0xff]  ;;  %7488 = vmatmul.mubr.msk.f32.gmra.mxu1 %vm5099_vm12, %v5086_v56  ;;  %v4980_v14 = vld [vmem:[#allocation2 + $0xbe] sm:$0xff]  ;;  %7292 = vmatpush3.msra.mxu0 %v5040_v57 }
 0x44e   : > { %v4837_v5 = vld [vmem:[#allocation2 + $0xb3] sm:$0xff]  ;;  %v5002_v15 = vmax.f32 %v12015_v0, %v4966_v43  ;;  %7490 = vmatprep.mubr.msk.f32.mxu1 %vm5099_vm12, %v5089_v36  ;;  %v4964_v52 = vld [vmem:[#allocation2 + $0x3e] sm:$0xff]  ;;  %7293 = vmatprep.subr.mxu0 %v5055_v27  ;;  %v5054_v34 = vmax.f32 %v4910_v39, %v5018_v44  ;;  %v4836_v53 = vld [vmem:[#allocation2 + $0xab] sm:$0xff]  ;;  %v5016_v1 = vmax.f32 %v4944_v49, %v4980_v14 }
 0x44f   : > { %v4821_v4 = vld [vmem:[#allocation2 + $0x33] sm:$0xff]  ;;  %v4909_v18 = vmax.f32 %v4837_v5, %v4873_v59  ;;  %v4820_v24 = vld [vmem:[#allocation2 + $0x2b] sm:$0xff]  ;;  %7294 = vmatpush3.msra.mxu0 %v5039_v30  ;;  %v5001_v61 = vmax.f32 %v4929_v62, %v4965_v16  ;;  %v5000_v63 = vmax.f32 %v12032_v22, %v4964_v52  ;;  %v4835_v56 = vld [vmem:[#allocation2 + $0xa3] sm:$0xff] }
 0x450   : > { %v5092_v19 = vld [vmem:[%s12606_s6 + $0xb8] sm:$0xff]  ;;  %v4856_v55 = vld [vmem:[#allocation2 + $0x2c] sm:$0xff]  ;;  %v4893_v37 = vmax.f32 %v4821_v4, %v12025_v46  ;;  %v4871_v42 = vld [vmem:[#allocation2 + $0xa4] sm:$0xff]  ;;  %v5038_v58 = vmax.f32 %v4894_v20, %v5002_v15  ;;  %7295 = vmatprep.subr.mxu0 %v5054_v34 }
 0x451   : > { %v12043_v31 = vld [vmem:[#allocation2 + $0x35] sm:$0xff]  ;;  %v4872_v11 = vld [vmem:[#allocation2 + $0xac] sm:$0xff]  ;;  %v4855_v45 = vld [vmem:[#allocation2 + $0x24] sm:$0xff]  ;;  %7491 = vmatmul.mubr.msk.f32.gmra.mxu1 %vm5099_vm12, %v5092_v19  ;;  %v5053_v2 = vmax.f32 %v4909_v18, %v5017_v35  ;;  %v4892_v60 = vmax.f32 %v4820_v24, %v4856_v55  ;;  %v4907_v32 = vmax.f32 %v4835_v56, %v4871_v42 }
 0x452   : > { %v4943_v8 = vld [vmem:[#allocation2 + $0xb5] sm:$0xff]  ;;  %v4942_v0 = vld [vmem:[#allocation2 + $0xad] sm:$0xff]  ;;  %7493 = vmatprep.mubr.msk.f32.mxu1 %vm5099_vm12, %v5095_v50  ;;  %v4908_v28 = vmax.f32 %v4836_v53, %v4872_v11  ;;  %v4819_v9 = vld [vmem:[#allocation2 + $0x23] sm:$0xff]  ;;  %7296 = vmatpush3.msra.mxu0 %v5038_v58  ;;  %v5037_v47 = vmax.f32 %v4893_v37, %v5001_v61 }
 0x453   : > { %v4979_v26 = vld [vmem:[#allocation2 + $0xb6] sm:$0xff]  ;;  %v4978_v3 = vld [vmem:[#allocation2 + $0xae] sm:$0xff]  ;;  %v5098_v54 = vld [vmem:[%s12606_s6 + $0xe8] sm:$0x3f]  ;;  %7297 = vmatprep.subr.mxu0 %v5053_v2  ;;  %v5036_v51 = vmax.f32 %v4892_v60, %v5000_v63  ;;  %v4891_v23 = vmax.f32 %v4819_v9, %v4855_v45 }
 0x454   : > { %v4963_v38 = vld [vmem:[#allocation2 + $0x36] sm:$0xff]  ;;  %v5015_v7 = vmax.f32 %v4943_v8, %v4979_v26  ;;  %v4926_v10 = vld [vmem:[#allocation2 + $0x2d] sm:$0xff]  ;;  %v5052_v21 = vmax.f32 %v4908_v28, %v5016_v1  ;;  %v5014_v12 = vmax.f32 %v4942_v0, %v4978_v3  ;;  %7298 = vmatpush3.msra.mxu0 %v5037_v47  ;;  %v4941_v33 = vld [vmem:[#allocation2 + $0xa5] sm:$0xff] }
 0x455   : > { %v4962_v17 = vld [vmem:[#allocation2 + $0x2e] sm:$0xff]  ;;  %v4999_v40 = vmax.f32 %v12043_v31, %v4963_v38  ;;  %v4834_v43 = vld [vmem:[#allocation2 + $0x9b] sm:$0xff]  ;;  %7494 = vmatmul.mubr.msk.f32.gmra.mxu1 %vm5099_vm12, %v5098_v54  ;;  %v4977_v6 = vld [vmem:[#allocation2 + $0xa6] sm:$0xff] }
 0x456   : > { %v4870_v46 = vld [vmem:[#allocation2 + $0x9c] sm:$0xff]  ;;  %v4869_v36 = vld [vmem:[#allocation2 + $0x94] sm:$0xff]  ;;  %v4998_v44 = vmax.f32 %v4926_v10, %v4962_v17  ;;  %7299 = vmatprep.subr.mxu0 %v5052_v21  ;;  %v5051_v4 = vmax.f32 %v4907_v32, %v5015_v7  ;;  %v4925_v57 = vld [vmem:[#allocation2 + $0x25] sm:$0xff]  ;;  %v5013_v27 = vmax.f32 %v4941_v33, %v4977_v6  ;;  %7506 = vmatprep.mubr.msk.bf16.mxu1 %vm9542_vm14, %v9541_v29 }
 0x457   : > { %v4818_v13 = vld [vmem:[#allocation2 + $0x1b] sm:$0xff]  ;;  %v4833_v5 = vld [vmem:[#allocation2 + $0x93] sm:$0xff]  ;;  %v4906_v62 = vmax.f32 %v4834_v43, %v4870_v46  ;;  %v4961_v41 = vld [vmem:[#allocation2 + $0x26] sm:$0xff]  ;;  %7300 = vmatpush3.msra.mxu0 %v5036_v51  ;;  %v5035_v15 = vmax.f32 %v4891_v23, %v4999_v40 }
 0x458   : > { %v4854_v25 = vld [vmem:[#allocation2 + $0x1c] sm:$0xff]  ;;  %v4853_v59 = vld [vmem:[#allocation2 + $0x14] sm:$0xff]  ;;  %v4905_v16 = vmax.f32 %v4833_v5, %v4869_v36  ;;  %7301 = vmatprep.subr.mxu0 %v5051_v4  ;;  %v4997_v18 = vmax.f32 %v4925_v57, %v4961_v41  ;;  %v5078_v8 = vld [vmem:[%s12606_s6 + $0x48] sm:$0xff] }
 0x459   : > { %v4817_v22 = vld [vmem:[#allocation2 + $0x13] sm:$0xff]  ;;  %v4890_v49 = vmax.f32 %v4818_v13, %v4854_v25  ;;  %v5050_v19 = vmax.f32 %v4906_v62, %v5014_v12  ;;  %7302 = vmatpush3.msra.mxu0 %v5035_v15  ;;  %v5069_v31 = vld [vmem:[%s12606_s6] sm:$0xff]  ;;  %v5082_v26 = vld [vmem:[%s12606_s6 + $0x68] sm:$0xff] }
 0x45a   : > { %v4889_v14 = vmax.f32 %v4817_v22, %v4853_v59  ;;  %v5049_v55 = vmax.f32 %v4905_v16, %v5013_v27  ;;  %v5073_v50 = vld [vmem:[%s12606_s6 + $0x20] sm:$0xff]  ;;  %v5072_v30 = vld [vmem:[%s12606_s6 + $0x18] sm:$0xff]  ;;  %v5075_v37 = vld [vmem:[%s12606_s6 + $0x30] sm:$0xff] }
 0x45b   : > { %v5034_v39 = vmax.f32 %v4890_v49, %v4998_v44  ;;  %7303 = vmatprep.subr.mxu0 %v5050_v19  ;;  %v5076_v20 = vld [vmem:[%s12606_s6 + $0x38] sm:$0xff]  ;;  %v5079_v11 = vld [vmem:[%s12606_s6 + $0x50] sm:$0xff]  ;;  %v5081_v34 = vld [vmem:[%s12606_s6 + $0x60] sm:$0xff] }
 0x45c   : > { %v5033_v52 = vmax.f32 %v4889_v14, %v4997_v18  ;;  %v5085_v35 = vld [vmem:[%s12606_s6 + $0x80] sm:$0xff]  ;;  %v5084_v53 = vld [vmem:[%s12606_s6 + $0x78] sm:$0xff]  ;;  %v5087_v24 = vld [vmem:[%s12606_s6 + $0x90] sm:$0xff] }
 0x45d   : > { %7304 = vmatpush3.msra.mxu0 %v5034_v39  ;;  %v5088_v1 = vld [vmem:[%s12606_s6 + $0x98] sm:$0xff]  ;;  %v5091_v42 = vld [vmem:[%s12606_s6 + $0xb0] sm:$0xff]  ;;  %v5090_v45 = vld [vmem:[%s12606_s6 + $0xa8] sm:$0xff] }
 0x45e   : > { %7305 = vmatprep.subr.mxu0 %v5049_v55  ;;  %v5094_v38 = vld [vmem:[%s12606_s6 + $0xc8] sm:$0xff]  ;;  %v5093_v58 = vld [vmem:[%s12606_s6 + $0xc0] sm:$0xff]  ;;  %v5096_v63 = vld [vmem:[%s12606_s6 + $0xd8] sm:$0x3f] }
 0x45f   : > { %7306 = vmatpush3.msra.mxu0 %v5033_v52  ;;  %v5097_v61 = vld [vmem:[%s12606_s6 + $0xe0] sm:$0x3f]  ;;  %v9454_v36 = vld [vmem:[%s12607_s7 + $0x18] sm:$0xff]   ;;  %v9455_v62 = vld [vmem:[%s12607_s7 + $0x10] sm:$0xff]  }
 0x460   : > { %5199 = vmatmul.mubr.f32.vlgmr.msra.gmra.mxu0 %v5069_v31  ;;  %6581 = vmatprep.subr.bf16.mxu0 %v9540_v48  ;;  %v9453_v10 = vld [vmem:[%s12607_s7 + $0x20] ss:$0 sps:$4 sm:$0xff]   ;;  %v12125_v13 = vld [vmem:[#allocation2 + $0x2] sm:$0xff] }
 0x461   : > { %5203 = vmatprep.mubr.f32.mxu0 %v5073_v50  ;;  %v5900_v40 = vsel %vm2312_vm0, %v9453_v10, 0  ;;  %v12127_v25 = vld [vmem:[#allocation2 + $0x1] sm:$0xff]  ;;  %vm6444_vm0 = vcmask 654336  }
 0x462   : > { %7497 = vmatpush3.bf16.msra.mxu1 %v5900_v40  ;;  %v9456_v18 = vld [vmem:[%s12607_s7 + $0x8] sm:$0xff]  }
 0x463   : > { %7498 = vmatprep.subr.bf16.mxu1 %v9541_v29 }
 0x464   : > { %5204 = vmatmul.mubr.f32.gmra.mxu0 %v5072_v30 }
 0x465   : > { %5208 = vmatprep.mubr.f32.mxu0 %v5076_v20 }
 0x466   : > { %7499 = vmatpush3.bf16.msra.mxu1 %v9454_v36 }
 0x467   : > { %7500 = vmatprep.subr.bf16.mxu1 %v9541_v29 }
 0x468   : > { %5209 = vmatmul.mubr.f32.gmra.mxu0 %v5075_v37 }
 0x469   : > { %5213 = vmatprep.mubr.f32.mxu0 %v5079_v11 }
 0x46a   : > { %7501 = vmatpush3.bf16.msra.mxu1 %v9455_v62 }
 0x46b   : > { %7502 = vmatprep.subr.bf16.mxu1 %v9541_v29 }
 0x46c   : > { %5214 = vmatmul.mubr.f32.gmra.mxu0 %v5078_v8 }
 0x46d   : > { %5218 = vmatprep.mubr.f32.mxu0 %v5082_v26 }
 0x46e   : > { %7503 = vmatpush3.bf16.msra.mxu1 %v9456_v18 }
 0x46f   : > { %7504 = vmatprep.subr.bf16.mxu1 %v9541_v29 }
 0x470   : > { %5219 = vmatmul.mubr.f32.gmra.mxu0 %v5081_v34 }
 0x471   : > { %5223 = vmatprep.mubr.f32.mxu0 %v5085_v35 }
 0x474   : > { %5224 = vmatmul.mubr.f32.gmra.mxu0 %v5084_v53  ;;  %v9457_v53 = vld [vmem:[%s12607_s7] sm:$0xff]  }
 0x475   : > { %5228 = vmatprep.mubr.f32.mxu0 %v5088_v1  ;;  %7505 = vmatpush3.bf16.msra.mxu1 %v9457_v53 }
 0x476   : > { %7526 = vmatprep.subr.mxu1 %v9541_v29 }
 0x478   : > { %5229 = vmatmul.mubr.f32.gmra.mxu0 %v5087_v24 }
 0x479   : > { %5233 = vmatprep.mubr.f32.mxu0 %v5091_v42 }
 0x47c   : > { %5234 = vmatmul.mubr.f32.gmra.mxu0 %v5090_v45 }
 0x47d   : > { %5238 = vmatprep.mubr.f32.mxu0 %v5094_v38 }
 0x480   : > { %5239 = vmatmul.mubr.f32.gmra.mxu0 %v5093_v58 }
 0x481   : > { %5243 = vmatprep.mubr.f32.mxu0 %v5097_v61 }
 0x484   : > { %5244 = vmatmul.mubr.f32.gmra.mxu0 %v5096_v63 }
 0x502   : > { %v7483_v3 = vpop.f32.mrf.mxu1 }
 0x504   : > { %v5315_v56 = vpop.f32.mrf.mxu1 }
 0x506   : > { %v7486_v60 = vpop.f32.mrf.mxu1 }
 0x508   : > { %v5325_v12 = vpop.f32.mrf.mxu1 }
 0x50d   : > { %v7489_v5 = vpop.f32.mrf.mxu1 }
 0x50f   : > { %v5335_v14 = vpop.f32.mrf.mxu1 }
 0x511   : > { %v7492_v37 = vpop.f32.mrf.mxu1 }
 0x513   : > { %v5345_v38 = vpop.f32.mrf.mxu1 }
 0x520   : > { %v7307_v0 = vpop.f32.mrf.mxu0 }
 0x522   : > { %v7308_v54 = vpop.f32.mrf.mxu0 }
 0x523   : > { %v7309_v2 = vadd.f32 %v7308_v54, %v7307_v0 }
 0x524   : > { %v7310_v28 = vpop.f32.mrf.mxu0 }
 0x525   : > { %v5316_v7 = vadd.f32 %v7309_v2, %v5315_v56 }
 0x526   : > { %v7311_v9 = vpop.f32.mrf.mxu0 }
 0x527   : > { %5364 = vst.msk [vmem:[#allocation2 + $0xb] sm:$0xff] %vm1901_vm1, %v5316_v7  ;;  %v7312_v17 = vadd.f32 %v7311_v9, %v7310_v28  ;;  %v7495_v9 = vpop.f32.mrf.mxu1 }
 0x528   : > { %v7313_v47 = vpop.f32.mrf.mxu0 }
 0x529   : > { %v5321_v43 = vadd.f32 %v7483_v3, %v7312_v17 }
 0x52a   : > { %v7314_v46 = vpop.f32.mrf.mxu0 }
 0x52b   : > { %5365 = vst.msk [vmem:[#allocation2 + $0x13] sm:$0xff] %vm1901_vm1, %v5321_v43  ;;  %v7315_v21 = vadd.f32 %v7314_v46, %v7313_v47 }
 0x52c   : > { %v7316_v32 = vpop.f32.mrf.mxu0 }
 0x52d   : > { %v5326_v59 = vadd.f32 %v7315_v21, %v5325_v12 }
 0x52e   : > { %v7317_v51 = vpop.f32.mrf.mxu0  ;;  %v5399_v23 = vld [vmem:[#allocation2 + $0xa] sm:$0xff] }
 0x52f   : > { %v5389_v44 = vld [vmem:[#allocation2 + $0x9] sm:$0xff]  ;;  %5366 = vst.msk [vmem:[#allocation2 + $0x1b] sm:$0xff] %vm1901_vm1, %v5326_v59  ;;  %v7318_v33 = vadd.f32 %v7317_v51, %v7316_v32  ;;  %v9073_v6 = vpack.i.bf16 %v5399_v23, %v12125_v13  ;;  %v5355_v32 = vpop.f32.mrf.mxu1 }
 0x530   : > { %v9068_v4 = vpack.i.bf16 %v5389_v44, %v12127_v25  ;;  %v7319_v16 = vpop.f32.mrf.mxu0  ;;  %v5410_v57 = vld [vmem:[#allocation2 + $0xb] sm:$0xff] }
 0x531   : > { %v5331_v22 = vadd.f32 %v7486_v60, %v7318_v33  ;;  %9074 = vrot.lane.b32.xlu0 %v9073_v6, %s12664_s22 }
 0x532   : > { %9069 = vrot.lane.b32.xlu1 %v9068_v4, %s12670_s24  ;;  %v5411_v41 = vld [vmem:[#allocation2 + $0x13] sm:$0xff]  ;;  %v7320_v49 = vpop.f32.mrf.mxu0 }
 0x533   : > { %v5400_v15 = vld [vmem:[#allocation2 + $0x12] sm:$0xff]  ;;  %5367 = vst.msk [vmem:[#allocation2 + $0x23] sm:$0xff] %vm1901_vm1, %v5331_v22  ;;  %v9083_v19 = vpack.i.bf16 %v5411_v41, %v5410_v57  ;;  %v7321_v39 = vadd.f32 %v7320_v49, %v7319_v16 }
 0x534   : > { %v9078_v27 = vpack.i.bf16 %v5400_v15, %v5399_v23  ;;  %v7322_v55 = vpop.f32.mrf.mxu0  ;;  %v5420_v50 = vld [vmem:[#allocation2 + $0xc] sm:$0xff] }
 0x535   : > { %9084 = vrot.lane.b32.xlu0 %v9083_v19, %s12666_s1  ;;  %v5336_v52 = vadd.f32 %v7321_v39, %v5335_v14  ;;  %v5390_v42 = vld [vmem:[#allocation2 + $0x11] sm:$0xff] }
 0x536   : > { %9079 = vrot.lane.b32.xlu1 %v9078_v27, %s12665_s19  ;;  %v5401_v31 = vld [vmem:[#allocation2 + $0x1a] sm:$0xff]  ;;  %v7323_v20 = vpop.f32.mrf.mxu0 }
 0x537   : > { %v5421_v30 = vld [vmem:[#allocation2 + $0x14] sm:$0xff]  ;;  %v9098_v11 = vpack.i.bf16 %v5401_v31, %v5400_v15  ;;  %v7324_v26 = vadd.f32 %v7323_v20, %v7322_v55  ;;  %5368 = vst.msk [vmem:[#allocation2 + $0x2b] sm:$0xff] %vm1901_vm1, %v5336_v52 }
 0x538   : > { %v9088_v8 = vpack.i.bf16 %v5421_v30, %v5420_v50  ;;  %v5391_v34 = vld [vmem:[#allocation2 + $0x19] sm:$0xff]  ;;  %v7325_v35 = vpop.f32.mrf.mxu0 }
 0x539   : > { %9099 = vrot.lane.b32.xlu0 %v9098_v11, %s12664_s22  ;;  %v5341_v1 = vadd.f32 %v7489_v5, %v7324_v26  ;;  %v9093_v61 = vpack.i.bf16 %v5391_v34, %v5390_v42  ;;  %v5442_v28 = vld [vmem:[#allocation2 + $0x16] sm:$0xff] }
 0x53a   : > { %9089 = vrot.lane.b32.xlu1 %v9088_v8, %s12667_s25  ;;  %v5422_v24 = vld [vmem:[#allocation2 + $0x1c] sm:$0xff]  ;;  %v7326_v45 = vpop.f32.mrf.mxu0 }
 0x53b   : > { %5369 = vst.msk [vmem:[#allocation2 + $0x33] sm:$0xff] %vm1901_vm1, %v5341_v1  ;;  %v9103_v58 = vpack.i.bf16 %v5422_v24, %v5421_v30  ;;  %v7327_v63 = vadd.f32 %v7326_v45, %v7325_v35  ;;  %v5443_v0 = vld [vmem:[#allocation2 + $0x1e] sm:$0xff]  ;;  %v5432_v56 = vld [vmem:[#allocation2 + $0x15] sm:$0xff] }
 0x53c   : > { %v5433_v3 = vld [vmem:[#allocation2 + $0x1d] sm:$0xff]  ;;  %v7328_v54 = vpop.f32.mrf.mxu0  ;;  %v9113_v10 = vpack.i.bf16 %v5443_v0, %v5442_v28 }
 0x53d   : > { %9104 = vrot.lane.b32.xlu0 %v9103_v58, %s12668_s28  ;;  %v5346_v2 = vadd.f32 %v7327_v63, %v5345_v38  ;;  %v9108_v17 = vpack.i.bf16 %v5433_v3, %v5432_v56  ;;  %v5413_v60 = vld [vmem:[#allocation2 + $0x23] sm:$0xff]  ;;  %v5412_v36 = vld [vmem:[#allocation2 + $0x1b] sm:$0xff] }
 0x53e   : > { %9094 = vrot.lane.b32.xlu1 %v9093_v61, %s12670_s24  ;;  %v7329_v7 = vpop.f32.mrf.mxu0  ;;  %v5402_v40 = vld [vmem:[#allocation2 + $0x22] sm:$0xff]  ;;  %v9123_v12 = vpack.i.bf16 %v5413_v60, %v5412_v36  ;;  %v5403_v23 = vld [vmem:[#allocation2 + $0x2a] sm:$0xff] }
 0x53f   : > { %v7330_v47 = vadd.f32 %v7329_v7, %v7328_v54  ;;  %5370 = vst.msk [vmem:[#allocation2 + $0x3b] sm:$0xff] %vm1901_vm1, %v5346_v2  ;;  %v9118_v59 = vpack.i.bf16 %v5402_v40, %v5401_v31  ;;  %v5423_v44 = vld [vmem:[#allocation2 + $0x24] sm:$0xff]  ;;  %v9138_v4 = vpack.i.bf16 %v5403_v23, %v5402_v40 }
 0x540   : > { %v7331_v43 = vpop.f32.mrf.mxu0  ;;  %v9128_v62 = vpack.i.bf16 %v5423_v44, %v5422_v24  ;;  %v5393_v57 = vld [vmem:[#allocation2 + $0x29] sm:$0xff]  ;;  %v5392_v15 = vld [vmem:[#allocation2 + $0x21] sm:$0xff] }
 0x541   : > { %9114 = vrot.lane.b32.xlu0 %v9113_v10, %s12671_s23  ;;  %v5351_v46 = vadd.f32 %v7492_v37, %v7330_v47  ;;  %v9133_v14 = vpack.i.bf16 %v5393_v57, %v5392_v15  ;;  %v5444_v39 = vld [vmem:[#allocation2 + $0x26] sm:$0xff]  ;;  %v5451_v15 = vld [vmem:[#allocation2 + $0x5e] sm:$0x3f] }
 0x542   : > { %9109 = vrot.lane.b32.xlu1 %v9108_v17, %s12669_s0  ;;  %v7332_v21 = vpop.f32.mrf.mxu0  ;;  %v5424_v22 = vld [vmem:[#allocation2 + $0x2c] sm:$0xff] }
 0x543   : > { %5371 = vst.msk [vmem:[#allocation2 + $0x43] sm:$0xff] %vm1901_vm1, %v5351_v46  ;;  %v7333_v51 = vadd.f32 %v7332_v21, %v7331_v43  ;;  %v9143_v49 = vpack.i.bf16 %v5424_v22, %v5423_v44  ;;  %v5445_v19 = vld [vmem:[#allocation2 + $0x2e] sm:$0xff]  ;;  %v5434_v18 = vld [vmem:[#allocation2 + $0x25] sm:$0xff] }
 0x544   : > { %v7334_v5 = vpop.f32.mrf.mxu0  ;;  %v5435_v27 = vld [vmem:[#allocation2 + $0x2d] sm:$0xff]  ;;  %v9153_v55 = vpack.i.bf16 %v5445_v19, %v5444_v39  ;;  %v5441_v19 = vld [vmem:[#allocation2 + $0x5d] sm:$0x3f] }
 0x545   : > { %9124 = vrot.lane.b32.xlu0 %v9123_v12, %s12666_s1  ;;  %v5356_v33 = vadd.f32 %v7333_v51, %v5355_v32  ;;  %v9148_v52 = vpack.i.bf16 %v5435_v27, %v5434_v18  ;;  %v5414_v31 = vld [vmem:[#allocation2 + $0x2b] sm:$0xff]  ;;  %v5415_v50 = vld [vmem:[#allocation2 + $0x33] sm:$0xff] }
 0x546   : > { %9119 = vrot.lane.b32.xlu1 %v9118_v59, %s12665_s19  ;;  %v7335_v6 = vpop.f32.mrf.mxu0  ;;  %v5404_v30 = vld [vmem:[#allocation2 + $0x32] sm:$0xff]  ;;  %v9163_v20 = vpack.i.bf16 %v5415_v50, %v5414_v31  ;;  %v5405_v11 = vld [vmem:[#allocation2 + $0x3a] sm:$0xff]  ;;  %v5986_v18 = vld [vmem:[%s12611_s11 + $0x8] sm:$0xff] }
 0x547   : > { %v7336_v16 = vadd.f32 %v7335_v6, %v7334_v5  ;;  %5372 = vst.msk [vmem:[#allocation2 + $0x4b] sm:$0xff] %vm1901_vm1, %v5356_v33  ;;  %v9158_v37 = vpack.i.bf16 %v5404_v30, %v5403_v23  ;;  %v5425_v8 = vld [vmem:[#allocation2 + $0x34] sm:$0xff]  ;;  %v9178_v26 = vpack.i.bf16 %v5405_v11, %v5404_v30  ;;  %v5990_v50 = vld [vmem:[%s12611_s11 + $0x28] sm:$0xff]  ;;  %v5989_v30 = vld [vmem:[%s12611_s11 + $0x20] sm:$0xff] }
 0x548   : > { %v9168_v34 = vpack.i.bf16 %v5425_v8, %v5424_v22  ;;  %v5395_v53 = vld [vmem:[#allocation2 + $0x39] sm:$0xff]  ;;  %v5394_v1 = vld [vmem:[#allocation2 + $0x31] sm:$0xff] }
 0x549   : > { %9139 = vrot.lane.b32.xlu0 %v9138_v4, %s12664_s22  ;;  %v5361_v41 = vadd.f32 %v7495_v9, %v7336_v16  ;;  %v9173_v42 = vpack.i.bf16 %v5395_v53, %v5394_v1  ;;  %v5446_v58 = vld [vmem:[#allocation2 + $0x36] sm:$0xff] }
 0x54a   : > { %9129 = vrot.lane.b32.xlu1 %v9128_v62, %s12667_s25  ;;  %v5426_v35 = vld [vmem:[#allocation2 + $0x3c] sm:$0xff]  ;;  %v5987_v31 = vld [vmem:[%s12611_s11 + $0x10] sm:$0xff] }
 0x54b   : > { %5373 = vst.msk [vmem:[#allocation2 + $0x53] sm:$0x3f] %vm2816_vm11, %v5361_v41  ;;  %v9183_v24 = vpack.i.bf16 %v5426_v35, %v5425_v8  ;;  %v5447_v45 = vld [vmem:[#allocation2 + $0x3e] sm:$0xff]  ;;  %v5436_v61 = vld [vmem:[#allocation2 + $0x35] sm:$0xff] }
 0x54c   : > { %v5437_v38 = vld [vmem:[#allocation2 + $0x3d] sm:$0xff]  ;;  %v9193_v63 = vpack.i.bf16 %v5447_v45, %v5446_v58  ;;  %v5379_v58 = vld [vmem:[#allocation2 + $0x8] sm:$0xff] }
 0x54d   : > { %9144 = vrot.lane.b32.xlu0 %v9143_v49, %s12668_s28  ;;  %v9188_v0 = vpack.i.bf16 %v5437_v38, %v5436_v61  ;;  %v5416_v3 = vld [vmem:[#allocation2 + $0x3b] sm:$0xff]  ;;  %v5417_v54 = vld [vmem:[#allocation2 + $0x43] sm:$0xff] }
 0x54e   : > { %9134 = vrot.lane.b32.xlu1 %v9133_v14, %s12670_s24  ;;  %v5406_v2 = vld [vmem:[#allocation2 + $0x42] sm:$0xff]  ;;  %v9203_v28 = vpack.i.bf16 %v5417_v54, %v5416_v3  ;;  %v5407_v7 = vld [vmem:[#allocation2 + $0x4a] sm:$0x3f]  ;;  %v5431_v16 = vld [vmem:[#allocation2 + $0x5c] sm:$0x3f] }
 0x54f   : > { %v9198_v56 = vpack.i.bf16 %v5406_v2, %v5405_v11  ;;  %v5427_v9 = vld [vmem:[#allocation2 + $0x44] sm:$0xff]  ;;  %v9218_v10 = vpack.i.bf16 %v5407_v7, %v5406_v2 }
 0x550   : > { %v9208_v17 = vpack.i.bf16 %v5427_v9, %v5426_v35  ;;  %v5396_v60 = vld [vmem:[#allocation2 + $0x41] sm:$0xff]  ;;  %v5397_v40 = vld [vmem:[#allocation2 + $0x49] sm:$0x3f] }
 0x551   : > { %9154 = vrot.lane.b32.xlu0 %v9153_v55, %s12671_s23  ;;  %v9213_v46 = vpack.i.bf16 %v5397_v40, %v5396_v60  ;;  %v5448_v36 = vld [vmem:[#allocation2 + $0x46] sm:$0xff] }
 0x552   : > { %9149 = vrot.lane.b32.xlu1 %v9148_v52, %s12669_s0  ;;  %v5428_v47 = vld [vmem:[#allocation2 + $0x4c] sm:$0xff]  ;;  %v5430_v62 = vld [vmem:[#allocation2 + $0x54] sm:$0xff]  ;;  %v5985_v55 = vld [vmem:[%s12611_s11] sm:$0xff] }
 0x553   : > { %v9223_v43 = vpack.i.bf16 %v5428_v47, %v5427_v9  ;;  %v5449_v21 = vld [vmem:[#allocation2 + $0x4e] sm:$0xff]  ;;  %v5438_v32 = vld [vmem:[#allocation2 + $0x45] sm:$0xff]  ;;  %v9253_v57 = vpack.i.bf16 %v5431_v16, %v5430_v62  ;;  %v5450_v49 = vld [vmem:[#allocation2 + $0x56] sm:$0xff] }
 0x554   : > { %v5439_v12 = vld [vmem:[#allocation2 + $0x4d] sm:$0xff]  ;;  %v9233_v59 = vpack.i.bf16 %v5449_v21, %v5448_v36  ;;  %v5440_v14 = vld [vmem:[#allocation2 + $0x55] sm:$0xff]  ;;  %v9263_v27 = vpack.i.bf16 %v5451_v15, %v5450_v49  ;;  %v5993_v8 = vld [vmem:[%s12611_s11 + $0x40] sm:$0xff] }
 0x555   : > { %9164 = vrot.lane.b32.xlu0 %v9163_v20, %s12666_s1  ;;  %v9228_v51 = vpack.i.bf16 %v5439_v12, %v5438_v32  ;;  %v5418_v23 = vld [vmem:[#allocation2 + $0x4b] sm:$0xff]  ;;  %v5419_v44 = vld [vmem:[#allocation2 + $0x53] sm:$0x3f]  ;;  %v9258_v39 = vpack.i.bf16 %v5441_v19, %v5440_v14 }
 0x556   : > { %9159 = vrot.lane.b32.xlu1 %v9158_v37, %s12665_s19  ;;  %v5408_v5 = vld [vmem:[#allocation2 + $0x4a] sm:$0xff]  ;;  %v5409_v33 = vld [vmem:[#allocation2 + $0x52] sm:$0x3f]  ;;  %v9243_v6 = vpack.i.bf16 %v5419_v44, %v5418_v23  ;;  %v5988_v52 = vld [vmem:[%s12611_s11 + $0x18] sm:$0xff] }
 0x557   : > { %v9238_v4 = vpack.i.bf16 %v5409_v33, %v5408_v5  ;;  %v5429_v22 = vld [vmem:[#allocation2 + $0x54] sm:$0x3f]  ;;  %v5994_v11 = vld [vmem:[%s12611_s11 + $0x48] sm:$0x3f] }
 0x558   : > { %v9248_v41 = vpack.i.bf16 %v5429_v22, %v5428_v47  ;;  %v5992_v20 = vld [vmem:[%s12611_s11 + $0x38] sm:$0xff]  ;;  %v5991_v37 = vld [vmem:[%s12611_s11 + $0x30] sm:$0xff] }
 0x559   : > { %9179 = vrot.lane.b32.xlu0 %v9178_v26, %s12664_s22 }
 0x55a   : > { %9169 = vrot.lane.b32.xlu1 %v9168_v34, %s12667_s25 }
 0x55d   : > { %9184 = vrot.lane.b32.xlu0 %v9183_v24, %s12668_s28 }
 0x55e   : > { %9174 = vrot.lane.b32.xlu1 %v9173_v42, %s12670_s24  ;;  %v12224_v42 = vld [vmem:[#allocation2] sm:$0xff] }
 0x561   : > { %9194 = vrot.lane.b32.xlu0 %v9193_v63, %s12671_s23 }
 0x562   : > { %9189 = vrot.lane.b32.xlu1 %v9188_v0, %s12669_s0 }
 0x565   : > { %9204 = vrot.lane.b32.xlu0 %v9203_v28, %s12666_s1 }
 0x566   : > { %9199 = vrot.lane.b32.xlu1 %v9198_v56, %s12665_s19 }
 0x569   : > { %9219 = vrot.lane.b32.xlu0 %v9218_v10, %s12664_s22 }
 0x56a   : > { %9209 = vrot.lane.b32.xlu1 %v9208_v17, %s12667_s25 }
 0x56d   : > { %9224 = vrot.lane.b32.xlu0 %v9223_v43, %s12668_s28 }
 0x56e   : > { %9214 = vrot.lane.b32.xlu1 %v9213_v46, %s12670_s24  ;;  %s9545_s24 = smov 112  }
 0x571   : > { %9234 = vrot.lane.b32.xlu0 %v9233_v59, %s12671_s23 }
 0x572   : > { %9229 = vrot.lane.b32.xlu1 %v9228_v51, %s12669_s0 }
 0x575   : > { %9244 = vrot.lane.b32.xlu0 %v9243_v6, %s12666_s1 }
 0x576   : > { %9239 = vrot.lane.b32.xlu1 %v9238_v4, %s12665_s19 }
 0x579   : > { %9254 = vrot.lane.b32.xlu0 %v9253_v57, %s12668_s28 }
 0x57a   : > { %9249 = vrot.lane.b32.xlu1 %v9248_v41, %s12667_s25 }
 0x57d   : > { %9264 = vrot.lane.b32.xlu0 %v9263_v27, %s12671_s23 }
 0x57e   : > { %9259 = vrot.lane.b32.xlu1 %v9258_v39, %s12669_s0  ;;  %v5381_v39 = vld [vmem:[#allocation2 + $0x18] sm:$0xff]  ;;  %s12676_s0 = sld [smem:[#allocation19_spill]] }
 0x581   : > { %6002 = vperm.xlu0 %8346, %v5986_v18   ;;  %v5380_v18 = vld [vmem:[#allocation2 + $0x10] sm:$0xff] }
 0x582   : > { %5997 = vperm.xlu1 %8347, %v5985_v55  }
 0x585   : > { %6012 = vperm.xlu0 %8346, %v5988_v52  }
 0x586   : > { %6007 = vperm.xlu1 %8347, %v5987_v31  }
 0x589   : > { %6022 = vperm.xlu0 %8346, %v5990_v50  }
 0x58a   : > { %6017 = vperm.xlu1 %8347, %v5989_v30  }
 0x58d   : > { %6032 = vperm.xlu0 %8346, %v5992_v20  }
 0x58e   : > { %6027 = vperm.xlu1 %8347, %v5991_v37  }
 0x591   : > { %6042 = vperm.xlu0 %8346, %v5994_v11  }
 0x592   : > { %6037 = vperm.xlu1 %8347, %v5993_v8  }
 0x5a3   : > { %v9075_v26 = vpop.permute.xlu0 %9074 }
 0x5a4   : > { %v9070_v34 = vpop.permute.xlu1 %9069  ;;  %v9077_v45 = vunpack.i.h.bf16 %v9075_v26  ;;  %v9076_v38 = vunpack.i.l.bf16 %v9075_v26 }
 0x5a5   : > { %v9072_v35 = vunpack.i.h.bf16 %v9070_v34  ;;  %v9071_v53 = vunpack.i.l.bf16 %v9070_v34 }
 0x5a7   : > { %v9085_v1 = vpop.permute.xlu0 %9084  ;;  %v5756_v61 = vsel %vm1901_vm1, %v12224_v42, %v9071_v53  ;;  %v5757_v63 = vsel %vm1901_vm1, %v5379_v58, %v9072_v35 }
 0x5a8   : > { %v9080_v24 = vpop.permute.xlu1 %9079  ;;  %v9087_v28 = vunpack.i.h.bf16 %v9085_v1  ;;  %v9086_v56 = vunpack.i.l.bf16 %v9085_v1  ;;  %v5766_v7 = vsel %vm549_vm2, %v5756_v61, %v9076_v38  ;;  %v5767_v9 = vsel %vm549_vm2, %v5757_v63, %v9077_v45 }
 0x5a9   : > { %v9082_v0 = vunpack.i.h.bf16 %v9080_v24  ;;  %v9081_v3 = vunpack.i.l.bf16 %v9080_v24 }
 0x5ab   : > { %v9100_v54 = vpop.permute.xlu0 %9099  ;;  %v5776_v10 = vsel %vm1974_vm3, %v5766_v7, %v9081_v3  ;;  %v5777_v17 = vsel %vm1974_vm3, %v5767_v9, %v9082_v0 }
 0x5ac   : > { %v9090_v2 = vpop.permute.xlu1 %9089  ;;  %v5786_v21 = vsel %vm2011_vm4, %v5776_v10, %v9086_v56  ;;  %v5787_v32 = vsel %vm2011_vm4, %v5777_v17, %v9087_v28  ;;  %v9102_v37 = vunpack.i.h.bf16 %v9100_v54  ;;  %v9101_v11 = vunpack.i.l.bf16 %v9100_v54 }
 0x5ad   : > { %v9092_v47 = vunpack.i.h.bf16 %v9090_v2  ;;  %v9091_v60 = vunpack.i.l.bf16 %v9090_v2 }
 0x5af   : > { %v9105_v40 = vpop.permute.xlu0 %9104  ;;  %v5796_v12 = vsel %vm2048_vm5, %v5786_v21, %v9091_v60  ;;  %v5797_v59 = vsel %vm2048_vm5, %v5787_v32, %v9092_v47 }
 0x5b0   : > { %v9095_v43 = vpop.permute.xlu1 %9094  ;;  %v9107_v46 = vunpack.i.h.bf16 %v9105_v40  ;;  %v9106_v36 = vunpack.i.l.bf16 %v9105_v40 }
 0x5b1   : > { %v9097_v57 = vunpack.i.h.bf16 %v9095_v43  ;;  %v9096_v41 = vunpack.i.l.bf16 %v9095_v43 }
 0x5b2   : > { %v5806_v4 = vsel %vm2085_vm6, %v5796_v12, %v9106_v36  ;;  %v5807_v62 = vsel %vm2085_vm6, %v5797_v59, %v9107_v46 }
 0x5b3   : > { %v9115_v51 = vpop.permute.xlu0 %9114  ;;  %v5759_v55 = vsel %vm1901_vm1, %v5381_v39, %v9097_v57  ;;  %v5758_v52 = vsel %vm1901_vm1, %v5380_v18, %v9096_v41 }
 0x5b4   : > { %v9110_v23 = vpop.permute.xlu1 %9109  ;;  %v9117_v44 = vunpack.i.h.bf16 %v9115_v51  ;;  %v9116_v5 = vunpack.i.l.bf16 %v9115_v51  ;;  %v5768_v34 = vsel %vm549_vm2, %v5758_v52, %v9101_v11  ;;  %v5769_v35 = vsel %vm549_vm2, %v5759_v55, %v9102_v37 }
 0x5b5   : > { %v9112_v33 = vunpack.i.h.bf16 %v9110_v23  ;;  %v9111_v6 = vunpack.i.l.bf16 %v9110_v23  ;;  %v5382_v23 = vld [vmem:[#allocation2 + $0x20] sm:$0xff] }
 0x5b7   : > { %v5816_v16 = vsel %vm2122_vm7, %v5806_v4, %v9111_v6  ;;  %v5817_v22 = vsel %vm2122_vm7, %v5807_v62, %v9112_v33  ;;  %v9125_v14 = vpop.permute.xlu0 %9124 }
 0x5b8   : > { %v5826_v15 = vsel %vm2159_vm8, %v5816_v16, %v9116_v5  ;;  %v5827_v49 = vsel %vm2159_vm8, %v5817_v22, %v9117_v44  ;;  %v9120_v19 = vpop.permute.xlu1 %9119  ;;  %v9127_v8 = vunpack.i.h.bf16 %v9125_v14  ;;  %v9126_v26 = vunpack.i.l.bf16 %v9125_v14  ;;  %v5383_v44 = vld [vmem:[#allocation2 + $0x28] sm:$0xff] }
 0x5b9   : > { %v5836_v27 = vpack.c.bf16 %v5827_v49, %v5826_v15  ;;  %v9122_v31 = vunpack.i.h.bf16 %v9120_v19  ;;  %v9121_v50 = vunpack.i.l.bf16 %v9120_v19 }
 0x5bb   : > { %7507 = vmatmul.mubr.msk.bf16.vlgmr.msra.gmra.mxu1 %vm2257_vm9, %v5836_v27  ;;  %v9140_v30 = vpop.permute.xlu0 %9139  ;;  %v5778_v53 = vsel %vm1974_vm3, %v5768_v34, %v9121_v50  ;;  %v5779_v1 = vsel %vm1974_vm3, %v5769_v35, %v9122_v31 }
 0x5bc   : > { %v9130_v20 = vpop.permute.xlu1 %9129  ;;  %7510 = vmatprep.mubr.msk.bf16.mxu1 %vm9542_vm14, %v9541_v29  ;;  %v5788_v0 = vsel %vm2011_vm4, %v5778_v53, %v9126_v26  ;;  %v5789_v3 = vsel %vm2011_vm4, %v5779_v1, %v9127_v8  ;;  %v9142_v22 = vunpack.i.h.bf16 %v9140_v30  ;;  %v9141_v57 = vunpack.i.l.bf16 %v9140_v30 }
 0x5bd   : > { %v9132_v24 = vunpack.i.h.bf16 %v9130_v20  ;;  %v9131_v45 = vunpack.i.l.bf16 %v9130_v20 }
 0x5bf   : > { %v9145_v38 = vpop.permute.xlu0 %9144  ;;  %v5798_v54 = vsel %vm2048_vm5, %v5788_v0, %v9131_v45  ;;  %v5799_v2 = vsel %vm2048_vm5, %v5789_v3, %v9132_v24 }
 0x5c0   : > { %v9135_v58 = vpop.permute.xlu1 %9134  ;;  %v9147_v61 = vunpack.i.h.bf16 %v9145_v38  ;;  %v9146_v63 = vunpack.i.l.bf16 %v9145_v38 }
 0x5c1   : > { %v9137_v46 = vunpack.i.h.bf16 %v9135_v58  ;;  %v9136_v36 = vunpack.i.l.bf16 %v9135_v58 }
 0x5c2   : > { %v5808_v47 = vsel %vm2085_vm6, %v5798_v54, %v9146_v63  ;;  %v5809_v60 = vsel %vm2085_vm6, %v5799_v2, %v9147_v61 }
 0x5c3   : > { %v9155_v28 = vpop.permute.xlu0 %9154  ;;  %v5761_v5 = vsel %vm1901_vm1, %v5383_v44, %v9137_v46  ;;  %v5760_v33 = vsel %vm1901_vm1, %v5382_v23, %v9136_v36 }
 0x5c4   : > { %v9150_v56 = vpop.permute.xlu1 %9149  ;;  %v9157_v7 = vunpack.i.h.bf16 %v9155_v28  ;;  %v9156_v9 = vunpack.i.l.bf16 %v9155_v28  ;;  %v5770_v49 = vsel %vm549_vm2, %v5760_v33, %v9141_v57  ;;  %v5771_v14 = vsel %vm549_vm2, %v5761_v5, %v9142_v22 }
 0x5c5   : > { %v9152_v10 = vunpack.i.h.bf16 %v9150_v56  ;;  %v9151_v17 = vunpack.i.l.bf16 %v9150_v56  ;;  %v5384_v56 = vld [vmem:[#allocation2 + $0x30] sm:$0xff] }
 0x5c7   : > { %v5818_v40 = vsel %vm2122_vm7, %v5808_v47, %v9151_v17  ;;  %v5819_v43 = vsel %vm2122_vm7, %v5809_v60, %v9152_v10  ;;  %v9165_v21 = vpop.permute.xlu0 %9164 }
 0x5c8   : > { %v9160_v32 = vpop.permute.xlu1 %9159  ;;  %v5828_v12 = vsel %vm2159_vm8, %v5818_v40, %v9156_v9  ;;  %v5829_v59 = vsel %vm2159_vm8, %v5819_v43, %v9157_v7  ;;  %v9167_v41 = vunpack.i.h.bf16 %v9165_v21  ;;  %v9166_v15 = vunpack.i.l.bf16 %v9165_v21  ;;  %v5385_v7 = vld [vmem:[#allocation2 + $0x38] sm:$0xff] }
 0x5c9   : > { %v5837_v51 = vpack.c.bf16 %v5829_v59, %v5828_v12  ;;  %v9162_v6 = vunpack.i.h.bf16 %v9160_v32  ;;  %v9161_v4 = vunpack.i.l.bf16 %v9160_v32 }
 0x5cb   : > { %7511 = vmatmul.mubr.msk.bf16.gmra.mxu1 %vm2257_vm9, %v5837_v51  ;;  %v9180_v62 = vpop.permute.xlu0 %9179  ;;  %v5780_v19 = vsel %vm1974_vm3, %v5770_v49, %v9161_v4  ;;  %v5781_v27 = vsel %vm1974_vm3, %v5771_v14, %v9162_v6 }
 0x5cc   : > { %v9170_v16 = vpop.permute.xlu1 %9169  ;;  %7514 = vmatprep.mubr.msk.bf16.mxu1 %vm9542_vm14, %v9541_v29  ;;  %v5790_v30 = vsel %vm2011_vm4, %v5780_v19, %v9166_v15  ;;  %v5791_v20 = vsel %vm2011_vm4, %v5781_v27, %v9167_v41  ;;  %v9182_v43 = vunpack.i.h.bf16 %v9180_v62  ;;  %v9181_v46 = vunpack.i.l.bf16 %v9180_v62  ;;  %v5386_v19 = vld [vmem:[#allocation2 + $0x40] sm:$0xff] }
 0x5cd   : > { %v9172_v39 = vunpack.i.h.bf16 %v9170_v16  ;;  %v9171_v18 = vunpack.i.l.bf16 %v9170_v16 }
 0x5cf   : > { %v9185_v55 = vpop.permute.xlu0 %9184  ;;  %v5800_v37 = vsel %vm2048_vm5, %v5790_v30, %v9171_v18  ;;  %v5801_v11 = vsel %vm2048_vm5, %v5791_v20, %v9172_v39 }
 0x5d0   : > { %v9175_v52 = vpop.permute.xlu1 %9174  ;;  %v9187_v31 = vunpack.i.h.bf16 %v9185_v55  ;;  %v9186_v50 = vunpack.i.l.bf16 %v9185_v55 }
 0x5d1   : > { %v9177_v61 = vunpack.i.h.bf16 %v9175_v52  ;;  %v9176_v63 = vunpack.i.l.bf16 %v9175_v52 }
 0x5d2   : > { %v5810_v24 = vsel %vm2085_vm6, %v5800_v37, %v9186_v50  ;;  %v5811_v45 = vsel %vm2085_vm6, %v5801_v11, %v9187_v31  ;;  %v5387_v50 = vld [vmem:[#allocation2 + $0x48] sm:$0x3f] }
 0x5d3   : > { %v9195_v8 = vpop.permute.xlu0 %9194  ;;  %v5763_v9 = vsel %vm1901_vm1, %v5385_v7, %v9177_v61  ;;  %v5762_v10 = vsel %vm1901_vm1, %v5384_v56, %v9176_v63 }
 0x5d4   : > { %v9190_v26 = vpop.permute.xlu1 %9189  ;;  %v9197_v34 = vunpack.i.h.bf16 %v9195_v8  ;;  %v9196_v35 = vunpack.i.l.bf16 %v9195_v8  ;;  %v5772_v32 = vsel %vm549_vm2, %v5762_v10, %v9181_v46  ;;  %v5773_v12 = vsel %vm549_vm2, %v5763_v9, %v9182_v43 }
 0x5d5   : > { %v9192_v53 = vunpack.i.h.bf16 %v9190_v26  ;;  %v9191_v1 = vunpack.i.l.bf16 %v9190_v26 }
 0x5d7   : > { %v5820_v38 = vsel %vm2122_vm7, %v5810_v24, %v9191_v1  ;;  %v5821_v58 = vsel %vm2122_vm7, %v5811_v45, %v9192_v53  ;;  %v9205_v0 = vpop.permute.xlu0 %9204 }
 0x5d8   : > { %v9200_v3 = vpop.permute.xlu1 %9199  ;;  %v5830_v54 = vsel %vm2159_vm8, %v5820_v38, %v9196_v35  ;;  %v5831_v2 = vsel %vm2159_vm8, %v5821_v58, %v9197_v34  ;;  %v9207_v36 = vunpack.i.h.bf16 %v9205_v0  ;;  %v9206_v21 = vunpack.i.l.bf16 %v9205_v0 }
 0x5d9   : > { %v5838_v28 = vpack.c.bf16 %v5831_v2, %v5830_v54  ;;  %v9202_v17 = vunpack.i.h.bf16 %v9200_v3  ;;  %v9201_v47 = vunpack.i.l.bf16 %v9200_v3 }
 0x5db   : > { %7515 = vmatmul.mubr.msk.bf16.gmra.mxu1 %vm2257_vm9, %v5838_v28  ;;  %v9220_v60 = vpop.permute.xlu0 %9219  ;;  %v5782_v59 = vsel %vm1974_vm3, %v5772_v32, %v9201_v47  ;;  %v5783_v51 = vsel %vm1974_vm3, %v5773_v12, %v9202_v17 }
 0x5dc   : > { %v9210_v40 = vpop.permute.xlu1 %9209  ;;  %7518 = vmatprep.mubr.msk.bf16.mxu1 %vm9542_vm14, %v9541_v29  ;;  %v5792_v16 = vsel %vm2011_vm4, %v5782_v59, %v9206_v21  ;;  %v5793_v22 = vsel %vm2011_vm4, %v5783_v51, %v9207_v36  ;;  %v9221_v20 = vunpack.i.l.bf16 %v9220_v60  ;;  %v9222_v26 = vunpack.i.h.bf16 %v9220_v60 }
 0x5dd   : > { %v9212_v23 = vunpack.i.h.bf16 %v9210_v40  ;;  %v9211_v44 = vunpack.i.l.bf16 %v9210_v40 }
 0x5df   : > { %v9225_v5 = vpop.permute.xlu0 %9224  ;;  %v5802_v41 = vsel %vm2048_vm5, %v5792_v16, %v9211_v44  ;;  %v5803_v15 = vsel %vm2048_vm5, %v5793_v22, %v9212_v23  ;;  %v12333_v16 = vld [vmem:[%s12608_s8] ss:$0 sm:$0xff] }
 0x5e0   : > { %v9215_v33 = vpop.permute.xlu1 %9214  ;;  %v9227_v6 = vunpack.i.h.bf16 %v9225_v5  ;;  %v9226_v4 = vunpack.i.l.bf16 %v9225_v5 }
 0x5e1   : > { %v9216_v62 = vunpack.i.l.bf16 %v9215_v33  ;;  %v9217_v57 = vunpack.i.h.bf16 %v9215_v33 }
 0x5e2   : > { %v5812_v52 = vsel %vm2085_vm6, %v5802_v41, %v9226_v4  ;;  %v5813_v31 = vsel %vm2085_vm6, %v5803_v15, %v9227_v6  ;;  %v9458_v4 = vld [vmem:[%s12609_s9 + $0x38] sm:$0xff]  }
 0x5e3   : > { %v9235_v49 = vpop.permute.xlu0 %9234  ;;  %v5764_v30 = vsel %vm1901_vm1, %v5386_v19, %v9216_v62  ;;  %v5765_v37 = vsel %vm1901_vm1, %v5387_v50, %v9217_v57  ;;  %6582 = vmatpush1.bf16.msra.mxu0 %v9458_v4  ;;  %v9459_v62 = vld [vmem:[%s12609_s9 + $0x30] sm:$0xff]   ;;  %v9461_v50 = vld [vmem:[%s12609_s9 + $0x20] sm:$0xff]   ;;  %vm6455_vm1 = vcmask 785408  }
 0x5e4   : > { %v9230_v14 = vpop.permute.xlu1 %9229  ;;  %v9237_v27 = vunpack.i.h.bf16 %v9235_v49  ;;  %v9236_v39 = vunpack.i.l.bf16 %v9235_v49  ;;  %v5774_v38 = vsel %vm549_vm2, %v5764_v30, %v9221_v20  ;;  %v5775_v63 = vsel %vm549_vm2, %v5765_v37, %v9222_v26  ;;  %6583 = vmatprep.subr.bf16.mxu0 %v9540_v48  ;;  %v9462_v30 = vld [vmem:[%s12609_s9 + $0x18] sm:$0xff]   ;;  %v9463_v26 = vld [vmem:[%s12609_s9 + $0x10] sm:$0xff]  }
 0x5e5   : > { %v9232_v18 = vunpack.i.h.bf16 %v9230_v14  ;;  %v9231_v55 = vunpack.i.l.bf16 %v9230_v14 }
 0x5e7   : > { %v5822_v11 = vsel %vm2122_vm7, %v5812_v52, %v9231_v55  ;;  %v5823_v8 = vsel %vm2122_vm7, %v5813_v31, %v9232_v18  ;;  %v9245_v34 = vpop.permute.xlu0 %9244  ;;  %6584 = vmatpush1.bf16.msra.mxu0 %v9459_v62  ;;  %v9460_v18 = vld [vmem:[%s12609_s9 + $0x28] sm:$0xff]  }
 0x5e8   : > { %v9240_v35 = vpop.permute.xlu1 %9239  ;;  %v5832_v53 = vsel %vm2159_vm8, %v5822_v11, %v9236_v39  ;;  %v5833_v1 = vsel %vm2159_vm8, %v5823_v8, %v9237_v27  ;;  %v9247_v58 = vunpack.i.h.bf16 %v9245_v34  ;;  %v9246_v61 = vunpack.i.l.bf16 %v9245_v34  ;;  %6585 = vmatprep.subr.bf16.mxu0 %v9540_v48 }
 0x5e9   : > { %v9242_v24 = vunpack.i.h.bf16 %v9240_v35  ;;  %v9241_v45 = vunpack.i.l.bf16 %v9240_v35  ;;  %v5839_v0 = vpack.c.bf16 %v5833_v1, %v5832_v53 }
 0x5eb   : > { %v5784_v3 = vsel %vm1974_vm3, %v5774_v38, %v9241_v45  ;;  %v5785_v54 = vsel %vm1974_vm3, %v5775_v63, %v9242_v24  ;;  %7519 = vmatmul.mubr.msk.bf16.gmra.mxu1 %vm2257_vm9, %v5839_v0  ;;  %v9255_v2 = vpop.permute.xlu0 %9254  ;;  %6586 = vmatpush1.bf16.msra.mxu0 %v9460_v18  ;;  %vm6466_vm3 = vcmask 916480  }
 0x5ec   : > { %v9250_v28 = vpop.permute.xlu1 %9249  ;;  %7522 = vmatprep.mubr.msk.bf16.mxu1 %vm9542_vm14, %v9541_v29  ;;  %v9257_v9 = vunpack.i.h.bf16 %v9255_v2  ;;  %v9256_v10 = vunpack.i.l.bf16 %v9255_v2  ;;  %v5794_v17 = vsel %vm2011_vm4, %v5784_v3, %v9246_v61  ;;  %v5795_v47 = vsel %vm2011_vm4, %v5785_v54, %v9247_v58  ;;  %6587 = vmatprep.subr.bf16.mxu0 %v9540_v48  ;;  %v9464_v54 = vld [vmem:[%s12609_s9 + $0x8] sm:$0xff]  }
 0x5ed   : > { %v9252_v56 = vunpack.i.h.bf16 %v9250_v28  ;;  %v9251_v7 = vunpack.i.l.bf16 %v9250_v28 }
 0x5ef   : > { %v5804_v60 = vsel %vm2048_vm5, %v5794_v17, %v9251_v7  ;;  %v5805_v40 = vsel %vm2048_vm5, %v5795_v47, %v9252_v56  ;;  %v9265_v43 = vpop.permute.xlu0 %9264  ;;  %6588 = vmatpush1.bf16.msra.mxu0 %v9461_v50  ;;  %v9465_v7 = vld [vmem:[%s12609_s9] sm:$0xff]  }
 0x5f0   : > { %v9260_v46 = vpop.permute.xlu1 %9259  ;;  %v9267_v36 = vunpack.i.h.bf16 %v9265_v43  ;;  %v9266_v21 = vunpack.i.l.bf16 %v9265_v43  ;;  %v5814_v59 = vsel %vm2085_vm6, %v5804_v60, %v9256_v10  ;;  %v5815_v51 = vsel %vm2085_vm6, %v5805_v40, %v9257_v9  ;;  %6589 = vmatprep.subr.bf16.mxu0 %v9540_v48 }
 0x5f1   : > { %v9262_v32 = vunpack.i.h.bf16 %v9260_v46  ;;  %v9261_v12 = vunpack.i.l.bf16 %v9260_v46 }
 0x5f3   : > { %v5824_v23 = vsel %vm2122_vm7, %v5814_v59, %v9261_v12  ;;  %v5825_v44 = vsel %vm2122_vm7, %v5815_v51, %v9262_v32  ;;  %6590 = vmatpush1.bf16.msra.mxu0 %v9462_v30 }
 0x5f4   : > { %v5834_v5 = vsel %vm2159_vm8, %v5824_v23, %v9266_v21  ;;  %v5835_v33 = vsel %vm2159_vm8, %v5825_v44, %v9267_v36  ;;  %6591 = vmatprep.subr.bf16.mxu0 %v9540_v48  ;;  %v9466_v36 = vld [vmem:[%s12609_s9 + $0x40] sm:$0xff]  }
 0x5f5   : > { %v5840_v6 = vpack.c.bf16 %v5835_v33, %v5834_v5 }
 0x5f7   : > { %7523 = vmatmul.mubr.msk.bf16.gmra.mxu1 %vm2257_vm9, %v5840_v6  ;;  %6592 = vmatpush1.bf16.msra.mxu0 %v9463_v26 }
 0x5f8   : > { %7546 = vmatprep.mubr.msk.f32.mxu1 %vm9542_vm14, %v9541_v29  ;;  %6593 = vmatprep.subr.bf16.mxu0 %v9540_v48 }
 0x5fb   : > { %6594 = vmatpush1.bf16.msra.mxu0 %v9464_v54 }
 0x5fc   : > { %v6003_v52 = vpop.permute.xlu0 %6002  ;;  %6595 = vmatprep.subr.bf16.mxu0 %v9540_v48 }
 0x5fd   : > { %v5998_v49 = vpop.permute.xlu1 %5997 }
 0x5ff   : > { %6596 = vmatpush1.bf16.msra.mxu0 %v9465_v7 }
 0x600   : > { %v6013_v28 = vpop.permute.xlu0 %6012  ;;  %6611 = vmatprep.subr.bf16.mxu0 %v9540_v48 }
 0x601   : > { %v6008_v58 = vpop.permute.xlu1 %6007 }
 0x603   : > { %6612 = vmatpush2.bf16.msra.mxu0 %v9466_v36 }
 0x605   : > { %v6018_v33 = vpop.permute.xlu1 %6017 }
 0x67b   : > { %v5936_v22 = vpop.f32.mrf.mxu1 }
 0x67c   : > { %v5937_v57 = vadd.f32 %v12333_v16, %v5936_v22 }
 0x67d   : > { %v7508_v41 = vpop.f32.mrf.mxu1 }
 0x67e   : > { %v5975_v15 = vmax.f32 %v5937_v57, 0.0 }
 0x67f   : > { %v5939_v14 = vpop.f32.mrf.mxu1 }
 0x680   : > { %v6045_v19 = vmul.f32 %v5998_v49, %v5975_v15  ;;  %v5940_v27 = vadd.f32 %v12333_v16, %v5939_v14 }
 0x681   : > { %v7509_v39 = vpop.f32.mrf.mxu1 }
 0x682   : > { %6055 = vst.msk [vmem:[#allocation2 + $0xb] sm:$0xff] %vm549_vm2, %v6045_v19  ;;  %v5976_v55 = vmax.f32 %v5940_v27, 0.0  ;;  %v6023_v19 = vpop.permute.xlu0 %6022 }
 0x684   : > { %v6046_v31 = vmul.f32 %v6003_v52, %v5976_v55 }
 0x686   : > { %6056 = vst.msk [vmem:[#allocation2 + $0x13] sm:$0xff] %vm549_vm2, %v6046_v31 }
 0x689   : > { %v6087_v20 = vld [vmem:[#allocation2 + $0xa] sm:$0xff] }
 0x68a   : > { %v6077_v37 = vld [vmem:[#allocation2 + $0x9] sm:$0xff]  ;;  %v9273_v11 = vpack.i.bf16 %v6087_v20, %v12125_v13 }
 0x68b   : > { %v9268_v8 = vpack.i.bf16 %v6077_v37, %v12127_v25  ;;  %v5944_v34 = vpop.f32.mrf.mxu1  ;;  %v6098_v53 = vld [vmem:[#allocation2 + $0xb] sm:$0xff] }
 0x68c   : > { %9274 = vrot.lane.b32.xlu0 %v9273_v11, %s12666_s1  ;;  %v5945_v35 = vadd.f32 %v12333_v16, %v5944_v34 }
 0x68d   : > { %9269 = vrot.lane.b32.xlu1 %v9268_v8, %s12664_s22  ;;  %v6099_v1 = vld [vmem:[#allocation2 + $0x13] sm:$0xff]  ;;  %v7512_v13 = vpop.f32.mrf.mxu1 }
 0x68e   : > { %v6088_v24 = vld [vmem:[#allocation2 + $0x12] sm:$0xff]  ;;  %v9283_v45 = vpack.i.bf16 %v6099_v1, %v6098_v53  ;;  %v5977_v38 = vmax.f32 %v5945_v35, 0.0  ;;  %v6028_v13 = vpop.permute.xlu1 %6027 }
 0x68f   : > { %v9278_v25 = vpack.i.bf16 %v6088_v24, %v6087_v20  ;;  %v5947_v61 = vpop.f32.mrf.mxu1  ;;  %v6108_v9 = vld [vmem:[#allocation2 + $0xc] sm:$0xff] }
 0x690   : > { %9284 = vrot.lane.b32.xlu0 %v9283_v45, %s12671_s23  ;;  %v6047_v63 = vmul.f32 %v6008_v58, %v5977_v38  ;;  %v5948_v0 = vadd.f32 %v12333_v16, %v5947_v61  ;;  %v6078_v17 = vld [vmem:[#allocation2 + $0x11] sm:$0xff] }
 0x691   : > { %9279 = vrot.lane.b32.xlu1 %v9278_v25, %s12668_s28  ;;  %v7513_v3 = vpop.f32.mrf.mxu1 }
 0x692   : > { %6057 = vst.msk [vmem:[#allocation2 + $0x1b] sm:$0xff] %vm549_vm2, %v6047_v63  ;;  %v5978_v2 = vmax.f32 %v5948_v0, 0.0 }
 0x694   : > { %v6048_v56 = vmul.f32 %v6013_v28, %v5978_v2  ;;  %v6033_v28 = vpop.permute.xlu0 %6032 }
 0x696   : > { %6058 = vst.msk [vmem:[#allocation2 + $0x23] sm:$0xff] %vm549_vm2, %v6048_v56 }
 0x699   : > { %v6109_v10 = vld [vmem:[#allocation2 + $0x14] sm:$0xff] }
 0x69a   : > { %v6079_v47 = vld [vmem:[#allocation2 + $0x19] sm:$0xff]  ;;  %v9288_v60 = vpack.i.bf16 %v6109_v10, %v6108_v9 }
 0x69b   : > { %v9293_v40 = vpack.i.bf16 %v6079_v47, %v6078_v17  ;;  %v5952_v43 = vpop.f32.mrf.mxu1  ;;  %v6089_v46 = vld [vmem:[#allocation2 + $0x1a] sm:$0xff] }
 0x69c   : > { %v5953_v21 = vadd.f32 %v12333_v16, %v5952_v43  ;;  %9289 = vrot.lane.b32.xlu1 %v9288_v60, %s9543_s21  ;;  %v6130_v12 = vld [vmem:[#allocation2 + $0x16] sm:$0xff]  ;;  %v9298_v23 = vpack.i.bf16 %v6089_v46, %v6088_v24 }
 0x69d   : > { %9294 = vrot.lane.b32.xlu0 %v9293_v40, %s12664_s22  ;;  %v7516_v32 = vpop.f32.mrf.mxu1  ;;  %v6131_v59 = vld [vmem:[#allocation2 + $0x1e] sm:$0xff]  ;;  %v6120_v15 = vld [vmem:[#allocation2 + $0x15] sm:$0xff] }
 0x69e   : > { %v6110_v51 = vld [vmem:[#allocation2 + $0x1c] sm:$0xff]  ;;  %v5979_v48 = vmax.f32 %v5953_v21, 0.0  ;;  %v6478_v44 = vpack.c.bf16 %v6131_v59, %v6130_v12  ;;  %v6038_v21 = vpop.permute.xlu1 %6037 }
 0x69f   : > { %v9303_v5 = vpack.i.bf16 %v6110_v51, %v6109_v10  ;;  %v5955_v6 = vpop.f32.mrf.mxu1  ;;  %v6121_v4 = vld [vmem:[#allocation2 + $0x1d] sm:$0xff] }
 0x6a0   : > { %v6049_v62 = vmul.f32 %v6018_v33, %v5979_v48  ;;  %v5956_v22 = vadd.f32 %v12333_v16, %v5955_v6  ;;  %9299 = vrot.lane.b32.xlu1 %v9298_v23, %s12666_s1  ;;  %7213 = vmatprep.mubr.msk.bf16.mxu0 %vm549_vm2, %v6478_v44  ;;  %v6090_v57 = vld [vmem:[#allocation2 + $0x22] sm:$0xff]  ;;  %v9308_v14 = vpack.i.bf16 %v6121_v4, %v6120_v15  ;;  %v6043_v6 = vpop.permute.xlu0 %6042 }
 0x6a1   : > { %9304 = vrot.lane.b32.xlu0 %v9303_v5, %s9544_s18  ;;  %v7517_v41 = vpop.f32.mrf.mxu1  ;;  %v9313_v27 = vpack.i.bf16 %v6090_v57, %v6089_v46  ;;  %v6101_v39 = vld [vmem:[#allocation2 + $0x23] sm:$0xff]  ;;  %v6100_v55 = vld [vmem:[#allocation2 + $0x1b] sm:$0xff] }
 0x6a2   : > { %6059 = vst.msk [vmem:[#allocation2 + $0x2b] sm:$0xff] %vm549_vm2, %v6049_v62  ;;  %v5980_v49 = vmax.f32 %v5956_v22, 0.0  ;;  %v9318_v52 = vpack.i.bf16 %v6101_v39, %v6100_v55  ;;  %v6080_v50 = vld [vmem:[#allocation2 + $0x21] sm:$0xff] }
 0x6a4   : > { %v6050_v18 = vmul.f32 %v6023_v19, %v5980_v49  ;;  %9309 = vrot.lane.b32.xlu1 %v9308_v14, %s9545_s24 }
 0x6a5   : > { %9314 = vrot.lane.b32.xlu0 %v9313_v27, %s12668_s28 }
 0x6a6   : > { %6060 = vst.msk [vmem:[#allocation2 + $0x33] sm:$0xff] %vm549_vm2, %v6050_v18 }
 0x6a8   : > { %9319 = vrot.lane.b32.xlu1 %v9318_v52, %s12671_s23 }
 0x6a9   : > { %v6111_v31 = vld [vmem:[#allocation2 + $0x24] sm:$0xff] }
 0x6aa   : > { %v6081_v30 = vld [vmem:[#allocation2 + $0x29] sm:$0xff]  ;;  %v9323_v20 = vpack.i.bf16 %v6111_v31, %v6110_v51 }
 0x6ab   : > { %v9328_v37 = vpack.i.bf16 %v6081_v30, %v6080_v50  ;;  %v5960_v11 = vpop.f32.mrf.mxu1  ;;  %v6091_v8 = vld [vmem:[#allocation2 + $0x2a] sm:$0xff] }
 0x6ac   : > { %v5961_v26 = vadd.f32 %v12333_v16, %v5960_v11  ;;  %9324 = vrot.lane.b32.xlu0 %v9323_v20, %s9543_s21  ;;  %v9333_v1 = vpack.i.bf16 %v6091_v8, %v6090_v57  ;;  %v6122_v0 = vld [vmem:[#allocation2 + $0x25] sm:$0xff] }
 0x6ad   : > { %9329 = vrot.lane.b32.xlu1 %v9328_v37, %s12664_s22  ;;  %v7520_v34 = vpop.f32.mrf.mxu1  ;;  %v6112_v35 = vld [vmem:[#allocation2 + $0x2c] sm:$0xff] }
 0x6ae   : > { %v5981_v53 = vmax.f32 %v5961_v26, 0.0  ;;  %v9338_v24 = vpack.i.bf16 %v6112_v35, %v6111_v31  ;;  %v6123_v25 = vld [vmem:[#allocation2 + $0x2d] sm:$0xff] }
 0x6af   : > { %v5963_v45 = vpop.f32.mrf.mxu1  ;;  %v6092_v38 = vld [vmem:[#allocation2 + $0x32] sm:$0xff]  ;;  %v9343_v54 = vpack.i.bf16 %v6123_v25, %v6122_v0  ;;  %v6119_v25 = vld [vmem:[#allocation2 + $0x5c] sm:$0x3f] }
 0x6b0   : > { %v6051_v58 = vmul.f32 %v6028_v13, %v5981_v53  ;;  %v5964_v61 = vadd.f32 %v12333_v16, %v5963_v45  ;;  %9334 = vrot.lane.b32.xlu0 %v9333_v1, %s12666_s1  ;;  %v9348_v2 = vpack.i.bf16 %v6092_v38, %v6091_v8  ;;  %v6103_v56 = vld [vmem:[#allocation2 + $0x33] sm:$0xff]  ;;  %v6102_v9 = vld [vmem:[#allocation2 + $0x2b] sm:$0xff]  ;;  %v6129_v0 = vld [vmem:[#allocation2 + $0x5d] sm:$0x3f] }
 0x6b1   : > { %9339 = vrot.lane.b32.xlu1 %v9338_v24, %s9544_s18  ;;  %v7521_v63 = vpop.f32.mrf.mxu1  ;;  %v9353_v17 = vpack.i.bf16 %v6103_v56, %v6102_v9  ;;  %v6082_v46 = vld [vmem:[#allocation2 + $0x31] sm:$0xff] }
 0x6b2   : > { %6061 = vst.msk [vmem:[#allocation2 + $0x3b] sm:$0xff] %vm549_vm2, %v6051_v58  ;;  %v5982_v3 = vmax.f32 %v5964_v61, 0.0 }
 0x6b4   : > { %v6052_v7 = vmul.f32 %v6033_v28, %v5982_v3  ;;  %9344 = vrot.lane.b32.xlu0 %v9343_v54, %s9545_s24 }
 0x6b5   : > { %9349 = vrot.lane.b32.xlu1 %v9348_v2, %s12668_s28 }
 0x6b6   : > { %6062 = vst.msk [vmem:[#allocation2 + $0x43] sm:$0xff] %vm549_vm2, %v6052_v7 }
 0x6b7   : > { %v5968_v10 = vpop.f32.mrf.mxu1 }
 0x6b8   : > { %v5969_v47 = vadd.f32 %v12333_v16, %v5968_v10  ;;  %9354 = vrot.lane.b32.xlu0 %v9353_v17, %s12671_s23 }
 0x6b9   : > { %v7524_v60 = vpop.f32.mrf.mxu1  ;;  %v6113_v43 = vld [vmem:[#allocation2 + $0x34] sm:$0xff] }
 0x6ba   : > { %v5983_v40 = vmax.f32 %v5969_v47, 0.0  ;;  %v6083_v36 = vld [vmem:[#allocation2 + $0x39] sm:$0xff]  ;;  %v9358_v12 = vpack.i.bf16 %v6113_v43, %v6112_v35  ;;  %v6067_v47 = vld [vmem:[#allocation2 + $0x8] sm:$0xff] }
 0x6bb   : > { %v5971_v32 = vpop.f32.mrf.mxu1  ;;  %v9363_v59 = vpack.i.bf16 %v6083_v36, %v6082_v46  ;;  %v6093_v23 = vld [vmem:[#allocation2 + $0x3a] sm:$0xff] }
 0x6bc   : > { %v6053_v51 = vmul.f32 %v6038_v21, %v5983_v40  ;;  %v5972_v48 = vadd.f32 %v12333_v16, %v5971_v32  ;;  %9359 = vrot.lane.b32.xlu1 %v9358_v12, %s9543_s21  ;;  %v9368_v4 = vpack.i.bf16 %v6093_v23, %v6092_v38  ;;  %v6124_v16 = vld [vmem:[#allocation2 + $0x35] sm:$0xff] }
 0x6bd   : > { %9364 = vrot.lane.b32.xlu0 %v9363_v59, %s12664_s22  ;;  %v7525_v44 = vpop.f32.mrf.mxu1  ;;  %v6114_v33 = vld [vmem:[#allocation2 + $0x3c] sm:$0xff] }
 0x6be   : > { %6063 = vst.msk [vmem:[#allocation2 + $0x4b] sm:$0xff] %vm549_vm2, %v6053_v51  ;;  %v5984_v5 = vmax.f32 %v5972_v48, 0.0  ;;  %v9373_v62 = vpack.i.bf16 %v6114_v33, %v6113_v43  ;;  %v6125_v57 = vld [vmem:[#allocation2 + $0x3d] sm:$0xff] }
 0x6bf   : > { %v6094_v41 = vld [vmem:[#allocation2 + $0x42] sm:$0xff]  ;;  %v9378_v15 = vpack.i.bf16 %v6125_v57, %v6124_v16 }
 0x6c0   : > { %v6054_v22 = vmul.f32 %v6043_v6, %v5984_v5  ;;  %9369 = vrot.lane.b32.xlu1 %v9368_v4, %s12666_s1  ;;  %v9383_v49 = vpack.i.bf16 %v6094_v41, %v6093_v23  ;;  %v6105_v14 = vld [vmem:[#allocation2 + $0x43] sm:$0xff]  ;;  %v6104_v27 = vld [vmem:[#allocation2 + $0x3b] sm:$0xff] }
 0x6c1   : > { %9374 = vrot.lane.b32.xlu0 %v9373_v62, %s9544_s18  ;;  %v9388_v18 = vpack.i.bf16 %v6105_v14, %v6104_v27  ;;  %v6084_v31 = vld [vmem:[#allocation2 + $0x41] sm:$0xff]  ;;  %v6133_v27 = vld [vmem:[#allocation2 + $0x2e] sm:$0xff] }
 0x6c2   : > { %6065 = vst.msk [vmem:[#allocation2 + $0x53] sm:$0x3f] %vm6064_vm15, %v6054_v22 }
 0x6c4   : > { %9379 = vrot.lane.b32.xlu1 %v9378_v15, %s9545_s24 }
 0x6c5   : > { %9384 = vrot.lane.b32.xlu0 %v9383_v49, %s12668_s28  ;;  %v6115_v19 = vld [vmem:[#allocation2 + $0x44] sm:$0xff] }
 0x6c6   : > { %v9393_v39 = vpack.i.bf16 %v6115_v19, %v6114_v33  ;;  %v6095_v55 = vld [vmem:[#allocation2 + $0x4a] sm:$0x3f] }
 0x6c7   : > { %v6085_v52 = vld [vmem:[#allocation2 + $0x49] sm:$0x3f]  ;;  %v9403_v50 = vpack.i.bf16 %v6095_v55, %v6094_v41 }
 0x6c8   : > { %9389 = vrot.lane.b32.xlu1 %v9388_v18, %s12671_s23  ;;  %v9398_v30 = vpack.i.bf16 %v6085_v52, %v6084_v31  ;;  %v6126_v11 = vld [vmem:[#allocation2 + $0x45] sm:$0xff] }
 0x6c9   : > { %9394 = vrot.lane.b32.xlu0 %v9393_v39, %s9543_s21  ;;  %v6127_v20 = vld [vmem:[#allocation2 + $0x4d] sm:$0xff]  ;;  %v6128_v63 = vld [vmem:[#allocation2 + $0x55] sm:$0xff] }
 0x6ca   : > { %v6116_v37 = vld [vmem:[#allocation2 + $0x4c] sm:$0xff]  ;;  %v9413_v8 = vpack.i.bf16 %v6127_v20, %v6126_v11  ;;  %v6118_v45 = vld [vmem:[#allocation2 + $0x54] sm:$0xff]  ;;  %v9438_v3 = vpack.i.bf16 %v6129_v0, %v6128_v63 }
 0x6cb   : > { %v9408_v26 = vpack.i.bf16 %v6116_v37, %v6115_v19  ;;  %v6107_v34 = vld [vmem:[#allocation2 + $0x53] sm:$0x3f]  ;;  %v6106_v53 = vld [vmem:[#allocation2 + $0x4b] sm:$0xff]  ;;  %v9433_v58 = vpack.i.bf16 %v6119_v25, %v6118_v45 }
 0x6cc   : > { %9399 = vrot.lane.b32.xlu1 %v9398_v30, %s12664_s22  ;;  %v6097_v35 = vld [vmem:[#allocation2 + $0x52] sm:$0x3f]  ;;  %v6096_v1 = vld [vmem:[#allocation2 + $0x4a] sm:$0xff]  ;;  %v9423_v24 = vpack.i.bf16 %v6107_v34, %v6106_v53  ;;  %s12673_s22 = sld [smem:[#allocation8_spill]] }
 0x6cd   : > { %9404 = vrot.lane.b32.xlu0 %v9403_v50, %s12666_s1  ;;  %v9418_v13 = vpack.i.bf16 %v6097_v35, %v6096_v1  ;;  %v6117_v38 = vld [vmem:[#allocation2 + $0x54] sm:$0x3f]  ;;  %v6132_v50 = vld [vmem:[#allocation2 + $0x26] sm:$0xff] }
 0x6ce   : > { %v9428_v61 = vpack.i.bf16 %v6117_v38, %v6116_v37  ;;  %v6480_v30 = vpack.c.bf16 %v6133_v27, %v6132_v50  ;;  %v6068_v1 = vld [vmem:[#allocation2 + $0x10] sm:$0xff] }
 0x6d0   : > { %9409 = vrot.lane.b32.xlu1 %v9408_v26, %s9544_s18 }
 0x6d1   : > { %9414 = vrot.lane.b32.xlu0 %v9413_v8, %s9545_s24 }
 0x6d2   : > { %s541_s19 = sand.u32 1, %s12673_s22  }
 0x6d3   : > { %s542_s16 = scalar_lea.vmem [#allocation4], %s541_s19  ;;  %s7061_s20 = scalar_lea.sflag [#allocation5], %s541_s19 }
 0x6d4   : > { %9419 = vrot.lane.b32.xlu1 %v9418_v13, %s12668_s28  ;;  %s7073_s17 = sshll.u32 %s542_s16, 4  ;;  %s12562_s17 = int_to_ptr.vmem [resolvable:$true] %s7073_s17 }
 0x6d5   : > { %9424 = vrot.lane.b32.xlu0 %v9423_v24, %s12671_s23  ;;  %v6069_v24 = vld [vmem:[#allocation2 + $0x18] sm:$0xff]  ;;  %s12674_s23 = sld [smem:[#allocation11_spill]]  ;;  %s9470_s30 = scalar_lea.vmem %s12562_s17, 16 }
 0x6d6   : > { %p9471_p11 = scmp.ne.s32.totalorder %s12562_s17, %s9470_s30 }
 0x6d8   : > { %9429 = vrot.lane.b32.xlu1 %v9428_v61, %s9543_s21  ;;  %p9472_p12 = pnand %p9471_p11, %p9678_p5  ;;  %s9546_s21 = smov [#allocation4]  }
 0x6d9   : > { %9434 = vrot.lane.b32.xlu0 %v9433_v58, %s9544_s18  ;;  %s9474_s18 = sshll.u32 %s9546_s21, 4  ;;  %s9475_s18 = int_to_ptr.vmem [resolvable:$false] %s9474_s18 }
 0x6da   : > { %p9473_p13 = pneg %p9472_p12  ;;  %p9477_p0 = scmp.lt.s32.totalorder %s12562_s17, %s9475_s18 }
 0x6db   : > { %s7226_s26 = sshll.u32 %s12674_s23, 4 }
 0x6dc   : > { %9439 = vrot.lane.b32.xlu1 %v9438_v3, %s9545_s24  ;;  %s7071_s29 = scalar_lea.hbm %s12676_s0, %s7226_s26  ;;  %s9476_s24 = scalar_lea.vmem %s9475_s18, 32 }
 0x6dd   : > { %p9478_p1 = scmp.lt.s32.totalorder %s9476_s24, %s9470_s30 }
 0x6df   : > { %p9479_p2 = por %p9478_p1, %p9477_p0 }
 0x6e1   : > { %p9480_p3 = pnand %p9479_p2, %p9473_p13 }
 0x6fe   : > { %v9275_v54 = vpop.permute.xlu0 %9274 }
 0x6ff   : > { %v9270_v2 = vpop.permute.xlu1 %9269  ;;  %v9277_v10 = vunpack.i.h.bf16 %v9275_v54  ;;  %v9276_v17 = vunpack.i.l.bf16 %v9275_v54 }
 0x700   : > { %v9272_v7 = vunpack.i.h.bf16 %v9270_v2  ;;  %v9271_v9 = vunpack.i.l.bf16 %v9270_v2 }
 0x702   : > { %v9285_v28 = vpop.permute.xlu0 %9284  ;;  %v6404_v43 = vsel %vm549_vm2, %v12224_v42, %v9271_v9  ;;  %v6405_v46 = vsel %vm549_vm2, %v6067_v47, %v9272_v7 }
 0x703   : > { %v9280_v56 = vpop.permute.xlu1 %9279  ;;  %v9287_v32 = vunpack.i.h.bf16 %v9285_v28  ;;  %v9286_v12 = vunpack.i.l.bf16 %v9285_v28  ;;  %v6414_v59 = vsel %vm2011_vm4, %v6404_v43, %v9276_v17  ;;  %v6415_v51 = vsel %vm2011_vm4, %v6405_v46, %v9277_v10 }
 0x704   : > { %v9282_v36 = vunpack.i.h.bf16 %v9280_v56  ;;  %v9281_v21 = vunpack.i.l.bf16 %v9280_v56 }
 0x706   : > { %v6425_v23 = vsel %vm2085_vm6, %v6415_v51, %v9282_v36  ;;  %v6424_v44 = vsel %vm2085_vm6, %v6414_v59, %v9281_v21  ;;  %v6135_v21 = vld [vmem:[#allocation2 + $0x3e] sm:$0xff] }
 0x707   : > { %v6434_v62 = vsel %vm2159_vm8, %v6424_v44, %v9286_v12  ;;  %v6435_v22 = vsel %vm2159_vm8, %v6425_v23, %v9287_v32  ;;  %v6134_v23 = vld [vmem:[#allocation2 + $0x36] sm:$0xff] }
 0x708   : > { %v6482_v44 = vpack.c.bf16 %v6135_v21, %v6134_v23 }
 0x70e   : > { %v9290_v60 = vpop.permute.xlu1 %9289 }
 0x70f   : > { %v9295_v40 = vpop.permute.xlu0 %9294  ;;  %v9292_v5 = vunpack.i.h.bf16 %v9290_v60  ;;  %v9291_v33 = vunpack.i.l.bf16 %v9290_v60 }
 0x710   : > { %v9297_v11 = vunpack.i.h.bf16 %v9295_v40  ;;  %v9296_v8 = vunpack.i.l.bf16 %v9295_v40 }
 0x711   : > { %v6446_v41 = vsel %vm6444_vm0, %v6435_v22, %v9292_v5  ;;  %v6445_v16 = vsel %vm6444_vm0, %v6434_v62, %v9291_v33 }
 0x712   : > { %v9300_v48 = vpop.permute.xlu1 %9299  ;;  %v6406_v58 = vsel %vm549_vm2, %v6068_v1, %v9296_v8  ;;  %v6407_v61 = vsel %vm549_vm2, %v6069_v24, %v9297_v11 }
 0x713   : > { %v9305_v6 = vpop.permute.xlu0 %9304  ;;  %v9302_v26 = vunpack.i.h.bf16 %v9300_v48  ;;  %v9301_v34 = vunpack.i.l.bf16 %v9300_v48 }
 0x714   : > { %v9307_v42 = vunpack.i.h.bf16 %v9305_v6  ;;  %v9306_v4 = vunpack.i.l.bf16 %v9305_v6 }
 0x715   : > { %v6416_v3 = vsel %vm2011_vm4, %v6406_v58, %v9301_v34  ;;  %v6417_v54 = vsel %vm2011_vm4, %v6407_v61, %v9302_v26 }
 0x716   : > { %v9310_v57 = vpop.permute.xlu1 %9309  ;;  %v6457_v14 = vsel %vm6455_vm1, %v6446_v41, %v9307_v42  ;;  %v6456_v19 = vsel %vm6455_vm1, %v6445_v16, %v9306_v4  ;;  %v6070_v41 = vld [vmem:[#allocation2 + $0x20] sm:$0xff]  ;;  %v6071_v16 = vld [vmem:[#allocation2 + $0x28] sm:$0xff] }
 0x717   : > { %v9312_v15 = vunpack.i.h.bf16 %v9310_v57  ;;  %v9311_v49 = vunpack.i.l.bf16 %v9310_v57  ;;  %v9315_v52 = vpop.permute.xlu0 %9314 }
 0x718   : > { %v9317_v35 = vunpack.i.h.bf16 %v9315_v52  ;;  %v9316_v53 = vunpack.i.l.bf16 %v9315_v52 }
 0x719   : > { %v6467_v39 = vsel %vm6466_vm3, %v6456_v19, %v9311_v49  ;;  %v6468_v18 = vsel %vm6466_vm3, %v6457_v14, %v9312_v15 }
 0x71a   : > { %v6477_v55 = vpack.c.bf16 %v6468_v18, %v6467_v39  ;;  %v9320_v31 = vpop.permute.xlu1 %9319  ;;  %v6427_v56 = vsel %vm2085_vm6, %v6417_v54, %v9317_v35  ;;  %v6426_v7 = vsel %vm2085_vm6, %v6416_v3, %v9316_v53 }
 0x71b   : > { %v9322_v13 = vunpack.i.h.bf16 %v9320_v31  ;;  %v9321_v45 = vunpack.i.l.bf16 %v9320_v31 }
 0x71c   : > { %6614 = vmatmul.mubr.bf16.vlgmr.msra.gmra.mxu0 %v6477_v55 }
 0x71d   : > { %7214 = vmatprep.mubr.msk.bf16.mxu0 %vm549_vm2, %v6480_v30  ;;  %v6436_v9 = vsel %vm2159_vm8, %v6426_v7, %v9321_v45  ;;  %v6437_v10 = vsel %vm2159_vm8, %v6427_v56, %v9322_v13 }
 0x71e   : > { %v9325_v20 = vpop.permute.xlu0 %9324 }
 0x71f   : > { %v9330_v37 = vpop.permute.xlu1 %9329  ;;  %v9327_v63 = vunpack.i.h.bf16 %v9325_v20  ;;  %v9326_v0 = vunpack.i.l.bf16 %v9325_v20 }
 0x720   : > { %v9332_v6 = vunpack.i.h.bf16 %v9330_v37  ;;  %v9331_v42 = vunpack.i.l.bf16 %v9330_v37 }
 0x721   : > { %v6448_v47 = vsel %vm6444_vm0, %v6437_v10, %v9327_v63  ;;  %v6447_v60 = vsel %vm6444_vm0, %v6436_v9, %v9326_v0  ;;  %v6073_v10 = vld [vmem:[#allocation2 + $0x38] sm:$0xff] }
 0x722   : > { %v9335_v25 = vpop.permute.xlu0 %9334  ;;  %v6408_v27 = vsel %vm549_vm2, %v6070_v41, %v9331_v42  ;;  %v6409_v39 = vsel %vm549_vm2, %v6071_v16, %v9332_v6 }
 0x723   : > { %v9340_v38 = vpop.permute.xlu1 %9339  ;;  %v9337_v4 = vunpack.i.h.bf16 %v9335_v25  ;;  %v9336_v62 = vunpack.i.l.bf16 %v9335_v25  ;;  %v6137_v25 = vld [vmem:[#allocation2 + $0x4e] sm:$0xff] }
 0x724   : > { %v9342_v2 = vunpack.i.h.bf16 %v9340_v38  ;;  %v9341_v28 = vunpack.i.l.bf16 %v9340_v38 }
 0x725   : > { %v6418_v52 = vsel %vm2011_vm4, %v6408_v27, %v9336_v62  ;;  %v6419_v31 = vsel %vm2011_vm4, %v6409_v39, %v9337_v4  ;;  %v6075_v27 = vld [vmem:[#allocation2 + $0x48] sm:$0x3f] }
 0x726   : > { %v9345_v17 = vpop.permute.xlu0 %9344  ;;  %v6459_v46 = vsel %vm6455_vm1, %v6448_v47, %v9342_v2  ;;  %v6458_v36 = vsel %vm6455_vm1, %v6447_v60, %v9341_v28  ;;  %v6136_v28 = vld [vmem:[#allocation2 + $0x46] sm:$0xff]  ;;  %v6072_v47 = vld [vmem:[#allocation2 + $0x30] sm:$0xff] }
 0x727   : > { %v9347_v40 = vunpack.i.h.bf16 %v9345_v17  ;;  %v9346_v43 = vunpack.i.l.bf16 %v9345_v17  ;;  %v9350_v59 = vpop.permute.xlu1 %9349  ;;  %v6484_v9 = vpack.c.bf16 %v6137_v25, %v6136_v28 }
 0x728   : > { %v9352_v22 = vunpack.i.h.bf16 %v9350_v59  ;;  %v9351_v57 = vunpack.i.l.bf16 %v9350_v59 }
 0x729   : > { %v6469_v32 = vsel %vm6466_vm3, %v6458_v36, %v9346_v43  ;;  %v6470_v12 = vsel %vm6466_vm3, %v6459_v46, %v9347_v40 }
 0x72a   : > { %v9355_v51 = vpop.permute.xlu0 %9354  ;;  %v6479_v48 = vpack.c.bf16 %v6470_v12, %v6469_v32  ;;  %v6429_v20 = vsel %vm2085_vm6, %v6419_v31, %v9352_v22  ;;  %v6428_v37 = vsel %vm2085_vm6, %v6418_v52, %v9351_v57  ;;  %v6074_v22 = vld [vmem:[#allocation2 + $0x40] sm:$0xff] }
 0x72b   : > { %v9357_v15 = vunpack.i.h.bf16 %v9355_v51  ;;  %v9356_v49 = vunpack.i.l.bf16 %v9355_v51 }
 0x72c   : > { %6622 = vmatmul.mubr.bf16.gmra.mxu0 %v6479_v48 }
 0x72d   : > { %7215 = vmatprep.mubr.msk.bf16.mxu0 %vm549_vm2, %v6482_v44  ;;  %v6438_v11 = vsel %vm2159_vm8, %v6428_v37, %v9356_v49  ;;  %v6439_v8 = vsel %vm2159_vm8, %v6429_v20, %v9357_v15  ;;  %v6138_v37 = vld [vmem:[#allocation2 + $0x56] sm:$0xff] }
 0x72e   : > { %v9360_v5 = vpop.permute.xlu1 %9359 }
 0x72f   : > { %v9365_v33 = vpop.permute.xlu0 %9364  ;;  %v9362_v18 = vunpack.i.h.bf16 %v9360_v5  ;;  %v9361_v55 = vunpack.i.l.bf16 %v9360_v5 }
 0x730   : > { %v9367_v38 = vunpack.i.h.bf16 %v9365_v33  ;;  %v9366_v63 = vunpack.i.l.bf16 %v9365_v33 }
 0x731   : > { %v6450_v35 = vsel %vm6444_vm0, %v6439_v8, %v9362_v18  ;;  %v6449_v53 = vsel %vm6444_vm0, %v6438_v11, %v9361_v55  ;;  %v6139_v11 = vld [vmem:[#allocation2 + $0x5e] sm:$0x3f] }
 0x732   : > { %v9370_v14 = vpop.permute.xlu1 %9369  ;;  %v6411_v60 = vsel %vm549_vm2, %v6073_v10, %v9367_v38  ;;  %v6410_v46 = vsel %vm549_vm2, %v6072_v47, %v9366_v63  ;;  %v6486_v25 = vpack.c.bf16 %v6139_v11, %v6138_v37 }
 0x733   : > { %v9375_v19 = vpop.permute.xlu0 %9374  ;;  %v9372_v0 = vunpack.i.h.bf16 %v9370_v14  ;;  %v9371_v56 = vunpack.i.l.bf16 %v9370_v14 }
 0x734   : > { %v9377_v50 = vunpack.i.h.bf16 %v9375_v19  ;;  %v9376_v30 = vunpack.i.l.bf16 %v9375_v19 }
 0x735   : > { %v6421_v36 = vsel %vm2011_vm4, %v6411_v60, %v9372_v0  ;;  %v6420_v12 = vsel %vm2011_vm4, %v6410_v46, %v9371_v56  ;;  %v7203_v46 = vld [vmem:[%s12610_s10] ss:$0 sm:$0xff] }
 0x736   : > { %v9380_v26 = vpop.permute.xlu1 %9379  ;;  %v6461_v13 = vsel %vm6455_vm1, %v6450_v35, %v9377_v50  ;;  %v6460_v45 = vsel %vm6455_vm1, %v6449_v53, %v9376_v30 }
 0x737   : > { %v9385_v34 = vpop.permute.xlu0 %9384  ;;  %v9382_v1 = vunpack.i.h.bf16 %v9380_v26  ;;  %v9381_v24 = vunpack.i.l.bf16 %v9380_v26 }
 0x738   : > { %v9387_v7 = vunpack.i.h.bf16 %v9385_v34  ;;  %v9386_v17 = vunpack.i.l.bf16 %v9385_v34 }
 0x739   : > { %v6471_v58 = vsel %vm6466_vm3, %v6460_v45, %v9381_v24  ;;  %v6472_v61 = vsel %vm6466_vm3, %v6461_v13, %v9382_v1 }
 0x73a   : > { %v9390_v3 = vpop.permute.xlu1 %9389  ;;  %v6481_v2 = vpack.c.bf16 %v6472_v61, %v6471_v58  ;;  %v6431_v59 = vsel %vm2085_vm6, %v6421_v36, %v9387_v7  ;;  %v6430_v51 = vsel %vm2085_vm6, %v6420_v12, %v9386_v17 }
 0x73b   : > { %v9395_v54 = vpop.permute.xlu0 %9394  ;;  %v9392_v40 = vunpack.i.h.bf16 %v9390_v3  ;;  %v9391_v43 = vunpack.i.l.bf16 %v9390_v3 }
 0x73c   : > { %6630 = vmatmul.mubr.bf16.gmra.mxu0 %v6481_v2  ;;  %v9397_v48 = vunpack.i.h.bf16 %v9395_v54  ;;  %v9396_v23 = vunpack.i.l.bf16 %v9395_v54 }
 0x73d   : > { %7216 = vmatprep.mubr.msk.bf16.mxu0 %vm549_vm2, %v6484_v9  ;;  %v6440_v5 = vsel %vm2159_vm8, %v6430_v51, %v9391_v43  ;;  %v6441_v33 = vsel %vm2159_vm8, %v6431_v59, %v9392_v40 }
 0x73e   : > { %v9400_v32 = vpop.permute.xlu1 %9399  ;;  %v6452_v49 = vsel %vm6444_vm0, %v6441_v33, %v9397_v48  ;;  %v6451_v14 = vsel %vm6444_vm0, %v6440_v5, %v9396_v23 }
 0x73f   : > { %v9405_v21 = vpop.permute.xlu0 %9404  ;;  %v9401_v44 = vunpack.i.l.bf16 %v9400_v32  ;;  %v9402_v6 = vunpack.i.h.bf16 %v9400_v32 }
 0x740   : > { %v9406_v42 = vunpack.i.l.bf16 %v9405_v21  ;;  %v9407_v19 = vunpack.i.h.bf16 %v9405_v21 }
 0x741   : > { %v6412_v39 = vsel %vm549_vm2, %v6074_v22, %v9401_v44  ;;  %v6413_v18 = vsel %vm549_vm2, %v6075_v27, %v9402_v6 }
 0x742   : > { %v9410_v62 = vpop.permute.xlu1 %9409  ;;  %v6422_v8 = vsel %vm2011_vm4, %v6412_v39, %v9406_v42  ;;  %v6423_v1 = vsel %vm2011_vm4, %v6413_v18, %v9407_v19  ;;  %vm6745_vm4 = vcmask 637952  }
 0x743   : > { %v9415_v4 = vpop.permute.xlu0 %9414  ;;  %v9412_v16 = vunpack.i.h.bf16 %v9410_v62  ;;  %v9411_v15 = vunpack.i.l.bf16 %v9410_v62 }
 0x744   : > { %v9417_v57 = vunpack.i.h.bf16 %v9415_v4  ;;  %v9416_v41 = vunpack.i.l.bf16 %v9415_v4 }
 0x745   : > { %v6463_v55 = vsel %vm6455_vm1, %v6452_v49, %v9412_v16  ;;  %v6462_v52 = vsel %vm6455_vm1, %v6451_v14, %v9411_v15 }
 0x746   : > { %v9420_v50 = vpop.permute.xlu1 %9419  ;;  %v6473_v30 = vsel %vm6466_vm3, %v6462_v52, %v9416_v41  ;;  %v6474_v20 = vsel %vm6466_vm3, %v6463_v55, %v9417_v57 }
 0x747   : > { %v9425_v31 = vpop.permute.xlu0 %9424  ;;  %v9422_v26 = vunpack.i.h.bf16 %v9420_v50  ;;  %v9421_v34 = vunpack.i.l.bf16 %v9420_v50  ;;  %v6483_v24 = vpack.c.bf16 %v6474_v20, %v6473_v30 }
 0x748   : > { %v9427_v35 = vunpack.i.h.bf16 %v9425_v31  ;;  %v9426_v53 = vunpack.i.l.bf16 %v9425_v31 }
 0x749   : > { %v6433_v13 = vsel %vm2085_vm6, %v6423_v1, %v9422_v26  ;;  %v6432_v45 = vsel %vm2085_vm6, %v6422_v8, %v9421_v34  ;;  %6638 = vmatmul.mubr.bf16.gmra.mxu0 %v6483_v24  ;;  %v6713_v24 = vld [vmem:[#allocation2 + $0x5d] sm:$0x3f] }
 0x74a   : > { %v9430_v58 = vpop.permute.xlu1 %9429  ;;  %7217 = vmatprep.mubr.msk.bf16.mxu0 %vm549_vm2, %v6486_v25  ;;  %v6442_v54 = vsel %vm2159_vm8, %v6432_v45, %v9426_v53  ;;  %v6443_v2 = vsel %vm2159_vm8, %v6433_v13, %v9427_v35  ;;  %v6723_v13 = vld [vmem:[#allocation2 + $0x5e] sm:$0x3f] }
 0x74b   : > { %v9435_v38 = vpop.permute.xlu0 %9434  ;;  %v9432_v61 = vunpack.i.h.bf16 %v9430_v58  ;;  %v9431_v63 = vunpack.i.l.bf16 %v9430_v58  ;;  %v6733_v45 = vmax.f32 %v6713_v24, %v6723_v13 }
 0x74c   : > { %v9437_v0 = vunpack.i.h.bf16 %v9435_v38  ;;  %v9436_v3 = vunpack.i.l.bf16 %v9435_v38 }
 0x74d   : > { %v6453_v28 = vsel %vm6444_vm0, %v6442_v54, %v9431_v63  ;;  %v6454_v56 = vsel %vm6444_vm0, %v6443_v2, %v9432_v61 }
 0x74e   : > { %v9440_v7 = vpop.permute.xlu1 %9439  ;;  %v6464_v17 = vsel %vm6455_vm1, %v6453_v28, %v9436_v3  ;;  %v6465_v47 = vsel %vm6455_vm1, %v6454_v56, %v9437_v0 }
 0x74f   : > { %v9442_v9 = vunpack.i.h.bf16 %v9440_v7  ;;  %v9441_v10 = vunpack.i.l.bf16 %v9440_v7 }
 0x751   : > { %v6475_v60 = vsel %vm6466_vm3, %v6464_v17, %v9441_v10  ;;  %v6476_v40 = vsel %vm6466_vm3, %v6465_v47, %v9442_v9 }
 0x752   : > { %v6485_v43 = vpack.c.bf16 %v6476_v40, %v6475_v60 }
 0x754   : > { %6646 = vmatmul.mubr.bf16.gmra.mxu0 %v6485_v43 }
 0x7dc   : > { %v6615_v36 = vpop.f32.mrf.mxu0 }
 0x7dd   : > { %v6616_v21 = vadd.f32 %v7203_v46, %v6615_v36 }
 0x7de   : > { %v6617_v32 = vpop.f32.mrf.mxu0 }
 0x7df   : > { %v6654_v12 = vmax.f32 %v6616_v21, 0.0 }
 0x7e0   : > { %v6618_v59 = vpop.f32.mrf.mxu0 }
 0x7e1   : > { %6664 = vst.msk [vmem:[#allocation2 + $0xb] sm:$0xff] %vm549_vm2, %v6654_v12  ;;  %v6619_v51 = vadd.f32 %v7203_v46, %v6618_v59 }
 0x7e2   : > { %v6620_v48 = vpop.f32.mrf.mxu0 }
 0x7e3   : > { %v6655_v23 = vmax.f32 %v6619_v51, 0.0 }
 0x7e5   : > { %6665 = vst.msk [vmem:[#allocation2 + $0x13] sm:$0xff] %vm549_vm2, %v6655_v23 }
 0x7ec   : > { %v6623_v44 = vpop.f32.mrf.mxu0 }
 0x7ed   : > { %v6624_v5 = vadd.f32 %v7203_v46, %v6623_v44 }
 0x7ee   : > { %v6625_v33 = vpop.f32.mrf.mxu0 }
 0x7ef   : > { %v6656_v6 = vmax.f32 %v6624_v5, 0.0 }
 0x7f0   : > { %v6626_v42 = vpop.f32.mrf.mxu0 }
 0x7f1   : > { %6666 = vst.msk [vmem:[#allocation2 + $0x1b] sm:$0xff] %vm549_vm2, %v6656_v6  ;;  %v6627_v4 = vadd.f32 %v7203_v46, %v6626_v42 }
 0x7f2   : > { %v6628_v62 = vpop.f32.mrf.mxu0 }
 0x7f3   : > { %v6657_v22 = vmax.f32 %v6627_v4, 0.0 }
 0x7f5   : > { %6667 = vst.msk [vmem:[#allocation2 + $0x23] sm:$0xff] %vm549_vm2, %v6657_v22 }
 0x7fc   : > { %v6631_v57 = vpop.f32.mrf.mxu0 }
 0x7fd   : > { %v6632_v41 = vadd.f32 %v7203_v46, %v6631_v57 }
 0x7fe   : > { %v6633_v16 = vpop.f32.mrf.mxu0 }
 0x7ff   : > { %v6658_v15 = vmax.f32 %v6632_v41, 0.0 }
 0x800   : > { %v6634_v49 = vpop.f32.mrf.mxu0 }
 0x801   : > { %6668 = vst.msk [vmem:[#allocation2 + $0x2b] sm:$0xff] %vm549_vm2, %v6658_v15  ;;  %v6635_v14 = vadd.f32 %v7203_v46, %v6634_v49 }
 0x802   : > { %v6636_v19 = vpop.f32.mrf.mxu0 }
 0x803   : > { %v6659_v27 = vmax.f32 %v6635_v14, 0.0 }
 0x805   : > { %6669 = vst.msk [vmem:[#allocation2 + $0x33] sm:$0xff] %vm549_vm2, %v6659_v27  ;;  %v6677_v27 = vld [vmem:[#allocation2 + $0x23] sm:$0xff] }
 0x808   : > { %v6678_v57 = vld [vmem:[#allocation2 + $0x2b] sm:$0xff] }
 0x809   : > { %v6639_v39 = vpop.f32.mrf.mxu0  ;;  %v6687_v16 = vld [vmem:[#allocation2 + $0x24] sm:$0xff] }
 0x80a   : > { %v6640_v18 = vadd.f32 %v7203_v46, %v6639_v39  ;;  %v6706_v15 = vld [vmem:[#allocation2 + $0x25] sm:$0xff] }
 0x80b   : > { %v6641_v55 = vpop.f32.mrf.mxu0  ;;  %v6716_v49 = vld [vmem:[#allocation2 + $0x26] sm:$0xff] }
 0x80c   : > { %v6660_v52 = vmax.f32 %v6640_v18, 0.0  ;;  %v6679_v5 = vld [vmem:[#allocation2 + $0x33] sm:$0xff]  ;;  %v6686_v18 = vld [vmem:[#allocation2 + $0x1c] sm:$0xff] }
 0x80d   : > { %v6642_v31 = vpop.f32.mrf.mxu0  ;;  %v6688_v6 = vld [vmem:[#allocation2 + $0x2c] sm:$0xff]  ;;  %v6705_v55 = vld [vmem:[#allocation2 + $0x1d] sm:$0xff] }
 0x80e   : > { %6670 = vst.msk [vmem:[#allocation2 + $0x3b] sm:$0xff] %vm549_vm2, %v6660_v52  ;;  %v6643_v50 = vadd.f32 %v7203_v46, %v6642_v31  ;;  %v6707_v42 = vld [vmem:[#allocation2 + $0x2d] sm:$0xff]  ;;  %v6698_v19 = vmax.f32 %v6678_v57, %v6688_v6  ;;  %v6715_v52 = vld [vmem:[#allocation2 + $0x1e] sm:$0xff] }
 0x80f   : > { %v6644_v30 = vpop.f32.mrf.mxu0  ;;  %v6717_v4 = vld [vmem:[#allocation2 + $0x2e] sm:$0xff] }
 0x810   : > { %v6661_v20 = vmax.f32 %v6643_v50, 0.0  ;;  %v6727_v39 = vmax.f32 %v6707_v42, %v6717_v4  ;;  %v6697_v50 = vmax.f32 %v6677_v27, %v6687_v16  ;;  %v6676_v30 = vld [vmem:[#allocation2 + $0x1b] sm:$0xff] }
 0x812   : > { %6671 = vst.msk [vmem:[#allocation2 + $0x43] sm:$0xff] %vm549_vm2, %v6661_v20  ;;  %v6726_v20 = vmax.f32 %v6706_v15, %v6716_v49 }
 0x814   : > { %v6647_v37 = vpop.f32.mrf.mxu0 }
 0x815   : > { %v6648_v11 = vadd.f32 %v7203_v46, %v6647_v37  ;;  %v6680_v32 = vld [vmem:[#allocation2 + $0x3b] sm:$0xff] }
 0x816   : > { %v6649_v8 = vpop.f32.mrf.mxu0  ;;  %v6689_v59 = vld [vmem:[#allocation2 + $0x34] sm:$0xff] }
 0x817   : > { %v6662_v26 = vmax.f32 %v6648_v11, 0.0  ;;  %v6708_v51 = vld [vmem:[#allocation2 + $0x35] sm:$0xff]  ;;  %v6699_v22 = vmax.f32 %v6679_v5, %v6689_v59 }
 0x818   : > { %v6650_v34 = vpop.f32.mrf.mxu0  ;;  %v6718_v48 = vld [vmem:[#allocation2 + $0x36] sm:$0xff] }
 0x819   : > { %6672 = vst.msk [vmem:[#allocation2 + $0x4b] sm:$0xff] %vm549_vm2, %v6662_v26  ;;  %v6651_v35 = vadd.f32 %v7203_v46, %v6650_v34  ;;  %v6681_v47 = vld [vmem:[#allocation2 + $0x43] sm:$0xff]  ;;  %v6728_v41 = vmax.f32 %v6708_v51, %v6718_v48  ;;  %v6685_v37 = vld [vmem:[#allocation2 + $0x14] sm:$0xff]  ;;  %v6737_v26 = vmax.f32 %v6697_v50, %v6727_v39  ;;  %v6696_v34 = vmax.f32 %v6676_v30, %v6686_v18 }
 0x81a   : > { %v6652_v53 = vpop.f32.mrf.mxu0  ;;  %v6690_v40 = vld [vmem:[#allocation2 + $0x3c] sm:$0xff] }
 0x81b   : > { %v6663_v1 = vmax.f32 %v6651_v35, 0.0  ;;  %v6709_v43 = vld [vmem:[#allocation2 + $0x3d] sm:$0xff]  ;;  %v6700_v44 = vmax.f32 %v6680_v32, %v6690_v40  ;;  %v6738_v31 = vmax.f32 %v6698_v19, %v6728_v41  ;;  %v6704_v11 = vld [vmem:[#allocation2 + $0x15] sm:$0xff]  ;;  %v6725_v35 = vmax.f32 %v6705_v55, %v6715_v52 }
 0x81c   : > { %v6719_v46 = vld [vmem:[#allocation2 + $0x3e] sm:$0xff]  ;;  %v6714_v8 = vld [vmem:[#allocation2 + $0x16] sm:$0xff]  ;;  %v6736_v24 = vmax.f32 %v6696_v34, %v6726_v20 }
 0x81d   : > { %6673 = vst.msk [vmem:[#allocation2 + $0x53] sm:$0x3f] %vm6064_vm15, %v6663_v1  ;;  %v6729_v33 = vmax.f32 %v6709_v43, %v6719_v46  ;;  %v6675_v53 = vld [vmem:[#allocation2 + $0x13] sm:$0xff]  ;;  %v6978_v40 = vld [vmem:[%s12615_s15] sm:$0xff] }
 0x81e   : > { %v6684_v1 = vld [vmem:[#allocation2 + $0xc] sm:$0xff]  ;;  %v6695_v13 = vmax.f32 %v6675_v53, %v6685_v37  ;;  %v7223_v43 = vld [vmem:[%s12614_s14 + $0x1] sm:$0x1] }
 0x81f   : > { %v6739_v14 = vmax.f32 %v6699_v22, %v6729_v33 }
 0x820   : > { %v6682_v25 = vld [vmem:[#allocation2 + $0x4b] sm:$0xff] }
 0x821   : > { %v6691_v63 = vld [vmem:[#allocation2 + $0x44] sm:$0xff] }
 0x822   : > { %v6710_v9 = vld [vmem:[#allocation2 + $0x45] sm:$0xff]  ;;  %v6701_v21 = vmax.f32 %v6681_v47, %v6691_v63  ;;  %v6744_v63 = vld [vmem:[%s12612_s12] sm:$0x1] }
 0x823   : > { %v6720_v10 = vld [vmem:[#allocation2 + $0x46] sm:$0xff] }
 0x824   : > { %v6683_v38 = vld [vmem:[#allocation2 + $0x53] sm:$0x3f]  ;;  %v6730_v12 = vmax.f32 %v6710_v9, %v6720_v10 }
 0x825   : > { %v6693_v58 = vld [vmem:[#allocation2 + $0x54] sm:$0x3f]  ;;  %v6692_v61 = vld [vmem:[#allocation2 + $0x4c] sm:$0xff] }
 0x826   : > { %v6703_v0 = vmax.f32 %v6683_v38, %v6693_v58  ;;  %v6702_v3 = vmax.f32 %v6682_v25, %v6692_v61  ;;  %v6712_v54 = vld [vmem:[#allocation2 + $0x55] sm:$0xff]  ;;  %v6711_v28 = vld [vmem:[#allocation2 + $0x4d] sm:$0xff]  ;;  %v6740_v62 = vmax.f32 %v6700_v44, %v6730_v12  ;;  %v6735_v38 = vmax.f32 %v6695_v13, %v6725_v35  ;;  %v6980_v12 = vld [vmem:[#allocation3] sm:$0x1] }
 0x827   : > { %v6722_v2 = vld [vmem:[#allocation2 + $0x56] sm:$0xff]  ;;  %v6721_v7 = vld [vmem:[#allocation2 + $0x4e] sm:$0xff] }
 0x828   : > { %v6732_v56 = vmax.f32 %v6712_v54, %v6722_v2  ;;  %v6743_v17 = vmax.f32 %v6703_v0, %v6733_v45  ;;  %v6731_v60 = vmax.f32 %v6711_v28, %v6721_v7  ;;  %v6724_v45 = vmax.f32 %v6704_v11, %v6714_v8  ;;  %v6674_v25 = vld [vmem:[#allocation2 + $0xb] sm:$0xff]  ;;  %v7222_v28 = vld [vmem:[%s12613_s13 + $0x18] sm:$0xff]  ;;  %v6824_v7 = vld [vmem:[%s12614_s14] sm:$0x1] }
 0x829   : > { %v6694_v58 = vmax.f32 %v6674_v25, %v6684_v1  ;;  %v6823_v0 = vld [vmem:[%s12613_s13 + $0x8] sm:$0xff] }
 0x82a   : > { %7527 = vmatpush3.msk.msra.mxu1 %vm5130_vm13, %v6743_v17  ;;  %v6742_v36 = vmax.f32 %v6702_v3, %v6732_v56  ;;  %v6741_v23 = vmax.f32 %v6701_v21, %v6731_v60  ;;  %v6822_v3 = vld [vmem:[%s12613_s13] sm:$0xff]  ;;  %v7221_v56 = vld [vmem:[%s12613_s13 + $0x10] sm:$0xff]  ;;  %v6979_v60 = vld [vmem:[%s12615_s15 + $0x8] sm:$0xff] }
 0x82b   : > { %7528 = vmatprep.subr.mxu1 %v9541_v29  ;;  %v6734_v61 = vmax.f32 %v6694_v58, %v6724_v45 }
 0x82c   : > { %7529 = vmatpush3.msra.mxu1 %v6742_v36 }
 0x82d   : > { %7530 = vmatprep.subr.mxu1 %v9541_v29 }
 0x82e   : > { %7531 = vmatpush3.msra.mxu1 %v6741_v23 }
 0x82f   : > { %7532 = vmatprep.subr.mxu1 %v9541_v29 }
 0x830   : > { %7533 = vmatpush3.msra.mxu1 %v6740_v62 }
 0x831   : > { %7534 = vmatprep.subr.mxu1 %v9541_v29 }
 0x832   : > { %7535 = vmatpush3.msra.mxu1 %v6739_v14 }
 0x833   : > { %7536 = vmatprep.subr.mxu1 %v9541_v29 }
 0x834   : > { %7537 = vmatpush3.msra.mxu1 %v6738_v31 }
 0x835   : > { %7538 = vmatprep.subr.mxu1 %v9541_v29 }
 0x836   : > { %7539 = vmatpush3.msra.mxu1 %v6737_v26 }
 0x837   : > { %7540 = vmatprep.subr.mxu1 %v9541_v29 }
 0x838   : > { %7541 = vmatpush3.msra.mxu1 %v6736_v24 }
 0x839   : > { %7542 = vmatprep.subr.mxu1 %v9541_v29 }
 0x83a   : > { %7543 = vmatpush3.msra.mxu1 %v6735_v38 }
 0x83b   : > { %7544 = vmatprep.subr.mxu1 %v9541_v29 }
 0x83c   : > { %7545 = vmatpush3.msra.mxu1 %v6734_v61 }
 0x83d   : > { %7547 = vmatmul.mubr.msk.f32.vlgmr.msra.gmra.mxu1 %vm6745_vm4, %v6744_v63  ;;  %7549 = vmatprep.subr.mxu1 %v9541_v29 }
 0x83e   : > { %7550 = vmatpush3.msra.mxu1 %v6823_v0  ;;  %7553 = vmatprep.mubr.msk.f32.mxu1 %vm9542_vm14, %v9541_v29 }
 0x83f   : > { %7551 = vmatprep.subr.mxu1 %v9541_v29 }
 0x840   : > { %7552 = vmatpush3.msra.mxu1 %v6822_v3 }
 0x841   : > { %7556 = vmatprep.subr.mxu1 %v9541_v29 }
 0x8fd   : > { %v6818_v54 = vpop.f32.mrf.mxu1 }
 0x8fe   : > { %7554 = vmatmul.mubr.msk.f32.vlgmr.msra.gmra.mxu1 %vm549_vm2, %v6818_v54 }
 0x8ff   : > { %v7548_v2 = vpop.f32.mrf.mxu1  ;;  %7560 = vmatprep.mubr.msk.f32.mxu1 %vm9542_vm14, %v9541_v29  ;;  %7557 = vmatpush3.msra.mxu1 %v7222_v28 }
 0x900   : > { %7558 = vmatprep.subr.mxu1 %v9541_v29 }
 0x901   : > { %7559 = vmatpush3.msra.mxu1 %v7221_v56 }
 0x902   : > { %7563 = vmatprep.subr.mxu1 %v9541_v29 }
 0x9be   : > { %v6894_v9 = vpop.f32.mrf.mxu1 }
 0x9bf   : > { %v6895_v10 = vadd.f32 %v6894_v9, %v6824_v7 }
 0x9c0   : > { %v7555_v17 = vpop.f32.mrf.mxu1 }
 0x9c1   : > { %v6898_v47 = vmax.f32 %v6895_v10, 0.0 }
 0x9c3   : > { %7561 = vmatmul.mubr.msk.f32.vlgmr.msra.gmra.mxu1 %vm549_vm2, %v6898_v47 }
 0x9c4   : > { %7567 = vmatprep.mubr.msk.f32.mxu1 %vm9542_vm14, %v9541_v29  ;;  %7564 = vmatpush3.msra.mxu1 %v6979_v60 }
 0x9c5   : > { %7565 = vmatprep.subr.mxu1 %v9541_v29 }
 0x9c6   : > { %7566 = vmatpush3.msra.mxu1 %v6978_v40 }
 0xa83   : > { %v6973_v46 = vpop.f32.mrf.mxu1 }
 0xa84   : > { %v6974_v36 = vadd.f32 %v7223_v43, %v6973_v46 }
 0xa85   : > { %v7562_v21 = vpop.f32.mrf.mxu1 }
 0xa86   : > { %v6977_v32 = vmax.f32 %v6974_v36, 0.0 }
 0xa88   : > { %7568 = vmatmul.mubr.msk.f32.vlgmr.msra.gmra.mxu1 %vm549_vm2, %v6977_v32 }
 0xb48   : > { %v7050_v59 = vpop.f32.mrf.mxu1 }
 0xb49   : > { %v7051_v51 = vadd.f32 %v7050_v59, %v6980_v12 }
 0xb4a   : > { %v7569_v48 = vpop.f32.mrf.mxu1 }
 0xb4b   : > { %7056 = vperm.xlu0 %8346, %v7051_v51  }
 0xbc6   : > { %v7057_v29 = vpop.permute.xlu0 %7056 }
 0xbc7   : > { %7059 = vst [vmem:[%s542_s16] sm:$0x1] %v7057_v29 }
 0xbc8   : > { %9483 = shalt.err (!%p9480_p3)
}
 0xbc9   : > { %s9484_s22 = scalar_lea.hbm %s7071_s29, 16  ;;  %s9488_s28 = scalar_lea.hbm %s12676_s0, 32 }
 0xbca   : > { %p9485_p4 = scmp.ne.s32.totalorder %s7071_s29, %s9484_s22  ;;  %p9489_p9 = scmp.lt.s32.totalorder %s7071_s29, %s12676_s0 }
 0xbcb   : > { %p9490_p10 = scmp.lt.s32.totalorder %s9488_s28, %s9484_s22 }
 0xbcc   : > { %p9486_p7 = pnand %p9485_p4, %p9678_p5 }
 0xbcd   : > { %p9491_p11 = por %p9490_p10, %p9489_p9 }
 0xbce   : > { %p9487_p8 = pneg %p9486_p7 }
 0xbd0   : > { %p9492_p12 = pnand %p9491_p11, %p9487_p8 }
 0xbd2   : > { %9495 = shalt.err (!%p9492_p12)
}
 0xbd3   : > { %7573 = dma.vmem_to_hbm [thread:$0]  (%p9678_p5), %s12562_s17, 16, %s7071_s29, %s7061_s20  }
 0xbd4 PF: > { %s12677_s26 = sld [smem:[#allocation10_spill]] }
 0xbd5   : > { %s12678_s25 = sld [smem:[#allocation7_spill]] }
 0xbda   : > { %p7579_p13 = scmp.ge.s32.totalorder %s12677_s26, 2 }
 0xbdb   : > { %s7085_s30 = sand.u32 1, %s12678_s25  }
 0xbdc   : > { %p7576_p0 = pnand %p7579_p13, %p9682_p6  ;;  %s7086_s21 = scalar_lea.sflag [#allocation5], %s7085_s30 }
 0xbde   : > { %p7577_p1 = pneg %p7576_p0 }
 0xbe0   : > { %9513 = dma.done.wait (%p7577_p1), %s7086_s21, 16  }
 0xbe1   : > { %9515 = vsyncadd (%p7577_p1), %s7086_s21, 4294967280  ;;  %s12680_s29 = sld [smem:[#allocation12_spill]] }
 0xbe2   : > { %s12681_s26 = sld [smem:[#allocation8_spill]] }
 0xbe3   : > { %s12682_s27 = sld [smem:[#allocation9_spill]] }
 0xbe4   : > { %s12683_s28 = sld [smem:[#allocation13_spill]] }
 0xbe7   : > { %p29_p2 = scmp.ge.s32.totalorder %s12680_s29, 4  }
 0xbe9   :  { %31 = sbr.rel (!%p29_p2) target bundleno = 8 (0x8), region = 125 }
 0xbee   :  { %7090 = vsyncpa [#allocation5], 1 }
 0xbef   :  { %7092 = vsyncpa [#allocation5 + $0x1], 1 }

</bundles_post_ra>
